<compile_context>
chip_gen: v6e
topology: v6e:2x2x1
jax: 0.10.0
libtpu: 0.0.40
codegen_flags: <defaults>
</compile_context>

<pallas_src>
import jax
import jax.numpy as jnp
from jax.experimental import pallas as pl
from jax.experimental.pallas import tpu as pltpu


# ---------------------------------------------------------------------------
# Pallas kernels
# ---------------------------------------------------------------------------
def _conv_mm_kernel(w_ref, x_ref, b_ref, o_ref):
    # w: (OC, K) bf16, x: (K, M) bf16, b: (OC, 1) f32 -> o: (OC, M) f32
    acc = jnp.dot(w_ref[...], x_ref[...], preferred_element_type=jnp.float32)
    o_ref[...] = jnp.maximum(acc + b_ref[...], 0.0).astype(o_ref.dtype)


def _maxpool_kernel(x_ref, se_ref, so_ref, o_ref):
    # x: (rows, 2, W) f32 -> o: (rows, W//2) f32
    v = x_ref[...]
    hmax = jnp.maximum(v[:, 0, :], v[:, 1, :])          # pool the H-direction pair
    # Exact even/odd column extraction via one-hot selection matmuls (MXU).
    even = jnp.dot(hmax, se_ref[...], preferred_element_type=jnp.float32)
    odd = jnp.dot(hmax, so_ref[...], preferred_element_type=jnp.float32)
    o_ref[...] = jnp.maximum(even, odd).astype(o_ref.dtype)


def _mlp_kernel(x_ref, w1_ref, b1_ref, w2_ref, b2_ref, w3_ref, b3_ref, o_ref):
    # Fused Linear(7744,120)+ReLU -> Linear(120,84)+ReLU -> Linear(84,101)+ReLU
    h = jnp.dot(x_ref[...], w1_ref[...], preferred_element_type=jnp.float32)
    h = jnp.maximum(h + b1_ref[...], 0.0)
    h = jnp.dot(h.astype(jnp.bfloat16), w2_ref[...], preferred_element_type=jnp.float32)
    h = jnp.maximum(h + b2_ref[...], 0.0)
    h = jnp.dot(h.astype(jnp.bfloat16), w3_ref[...], preferred_element_type=jnp.float32)
    o_ref[...] = jnp.maximum(h + b3_ref[...], 0.0).astype(o_ref.dtype)


# ---------------------------------------------------------------------------
# Wrappers
# ---------------------------------------------------------------------------
def im2col_km(x, kh, kw):
    """x: (N, C, H, W) -> patches (N, C*kh*kw, OH*OW)  (valid conv, stride 1)."""
    N, C, H, W = x.shape
    OH, OW = H - kh + 1, W - kw + 1
    cols = []
    for i in range(kh):
        for j in range(kw):
            cols.append(x[:, :, i:i + OH, j:j + OW])
    p = jnp.stack(cols, axis=2)                      # (N, C, KH*KW, OH, OW)
    p = p.reshape(N, C * kh * kw, OH * OW)           # contiguous -> free reshape
    return p, OH, OW


def conv_relu(x, wm, b, kh, kw):
    """Conv2d (no pad, stride 1) + ReLU as a lane-dense (OC, OH*OW) matmul."""
    N = x.shape[0]
    OC, K = wm.shape
    patches, OH, OW = im2col_km(x.astype(jnp.bfloat16), kh, kw)
    M = OH * OW
    out = pl.pallas_call(
        _conv_mm_kernel,
        out_shape=jax.ShapeDtypeStruct((N, OC, M), jnp.float32),
        grid=(N,),
        in_specs=[
            pl.BlockSpec((OC, K), lambda n: (0, 0)),          # weights (resident)
            pl.BlockSpec((None, K, M), lambda n: (n, 0, 0)),  # per-sample patches
            pl.BlockSpec((OC, 1), lambda n: (0, 0)),          # bias column
        ],
        out_specs=pl.BlockSpec((None, OC, M), lambda n: (n, 0, 0)),
        compiler_params=pltpu.CompilerParams(dimension_semantics=("parallel",)),
    )(wm, patches, b)
    return out.reshape(N, OC, OH, OW)                 # already channel-major (NCHW)


def maxpool2(x):
    """2x2 max pooling with stride 2 (NCHW), H and W even."""
    N, C, H, W = x.shape
    H2, W2 = H // 2, W // 2
    R = N * C * H2
    xr = x.reshape(R, 2, W)                           # free reshape: (h, h+1) paired
    # One-hot column-selection matrices (exact even/odd lane extraction).
    w_idx = jnp.arange(W, dtype=jnp.int32)[:, None]
    k_idx = jnp.arange(W2, dtype=jnp.int32)[None, :]
    se = (w_idx == 2 * k_idx).astype(x.dtype)         # (W, W2)
    so = (w_idx == 2 * k_idx + 1).astype(x.dtype)     # (W, W2)
    steps = 2 if R % 2 == 0 else 1                    # keep >=2 grid steps (megacore)
    rt = R // steps
    out = pl.pallas_call(
        _maxpool_kernel,
        out_shape=jax.ShapeDtypeStruct((R, W2), x.dtype),
        grid=(steps,),
        in_specs=[
            pl.BlockSpec((rt, 2, W), lambda i: (i, 0, 0)),
            pl.BlockSpec((W, W2), lambda i: (0, 0)),
            pl.BlockSpec((W, W2), lambda i: (0, 0)),
        ],
        out_specs=pl.BlockSpec((rt, W2), lambda i: (i, 0)),
        compiler_params=pltpu.CompilerParams(dimension_semantics=("parallel",)),
    )(xr, se, so)
    return out.reshape(N, C, H2, W2)


def mlp_head(x, p):
    """Fused fc1/fc2/fc3 (+ReLU).  Weights pre-transposed (K, N) bf16."""
    M, _ = x.shape
    Mp = ((max(M, 8) + 7) // 8) * 8                   # pad batch to sublane (8) only
    xb = x.astype(jnp.bfloat16)
    if Mp != M:
        xb = jnp.pad(xb, ((0, Mp - M), (0, 0)))
    w1, b1 = p["fc1_w"], p["fc1_b"]
    w2, b2 = p["fc2_w"], p["fc2_b"]
    w3, b3 = p["fc3_w"], p["fc3_b"]
    Nout = w3.shape[1]

    def full2d(a):
        return pl.BlockSpec(a.shape, lambda i: (0, 0))

    out = pl.pallas_call(
        _mlp_kernel,
        out_shape=jax.ShapeDtypeStruct((Mp, Nout), jnp.float32),
        grid=(1,),
        in_specs=[full2d(xb), full2d(w1), full2d(b1),
                  full2d(w2), full2d(b2), full2d(w3), full2d(b3)],
        out_specs=pl.BlockSpec((Mp, Nout), lambda i: (0, 0)),
        compiler_params=pltpu.CompilerParams(dimension_semantics=("arbitrary",)),
    )(xb, w1, b1, w2, b2, w3, b3)
    return out[:M]


# ---------------------------------------------------------------------------
# Parameters & forward pass
# ---------------------------------------------------------------------------
def init_params(key):
    """PyTorch-style uniform(-1/sqrt(fan_in), 1/sqrt(fan_in)) init, stored in
    kernel-ready layouts: conv W -> (OC, C*KH*KW) bf16, fc W -> (K, N) bf16
    (pre-transposed once, outside the jitted forward), biases f32."""
    def uniform(k, shape, fan_in):
        bound = 1.0 / (fan_in ** 0.5)
        return jax.random.uniform(k, shape, jnp.float32, -bound, bound)

    ks = jax.random.split(key, 10)
    conv1_w = uniform(ks[0], (6, 3, 5, 5), 3 * 5 * 5)
    conv1_b = uniform(ks[1], (6,), 3 * 5 * 5)
    conv2_w = uniform(ks[2], (16, 6, 5, 5), 6 * 5 * 5)
    conv2_b = uniform(ks[3], (16,), 6 * 5 * 5)
    fc1_w = uniform(ks[4], (120, 7744), 7744)
    fc1_b = uniform(ks[5], (120,), 7744)
    fc2_w = uniform(ks[6], (84, 120), 120)
    fc2_b = uniform(ks[7], (84,), 120)
    fc3_w = uniform(ks[8], (101, 84), 84)
    fc3_b = uniform(ks[9], (101,), 84)
    return {
        "conv1_w": conv1_w.reshape(6, -1).astype(jnp.bfloat16),
        "conv1_b": conv1_b.reshape(6, 1),
        "conv2_w": conv2_w.reshape(16, -1).astype(jnp.bfloat16),
        "conv2_b": conv2_b.reshape(16, 1),
        "fc1_w": fc1_w.T.astype(jnp.bfloat16),   # (7744, 120)
        "fc1_b": fc1_b.reshape(1, -1),
        "fc2_w": fc2_w.T.astype(jnp.bfloat16),   # (120, 84)
        "fc2_b": fc2_b.reshape(1, -1),
        "fc3_w": fc3_w.T.astype(jnp.bfloat16),   # (84, 101)
        "fc3_b": fc3_b.reshape(1, -1),
    }


def food101_forward(params, x):
    N = x.shape[0]
    # features: Conv(3->6,5)+ReLU, MaxPool2, Conv(6->16,5)+ReLU, MaxPool2, ReLU
    x = conv_relu(x, params["conv1_w"], params["conv1_b"], 5, 5)   # (N, 6, 96, 96)
    x = maxpool2(x)                                                # (N, 6, 48, 48)
    x = conv_relu(x, params["conv2_w"], params["conv2_b"], 5, 5)   # (N, 16, 44, 44)
    x = maxpool2(x)                                                # (N, 16, 22, 22)
    # trailing ReLU in `features` is exact identity: values are already >= 0
    x = x.reshape(N, -1)                                           # (N, 7744), torch .view on NCHW
    return mlp_head(x, params)                                     # (N, 101)


if __name__ == "__main__":
    key = jax.random.PRNGKey(0)
    kx, kp = jax.random.split(key)
    # Linear(7744, ...) pins the conv stack output to 16*22*22, i.e. input
    # must be (N, 3, 100, 100); keep the batch small (N=2).
    x = jax.random.normal(kx, (2, 3, 100, 100), dtype=jnp.float32)
    params = init_params(kp)

    fwd = jax.jit(food101_forward)
    out = jax.block_until_ready(fwd(params, x))
    assert out.shape == (2, 101), out.shape
    assert bool(jnp.all(out >= 0.0))  # final ReLU
    print("KERNEL_OK")
</pallas_src>

<mosaic_0001>
module attributes {stable_mosaic.version = 11 : i64} {
  func.func @_conv_mm_kernel(%arg0: i32, %arg1: memref<6x75xbf16, #tpu.memory_space<vmem>>, %arg2: memref<1x75x9216xbf16, #tpu.memory_space<vmem>>, %arg3: memref<6x1xf32, #tpu.memory_space<vmem>>, %arg4: memref<1x6x9216xf32, #tpu.memory_space<vmem>>) attributes {dimension_semantics = [#tpu.dimension_semantics<parallel>], iteration_bounds = array<i64: 2>, scalar_prefetch = 0 : i64, scratch_operands = 0 : i64, tpu.core_type = #tpu.core_type<tc>, window_params = [{pipeline_mode = #tpu.pipeline_mode<synchronous>, transform_indices = @transform_0, window_bounds = array<i64: 6, 75>}, {transform_indices = @transform_1, window_bounds = array<i64: 1, 75, 9216>}, {pipeline_mode = #tpu.pipeline_mode<synchronous>, transform_indices = @transform_2, window_bounds = array<i64: 6, 1>}, {transform_indices = @transform_3, window_bounds = array<i64: 1, 6, 9216>}]} {
    %c0 = arith.constant 0 : index
    %c0_0 = arith.constant 0 : index
    %0 = vector.load %arg1[%c0, %c0_0] : memref<6x75xbf16, #tpu.memory_space<vmem>>, vector<6x75xbf16>
    %c0_1 = arith.constant 0 : index
    %c0_2 = arith.constant 0 : index
    %c0_3 = arith.constant 0 : index
    %1 = vector.load %arg2[%c0_1, %c0_2, %c0_3] : memref<1x75x9216xbf16, #tpu.memory_space<vmem>>, vector<1x75x9216xbf16>
    %2 = vector.shape_cast %1 : vector<1x75x9216xbf16> to vector<75x9216xbf16>
    %cst = arith.constant dense<0.000000e+00> : vector<6x9216xf32>
    %3 = tpu.matmul %0, %2, %cst {dimension_numbers = #tpu.dot_dimension_numbers<[1], [0], [0], [1], [0, 0, 1, 1], [], []>} : vector<6x75xbf16>, vector<75x9216xbf16>, vector<6x9216xf32> -> vector<6x9216xf32>
    %c0_4 = arith.constant 0 : index
    %c0_5 = arith.constant 0 : index
    %4 = vector.load %arg3[%c0_4, %c0_5] : memref<6x1xf32, #tpu.memory_space<vmem>>, vector<6x1xf32>
    %5 = vector.broadcast %4 : vector<6x1xf32> to vector<6x9216xf32>
    %6 = arith.addf %3, %5 : vector<6x9216xf32>
    %cst_6 = arith.constant 0.000000e+00 : f32
    %7 = vector.broadcast %cst_6 : f32 to vector<6x9216xf32>
    %8 = arith.maximumf %6, %7 : vector<6x9216xf32>
    %c0_7 = arith.constant 0 : index
    %c0_8 = arith.constant 0 : index
    %c0_9 = arith.constant 0 : index
    %9 = vector.load %arg4[%c0_7, %c0_8, %c0_9] : memref<1x6x9216xf32, #tpu.memory_space<vmem>>, vector<1x6x9216xf32>
    %10 = vector.shape_cast %9 : vector<1x6x9216xf32> to vector<6x9216xf32>
    %11 = vector.shape_cast %8 : vector<6x9216xf32> to vector<1x6x9216xf32>
    tpu.vector_store %arg4[%c0_7, %c0_8, %c0_9], %11 {strides = array<i32>} : memref<1x6x9216xf32, #tpu.memory_space<vmem>>, vector<1x6x9216xf32>,
    return
  }
  func.func @transform_0(%arg0: i32) -> (i32, i32) {
    %c0_i32 = arith.constant 0 : i32
    %c0_i32_0 = arith.constant 0 : i32
    %c0_i32_1 = arith.constant 0 : i32
    return %c0_i32, %c0_i32_0 : i32, i32
  }
  func.func @transform_1(%arg0: i32) -> (i32, i32, i32) {
    %c0_i32 = arith.constant 0 : i32
    %c0_i32_0 = arith.constant 0 : i32
    %c0_i32_1 = arith.constant 0 : i32
    return %arg0, %c0_i32, %c0_i32_0 : i32, i32, i32
  }
  func.func @transform_2(%arg0: i32) -> (i32, i32) {
    %c0_i32 = arith.constant 0 : i32
    %c0_i32_0 = arith.constant 0 : i32
    %c0_i32_1 = arith.constant 0 : i32
    return %c0_i32, %c0_i32_0 : i32, i32
  }
  func.func @transform_3(%arg0: i32) -> (i32, i32, i32) {
    %c0_i32 = arith.constant 0 : i32
    %c0_i32_0 = arith.constant 0 : i32
    %c0_i32_1 = arith.constant 0 : i32
    return %arg0, %c0_i32, %c0_i32_0 : i32, i32, i32
  }
}

module attributes {stable_mosaic.version = 11 : i64} {
  func.func @_maxpool_kernel(%arg0: i32, %arg1: memref<288x2x96xf32, #tpu.memory_space<vmem>>, %arg2: memref<96x48xf32, #tpu.memory_space<vmem>>, %arg3: memref<96x48xf32, #tpu.memory_space<vmem>>, %arg4: memref<288x48xf32, #tpu.memory_space<vmem>>) attributes {dimension_semantics = [#tpu.dimension_semantics<parallel>], iteration_bounds = array<i64: 2>, scalar_prefetch = 0 : i64, scratch_operands = 0 : i64, tpu.core_type = #tpu.core_type<tc>, window_params = [{transform_indices = @transform_0, window_bounds = array<i64: 288, 2, 96>}, {pipeline_mode = #tpu.pipeline_mode<synchronous>, transform_indices = @transform_1, window_bounds = array<i64: 96, 48>}, {pipeline_mode = #tpu.pipeline_mode<synchronous>, transform_indices = @transform_2, window_bounds = array<i64: 96, 48>}, {transform_indices = @transform_3, window_bounds = array<i64: 288, 48>}]} {
    %c0 = arith.constant 0 : index
    %c0_0 = arith.constant 0 : index
    %c0_1 = arith.constant 0 : index
    %0 = vector.load %arg1[%c0, %c0_0, %c0_1] : memref<288x2x96xf32, #tpu.memory_space<vmem>>, vector<288x2x96xf32>
    %1 = vector.extract_strided_slice %0 {offsets = [0, 0, 0], sizes = [288, 1, 96], strides = [1, 1, 1]} : vector<288x2x96xf32> to vector<288x1x96xf32>
    %2 = vector.shape_cast %1 : vector<288x1x96xf32> to vector<288x96xf32>
    %3 = vector.extract_strided_slice %0 {offsets = [0, 1, 0], sizes = [288, 1, 96], strides = [1, 1, 1]} : vector<288x2x96xf32> to vector<288x1x96xf32>
    %4 = vector.shape_cast %3 : vector<288x1x96xf32> to vector<288x96xf32>
    %5 = arith.maximumf %2, %4 : vector<288x96xf32>
    %c0_2 = arith.constant 0 : index
    %c0_3 = arith.constant 0 : index
    %6 = vector.load %arg2[%c0_2, %c0_3] : memref<96x48xf32, #tpu.memory_space<vmem>>, vector<96x48xf32>
    %cst = arith.constant dense<0.000000e+00> : vector<288x48xf32>
    %7 = tpu.matmul %5, %6, %cst {dimension_numbers = #tpu.dot_dimension_numbers<[1], [0], [0], [1], [0, 0, 1, 1], [], []>} : vector<288x96xf32>, vector<96x48xf32>, vector<288x48xf32> -> vector<288x48xf32>
    %c0_4 = arith.constant 0 : index
    %c0_5 = arith.constant 0 : index
    %8 = vector.load %arg3[%c0_4, %c0_5] : memref<96x48xf32, #tpu.memory_space<vmem>>, vector<96x48xf32>
    %cst_6 = arith.constant dense<0.000000e+00> : vector<288x48xf32>
    %9 = tpu.matmul %5, %8, %cst_6 {dimension_numbers = #tpu.dot_dimension_numbers<[1], [0], [0], [1], [0, 0, 1, 1], [], []>} : vector<288x96xf32>, vector<96x48xf32>, vector<288x48xf32> -> vector<288x48xf32>
    %10 = arith.maximumf %7, %9 : vector<288x48xf32>
    %c0_7 = arith.constant 0 : index
    %c0_8 = arith.constant 0 : index
    %11 = vector.load %arg4[%c0_7, %c0_8] : memref<288x48xf32, #tpu.memory_space<vmem>>, vector<288x48xf32>
    tpu.vector_store %arg4[%c0_7, %c0_8], %10 {strides = array<i32>} : memref<288x48xf32, #tpu.memory_space<vmem>>, vector<288x48xf32>,
    return
  }
  func.func @transform_0(%arg0: i32) -> (i32, i32, i32) {
    %c0_i32 = arith.constant 0 : i32
    %c0_i32_0 = arith.constant 0 : i32
    %c0_i32_1 = arith.constant 0 : i32
    return %arg0, %c0_i32, %c0_i32_0 : i32, i32, i32
  }
  func.func @transform_1(%arg0: i32) -> (i32, i32) {
    %c0_i32 = arith.constant 0 : i32
    %c0_i32_0 = arith.constant 0 : i32
    %c0_i32_1 = arith.constant 0 : i32
    return %c0_i32, %c0_i32_0 : i32, i32
  }
  func.func @transform_2(%arg0: i32) -> (i32, i32) {
    %c0_i32 = arith.constant 0 : i32
    %c0_i32_0 = arith.constant 0 : i32
    %c0_i32_1 = arith.constant 0 : i32
    return %c0_i32, %c0_i32_0 : i32, i32
  }
  func.func @transform_3(%arg0: i32) -> (i32, i32) {
    %c0_i32 = arith.constant 0 : i32
    %c0_i32_0 = arith.constant 0 : i32
    return %arg0, %c0_i32 : i32, i32
  }
}

module attributes {stable_mosaic.version = 11 : i64} {
  func.func @_conv_mm_kernel(%arg0: i32, %arg1: memref<16x150xbf16, #tpu.memory_space<vmem>>, %arg2: memref<1x150x1936xbf16, #tpu.memory_space<vmem>>, %arg3: memref<16x1xf32, #tpu.memory_space<vmem>>, %arg4: memref<1x16x1936xf32, #tpu.memory_space<vmem>>) attributes {dimension_semantics = [#tpu.dimension_semantics<parallel>], iteration_bounds = array<i64: 2>, scalar_prefetch = 0 : i64, scratch_operands = 0 : i64, tpu.core_type = #tpu.core_type<tc>, window_params = [{pipeline_mode = #tpu.pipeline_mode<synchronous>, transform_indices = @transform_0, window_bounds = array<i64: 16, 150>}, {transform_indices = @transform_1, window_bounds = array<i64: 1, 150, 1936>}, {pipeline_mode = #tpu.pipeline_mode<synchronous>, transform_indices = @transform_2, window_bounds = array<i64: 16, 1>}, {transform_indices = @transform_3, window_bounds = array<i64: 1, 16, 1936>}]} {
    %c0 = arith.constant 0 : index
    %c0_0 = arith.constant 0 : index
    %0 = vector.load %arg1[%c0, %c0_0] : memref<16x150xbf16, #tpu.memory_space<vmem>>, vector<16x150xbf16>
    %c0_1 = arith.constant 0 : index
    %c0_2 = arith.constant 0 : index
    %c0_3 = arith.constant 0 : index
    %1 = vector.load %arg2[%c0_1, %c0_2, %c0_3] : memref<1x150x1936xbf16, #tpu.memory_space<vmem>>, vector<1x150x1936xbf16>
    %2 = vector.shape_cast %1 : vector<1x150x1936xbf16> to vector<150x1936xbf16>
    %cst = arith.constant dense<0.000000e+00> : vector<16x1936xf32>
    %3 = tpu.matmul %0, %2, %cst {dimension_numbers = #tpu.dot_dimension_numbers<[1], [0], [0], [1], [0, 0, 1, 1], [], []>} : vector<16x150xbf16>, vector<150x1936xbf16>, vector<16x1936xf32> -> vector<16x1936xf32>
    %c0_4 = arith.constant 0 : index
    %c0_5 = arith.constant 0 : index
    %4 = vector.load %arg3[%c0_4, %c0_5] : memref<16x1xf32, #tpu.memory_space<vmem>>, vector<16x1xf32>
    %5 = vector.broadcast %4 : vector<16x1xf32> to vector<16x1936xf32>
    %6 = arith.addf %3, %5 : vector<16x1936xf32>
    %cst_6 = arith.constant 0.000000e+00 : f32
    %7 = vector.broadcast %cst_6 : f32 to vector<16x1936xf32>
    %8 = arith.maximumf %6, %7 : vector<16x1936xf32>
    %c0_7 = arith.constant 0 : index
    %c0_8 = arith.constant 0 : index
    %c0_9 = arith.constant 0 : index
    %9 = vector.load %arg4[%c0_7, %c0_8, %c0_9] : memref<1x16x1936xf32, #tpu.memory_space<vmem>>, vector<1x16x1936xf32>
    %10 = vector.shape_cast %9 : vector<1x16x1936xf32> to vector<16x1936xf32>
    %11 = vector.shape_cast %8 : vector<16x1936xf32> to vector<1x16x1936xf32>
    tpu.vector_store %arg4[%c0_7, %c0_8, %c0_9], %11 {strides = array<i32>} : memref<1x16x1936xf32, #tpu.memory_space<vmem>>, vector<1x16x1936xf32>,
    return
  }
  func.func @transform_0(%arg0: i32) -> (i32, i32) {
    %c0_i32 = arith.constant 0 : i32
    %c0_i32_0 = arith.constant 0 : i32
    %c0_i32_1 = arith.constant 0 : i32
    return %c0_i32, %c0_i32_0 : i32, i32
  }
  func.func @transform_1(%arg0: i32) -> (i32, i32, i32) {
    %c0_i32 = arith.constant 0 : i32
    %c0_i32_0 = arith.constant 0 : i32
    %c0_i32_1 = arith.constant 0 : i32
    return %arg0, %c0_i32, %c0_i32_0 : i32, i32, i32
  }
  func.func @transform_2(%arg0: i32) -> (i32, i32) {
    %c0_i32 = arith.constant 0 : i32
    %c0_i32_0 = arith.constant 0 : i32
    %c0_i32_1 = arith.constant 0 : i32
    return %c0_i32, %c0_i32_0 : i32, i32
  }
  func.func @transform_3(%arg0: i32) -> (i32, i32, i32) {
    %c0_i32 = arith.constant 0 : i32
    %c0_i32_0 = arith.constant 0 : i32
    %c0_i32_1 = arith.constant 0 : i32
    return %arg0, %c0_i32, %c0_i32_0 : i32, i32, i32
  }
}

module attributes {stable_mosaic.version = 11 : i64} {
  func.func @_maxpool_kernel(%arg0: i32, %arg1: memref<352x2x44xf32, #tpu.memory_space<vmem>>, %arg2: memref<44x22xf32, #tpu.memory_space<vmem>>, %arg3: memref<44x22xf32, #tpu.memory_space<vmem>>, %arg4: memref<352x22xf32, #tpu.memory_space<vmem>>) attributes {dimension_semantics = [#tpu.dimension_semantics<parallel>], iteration_bounds = array<i64: 2>, scalar_prefetch = 0 : i64, scratch_operands = 0 : i64, tpu.core_type = #tpu.core_type<tc>, window_params = [{transform_indices = @transform_0, window_bounds = array<i64: 352, 2, 44>}, {pipeline_mode = #tpu.pipeline_mode<synchronous>, transform_indices = @transform_1, window_bounds = array<i64: 44, 22>}, {pipeline_mode = #tpu.pipeline_mode<synchronous>, transform_indices = @transform_2, window_bounds = array<i64: 44, 22>}, {transform_indices = @transform_3, window_bounds = array<i64: 352, 22>}]} {
    %c0 = arith.constant 0 : index
    %c0_0 = arith.constant 0 : index
    %c0_1 = arith.constant 0 : index
    %0 = vector.load %arg1[%c0, %c0_0, %c0_1] : memref<352x2x44xf32, #tpu.memory_space<vmem>>, vector<352x2x44xf32>
    %1 = vector.extract_strided_slice %0 {offsets = [0, 0, 0], sizes = [352, 1, 44], strides = [1, 1, 1]} : vector<352x2x44xf32> to vector<352x1x44xf32>
    %2 = vector.shape_cast %1 : vector<352x1x44xf32> to vector<352x44xf32>
    %3 = vector.extract_strided_slice %0 {offsets = [0, 1, 0], sizes = [352, 1, 44], strides = [1, 1, 1]} : vector<352x2x44xf32> to vector<352x1x44xf32>
    %4 = vector.shape_cast %3 : vector<352x1x44xf32> to vector<352x44xf32>
    %5 = arith.maximumf %2, %4 : vector<352x44xf32>
    %c0_2 = arith.constant 0 : index
    %c0_3 = arith.constant 0 : index
    %6 = vector.load %arg2[%c0_2, %c0_3] : memref<44x22xf32, #tpu.memory_space<vmem>>, vector<44x22xf32>
    %cst = arith.constant dense<0.000000e+00> : vector<352x22xf32>
    %7 = tpu.matmul %5, %6, %cst {dimension_numbers = #tpu.dot_dimension_numbers<[1], [0], [0], [1], [0, 0, 1, 1], [], []>} : vector<352x44xf32>, vector<44x22xf32>, vector<352x22xf32> -> vector<352x22xf32>
    %c0_4 = arith.constant 0 : index
    %c0_5 = arith.constant 0 : index
    %8 = vector.load %arg3[%c0_4, %c0_5] : memref<44x22xf32, #tpu.memory_space<vmem>>, vector<44x22xf32>
    %cst_6 = arith.constant dense<0.000000e+00> : vector<352x22xf32>
    %9 = tpu.matmul %5, %8, %cst_6 {dimension_numbers = #tpu.dot_dimension_numbers<[1], [0], [0], [1], [0, 0, 1, 1], [], []>} : vector<352x44xf32>, vector<44x22xf32>, vector<352x22xf32> -> vector<352x22xf32>
    %10 = arith.maximumf %7, %9 : vector<352x22xf32>
    %c0_7 = arith.constant 0 : index
    %c0_8 = arith.constant 0 : index
    %11 = vector.load %arg4[%c0_7, %c0_8] : memref<352x22xf32, #tpu.memory_space<vmem>>, vector<352x22xf32>
    tpu.vector_store %arg4[%c0_7, %c0_8], %10 {strides = array<i32>} : memref<352x22xf32, #tpu.memory_space<vmem>>, vector<352x22xf32>,
    return
  }
  func.func @transform_0(%arg0: i32) -> (i32, i32, i32) {
    %c0_i32 = arith.constant 0 : i32
    %c0_i32_0 = arith.constant 0 : i32
    %c0_i32_1 = arith.constant 0 : i32
    return %arg0, %c0_i32, %c0_i32_0 : i32, i32, i32
  }
  func.func @transform_1(%arg0: i32) -> (i32, i32) {
    %c0_i32 = arith.constant 0 : i32
    %c0_i32_0 = arith.constant 0 : i32
    %c0_i32_1 = arith.constant 0 : i32
    return %c0_i32, %c0_i32_0 : i32, i32
  }
  func.func @transform_2(%arg0: i32) -> (i32, i32) {
    %c0_i32 = arith.constant 0 : i32
    %c0_i32_0 = arith.constant 0 : i32
    %c0_i32_1 = arith.constant 0 : i32
    return %c0_i32, %c0_i32_0 : i32, i32
  }
  func.func @transform_3(%arg0: i32) -> (i32, i32) {
    %c0_i32 = arith.constant 0 : i32
    %c0_i32_0 = arith.constant 0 : i32
    return %arg0, %c0_i32 : i32, i32
  }
}

module attributes {stable_mosaic.version = 11 : i64} {
  func.func @_mlp_kernel(%arg0: i32, %arg1: memref<8x7744xbf16, #tpu.memory_space<vmem>>, %arg2: memref<7744x120xbf16, #tpu.memory_space<vmem>>, %arg3: memref<1x120xf32, #tpu.memory_space<vmem>>, %arg4: memref<120x84xbf16, #tpu.memory_space<vmem>>, %arg5: memref<1x84xf32, #tpu.memory_space<vmem>>, %arg6: memref<84x101xbf16, #tpu.memory_space<vmem>>, %arg7: memref<1x101xf32, #tpu.memory_space<vmem>>, %arg8: memref<8x101xf32, #tpu.memory_space<vmem>>) attributes {dimension_semantics = [#tpu.dimension_semantics<arbitrary>], iteration_bounds = array<i64: 1>, scalar_prefetch = 0 : i64, scratch_operands = 0 : i64, tpu.core_type = #tpu.core_type<tc>, window_params = [{pipeline_mode = #tpu.pipeline_mode<synchronous>, transform_indices = @transform_0, window_bounds = array<i64: 8, 7744>}, {pipeline_mode = #tpu.pipeline_mode<synchronous>, transform_indices = @transform_1, window_bounds = array<i64: 7744, 120>}, {pipeline_mode = #tpu.pipeline_mode<synchronous>, transform_indices = @transform_2, window_bounds = array<i64: 1, 120>}, {pipeline_mode = #tpu.pipeline_mode<synchronous>, transform_indices = @transform_3, window_bounds = array<i64: 120, 84>}, {pipeline_mode = #tpu.pipeline_mode<synchronous>, transform_indices = @transform_4, window_bounds = array<i64: 1, 84>}, {pipeline_mode = #tpu.pipeline_mode<synchronous>, transform_indices = @transform_5, window_bounds = array<i64: 84, 101>}, {pipeline_mode = #tpu.pipeline_mode<synchronous>, transform_indices = @transform_6, window_bounds = array<i64: 1, 101>}, {pipeline_mode = #tpu.pipeline_mode<synchronous>, transform_indices = @transform_7, window_bounds = array<i64: 8, 101>}]} {
    %c0 = arith.constant 0 : index
    %c0_0 = arith.constant 0 : index
    %0 = vector.load %arg1[%c0, %c0_0] : memref<8x7744xbf16, #tpu.memory_space<vmem>>, vector<8x7744xbf16>
    %c0_1 = arith.constant 0 : index
    %c0_2 = arith.constant 0 : index
    %1 = vector.load %arg2[%c0_1, %c0_2] : memref<7744x120xbf16, #tpu.memory_space<vmem>>, vector<7744x120xbf16>
    %cst = arith.constant dense<0.000000e+00> : vector<8x120xf32>
    %2 = tpu.matmul %0, %1, %cst {dimension_numbers = #tpu.dot_dimension_numbers<[1], [0], [0], [1], [0, 0, 1, 1], [], []>} : vector<8x7744xbf16>, vector<7744x120xbf16>, vector<8x120xf32> -> vector<8x120xf32>
    %c0_3 = arith.constant 0 : index
    %c0_4 = arith.constant 0 : index
    %3 = vector.load %arg3[%c0_3, %c0_4] : memref<1x120xf32, #tpu.memory_space<vmem>>, vector<1x120xf32>
    %4 = vector.broadcast %3 : vector<1x120xf32> to vector<8x120xf32>
    %5 = arith.addf %2, %4 : vector<8x120xf32>
    %cst_5 = arith.constant 0.000000e+00 : f32
    %6 = vector.broadcast %cst_5 : f32 to vector<8x120xf32>
    %7 = arith.maximumf %5, %6 : vector<8x120xf32>
    %8 = arith.truncf %7 : vector<8x120xf32> to vector<8x120xbf16>
    %c0_6 = arith.constant 0 : index
    %c0_7 = arith.constant 0 : index
    %9 = vector.load %arg4[%c0_6, %c0_7] : memref<120x84xbf16, #tpu.memory_space<vmem>>, vector<120x84xbf16>
    %cst_8 = arith.constant dense<0.000000e+00> : vector<8x84xf32>
    %10 = tpu.matmul %8, %9, %cst_8 {dimension_numbers = #tpu.dot_dimension_numbers<[1], [0], [0], [1], [0, 0, 1, 1], [], []>} : vector<8x120xbf16>, vector<120x84xbf16>, vector<8x84xf32> -> vector<8x84xf32>
    %c0_9 = arith.constant 0 : index
    %c0_10 = arith.constant 0 : index
    %11 = vector.load %arg5[%c0_9, %c0_10] : memref<1x84xf32, #tpu.memory_space<vmem>>, vector<1x84xf32>
    %12 = vector.broadcast %11 : vector<1x84xf32> to vector<8x84xf32>
    %13 = arith.addf %10, %12 : vector<8x84xf32>
    %cst_11 = arith.constant 0.000000e+00 : f32
    %14 = vector.broadcast %cst_11 : f32 to vector<8x84xf32>
    %15 = arith.maximumf %13, %14 : vector<8x84xf32>
    %16 = arith.truncf %15 : vector<8x84xf32> to vector<8x84xbf16>
    %c0_12 = arith.constant 0 : index
    %c0_13 = arith.constant 0 : index
    %17 = vector.load %arg6[%c0_12, %c0_13] : memref<84x101xbf16, #tpu.memory_space<vmem>>, vector<84x101xbf16>
    %cst_14 = arith.constant dense<0.000000e+00> : vector<8x101xf32>
    %18 = tpu.matmul %16, %17, %cst_14 {dimension_numbers = #tpu.dot_dimension_numbers<[1], [0], [0], [1], [0, 0, 1, 1], [], []>} : vector<8x84xbf16>, vector<84x101xbf16>, vector<8x101xf32> -> vector<8x101xf32>
    %c0_15 = arith.constant 0 : index
    %c0_16 = arith.constant 0 : index
    %19 = vector.load %arg7[%c0_15, %c0_16] : memref<1x101xf32, #tpu.memory_space<vmem>>, vector<1x101xf32>
    %20 = vector.broadcast %19 : vector<1x101xf32> to vector<8x101xf32>
    %21 = arith.addf %18, %20 : vector<8x101xf32>
    %cst_17 = arith.constant 0.000000e+00 : f32
    %22 = vector.broadcast %cst_17 : f32 to vector<8x101xf32>
    %23 = arith.maximumf %21, %22 : vector<8x101xf32>
    %c0_18 = arith.constant 0 : index
    %c0_19 = arith.constant 0 : index
    %24 = vector.load %arg8[%c0_18, %c0_19] : memref<8x101xf32, #tpu.memory_space<vmem>>, vector<8x101xf32>
    tpu.vector_store %arg8[%c0_18, %c0_19], %23 {strides = array<i32>} : memref<8x101xf32, #tpu.memory_space<vmem>>, vector<8x101xf32>,
    return
  }
  func.func @transform_0(%arg0: i32) -> (i32, i32) {
    %c0_i32 = arith.constant 0 : i32
    %c0_i32_0 = arith.constant 0 : i32
    %c0_i32_1 = arith.constant 0 : i32
    return %c0_i32, %c0_i32_0 : i32, i32
  }
  func.func @transform_1(%arg0: i32) -> (i32, i32) {
    %c0_i32 = arith.constant 0 : i32
    %c0_i32_0 = arith.constant 0 : i32
    %c0_i32_1 = arith.constant 0 : i32
    return %c0_i32, %c0_i32_0 : i32, i32
  }
  func.func @transform_2(%arg0: i32) -> (i32, i32) {
    %c0_i32 = arith.constant 0 : i32
    %c0_i32_0 = arith.constant 0 : i32
    %c0_i32_1 = arith.constant 0 : i32
    return %c0_i32, %c0_i32_0 : i32, i32
  }
  func.func @transform_3(%arg0: i32) -> (i32, i32) {
    %c0_i32 = arith.constant 0 : i32
    %c0_i32_0 = arith.constant 0 : i32
    %c0_i32_1 = arith.constant 0 : i32
    return %c0_i32, %c0_i32_0 : i32, i32
  }
  func.func @transform_4(%arg0: i32) -> (i32, i32) {
    %c0_i32 = arith.constant 0 : i32
    %c0_i32_0 = arith.constant 0 : i32
    %c0_i32_1 = arith.constant 0 : i32
    return %c0_i32, %c0_i32_0 : i32, i32
  }
  func.func @transform_5(%arg0: i32) -> (i32, i32) {
    %c0_i32 = arith.constant 0 : i32
    %c0_i32_0 = arith.constant 0 : i32
    %c0_i32_1 = arith.constant 0 : i32
    return %c0_i32, %c0_i32_0 : i32, i32
  }
  func.func @transform_6(%arg0: i32) -> (i32, i32) {
    %c0_i32 = arith.constant 0 : i32
    %c0_i32_0 = arith.constant 0 : i32
    %c0_i32_1 = arith.constant 0 : i32
    return %c0_i32, %c0_i32_0 : i32, i32
  }
  func.func @transform_7(%arg0: i32) -> (i32, i32) {
    %c0_i32 = arith.constant 0 : i32
    %c0_i32_0 = arith.constant 0 : i32
    %c0_i32_1 = arith.constant 0 : i32
    return %c0_i32, %c0_i32_0 : i32, i32
  }
}

</mosaic_0001>

<bundles_post_ra>
// kernel: food101_forward.5
= control target key start
LH: loop header
LB: loop body
LE: loop exit
PB: predicated region body
PF: predicated region fallthrough
CT: control target
= control target key end

     0   :  { %s4616_s12 = smov 0   ;;  %s5348_s0 = inlined_call_operand.vmem [shape: bf16[6,75], index: 0, kind: input, shape index: {}]   ;;  %s5349_s1 = inlined_call_operand.vmem [shape: bf16[2,75,9216], index: 1, kind: input, shape index: {}]   ;;  %s5350_s2 = inlined_call_operand.vmem [shape: f32[6,1], index: 2, kind: input, shape index: {}]   ;;  %s5351_s3 = inlined_call_operand.vmem [shape: f32[2,6,9216], index: 3, kind: output, shape index: {}]  }
   0x1 LB: > { %s4166_s13 = sadd.s32 4294967295, %s4592_s12   ;;  %p4170_p0 = scmp.ge.s32.totalorder %s4592_s12, 1  ;;  %s4592_s12 = sphi %s4616_s12, %s13_s12  }
   0x2   : > { %p137_p1 = scmp.lt.s32.totalorder %s4592_s12, 3 }
   0x4   : > { %p138_p2 = pnand %p4170_p0, %p137_p1 }
   0x5   : > { %p161_p3 = scmp.lt.s32.totalorder (!%p138_p2), %s4166_s13, 1 }
   0x6   : > { %141 = sbr.rel (%p138_p2) target bundleno = 581 (0x245), region = 32 }
   0xb   : > { %vm2271_vm0 = vcmask 1044480   ;;  %v4594_v0 = vmov 0   ;;  %v533_v1 = vld [vmem:[%s5350_s2] sm:$0x3f]  ;;  %s5353_s13 = smov (!%p161_p3, %s4166_s13), 1  ;;  %vm2272_vm1 = vcmask 1045504  }
   0xc   : > { %2523 = vmatprep.mubr.bf16.mxu0 %v4594_v0  ;;  %2564 = vmatprep.mubr.bf16.mxu1 %v4594_v0  ;;  %s4571_s16 = smul.u32 2880, %s5353_s13  ;;  %v4595_v2 = vmov 65535   ;;  %v4677_v63 = vld [vmem:[%s5348_s0] sm:$0x7]  ;;  %vm2267_vm2 = vcmask 613376  }
   0xd   : > { %4583 = vset.pattern.permute.xlu0 %v4594_v0  ;;  %v2273_v3 = vsel %vm2271_vm0, 4294967295, %v4595_v2  ;;  %s4572_s24 = smul.u32 576, %s5353_s13 }
   0xe   : > { %536 = vperm.xlu0 %4583, %v533_v1   ;;  %s4636_s19 = scalar_lea.vmem %s5349_s1, %s4571_s16  ;;  %v4640_v6 = vsel %vm2272_vm1, %v2273_v3, 0 }
   0xf   : > { %v461_v4 = vld [vmem:[%s4636_s19 + $0x900] sm:$0xff]  ;;  %v462_v7 = vld [vmem:[%s4636_s19 + $0x908] sm:$0xff]  ;;  %v463_v42 = vld [vmem:[%s4636_s19 + $0x910] sm:$0xff]  ;;  %s4985_s27 = scalar_lea.vmem %s5351_s3, %s4572_s24 }
  0x10   : > { %v497_v5 = vld [vmem:[%s4636_s19 + $0xa20] sm:$0x33]  ;;  %v498_v9 = vld [vmem:[%s4636_s19 + $0xa28] sm:$0x33]  ;;  %v499_v43 = vld [vmem:[%s4636_s19 + $0xa30] sm:$0x33] }
  0x11   : > { %v4462_v8 = vcombine.high %v461_v4, %v497_v5  ;;  %v4461_v10 = vcombine.low %v461_v4, %v497_v5  ;;  %v389_v11 = vld [vmem:[%s4636_s19 + $0x6c0] sm:$0xff]  ;;  %v4464_v13 = vcombine.high %v462_v7, %v498_v9  ;;  %v4463_v14 = vcombine.low %v462_v7, %v498_v9  ;;  %v390_v15 = vld [vmem:[%s4636_s19 + $0x6c8] sm:$0xff]  ;;  %v464_v45 = vld [vmem:[%s4636_s19 + $0x918] sm:$0xff] }
  0x12   : > { %v425_v12 = vld [vmem:[%s4636_s19 + $0x7e0] sm:$0xff]  ;;  %v426_v16 = vld [vmem:[%s4636_s19 + $0x7e8] sm:$0xff]  ;;  %v500_v46 = vld [vmem:[%s4636_s19 + $0xa38] sm:$0x33]  ;;  %v4466_v50 = vcombine.high %v463_v42, %v499_v43  ;;  %v4465_v54 = vcombine.low %v463_v42, %v499_v43 }
  0x13   : > { %v2279_v17 = vand.u32 %v4462_v8, %v4640_v6  ;;  %v2276_v18 = vand.u32 %v4461_v10, %v4640_v6  ;;  %v4390_v19 = vcombine.high %v389_v11, %v425_v12  ;;  %v2285_v20 = vand.u32 %v4464_v13, %v4640_v6  ;;  %v317_v23 = vld [vmem:[%s4636_s19 + $0x480] sm:$0xff]  ;;  %v318_v25 = vld [vmem:[%s4636_s19 + $0x488] sm:$0xff]  ;;  %v391_v59 = vld [vmem:[%s4636_s19 + $0x6d0] sm:$0xff] }
  0x14   : > { %v2282_v21 = vand.u32 %v4463_v14, %v4640_v6  ;;  %v4392_v22 = vcombine.high %v390_v15, %v426_v16  ;;  %v353_v24 = vld [vmem:[%s4636_s19 + $0x5a0] sm:$0xff]  ;;  %v354_v26 = vld [vmem:[%s4636_s19 + $0x5a8] sm:$0xff]  ;;  %v4389_v27 = vcombine.low %v389_v11, %v425_v12  ;;  %v4391_v28 = vcombine.low %v390_v15, %v426_v16  ;;  %v427_v60 = vld [vmem:[%s4636_s19 + $0x7f0] sm:$0xff] }
  0x15   : > { %2497 = vmatprep.subr.bf16.mxu0 %v2279_v17  ;;  %2538 = vmatprep.subr.bf16.mxu1 %v2285_v20  ;;  %v4318_v29 = vcombine.high %v317_v23, %v353_v24  ;;  %v4320_v30 = vcombine.high %v318_v25, %v354_v26  ;;  %v245_v31 = vld [vmem:[%s4636_s19 + $0x240] sm:$0xff]  ;;  %v246_v33 = vld [vmem:[%s4636_s19 + $0x248] sm:$0xff]  ;;  %v4317_v35 = vcombine.low %v317_v23, %v353_v24  ;;  %v392_v61 = vld [vmem:[%s4636_s19 + $0x6d8] sm:$0xff] }
  0x16   : > { %2498 = vmatpush1.bf16.msra.mxu0 %v2276_v18  ;;  %2539 = vmatpush1.bf16.msra.mxu1 %v2282_v21  ;;  %v281_v32 = vld [vmem:[%s4636_s19 + $0x360] sm:$0xff]  ;;  %v282_v34 = vld [vmem:[%s4636_s19 + $0x368] sm:$0xff]  ;;  %v4319_v36 = vcombine.low %v318_v25, %v354_v26  ;;  %v4468_v52 = vcombine.high %v464_v45, %v500_v46  ;;  %v2291_v56 = vand.u32 %v4466_v50, %v4640_v6  ;;  %v428_v62 = vld [vmem:[%s4636_s19 + $0x7f8] sm:$0xff] }
  0x17   : > { %2499 = vmatprep.subr.bf16.mxu0 %v4390_v19  ;;  %2540 = vmatprep.subr.bf16.mxu1 %v4392_v22  ;;  %v4246_v37 = vcombine.high %v245_v31, %v281_v32  ;;  %v173_v38 = vld [vmem:[%s4636_s19] sm:$0xff]  ;;  %v4248_v40 = vcombine.high %v246_v33, %v282_v34  ;;  %v174_v41 = vld [vmem:[%s4636_s19 + $0x8] sm:$0xff]  ;;  %v4245_v47 = vcombine.low %v245_v31, %v281_v32  ;;  %v319_v5 = vld [vmem:[%s4636_s19 + $0x490] sm:$0xff] }
  0x18   : > { %v209_v39 = vld [vmem:[%s4636_s19 + $0x120] sm:$0xff]  ;;  %v210_v44 = vld [vmem:[%s4636_s19 + $0x128] sm:$0xff]  ;;  %v4247_v48 = vcombine.low %v246_v33, %v282_v34  ;;  %v4467_v57 = vcombine.low %v464_v45, %v500_v46  ;;  %v2297_v58 = vand.u32 %v4468_v52, %v4640_v6  ;;  %v2288_v1 = vand.u32 %v4465_v54, %v4640_v6  ;;  %v355_v7 = vld [vmem:[%s4636_s19 + $0x5b0] sm:$0xff] }
  0x19   : > { %v4174_v49 = vcombine.high %v173_v38, %v209_v39  ;;  %v4176_v51 = vcombine.high %v174_v41, %v210_v44  ;;  %v4173_v53 = vcombine.low %v173_v38, %v209_v39  ;;  %v4175_v55 = vcombine.low %v174_v41, %v210_v44  ;;  %v320_v8 = vld [vmem:[%s4636_s19 + $0x498] sm:$0xff]  ;;  %v247_v14 = vld [vmem:[%s4636_s19 + $0x250] sm:$0xff]  ;;  %v465_v25 = vld [vmem:[%s4636_s19 + $0x920] sm:$0xff] }
  0x1a   : > { %2500 = vmatpush1.bf16.msra.mxu0 %v4389_v27  ;;  %2541 = vmatpush1.bf16.msra.mxu1 %v4391_v28  ;;  %v2294_v2 = vand.u32 %v4467_v57, %v4640_v6  ;;  %v4394_v3 = vcombine.high %v391_v59, %v427_v60  ;;  %v4396_v4 = vcombine.high %v392_v61, %v428_v62  ;;  %v356_v9 = vld [vmem:[%s4636_s19 + $0x5b8] sm:$0xff]  ;;  %v283_v15 = vld [vmem:[%s4636_s19 + $0x370] sm:$0xff]  ;;  %v501_v26 = vld [vmem:[%s4636_s19 + $0xa40] sm:$0x33] }
  0x1b   : > { %2501 = vmatprep.subr.bf16.mxu0 %v4318_v29  ;;  %2542 = vmatprep.subr.bf16.mxu1 %v4320_v30  ;;  %v4393_v10 = vcombine.low %v391_v59, %v427_v60  ;;  %v4395_v11 = vcombine.low %v392_v61, %v428_v62  ;;  %v4322_v12 = vcombine.high %v319_v5, %v355_v7  ;;  %v248_v16 = vld [vmem:[%s4636_s19 + $0x258] sm:$0xff]  ;;  %v175_v21 = vld [vmem:[%s4636_s19 + $0x10] sm:$0xff]  ;;  %v466_v28 = vld [vmem:[%s4636_s19 + $0x928] sm:$0xff] }
  0x1c   : > { %v4324_v13 = vcombine.high %v320_v8, %v356_v9  ;;  %v284_v17 = vld [vmem:[%s4636_s19 + $0x378] sm:$0xff]  ;;  %v4321_v18 = vcombine.low %v319_v5, %v355_v7  ;;  %v4323_v19 = vcombine.low %v320_v8, %v356_v9  ;;  %v4250_v20 = vcombine.high %v247_v14, %v283_v15  ;;  %v211_v22 = vld [vmem:[%s4636_s19 + $0x130] sm:$0xff]  ;;  %v502_v29 = vld [vmem:[%s4636_s19 + $0xa48] sm:$0x33] }
  0x1d   : > { %v4252_v23 = vcombine.high %v248_v16, %v284_v17  ;;  %v176_v24 = vld [vmem:[%s4636_s19 + $0x18] sm:$0xff]  ;;  %v4249_v30 = vcombine.low %v247_v14, %v283_v15  ;;  %v4251_v31 = vcombine.low %v248_v16, %v284_v17  ;;  %v4178_v32 = vcombine.high %v175_v21, %v211_v22  ;;  %v393_v42 = vld [vmem:[%s4636_s19 + $0x6e0] sm:$0xff]  ;;  %v394_v44 = vld [vmem:[%s4636_s19 + $0x6e8] sm:$0xff] }
  0x1e   : > { %2502 = vmatpush1.bf16.msra.mxu0 %v4317_v35  ;;  %2543 = vmatpush1.bf16.msra.mxu1 %v4319_v36  ;;  %v212_v27 = vld [vmem:[%s4636_s19 + $0x138] sm:$0xff]  ;;  %v4470_v33 = vcombine.high %v465_v25, %v501_v26  ;;  %v4472_v35 = vcombine.high %v466_v28, %v502_v29  ;;  %v4177_v36 = vcombine.low %v175_v21, %v211_v22  ;;  %v429_v43 = vld [vmem:[%s4636_s19 + $0x800] sm:$0xff]  ;;  %v430_v45 = vld [vmem:[%s4636_s19 + $0x808] sm:$0xff] }
  0x1f   : > { %2503 = vmatprep.subr.bf16.mxu0 %v4246_v37  ;;  %2544 = vmatprep.subr.bf16.mxu1 %v4248_v40  ;;  %v4180_v34 = vcombine.high %v176_v24, %v212_v27  ;;  %v4469_v37 = vcombine.low %v465_v25, %v501_v26  ;;  %v4179_v38 = vcombine.low %v176_v24, %v212_v27  ;;  %v321_v50 = vld [vmem:[%s4636_s19 + $0x4a0] sm:$0xff]  ;;  %v322_v52 = vld [vmem:[%s4636_s19 + $0x4a8] sm:$0xff]  ;;  %v467_v8 = vld [vmem:[%s4636_s19 + $0x930] sm:$0xff] }
  0x20   : > { %v2303_v39 = vand.u32 %v4470_v33, %v4640_v6  ;;  %v4471_v40 = vcombine.low %v466_v28, %v502_v29  ;;  %v2309_v41 = vand.u32 %v4472_v35, %v4640_v6  ;;  %v4397_v54 = vcombine.low %v393_v42, %v429_v43  ;;  %v285_v59 = vld [vmem:[%s4636_s19 + $0x380] sm:$0xff]  ;;  %v250_v60 = vld [vmem:[%s4636_s19 + $0x268] sm:$0xff]  ;;  %v503_v9 = vld [vmem:[%s4636_s19 + $0xa50] sm:$0x33] }
  0x21   : > { %v2300_v46 = vand.u32 %v4469_v37, %v4640_v6  ;;  %v286_v61 = vld [vmem:[%s4636_s19 + $0x388] sm:$0xff]  ;;  %v4474_v16 = vcombine.high %v467_v8, %v503_v9  ;;  %v395_v25 = vld [vmem:[%s4636_s19 + $0x6f0] sm:$0xff]  ;;  %v396_v27 = vld [vmem:[%s4636_s19 + $0x6f8] sm:$0xff] }
  0x22   : > { %2504 = vmatpush1.bf16.msra.mxu0 %v4245_v47  ;;  %2545 = vmatpush1.bf16.msra.mxu1 %v4247_v48  ;;  %v2306_v47 = vand.u32 %v4471_v40, %v4640_v6  ;;  %v4398_v48 = vcombine.high %v393_v42, %v429_v43  ;;  %v4256_v5 = vcombine.high %v250_v60, %v286_v61  ;;  %v178_v7 = vld [vmem:[%s4636_s19 + $0x28] sm:$0xff]  ;;  %v431_v26 = vld [vmem:[%s4636_s19 + $0x810] sm:$0xff]  ;;  %v432_v28 = vld [vmem:[%s4636_s19 + $0x818] sm:$0xff] }
  0x23   : > { %2505 = vmatprep.subr.bf16.mxu0 %v4174_v49  ;;  %2546 = vmatprep.subr.bf16.mxu1 %v4176_v51  ;;  %v4400_v49 = vcombine.high %v394_v44, %v430_v45  ;;  %v357_v51 = vld [vmem:[%s4636_s19 + $0x5c0] sm:$0xff]  ;;  %v4255_v14 = vcombine.low %v250_v60, %v286_v61  ;;  %v2315_v22 = vand.u32 %v4474_v16, %v4640_v6  ;;  %v323_v33 = vld [vmem:[%s4636_s19 + $0x4b0] sm:$0xff]  ;;  %v324_v35 = vld [vmem:[%s4636_s19 + $0x4b8] sm:$0xff] }
  0x24   : > { %v4325_v62 = vcombine.low %v321_v50, %v357_v51  ;;  %v4401_v37 = vcombine.low %v395_v25, %v431_v26  ;;  %v287_v42 = vld [vmem:[%s4636_s19 + $0x390] sm:$0xff]  ;;  %v252_v43 = vld [vmem:[%s4636_s19 + $0x278] sm:$0xff]  ;;  %v325_v16 = vld [vmem:[%s4636_s19 + $0x4c0] sm:$0xff] }
  0x26   : > { %2506 = vmatpush1.bf16.msra.mxu0 %v4173_v53  ;;  %2547 = vmatpush1.bf16.msra.mxu1 %v4175_v55  ;;  %v358_v53 = vld [vmem:[%s4636_s19 + $0x5c8] sm:$0xff]  ;;  %v4399_v55 = vcombine.low %v394_v44, %v430_v45  ;;  %v288_v44 = vld [vmem:[%s4636_s19 + $0x398] sm:$0xff] }
  0x27   : > { %2579 = vmatprep.subr.bf16.mxu0 %v2291_v56  ;;  %2620 = vmatprep.subr.bf16.mxu1 %v2297_v58  ;;  %v4326_v56 = vcombine.high %v321_v50, %v357_v51  ;;  %v4328_v57 = vcombine.high %v322_v52, %v358_v53  ;;  %v249_v58 = vld [vmem:[%s4636_s19 + $0x260] sm:$0xff]  ;;  %v4260_v50 = vcombine.high %v252_v43, %v288_v44  ;;  %v180_v51 = vld [vmem:[%s4636_s19 + $0x38] sm:$0xff] }
  0x29   : > { %4533 = vmatmul.mubr.msk.bf16.vlgmr.msra.gmra.mxu0 %vm2267_vm2, %v4677_v63  ;;  %4534 = vmatmul.mubr.msk.bf16.vlgmr.msra.gmra.mxu1 %vm2267_vm2, %v4677_v63 }
  0x2a   : > { %2580 = vmatpush1.bf16.msra.mxu0 %v2288_v1  ;;  %2621 = vmatpush1.bf16.msra.mxu1 %v2294_v2  ;;  %v4327_v1 = vcombine.low %v322_v52, %v358_v53  ;;  %v4254_v2 = vcombine.high %v249_v58, %v285_v59  ;;  %v469_v52 = vld [vmem:[%s4636_s19 + $0x940] sm:$0xff] }
  0x2b   : > { %2581 = vmatprep.subr.bf16.mxu0 %v4394_v3  ;;  %2622 = vmatprep.subr.bf16.mxu1 %v4396_v4  ;;  %v177_v3 = vld [vmem:[%s4636_s19 + $0x20] sm:$0xff] }
  0x2c   : > { %2605 = vmatprep.mubr.bf16.mxu0 %v4594_v0  ;;  %2646 = vmatprep.mubr.bf16.mxu1 %v4594_v0  ;;  %v213_v4 = vld [vmem:[%s4636_s19 + $0x140] sm:$0xff] }
  0x2d   : > { %v4182_v15 = vcombine.high %v177_v3, %v213_v4  ;;  %v505_v53 = vld [vmem:[%s4636_s19 + $0xa60] sm:$0x33] }
  0x2e   : > { %2582 = vmatpush1.bf16.msra.mxu0 %v4393_v10  ;;  %2623 = vmatpush1.bf16.msra.mxu1 %v4395_v11  ;;  %v214_v10 = vld [vmem:[%s4636_s19 + $0x148] sm:$0xff]  ;;  %v468_v11 = vld [vmem:[%s4636_s19 + $0x938] sm:$0xff]  ;;  %v4478_v60 = vcombine.high %v469_v52, %v505_v53 }
  0x2f   : > { %2583 = vmatprep.subr.bf16.mxu0 %v4322_v12  ;;  %2624 = vmatprep.subr.bf16.mxu1 %v4324_v13  ;;  %v504_v12 = vld [vmem:[%s4636_s19 + $0xa58] sm:$0x33]  ;;  %v4253_v13 = vcombine.low %v249_v58, %v285_v59  ;;  %v4184_v17 = vcombine.high %v178_v7, %v214_v10  ;;  %v4183_v21 = vcombine.low %v178_v7, %v214_v10  ;;  %v398_v10 = vld [vmem:[%s4636_s19 + $0x708] sm:$0xff] }
  0x30   : > { %v4259_v58 = vcombine.low %v252_v43, %v288_v44 }
  0x32   : > { %2584 = vmatpush1.bf16.msra.mxu0 %v4321_v18  ;;  %2625 = vmatpush1.bf16.msra.mxu1 %v4323_v19  ;;  %v4476_v18 = vcombine.high %v468_v11, %v504_v12  ;;  %v4181_v19 = vcombine.low %v177_v3, %v213_v4  ;;  %v2327_v4 = vand.u32 %v4478_v60, %v4640_v6  ;;  %v327_v60 = vld [vmem:[%s4636_s19 + $0x4d0] sm:$0xff] }
  0x33   : > { %2585 = vmatprep.subr.bf16.mxu0 %v4250_v20  ;;  %2626 = vmatprep.subr.bf16.mxu1 %v4252_v23  ;;  %v4473_v20 = vcombine.low %v467_v8, %v503_v9  ;;  %v4475_v23 = vcombine.low %v468_v11, %v504_v12  ;;  %v397_v8 = vld [vmem:[%s4636_s19 + $0x700] sm:$0xff]  ;;  %v434_v11 = vld [vmem:[%s4636_s19 + $0x828] sm:$0xff] }
  0x34   : > { %v2321_v24 = vand.u32 %v4476_v18, %v4640_v6  ;;  %v433_v9 = vld [vmem:[%s4636_s19 + $0x820] sm:$0xff]  ;;  %v326_v18 = vld [vmem:[%s4636_s19 + $0x4c8] sm:$0xff] }
  0x35   : > { %v2312_v29 = vand.u32 %v4473_v20, %v4640_v6  ;;  %v4405_v20 = vcombine.low %v397_v8, %v433_v9 }
  0x36   : > { %2586 = vmatpush1.bf16.msra.mxu0 %v4249_v30  ;;  %2627 = vmatpush1.bf16.msra.mxu1 %v4251_v31  ;;  %v2318_v30 = vand.u32 %v4475_v23, %v4640_v6  ;;  %v4402_v31 = vcombine.high %v395_v25, %v431_v26  ;;  %v289_v25 = vld [vmem:[%s4636_s19 + $0x3a0] sm:$0xff]  ;;  %v254_v26 = vld [vmem:[%s4636_s19 + $0x288] sm:$0xff] }
  0x37   : > { %2587 = vmatprep.subr.bf16.mxu0 %v4178_v32  ;;  %2628 = vmatprep.subr.bf16.mxu1 %v4180_v34  ;;  %v4404_v32 = vcombine.high %v396_v27, %v432_v28  ;;  %v359_v34 = vld [vmem:[%s4636_s19 + $0x5d0] sm:$0xff] }
  0x38   : > { %v4329_v45 = vcombine.low %v323_v33, %v359_v34 }
  0x3a   : > { %2588 = vmatpush1.bf16.msra.mxu0 %v4177_v36  ;;  %2629 = vmatpush1.bf16.msra.mxu1 %v4179_v38  ;;  %v360_v36 = vld [vmem:[%s4636_s19 + $0x5d8] sm:$0xff]  ;;  %v4403_v38 = vcombine.low %v396_v27, %v432_v28  ;;  %v290_v27 = vld [vmem:[%s4636_s19 + $0x3a8] sm:$0xff] }
  0x3b   : > { %2661 = vmatprep.subr.bf16.mxu0 %v2303_v39  ;;  %2702 = vmatprep.subr.bf16.mxu1 %v2309_v41  ;;  %v4330_v39 = vcombine.high %v323_v33, %v359_v34  ;;  %v4332_v40 = vcombine.high %v324_v35, %v360_v36  ;;  %v251_v41 = vld [vmem:[%s4636_s19 + $0x270] sm:$0xff]  ;;  %v4264_v33 = vcombine.high %v254_v26, %v290_v27  ;;  %v182_v34 = vld [vmem:[%s4636_s19 + $0x48] sm:$0xff] }
  0x3d   : > { %4535 = vmatmul.mubr.msk.bf16.vlgmr.msra.gmra.mxu0 %vm2267_vm2, %v4677_v63  ;;  %4536 = vmatmul.mubr.msk.bf16.vlgmr.msra.gmra.mxu1 %vm2267_vm2, %v4677_v63 }
  0x3e   : > { %2662 = vmatpush1.bf16.msra.mxu0 %v2300_v46  ;;  %2703 = vmatpush1.bf16.msra.mxu1 %v2306_v47  ;;  %v4331_v46 = vcombine.low %v324_v35, %v360_v36  ;;  %v4258_v47 = vcombine.high %v251_v41, %v287_v42  ;;  %v471_v35 = vld [vmem:[%s4636_s19 + $0x950] sm:$0xff] }
  0x3f   : > { %2663 = vmatprep.subr.bf16.mxu0 %v4398_v48  ;;  %2704 = vmatprep.subr.bf16.mxu1 %v4400_v49  ;;  %v179_v48 = vld [vmem:[%s4636_s19 + $0x30] sm:$0xff] }
  0x40   : > { %2687 = vmatprep.mubr.bf16.mxu0 %v4594_v0  ;;  %2728 = vmatprep.mubr.bf16.mxu1 %v4594_v0  ;;  %v215_v49 = vld [vmem:[%s4636_s19 + $0x150] sm:$0xff] }
  0x41   : > { %v4186_v59 = vcombine.high %v179_v48, %v215_v49  ;;  %v507_v36 = vld [vmem:[%s4636_s19 + $0xa70] sm:$0x33] }
  0x42   : > { %2664 = vmatpush1.bf16.msra.mxu0 %v4397_v54  ;;  %2705 = vmatpush1.bf16.msra.mxu1 %v4399_v55  ;;  %v216_v54 = vld [vmem:[%s4636_s19 + $0x158] sm:$0xff]  ;;  %v470_v55 = vld [vmem:[%s4636_s19 + $0x948] sm:$0xff]  ;;  %v4482_v43 = vcombine.high %v471_v35, %v507_v36 }
  0x43   : > { %2665 = vmatprep.subr.bf16.mxu0 %v4326_v56  ;;  %2706 = vmatprep.subr.bf16.mxu1 %v4328_v57  ;;  %v506_v56 = vld [vmem:[%s4636_s19 + $0xa68] sm:$0x33]  ;;  %v4257_v57 = vcombine.low %v251_v41, %v287_v42  ;;  %v4188_v61 = vcombine.high %v180_v51, %v216_v54  ;;  %v4187_v3 = vcombine.low %v180_v51, %v216_v54  ;;  %v400_v54 = vld [vmem:[%s4636_s19 + $0x718] sm:$0xff] }
  0x44   : > { %v4263_v41 = vcombine.low %v254_v26, %v290_v27 }
  0x46   : > { %2666 = vmatpush1.bf16.msra.mxu0 %v4325_v62  ;;  %2707 = vmatpush1.bf16.msra.mxu1 %v4327_v1  ;;  %v4480_v62 = vcombine.high %v470_v55, %v506_v56  ;;  %v4185_v1 = vcombine.low %v179_v48, %v215_v49  ;;  %v2339_v49 = vand.u32 %v4482_v43, %v4640_v6  ;;  %v329_v43 = vld [vmem:[%s4636_s19 + $0x4e0] sm:$0xff] }
  0x47   : > { %2667 = vmatprep.subr.bf16.mxu0 %v4254_v2  ;;  %2708 = vmatprep.subr.bf16.mxu1 %v4256_v5  ;;  %v4477_v2 = vcombine.low %v469_v52, %v505_v53  ;;  %v4479_v5 = vcombine.low %v470_v55, %v506_v56  ;;  %v399_v52 = vld [vmem:[%s4636_s19 + $0x710] sm:$0xff]  ;;  %v436_v55 = vld [vmem:[%s4636_s19 + $0x838] sm:$0xff] }
  0x48   : > { %v2333_v7 = vand.u32 %v4480_v62, %v4640_v6  ;;  %v435_v53 = vld [vmem:[%s4636_s19 + $0x830] sm:$0xff]  ;;  %v328_v62 = vld [vmem:[%s4636_s19 + $0x4d8] sm:$0xff] }
  0x49   : > { %v2324_v12 = vand.u32 %v4477_v2, %v4640_v6  ;;  %v4409_v2 = vcombine.low %v399_v52, %v435_v53 }
  0x4a   : > { %2668 = vmatpush1.bf16.msra.mxu0 %v4253_v13  ;;  %2709 = vmatpush1.bf16.msra.mxu1 %v4255_v14  ;;  %v2330_v13 = vand.u32 %v4479_v5, %v4640_v6  ;;  %v4406_v14 = vcombine.high %v397_v8, %v433_v9  ;;  %v291_v8 = vld [vmem:[%s4636_s19 + $0x3b0] sm:$0xff]  ;;  %v256_v9 = vld [vmem:[%s4636_s19 + $0x298] sm:$0xff] }
  0x4b   : > { %2669 = vmatprep.subr.bf16.mxu0 %v4182_v15  ;;  %2710 = vmatprep.subr.bf16.mxu1 %v4184_v17  ;;  %v4408_v15 = vcombine.high %v398_v10, %v434_v11  ;;  %v361_v17 = vld [vmem:[%s4636_s19 + $0x5e0] sm:$0xff] }
  0x4c   : > { %v4333_v28 = vcombine.low %v325_v16, %v361_v17 }
  0x4e   : > { %2670 = vmatpush1.bf16.msra.mxu0 %v4181_v19  ;;  %2711 = vmatpush1.bf16.msra.mxu1 %v4183_v21  ;;  %v362_v19 = vld [vmem:[%s4636_s19 + $0x5e8] sm:$0xff]  ;;  %v4407_v21 = vcombine.low %v398_v10, %v434_v11  ;;  %v292_v10 = vld [vmem:[%s4636_s19 + $0x3b8] sm:$0xff] }
  0x4f   : > { %2743 = vmatprep.subr.bf16.mxu0 %v2315_v22  ;;  %2784 = vmatprep.subr.bf16.mxu1 %v2321_v24  ;;  %v4334_v22 = vcombine.high %v325_v16, %v361_v17  ;;  %v4336_v23 = vcombine.high %v326_v18, %v362_v19  ;;  %v253_v24 = vld [vmem:[%s4636_s19 + $0x280] sm:$0xff]  ;;  %v4268_v16 = vcombine.high %v256_v9, %v292_v10  ;;  %v184_v17 = vld [vmem:[%s4636_s19 + $0x58] sm:$0xff] }
  0x51   : > { %4537 = vmatmul.mubr.msk.bf16.vlgmr.msra.gmra.mxu0 %vm2267_vm2, %v4677_v63  ;;  %4538 = vmatmul.mubr.msk.bf16.vlgmr.msra.gmra.mxu1 %vm2267_vm2, %v4677_v63 }
  0x52   : > { %2744 = vmatpush1.bf16.msra.mxu0 %v2312_v29  ;;  %2785 = vmatpush1.bf16.msra.mxu1 %v2318_v30  ;;  %v4335_v29 = vcombine.low %v326_v18, %v362_v19  ;;  %v4262_v30 = vcombine.high %v253_v24, %v289_v25  ;;  %v473_v18 = vld [vmem:[%s4636_s19 + $0x960] sm:$0xff] }
  0x53   : > { %2745 = vmatprep.subr.bf16.mxu0 %v4402_v31  ;;  %2786 = vmatprep.subr.bf16.mxu1 %v4404_v32  ;;  %v181_v31 = vld [vmem:[%s4636_s19 + $0x40] sm:$0xff] }
  0x54   : > { %2769 = vmatprep.mubr.bf16.mxu0 %v4594_v0  ;;  %2810 = vmatprep.mubr.bf16.mxu1 %v4594_v0  ;;  %v217_v32 = vld [vmem:[%s4636_s19 + $0x160] sm:$0xff] }
  0x55   : > { %v4190_v42 = vcombine.high %v181_v31, %v217_v32  ;;  %v509_v19 = vld [vmem:[%s4636_s19 + $0xa80] sm:$0x33] }
  0x56   : > { %2746 = vmatpush1.bf16.msra.mxu0 %v4401_v37  ;;  %2787 = vmatpush1.bf16.msra.mxu1 %v4403_v38  ;;  %v218_v37 = vld [vmem:[%s4636_s19 + $0x168] sm:$0xff]  ;;  %v472_v38 = vld [vmem:[%s4636_s19 + $0x958] sm:$0xff]  ;;  %v4486_v26 = vcombine.high %v473_v18, %v509_v19 }
  0x57   : > { %2747 = vmatprep.subr.bf16.mxu0 %v4330_v39  ;;  %2788 = vmatprep.subr.bf16.mxu1 %v4332_v40  ;;  %v508_v39 = vld [vmem:[%s4636_s19 + $0xa78] sm:$0x33]  ;;  %v4261_v40 = vcombine.low %v253_v24, %v289_v25  ;;  %v4192_v44 = vcombine.high %v182_v34, %v218_v37  ;;  %v4191_v48 = vcombine.low %v182_v34, %v218_v37  ;;  %v402_v37 = vld [vmem:[%s4636_s19 + $0x728] sm:$0xff] }
  0x58   : > { %v4267_v24 = vcombine.low %v256_v9, %v292_v10 }
  0x5a   : > { %2748 = vmatpush1.bf16.msra.mxu0 %v4329_v45  ;;  %2789 = vmatpush1.bf16.msra.mxu1 %v4331_v46  ;;  %v4484_v45 = vcombine.high %v472_v38, %v508_v39  ;;  %v4189_v46 = vcombine.low %v181_v31, %v217_v32  ;;  %v2351_v32 = vand.u32 %v4486_v26, %v4640_v6  ;;  %v331_v26 = vld [vmem:[%s4636_s19 + $0x4f0] sm:$0xff] }
  0x5b   : > { %2749 = vmatprep.subr.bf16.mxu0 %v4258_v47  ;;  %2790 = vmatprep.subr.bf16.mxu1 %v4260_v50  ;;  %v4481_v47 = vcombine.low %v471_v35, %v507_v36  ;;  %v4483_v50 = vcombine.low %v472_v38, %v508_v39  ;;  %v401_v35 = vld [vmem:[%s4636_s19 + $0x720] sm:$0xff]  ;;  %v438_v38 = vld [vmem:[%s4636_s19 + $0x848] sm:$0xff] }
  0x5c   : > { %v2345_v51 = vand.u32 %v4484_v45, %v4640_v6  ;;  %v437_v36 = vld [vmem:[%s4636_s19 + $0x840] sm:$0xff]  ;;  %v330_v45 = vld [vmem:[%s4636_s19 + $0x4e8] sm:$0xff] }
  0x5d   : > { %v2336_v56 = vand.u32 %v4481_v47, %v4640_v6  ;;  %v4413_v47 = vcombine.low %v401_v35, %v437_v36 }
  0x5e   : > { %2750 = vmatpush1.bf16.msra.mxu0 %v4257_v57  ;;  %2791 = vmatpush1.bf16.msra.mxu1 %v4259_v58  ;;  %v2342_v57 = vand.u32 %v4483_v50, %v4640_v6  ;;  %v4410_v58 = vcombine.high %v399_v52, %v435_v53  ;;  %v293_v52 = vld [vmem:[%s4636_s19 + $0x3c0] sm:$0xff]  ;;  %v258_v53 = vld [vmem:[%s4636_s19 + $0x2a8] sm:$0xff] }
  0x5f   : > { %2751 = vmatprep.subr.bf16.mxu0 %v4186_v59  ;;  %2792 = vmatprep.subr.bf16.mxu1 %v4188_v61  ;;  %v4412_v59 = vcombine.high %v400_v54, %v436_v55  ;;  %v363_v61 = vld [vmem:[%s4636_s19 + $0x5f0] sm:$0xff] }
  0x60   : > { %v4337_v11 = vcombine.low %v327_v60, %v363_v61 }
  0x62   : > { %2752 = vmatpush1.bf16.msra.mxu0 %v4185_v1  ;;  %2793 = vmatpush1.bf16.msra.mxu1 %v4187_v3  ;;  %v364_v1 = vld [vmem:[%s4636_s19 + $0x5f8] sm:$0xff]  ;;  %v4411_v3 = vcombine.low %v400_v54, %v436_v55  ;;  %v294_v54 = vld [vmem:[%s4636_s19 + $0x3c8] sm:$0xff] }
  0x63   : > { %2825 = vmatprep.subr.bf16.mxu0 %v2327_v4  ;;  %2866 = vmatprep.subr.bf16.mxu1 %v2333_v7  ;;  %v4338_v4 = vcombine.high %v327_v60, %v363_v61  ;;  %v4340_v5 = vcombine.high %v328_v62, %v364_v1  ;;  %v255_v7 = vld [vmem:[%s4636_s19 + $0x290] sm:$0xff]  ;;  %v4272_v60 = vcombine.high %v258_v53, %v294_v54  ;;  %v186_v61 = vld [vmem:[%s4636_s19 + $0x68] sm:$0xff] }
  0x65   : > { %4539 = vmatmul.mubr.msk.bf16.vlgmr.msra.gmra.mxu0 %vm2267_vm2, %v4677_v63  ;;  %4540 = vmatmul.mubr.msk.bf16.vlgmr.msra.gmra.mxu1 %vm2267_vm2, %v4677_v63 }
  0x66   : > { %2826 = vmatpush1.bf16.msra.mxu0 %v2324_v12  ;;  %2867 = vmatpush1.bf16.msra.mxu1 %v2330_v13  ;;  %v4339_v12 = vcombine.low %v328_v62, %v364_v1  ;;  %v4266_v13 = vcombine.high %v255_v7, %v291_v8  ;;  %v475_v62 = vld [vmem:[%s4636_s19 + $0x970] sm:$0xff] }
  0x67   : > { %2827 = vmatprep.subr.bf16.mxu0 %v4406_v14  ;;  %2868 = vmatprep.subr.bf16.mxu1 %v4408_v15  ;;  %v183_v14 = vld [vmem:[%s4636_s19 + $0x50] sm:$0xff] }
  0x68   : > { %2851 = vmatprep.mubr.bf16.mxu0 %v4594_v0  ;;  %2892 = vmatprep.mubr.bf16.mxu1 %v4594_v0  ;;  %v219_v15 = vld [vmem:[%s4636_s19 + $0x170] sm:$0xff] }
  0x69   : > { %v4194_v25 = vcombine.high %v183_v14, %v219_v15  ;;  %v511_v1 = vld [vmem:[%s4636_s19 + $0xa90] sm:$0x33] }
  0x6a   : > { %2828 = vmatpush1.bf16.msra.mxu0 %v4405_v20  ;;  %2869 = vmatpush1.bf16.msra.mxu1 %v4407_v21  ;;  %v220_v20 = vld [vmem:[%s4636_s19 + $0x178] sm:$0xff]  ;;  %v474_v21 = vld [vmem:[%s4636_s19 + $0x968] sm:$0xff]  ;;  %v4490_v9 = vcombine.high %v475_v62, %v511_v1 }
  0x6b   : > { %2829 = vmatprep.subr.bf16.mxu0 %v4334_v22  ;;  %2870 = vmatprep.subr.bf16.mxu1 %v4336_v23  ;;  %v510_v22 = vld [vmem:[%s4636_s19 + $0xa88] sm:$0x33]  ;;  %v4265_v23 = vcombine.low %v255_v7, %v291_v8  ;;  %v4196_v27 = vcombine.high %v184_v17, %v220_v20  ;;  %v4195_v31 = vcombine.low %v184_v17, %v220_v20  ;;  %v404_v20 = vld [vmem:[%s4636_s19 + $0x738] sm:$0xff] }
  0x6c   : > { %v4271_v7 = vcombine.low %v258_v53, %v294_v54 }
  0x6e   : > { %2830 = vmatpush1.bf16.msra.mxu0 %v4333_v28  ;;  %2871 = vmatpush1.bf16.msra.mxu1 %v4335_v29  ;;  %v4488_v28 = vcombine.high %v474_v21, %v510_v22  ;;  %v4193_v29 = vcombine.low %v183_v14, %v219_v15  ;;  %v2363_v15 = vand.u32 %v4490_v9, %v4640_v6  ;;  %v333_v9 = vld [vmem:[%s4636_s19 + $0x500] sm:$0xff] }
  0x6f   : > { %2831 = vmatprep.subr.bf16.mxu0 %v4262_v30  ;;  %2872 = vmatprep.subr.bf16.mxu1 %v4264_v33  ;;  %v4485_v30 = vcombine.low %v473_v18, %v509_v19  ;;  %v4487_v33 = vcombine.low %v474_v21, %v510_v22  ;;  %v403_v18 = vld [vmem:[%s4636_s19 + $0x730] sm:$0xff]  ;;  %v440_v21 = vld [vmem:[%s4636_s19 + $0x858] sm:$0xff] }
  0x70   : > { %v2357_v34 = vand.u32 %v4488_v28, %v4640_v6  ;;  %v439_v19 = vld [vmem:[%s4636_s19 + $0x850] sm:$0xff]  ;;  %v332_v28 = vld [vmem:[%s4636_s19 + $0x4f8] sm:$0xff] }
  0x71   : > { %v2348_v39 = vand.u32 %v4485_v30, %v4640_v6  ;;  %v4417_v30 = vcombine.low %v403_v18, %v439_v19 }
  0x72   : > { %2832 = vmatpush1.bf16.msra.mxu0 %v4261_v40  ;;  %2873 = vmatpush1.bf16.msra.mxu1 %v4263_v41  ;;  %v2354_v40 = vand.u32 %v4487_v33, %v4640_v6  ;;  %v4414_v41 = vcombine.high %v401_v35, %v437_v36  ;;  %v295_v35 = vld [vmem:[%s4636_s19 + $0x3d0] sm:$0xff]  ;;  %v260_v36 = vld [vmem:[%s4636_s19 + $0x2b8] sm:$0xff] }
  0x73   : > { %2833 = vmatprep.subr.bf16.mxu0 %v4190_v42  ;;  %2874 = vmatprep.subr.bf16.mxu1 %v4192_v44  ;;  %v4416_v42 = vcombine.high %v402_v37, %v438_v38  ;;  %v365_v44 = vld [vmem:[%s4636_s19 + $0x600] sm:$0xff] }
  0x74   : > { %v4341_v55 = vcombine.low %v329_v43, %v365_v44 }
  0x76   : > { %2834 = vmatpush1.bf16.msra.mxu0 %v4189_v46  ;;  %2875 = vmatpush1.bf16.msra.mxu1 %v4191_v48  ;;  %v366_v46 = vld [vmem:[%s4636_s19 + $0x608] sm:$0xff]  ;;  %v4415_v48 = vcombine.low %v402_v37, %v438_v38  ;;  %v296_v37 = vld [vmem:[%s4636_s19 + $0x3d8] sm:$0xff] }
  0x77   : > { %2907 = vmatprep.subr.bf16.mxu0 %v2339_v49  ;;  %2948 = vmatprep.subr.bf16.mxu1 %v2345_v51  ;;  %v4342_v49 = vcombine.high %v329_v43, %v365_v44  ;;  %v4344_v50 = vcombine.high %v330_v45, %v366_v46  ;;  %v257_v51 = vld [vmem:[%s4636_s19 + $0x2a0] sm:$0xff]  ;;  %v4276_v43 = vcombine.high %v260_v36, %v296_v37  ;;  %v188_v44 = vld [vmem:[%s4636_s19 + $0x78] sm:$0xff] }
  0x79   : > { %4541 = vmatmul.mubr.msk.bf16.vlgmr.msra.gmra.mxu0 %vm2267_vm2, %v4677_v63  ;;  %4542 = vmatmul.mubr.msk.bf16.vlgmr.msra.gmra.mxu1 %vm2267_vm2, %v4677_v63 }
  0x7a   : > { %2908 = vmatpush1.bf16.msra.mxu0 %v2336_v56  ;;  %2949 = vmatpush1.bf16.msra.mxu1 %v2342_v57  ;;  %v4343_v56 = vcombine.low %v330_v45, %v366_v46  ;;  %v4270_v57 = vcombine.high %v257_v51, %v293_v52  ;;  %v477_v45 = vld [vmem:[%s4636_s19 + $0x980] sm:$0xff] }
  0x7b   : > { %2909 = vmatprep.subr.bf16.mxu0 %v4410_v58  ;;  %2950 = vmatprep.subr.bf16.mxu1 %v4412_v59  ;;  %v185_v58 = vld [vmem:[%s4636_s19 + $0x60] sm:$0xff] }
  0x7c   : > { %2933 = vmatprep.mubr.bf16.mxu0 %v4594_v0  ;;  %2974 = vmatprep.mubr.bf16.mxu1 %v4594_v0  ;;  %v221_v59 = vld [vmem:[%s4636_s19 + $0x180] sm:$0xff] }
  0x7d   : > { %v4198_v8 = vcombine.high %v185_v58, %v221_v59  ;;  %v513_v46 = vld [vmem:[%s4636_s19 + $0xaa0] sm:$0x33] }
  0x7e   : > { %2910 = vmatpush1.bf16.msra.mxu0 %v4409_v2  ;;  %2951 = vmatpush1.bf16.msra.mxu1 %v4411_v3  ;;  %v222_v2 = vld [vmem:[%s4636_s19 + $0x188] sm:$0xff]  ;;  %v476_v3 = vld [vmem:[%s4636_s19 + $0x978] sm:$0xff]  ;;  %v4494_v53 = vcombine.high %v477_v45, %v513_v46 }
  0x7f   : > { %2911 = vmatprep.subr.bf16.mxu0 %v4338_v4  ;;  %2952 = vmatprep.subr.bf16.mxu1 %v4340_v5  ;;  %v512_v4 = vld [vmem:[%s4636_s19 + $0xa98] sm:$0x33]  ;;  %v4269_v5 = vcombine.low %v257_v51, %v293_v52  ;;  %v4200_v10 = vcombine.high %v186_v61, %v222_v2  ;;  %v4199_v14 = vcombine.low %v186_v61, %v222_v2  ;;  %v406_v2 = vld [vmem:[%s4636_s19 + $0x748] sm:$0xff] }
  0x80   : > { %v4275_v51 = vcombine.low %v260_v36, %v296_v37 }
  0x82   : > { %2912 = vmatpush1.bf16.msra.mxu0 %v4337_v11  ;;  %2953 = vmatpush1.bf16.msra.mxu1 %v4339_v12  ;;  %v4492_v11 = vcombine.high %v476_v3, %v512_v4  ;;  %v4197_v12 = vcombine.low %v185_v58, %v221_v59  ;;  %v2375_v59 = vand.u32 %v4494_v53, %v4640_v6  ;;  %v371_v53 = vld [vmem:[%s4636_s19 + $0x630] sm:$0xff] }
  0x83   : > { %2913 = vmatprep.subr.bf16.mxu0 %v4266_v13  ;;  %2954 = vmatprep.subr.bf16.mxu1 %v4268_v16  ;;  %v4489_v13 = vcombine.low %v475_v62, %v511_v1  ;;  %v4491_v16 = vcombine.low %v476_v3, %v512_v4  ;;  %v405_v62 = vld [vmem:[%s4636_s19 + $0x740] sm:$0xff]  ;;  %v442_v3 = vld [vmem:[%s4636_s19 + $0x868] sm:$0xff] }
  0x84   : > { %v2369_v17 = vand.u32 %v4492_v11, %v4640_v6  ;;  %v441_v1 = vld [vmem:[%s4636_s19 + $0x860] sm:$0xff]  ;;  %v334_v11 = vld [vmem:[%s4636_s19 + $0x508] sm:$0xff] }
  0x85   : > { %v2360_v22 = vand.u32 %v4489_v13, %v4640_v6  ;;  %v4421_v13 = vcombine.low %v405_v62, %v441_v1 }
  0x86   : > { %2914 = vmatpush1.bf16.msra.mxu0 %v4265_v23  ;;  %2955 = vmatpush1.bf16.msra.mxu1 %v4267_v24  ;;  %v2366_v23 = vand.u32 %v4491_v16, %v4640_v6  ;;  %v4418_v24 = vcombine.high %v403_v18, %v439_v19  ;;  %v297_v18 = vld [vmem:[%s4636_s19 + $0x3e0] sm:$0xff]  ;;  %v262_v19 = vld [vmem:[%s4636_s19 + $0x2c8] sm:$0xff] }
  0x87   : > { %2915 = vmatprep.subr.bf16.mxu0 %v4194_v25  ;;  %2956 = vmatprep.subr.bf16.mxu1 %v4196_v27  ;;  %v4420_v25 = vcombine.high %v404_v20, %v440_v21  ;;  %v367_v27 = vld [vmem:[%s4636_s19 + $0x610] sm:$0xff] }
  0x88   : > { %v4345_v38 = vcombine.low %v331_v26, %v367_v27 }
  0x8a   : > { %2916 = vmatpush1.bf16.msra.mxu0 %v4193_v29  ;;  %2957 = vmatpush1.bf16.msra.mxu1 %v4195_v31  ;;  %v368_v29 = vld [vmem:[%s4636_s19 + $0x618] sm:$0xff]  ;;  %v4419_v31 = vcombine.low %v404_v20, %v440_v21 }
  0x8b   : > { %2989 = vmatprep.subr.bf16.mxu0 %v2351_v32  ;;  %3030 = vmatprep.subr.bf16.mxu1 %v2357_v34  ;;  %v4346_v32 = vcombine.high %v331_v26, %v367_v27  ;;  %v4348_v33 = vcombine.high %v332_v28, %v368_v29  ;;  %v259_v34 = vld [vmem:[%s4636_s19 + $0x2b0] sm:$0xff]  ;;  %v190_v26 = vld [vmem:[%s4636_s19 + $0x88] sm:$0xff] }
  0x8c   : > { %v479_v27 = vld [vmem:[%s4636_s19 + $0x990] sm:$0xff] }
  0x8d   : > { %4543 = vmatmul.mubr.msk.bf16.vlgmr.msra.gmra.mxu0 %vm2267_vm2, %v4677_v63  ;;  %4544 = vmatmul.mubr.msk.bf16.vlgmr.msra.gmra.mxu1 %vm2267_vm2, %v4677_v63 }
  0x8e   : > { %2990 = vmatpush1.bf16.msra.mxu0 %v2348_v39  ;;  %3031 = vmatpush1.bf16.msra.mxu1 %v2354_v40  ;;  %v4347_v39 = vcombine.low %v332_v28, %v368_v29  ;;  %v4274_v40 = vcombine.high %v259_v34, %v295_v35  ;;  %v515_v28 = vld [vmem:[%s4636_s19 + $0xab0] sm:$0x33]  ;;  %v226_v29 = vld [vmem:[%s4636_s19 + $0x1a8] sm:$0xff] }
  0x8f   : > { %2991 = vmatprep.subr.bf16.mxu0 %v4414_v41  ;;  %3032 = vmatprep.subr.bf16.mxu1 %v4416_v42  ;;  %v187_v41 = vld [vmem:[%s4636_s19 + $0x70] sm:$0xff]  ;;  %v4208_v36 = vcombine.high %v190_v26, %v226_v29 }
  0x90   : > { %3015 = vmatprep.mubr.bf16.mxu0 %v4594_v0  ;;  %3056 = vmatprep.mubr.bf16.mxu1 %v4594_v0  ;;  %v223_v42 = vld [vmem:[%s4636_s19 + $0x190] sm:$0xff] }
  0x91   : > { %v4202_v52 = vcombine.high %v187_v41, %v223_v42 }
  0x92   : > { %2992 = vmatpush1.bf16.msra.mxu0 %v4413_v47  ;;  %3033 = vmatpush1.bf16.msra.mxu1 %v4415_v48  ;;  %v224_v47 = vld [vmem:[%s4636_s19 + $0x198] sm:$0xff]  ;;  %v478_v48 = vld [vmem:[%s4636_s19 + $0x988] sm:$0xff] }
  0x93   : > { %2993 = vmatprep.subr.bf16.mxu0 %v4342_v49  ;;  %3034 = vmatprep.subr.bf16.mxu1 %v4344_v50  ;;  %v514_v49 = vld [vmem:[%s4636_s19 + $0xaa8] sm:$0x33]  ;;  %v4273_v50 = vcombine.low %v259_v34, %v295_v35  ;;  %v4204_v54 = vcombine.high %v188_v44, %v224_v47  ;;  %v4203_v58 = vcombine.low %v188_v44, %v224_v47  ;;  %v407_v44 = vld [vmem:[%s4636_s19 + $0x750] sm:$0xff]  ;;  %v444_v47 = vld [vmem:[%s4636_s19 + $0x878] sm:$0xff] }
  0x94   : > { %v4498_v35 = vcombine.high %v479_v27, %v515_v28 }
  0x96   : > { %2994 = vmatpush1.bf16.msra.mxu0 %v4341_v55  ;;  %3035 = vmatpush1.bf16.msra.mxu1 %v4343_v56  ;;  %v4496_v55 = vcombine.high %v478_v48, %v514_v49  ;;  %v4201_v56 = vcombine.low %v187_v41, %v223_v42  ;;  %v2387_v41 = vand.u32 %v4498_v35, %v4640_v6  ;;  %v337_v35 = vld [vmem:[%s4636_s19 + $0x520] sm:$0xff] }
  0x97   : > { %2995 = vmatprep.subr.bf16.mxu0 %v4270_v57  ;;  %3036 = vmatprep.subr.bf16.mxu1 %v4272_v60  ;;  %v4493_v57 = vcombine.low %v477_v45, %v513_v46  ;;  %v4495_v60 = vcombine.low %v478_v48, %v514_v49  ;;  %v443_v45 = vld [vmem:[%s4636_s19 + $0x870] sm:$0xff]  ;;  %v408_v46 = vld [vmem:[%s4636_s19 + $0x758] sm:$0xff] }
  0x98   : > { %v2381_v61 = vand.u32 %v4496_v55, %v4640_v6  ;;  %v336_v55 = vld [vmem:[%s4636_s19 + $0x518] sm:$0xff] }
  0x99   : > { %v2372_v4 = vand.u32 %v4493_v57, %v4640_v6  ;;  %v4425_v57 = vcombine.low %v407_v44, %v443_v45 }
  0x9a   : > { %2996 = vmatpush1.bf16.msra.mxu0 %v4269_v5  ;;  %3037 = vmatpush1.bf16.msra.mxu1 %v4271_v7  ;;  %v2378_v5 = vand.u32 %v4495_v60, %v4640_v6  ;;  %v4422_v7 = vcombine.high %v405_v62, %v441_v1  ;;  %v299_v62 = vld [vmem:[%s4636_s19 + $0x3f0] sm:$0xff]  ;;  %v264_v1 = vld [vmem:[%s4636_s19 + $0x2d8] sm:$0xff] }
  0x9b   : > { %2997 = vmatprep.subr.bf16.mxu0 %v4198_v8  ;;  %3038 = vmatprep.subr.bf16.mxu1 %v4200_v10  ;;  %v4424_v8 = vcombine.high %v406_v2, %v442_v3  ;;  %v369_v10 = vld [vmem:[%s4636_s19 + $0x620] sm:$0xff] }
  0x9c   : > { %v4349_v20 = vcombine.low %v333_v9, %v369_v10 }
  0x9e   : > { %2998 = vmatpush1.bf16.msra.mxu0 %v4197_v12  ;;  %3039 = vmatpush1.bf16.msra.mxu1 %v4199_v14  ;;  %v370_v12 = vld [vmem:[%s4636_s19 + $0x628] sm:$0xff]  ;;  %v4423_v14 = vcombine.low %v406_v2, %v442_v3  ;;  %v300_v2 = vld [vmem:[%s4636_s19 + $0x3f8] sm:$0xff] }
  0x9f   : > { %3071 = vmatprep.subr.bf16.mxu0 %v2363_v15  ;;  %3112 = vmatprep.subr.bf16.mxu1 %v2369_v17  ;;  %v4350_v15 = vcombine.high %v333_v9, %v369_v10  ;;  %v4352_v16 = vcombine.high %v334_v11, %v370_v12  ;;  %v261_v17 = vld [vmem:[%s4636_s19 + $0x2c0] sm:$0xff]  ;;  %v4351_v21 = vcombine.low %v334_v11, %v370_v12  ;;  %v192_v10 = vld [vmem:[%s4636_s19 + $0x98] sm:$0xff] }
  0xa0   : > { %v4284_v9 = vcombine.high %v264_v1, %v300_v2  ;;  %v481_v11 = vld [vmem:[%s4636_s19 + $0x9a0] sm:$0xff] }
  0xa1   : > { %4545 = vmatmul.mubr.msk.bf16.vlgmr.msra.gmra.mxu0 %vm2267_vm2, %v4677_v63  ;;  %4546 = vmatmul.mubr.msk.bf16.vlgmr.msra.gmra.mxu1 %vm2267_vm2, %v4677_v63  ;;  %v517_v12 = vld [vmem:[%s4636_s19 + $0xac0] sm:$0x33] }
  0xa2   : > { %3072 = vmatpush1.bf16.msra.mxu0 %v2360_v22  ;;  %3113 = vmatpush1.bf16.msra.mxu1 %v2366_v23  ;;  %v4278_v22 = vcombine.high %v261_v17, %v297_v18  ;;  %v189_v23 = vld [vmem:[%s4636_s19 + $0x80] sm:$0xff] }
  0xa3   : > { %3073 = vmatprep.subr.bf16.mxu0 %v4418_v24  ;;  %3114 = vmatprep.subr.bf16.mxu1 %v4420_v25  ;;  %v225_v24 = vld [vmem:[%s4636_s19 + $0x1a0] sm:$0xff] }
  0xa4   : > { %3097 = vmatprep.mubr.bf16.mxu0 %v4594_v0  ;;  %3138 = vmatprep.mubr.bf16.mxu1 %v4594_v0  ;;  %v4206_v34 = vcombine.high %v189_v23, %v225_v24 }
  0xa6   : > { %3074 = vmatpush1.bf16.msra.mxu0 %v4417_v30  ;;  %3115 = vmatpush1.bf16.msra.mxu1 %v4419_v31  ;;  %v480_v30 = vld [vmem:[%s4636_s19 + $0x998] sm:$0xff] }
  0xa7   : > { %3075 = vmatprep.subr.bf16.mxu0 %v4346_v32  ;;  %3116 = vmatprep.subr.bf16.mxu1 %v4348_v33  ;;  %v516_v31 = vld [vmem:[%s4636_s19 + $0xab8] sm:$0x33]  ;;  %v4277_v32 = vcombine.low %v261_v17, %v297_v18  ;;  %v4283_v17 = vcombine.low %v264_v1, %v300_v2 }
  0xa8   : > { %v4500_v37 = vcombine.high %v480_v30, %v516_v31  ;;  %v4499_v42 = vcombine.low %v480_v30, %v516_v31  ;;  %v446_v30 = vld [vmem:[%s4636_s19 + $0x888] sm:$0xff] }
  0xaa   : > { %3076 = vmatpush1.bf16.msra.mxu0 %v4345_v38  ;;  %3117 = vmatpush1.bf16.msra.mxu1 %v4347_v39  ;;  %v4205_v38 = vcombine.low %v189_v23, %v225_v24  ;;  %v4497_v39 = vcombine.low %v479_v27, %v515_v28  ;;  %v2390_v49 = vand.u32 %v4499_v42, %v4640_v6  ;;  %v409_v27 = vld [vmem:[%s4636_s19 + $0x760] sm:$0xff] }
  0xab   : > { %3077 = vmatprep.subr.bf16.mxu0 %v4274_v40  ;;  %3118 = vmatprep.subr.bf16.mxu1 %v4276_v43  ;;  %v4207_v40 = vcombine.low %v190_v26, %v226_v29  ;;  %v2393_v43 = vand.u32 %v4500_v37, %v4640_v6  ;;  %v445_v28 = vld [vmem:[%s4636_s19 + $0x880] sm:$0xff]  ;;  %v410_v29 = vld [vmem:[%s4636_s19 + $0x768] sm:$0xff] }
  0xac   : > { %v2384_v48 = vand.u32 %v4497_v39, %v4640_v6  ;;  %v338_v37 = vld [vmem:[%s4636_s19 + $0x528] sm:$0xff]  ;;  %v4429_v39 = vcombine.low %v409_v27, %v445_v28 }
  0xae   : > { %3078 = vmatpush1.bf16.msra.mxu0 %v4273_v50  ;;  %3119 = vmatpush1.bf16.msra.mxu1 %v4275_v51  ;;  %v4426_v50 = vcombine.high %v407_v44, %v443_v45  ;;  %v4428_v51 = vcombine.high %v408_v46, %v444_v47  ;;  %v301_v44 = vld [vmem:[%s4636_s19 + $0x400] sm:$0xff]  ;;  %v266_v45 = vld [vmem:[%s4636_s19 + $0x2e8] sm:$0xff] }
  0xaf   : > { %3079 = vmatprep.subr.bf16.mxu0 %v4202_v52  ;;  %3120 = vmatprep.subr.bf16.mxu1 %v4204_v54  ;;  %v335_v52 = vld [vmem:[%s4636_s19 + $0x510] sm:$0xff]  ;;  %v4926_v54 = vld [vmem:[%s5348_s0] sm:$0x7] }
  0xb0   : > { %v4353_v3 = vcombine.low %v335_v52, %v371_v53 }
  0xb2   : > { %3080 = vmatpush1.bf16.msra.mxu0 %v4201_v56  ;;  %3121 = vmatpush1.bf16.msra.mxu1 %v4203_v58  ;;  %v372_v56 = vld [vmem:[%s4636_s19 + $0x638] sm:$0xff]  ;;  %v4427_v58 = vcombine.low %v408_v46, %v444_v47  ;;  %v302_v46 = vld [vmem:[%s4636_s19 + $0x408] sm:$0xff] }
  0xb3   : > { %3153 = vmatprep.subr.bf16.mxu0 %v2375_v59  ;;  %3194 = vmatprep.subr.bf16.mxu1 %v2381_v61  ;;  %v4354_v59 = vcombine.high %v335_v52, %v371_v53  ;;  %v4356_v60 = vcombine.high %v336_v55, %v372_v56  ;;  %v263_v61 = vld [vmem:[%s4636_s19 + $0x2d0] sm:$0xff]  ;;  %v4288_v52 = vcombine.high %v266_v45, %v302_v46  ;;  %v194_v53 = vld [vmem:[%s4636_s19 + $0xa8] sm:$0xff] }
  0xb5   : > { %4547 = vmatmul.mubr.msk.bf16.vlgmr.msra.gmra.mxu0 %vm2267_vm2, %v4677_v63  ;;  %4548 = vmatmul.mubr.msk.bf16.vlgmr.msra.gmra.mxu1 %vm2267_vm2, %v4677_v63  ;;  %v298_v63 = vld [vmem:[%s4636_s19 + $0x3e8] sm:$0xff] }
  0xb6   : > { %3154 = vmatpush1.bf16.msra.mxu0 %v2372_v4  ;;  %3195 = vmatpush1.bf16.msra.mxu1 %v2378_v5  ;;  %v4280_v25 = vcombine.high %v262_v19, %v298_v63  ;;  %v4279_v33 = vcombine.low %v262_v19, %v298_v63  ;;  %v4355_v4 = vcombine.low %v336_v55, %v372_v56  ;;  %v483_v55 = vld [vmem:[%s4636_s19 + $0x9b0] sm:$0xff] }
  0xb7   : > { %3155 = vmatprep.subr.bf16.mxu0 %v4422_v7  ;;  %3196 = vmatprep.subr.bf16.mxu1 %v4424_v8  ;;  %v4282_v5 = vcombine.high %v263_v61, %v299_v62  ;;  %v191_v7 = vld [vmem:[%s4636_s19 + $0x90] sm:$0xff]  ;;  %v4502_v19 = vcombine.high %v481_v11, %v517_v12 }
  0xb8   : > { %3179 = vmatprep.mubr.bf16.mxu0 %v4594_v0  ;;  %3220 = vmatprep.mubr.bf16.mxu1 %v4594_v0  ;;  %v227_v8 = vld [vmem:[%s4636_s19 + $0x1b0] sm:$0xff] }
  0xb9   : > { %v4210_v18 = vcombine.high %v191_v7, %v227_v8  ;;  %v2399_v24 = vand.u32 %v4502_v19, %v4640_v6  ;;  %v519_v56 = vld [vmem:[%s4636_s19 + $0xad0] sm:$0x33] }
  0xba   : > { %3156 = vmatpush1.bf16.msra.mxu0 %v4421_v13  ;;  %3197 = vmatpush1.bf16.msra.mxu1 %v4423_v14  ;;  %v228_v13 = vld [vmem:[%s4636_s19 + $0x1b8] sm:$0xff]  ;;  %v482_v14 = vld [vmem:[%s4636_s19 + $0x9a8] sm:$0xff]  ;;  %v4506_v2 = vcombine.high %v483_v55, %v519_v56 }
  0xbb   : > { %3157 = vmatprep.subr.bf16.mxu0 %v4350_v15  ;;  %3198 = vmatprep.subr.bf16.mxu1 %v4352_v16  ;;  %v518_v15 = vld [vmem:[%s4636_s19 + $0xac8] sm:$0x33]  ;;  %v4281_v16 = vcombine.low %v263_v61, %v299_v62  ;;  %v4212_v63 = vcombine.high %v192_v10, %v228_v13  ;;  %v4211_v23 = vcombine.low %v192_v10, %v228_v13  ;;  %v4978_v62 = vpop.permute.xlu0 %536 }
  0xbc   : > { %v4287_v61 = vcombine.low %v266_v45, %v302_v46  ;;  %v268_v45 = vld [vmem:[%s4636_s19 + $0x2f8] sm:$0xff] }
  0xbd   : > { %v304_v46 = vld [vmem:[%s4636_s19 + $0x418] sm:$0xff] }
  0xbe   : > { %3158 = vmatpush1.bf16.msra.mxu0 %v4349_v20  ;;  %3199 = vmatpush1.bf16.msra.mxu1 %v4351_v21  ;;  %v4504_v20 = vcombine.high %v482_v14, %v518_v15  ;;  %v4209_v21 = vcombine.low %v191_v7, %v227_v8 }
  0xbf   : > { %3159 = vmatprep.subr.bf16.mxu0 %v4278_v22  ;;  %3200 = vmatprep.subr.bf16.mxu1 %v4280_v25  ;;  %v4501_v22 = vcombine.low %v481_v11, %v517_v12  ;;  %v4503_v25 = vcombine.low %v482_v14, %v518_v15  ;;  %v4505_v11 = vcombine.low %v483_v55, %v519_v56  ;;  %v485_v55 = vld [vmem:[%s4636_s19 + $0x9c0] sm:$0xff] }
  0xc0   : > { %v2405_v26 = vand.u32 %v4504_v20, %v4640_v6  ;;  %v2411_v14 = vand.u32 %v4506_v2, %v4640_v6  ;;  %v447_v20 = vld [vmem:[%s4636_s19 + $0x890] sm:$0xff]  ;;  %v521_v56 = vld [vmem:[%s4636_s19 + $0xae0] sm:$0x33] }
  0xc1   : > { %v2396_v31 = vand.u32 %v4501_v22, %v4640_v6  ;;  %v4510_v2 = vcombine.high %v485_v55, %v521_v56 }
  0xc2   : > { %3160 = vmatpush1.bf16.msra.mxu0 %v4277_v32  ;;  %3201 = vmatpush1.bf16.msra.mxu1 %v4279_v33  ;;  %v2402_v32 = vand.u32 %v4503_v25, %v4640_v6  ;;  %v4430_v33 = vcombine.high %v409_v27, %v445_v28  ;;  %v448_v25 = vld [vmem:[%s4636_s19 + $0x898] sm:$0xff]  ;;  %v2408_v28 = vand.u32 %v4505_v11, %v4640_v6 }
  0xc3   : > { %3161 = vmatprep.subr.bf16.mxu0 %v4206_v34  ;;  %3202 = vmatprep.subr.bf16.mxu1 %v4208_v36  ;;  %v4432_v34 = vcombine.high %v410_v29, %v446_v30  ;;  %v373_v36 = vld [vmem:[%s4636_s19 + $0x640] sm:$0xff]  ;;  %v4509_v11 = vcombine.low %v485_v55, %v521_v56  ;;  %v487_v55 = vld [vmem:[%s4636_s19 + $0x9d0] sm:$0xff] }
  0xc4   : > { %v4357_v47 = vcombine.low %v337_v35, %v373_v36  ;;  %v523_v56 = vld [vmem:[%s4636_s19 + $0xaf0] sm:$0x33] }
  0xc6   : > { %3162 = vmatpush1.bf16.msra.mxu0 %v4205_v38  ;;  %3203 = vmatpush1.bf16.msra.mxu1 %v4207_v40  ;;  %v374_v38 = vld [vmem:[%s4636_s19 + $0x648] sm:$0xff]  ;;  %v4431_v40 = vcombine.low %v410_v29, %v446_v30 }
  0xc7   : > { %3235 = vmatprep.subr.bf16.mxu0 %v2387_v41  ;;  %3276 = vmatprep.subr.bf16.mxu1 %v2393_v43  ;;  %v4358_v41 = vcombine.high %v337_v35, %v373_v36  ;;  %v4360_v42 = vcombine.high %v338_v37, %v374_v38  ;;  %v265_v43 = vld [vmem:[%s4636_s19 + $0x2e0] sm:$0xff]  ;;  %v339_v35 = vld [vmem:[%s4636_s19 + $0x530] sm:$0xff] }
  0xc8   : > { %v375_v36 = vld [vmem:[%s4636_s19 + $0x650] sm:$0xff] }
  0xc9   : > { %4549 = vmatmul.mubr.msk.bf16.vlgmr.msra.gmra.mxu0 %vm2267_vm2, %v4926_v54  ;;  %4550 = vmatmul.mubr.msk.bf16.vlgmr.msra.gmra.mxu1 %vm2267_vm2, %v4926_v54 }
  0xca   : > { %3236 = vmatpush1.bf16.msra.mxu0 %v2384_v48  ;;  %3277 = vmatpush1.bf16.msra.mxu1 %v2390_v49  ;;  %v4359_v48 = vcombine.low %v338_v37, %v374_v38  ;;  %v4286_v49 = vcombine.high %v265_v43, %v301_v44  ;;  %v340_v37 = vld [vmem:[%s4636_s19 + $0x538] sm:$0xff] }
  0xcb   : > { %3237 = vmatprep.subr.bf16.mxu0 %v4426_v50  ;;  %3278 = vmatprep.subr.bf16.mxu1 %v4428_v51  ;;  %v193_v50 = vld [vmem:[%s4636_s19 + $0xa0] sm:$0xff]  ;;  %v376_v38 = vld [vmem:[%s4636_s19 + $0x658] sm:$0xff] }
  0xcc   : > { %3261 = vmatprep.mubr.bf16.mxu0 %v4594_v0  ;;  %3302 = vmatprep.mubr.bf16.mxu1 %v4594_v0  ;;  %v229_v51 = vld [vmem:[%s4636_s19 + $0x1c0] sm:$0xff] }
  0xcd   : > { %v4214_v1 = vcombine.high %v193_v50, %v229_v51 }
  0xce   : > { %3238 = vmatpush1.bf16.msra.mxu0 %v4425_v57  ;;  %3279 = vmatpush1.bf16.msra.mxu1 %v4427_v58  ;;  %v230_v57 = vld [vmem:[%s4636_s19 + $0x1c8] sm:$0xff]  ;;  %v484_v58 = vld [vmem:[%s4636_s19 + $0x9b8] sm:$0xff] }
  0xcf   : > { %3239 = vmatprep.subr.bf16.mxu0 %v4354_v59  ;;  %3280 = vmatprep.subr.bf16.mxu1 %v4356_v60  ;;  %v520_v59 = vld [vmem:[%s4636_s19 + $0xad8] sm:$0x33]  ;;  %v4285_v60 = vcombine.low %v265_v43, %v301_v44  ;;  %v4215_v10 = vcombine.low %v194_v53, %v230_v57  ;;  %v267_v43 = vld [vmem:[%s4636_s19 + $0x2f0] sm:$0xff] }
  0xd0   : > { %v4507_v15 = vcombine.low %v484_v58, %v520_v59  ;;  %v303_v44 = vld [vmem:[%s4636_s19 + $0x410] sm:$0xff] }
  0xd2   : > { %3240 = vmatpush1.bf16.msra.mxu0 %v4353_v3  ;;  %3281 = vmatpush1.bf16.msra.mxu1 %v4355_v4  ;;  %v4216_v3 = vcombine.high %v194_v53, %v230_v57  ;;  %v4508_v4 = vcombine.high %v484_v58, %v520_v59  ;;  %v196_v53 = vld [vmem:[%s4636_s19 + $0xb8] sm:$0xff]  ;;  %v486_v58 = vld [vmem:[%s4636_s19 + $0x9c8] sm:$0xff] }
  0xd3   : > { %3241 = vmatprep.subr.bf16.mxu0 %v4282_v5  ;;  %3282 = vmatprep.subr.bf16.mxu1 %v4284_v9  ;;  %v4213_v9 = vcombine.low %v193_v50, %v229_v51  ;;  %v195_v50 = vld [vmem:[%s4636_s19 + $0xb0] sm:$0xff]  ;;  %v232_v57 = vld [vmem:[%s4636_s19 + $0x1d8] sm:$0xff]  ;;  %v522_v59 = vld [vmem:[%s4636_s19 + $0xae8] sm:$0x33] }
  0xd4   : > { %v2417_v19 = vand.u32 %v4508_v4, %v4640_v6  ;;  %v231_v51 = vld [vmem:[%s4636_s19 + $0x1d0] sm:$0xff]  ;;  %v4512_v4 = vcombine.high %v486_v58, %v522_v59 }
  0xd6   : > { %3242 = vmatpush1.bf16.msra.mxu0 %v4281_v16  ;;  %3283 = vmatpush1.bf16.msra.mxu1 %v4283_v17 }
  0xd7   : > { %3243 = vmatprep.subr.bf16.mxu0 %v4210_v18  ;;  %3284 = vmatprep.subr.bf16.mxu1 %v4212_v63  ;;  %v411_v63 = vld [vmem:[%s4636_s19 + $0x770] sm:$0xff] }
  0xda   : > { %3244 = vmatpush1.bf16.msra.mxu0 %v4209_v21  ;;  %3285 = vmatpush1.bf16.msra.mxu1 %v4211_v23 }
  0xdb   : > { %3317 = vmatprep.subr.bf16.mxu0 %v2399_v24  ;;  %3358 = vmatprep.subr.bf16.mxu1 %v2405_v26  ;;  %v412_v24 = vld [vmem:[%s4636_s19 + $0x778] sm:$0xff] }
  0xdd   : > { %4551 = vmatmul.mubr.msk.bf16.vlgmr.msra.gmra.mxu0 %vm2267_vm2, %v4926_v54  ;;  %4552 = vmatmul.mubr.msk.bf16.vlgmr.msra.gmra.mxu1 %vm2267_vm2, %v4926_v54 }
  0xde   : > { %3318 = vmatpush1.bf16.msra.mxu0 %v2396_v31  ;;  %3359 = vmatpush1.bf16.msra.mxu1 %v2402_v32  ;;  %v2414_v31 = vand.u32 %v4507_v15, %v4640_v6  ;;  %v4434_v32 = vcombine.high %v411_v63, %v447_v20  ;;  %v4511_v15 = vcombine.low %v486_v58, %v522_v59  ;;  %v488_v58 = vld [vmem:[%s4636_s19 + $0x9d8] sm:$0xff] }
  0xdf   : > { %3319 = vmatprep.subr.bf16.mxu0 %v4430_v33  ;;  %3360 = vmatprep.subr.bf16.mxu1 %v4432_v34  ;;  %v4436_v34 = vcombine.high %v412_v24, %v448_v25  ;;  %v524_v59 = vld [vmem:[%s4636_s19 + $0xaf8] sm:$0x33] }
  0xe0   : > { %3343 = vmatprep.mubr.bf16.mxu0 %v4594_v0  ;;  %3384 = vmatprep.mubr.bf16.mxu1 %v4594_v0 }
  0xe2   : > { %3320 = vmatpush1.bf16.msra.mxu0 %v4429_v39  ;;  %3361 = vmatpush1.bf16.msra.mxu1 %v4431_v40  ;;  %v4433_v39 = vcombine.low %v411_v63, %v447_v20  ;;  %v4435_v40 = vcombine.low %v412_v24, %v448_v25  ;;  %v413_v63 = vld [vmem:[%s4636_s19 + $0x780] sm:$0xff]  ;;  %v414_v24 = vld [vmem:[%s4636_s19 + $0x788] sm:$0xff] }
  0xe3   : > { %3321 = vmatprep.subr.bf16.mxu0 %v4358_v41  ;;  %3362 = vmatprep.subr.bf16.mxu1 %v4360_v42  ;;  %v4362_v41 = vcombine.high %v339_v35, %v375_v36  ;;  %v4364_v42 = vcombine.high %v340_v37, %v376_v38  ;;  %v449_v20 = vld [vmem:[%s4636_s19 + $0x8a0] sm:$0xff]  ;;  %v450_v25 = vld [vmem:[%s4636_s19 + $0x8a8] sm:$0xff] }
  0xe6   : > { %3322 = vmatpush1.bf16.msra.mxu0 %v4357_v47  ;;  %3363 = vmatpush1.bf16.msra.mxu1 %v4359_v48  ;;  %v4361_v47 = vcombine.low %v339_v35, %v375_v36  ;;  %v4363_v48 = vcombine.low %v340_v37, %v376_v38  ;;  %v341_v35 = vld [vmem:[%s4636_s19 + $0x540] sm:$0xff]  ;;  %v342_v37 = vld [vmem:[%s4636_s19 + $0x548] sm:$0xff] }
  0xe7   : > { %3323 = vmatprep.subr.bf16.mxu0 %v4286_v49  ;;  %3364 = vmatprep.subr.bf16.mxu1 %v4288_v52  ;;  %v4290_v49 = vcombine.high %v267_v43, %v303_v44  ;;  %v4292_v52 = vcombine.high %v268_v45, %v304_v46  ;;  %v377_v36 = vld [vmem:[%s4636_s19 + $0x660] sm:$0xff]  ;;  %v378_v38 = vld [vmem:[%s4636_s19 + $0x668] sm:$0xff] }
  0xe9   : > { %v2525_v5 = vpop.f32.mrf.mxu0  ;;  %v2566_v7 = vpop.f32.mrf.mxu1 }
  0xea   : > { %v2526_v8 = vadd.f32 %v2525_v5, %v4978_v62  ;;  %3324 = vmatpush1.bf16.msra.mxu0 %v4285_v60  ;;  %v2567_v12 = vadd.f32 %v2566_v7, %v4978_v62  ;;  %3365 = vmatpush1.bf16.msra.mxu1 %v4287_v61  ;;  %v4289_v60 = vcombine.low %v267_v43, %v303_v44  ;;  %v269_v43 = vld [vmem:[%s4636_s19 + $0x300] sm:$0xff] }
  0xeb   : > { %v2527_v13 = vpop.f32.mrf.mxu0  ;;  %3325 = vmatprep.subr.bf16.mxu0 %v4214_v1  ;;  %v2568_v18 = vpop.f32.mrf.mxu1  ;;  %3366 = vmatprep.subr.bf16.mxu1 %v4216_v3  ;;  %v4291_v61 = vcombine.low %v268_v45, %v304_v46  ;;  %v4218_v1 = vcombine.high %v195_v50, %v231_v51  ;;  %v4220_v3 = vcombine.high %v196_v53, %v232_v57  ;;  %v305_v44 = vld [vmem:[%s4636_s19 + $0x420] sm:$0xff]  ;;  %v270_v45 = vld [vmem:[%s4636_s19 + $0x308] sm:$0xff] }
  0xec   : > { %v3967_v16 = vmax.f32 %v2526_v8, 0.0  ;;  %v2528_v17 = vadd.f32 %v2527_v13, %v4978_v62  ;;  %v3969_v21 = vmax.f32 %v2567_v12, 0.0  ;;  %v2569_v22 = vadd.f32 %v2568_v18, %v4978_v62  ;;  %v306_v46 = vld [vmem:[%s4636_s19 + $0x428] sm:$0xff] }
  0xed   : > { %v2529_v23 = vpop.f32.mrf.mxu0  ;;  %v2570_v27 = vpop.f32.mrf.mxu1 }
  0xee   : > { %4039 = vst [vmem:[%s4985_s27] sm:$0x3f] %v3967_v16  ;;  %v3968_v26 = vmax.f32 %v2528_v17, 0.0  ;;  %3326 = vmatpush1.bf16.msra.mxu0 %v4213_v9  ;;  %4041 = vst [vmem:[%s4985_s27 + $0x10] sm:$0x3f] %v3969_v21  ;;  %v3970_v29 = vmax.f32 %v2569_v22, 0.0  ;;  %3367 = vmatpush1.bf16.msra.mxu1 %v4215_v10  ;;  %v4217_v9 = vcombine.low %v195_v50, %v231_v51  ;;  %v197_v50 = vld [vmem:[%s4636_s19 + $0xc0] sm:$0xff] }
  0xef   : > { %v2530_v30 = vpop.f32.mrf.mxu0  ;;  %3399 = vmatprep.subr.bf16.mxu0 %v2411_v14  ;;  %v2571_v33 = vpop.f32.mrf.mxu1  ;;  %3440 = vmatprep.subr.bf16.mxu1 %v2417_v19  ;;  %v4219_v10 = vcombine.low %v196_v53, %v232_v57  ;;  %v2423_v14 = vand.u32 %v4510_v2, %v4640_v6  ;;  %v2429_v19 = vand.u32 %v4512_v4, %v4640_v6  ;;  %v233_v51 = vld [vmem:[%s4636_s19 + $0x1e0] sm:$0xff]  ;;  %v198_v53 = vld [vmem:[%s4636_s19 + $0xc8] sm:$0xff] }
  0xf0   : > { %4040 = vst [vmem:[%s4985_s27 + $0x8] sm:$0x3f] %v3968_v26  ;;  %4042 = vst [vmem:[%s4985_s27 + $0x18] sm:$0x3f] %v3970_v29  ;;  %v234_v57 = vld [vmem:[%s4636_s19 + $0x1e8] sm:$0xff]  ;;  %v4514_v2 = vcombine.high %v487_v55, %v523_v56  ;;  %v4516_v4 = vcombine.high %v488_v58, %v524_v59 }
  0xf1   : > { %4553 = vmatmul.mubr.msk.bf16.vlgmr.msra.gmra.mxu0 %vm2267_vm2, %v4926_v54  ;;  %4554 = vmatmul.mubr.msk.bf16.vlgmr.msra.gmra.mxu1 %vm2267_vm2, %v4926_v54 }
  0xf2   : > { %3400 = vmatpush1.bf16.msra.mxu0 %v2408_v28  ;;  %3441 = vmatpush1.bf16.msra.mxu1 %v2414_v31  ;;  %v2420_v28 = vand.u32 %v4509_v11, %v4640_v6  ;;  %v2426_v31 = vand.u32 %v4511_v15, %v4640_v6  ;;  %v4513_v11 = vcombine.low %v487_v55, %v523_v56  ;;  %v489_v55 = vld [vmem:[%s4636_s19 + $0x9e0] sm:$0xff] }
  0xf3   : > { %3401 = vmatprep.subr.bf16.mxu0 %v4434_v32  ;;  %3442 = vmatprep.subr.bf16.mxu1 %v4436_v34  ;;  %v4438_v32 = vcombine.high %v413_v63, %v449_v20  ;;  %v4440_v34 = vcombine.high %v414_v24, %v450_v25  ;;  %v4515_v15 = vcombine.low %v488_v58, %v524_v59  ;;  %v525_v56 = vld [vmem:[%s4636_s19 + $0xb00] sm:$0x33]  ;;  %v490_v58 = vld [vmem:[%s4636_s19 + $0x9e8] sm:$0xff] }
  0xf4   : > { %3425 = vmatprep.mubr.bf16.mxu0 %v4594_v0  ;;  %3466 = vmatprep.mubr.bf16.mxu1 %v4594_v0  ;;  %v526_v59 = vld [vmem:[%s4636_s19 + $0xb08] sm:$0x33] }
  0xf6   : > { %3402 = vmatpush1.bf16.msra.mxu0 %v4433_v39  ;;  %3443 = vmatpush1.bf16.msra.mxu1 %v4435_v40  ;;  %v4437_v39 = vcombine.low %v413_v63, %v449_v20  ;;  %v4439_v40 = vcombine.low %v414_v24, %v450_v25  ;;  %v415_v63 = vld [vmem:[%s4636_s19 + $0x790] sm:$0xff]  ;;  %v416_v24 = vld [vmem:[%s4636_s19 + $0x798] sm:$0xff] }
  0xf7   : > { %3403 = vmatprep.subr.bf16.mxu0 %v4362_v41  ;;  %3444 = vmatprep.subr.bf16.mxu1 %v4364_v42  ;;  %v4366_v41 = vcombine.high %v341_v35, %v377_v36  ;;  %v4368_v42 = vcombine.high %v342_v37, %v378_v38  ;;  %v451_v20 = vld [vmem:[%s4636_s19 + $0x8b0] sm:$0xff]  ;;  %v452_v25 = vld [vmem:[%s4636_s19 + $0x8b8] sm:$0xff] }
  0xfa   : > { %3404 = vmatpush1.bf16.msra.mxu0 %v4361_v47  ;;  %3445 = vmatpush1.bf16.msra.mxu1 %v4363_v48  ;;  %v4365_v47 = vcombine.low %v341_v35, %v377_v36  ;;  %v4367_v48 = vcombine.low %v342_v37, %v378_v38  ;;  %v343_v35 = vld [vmem:[%s4636_s19 + $0x550] sm:$0xff]  ;;  %v344_v37 = vld [vmem:[%s4636_s19 + $0x558] sm:$0xff] }
  0xfb   : > { %3405 = vmatprep.subr.bf16.mxu0 %v4290_v49  ;;  %3446 = vmatprep.subr.bf16.mxu1 %v4292_v52  ;;  %v4294_v49 = vcombine.high %v269_v43, %v305_v44  ;;  %v4296_v52 = vcombine.high %v270_v45, %v306_v46  ;;  %v379_v36 = vld [vmem:[%s4636_s19 + $0x670] sm:$0xff]  ;;  %v380_v38 = vld [vmem:[%s4636_s19 + $0x678] sm:$0xff] }
  0xfd   : > { %v2607_v5 = vpop.f32.mrf.mxu0  ;;  %v2648_v8 = vpop.f32.mrf.mxu1 }
  0xfe   : > { %v2608_v7 = vadd.f32 %v2607_v5, %v4978_v62  ;;  %3406 = vmatpush1.bf16.msra.mxu0 %v4289_v60  ;;  %v2649_v12 = vadd.f32 %v2648_v8, %v4978_v62  ;;  %3447 = vmatpush1.bf16.msra.mxu1 %v4291_v61  ;;  %v4293_v60 = vcombine.low %v269_v43, %v305_v44  ;;  %v271_v43 = vld [vmem:[%s4636_s19 + $0x310] sm:$0xff] }
  0xff   : > { %v2609_v13 = vpop.f32.mrf.mxu0  ;;  %3407 = vmatprep.subr.bf16.mxu0 %v4218_v1  ;;  %v2650_v18 = vpop.f32.mrf.mxu1  ;;  %3448 = vmatprep.subr.bf16.mxu1 %v4220_v3  ;;  %v4295_v61 = vcombine.low %v270_v45, %v306_v46  ;;  %v4222_v1 = vcombine.high %v197_v50, %v233_v51  ;;  %v4224_v3 = vcombine.high %v198_v53, %v234_v57  ;;  %v307_v44 = vld [vmem:[%s4636_s19 + $0x430] sm:$0xff]  ;;  %v272_v45 = vld [vmem:[%s4636_s19 + $0x318] sm:$0xff] }
 0x100   : > { %v3971_v16 = vmax.f32 %v2608_v7, 0.0  ;;  %v2610_v17 = vadd.f32 %v2609_v13, %v4978_v62  ;;  %v3973_v21 = vmax.f32 %v2649_v12, 0.0  ;;  %v2651_v22 = vadd.f32 %v2650_v18, %v4978_v62  ;;  %v308_v46 = vld [vmem:[%s4636_s19 + $0x438] sm:$0xff] }
 0x101   : > { %v2611_v23 = vpop.f32.mrf.mxu0  ;;  %v2652_v27 = vpop.f32.mrf.mxu1 }
 0x102   : > { %4043 = vst [vmem:[%s4985_s27 + $0x20] sm:$0x3f] %v3971_v16  ;;  %v3972_v26 = vmax.f32 %v2610_v17, 0.0  ;;  %3408 = vmatpush1.bf16.msra.mxu0 %v4217_v9  ;;  %4045 = vst [vmem:[%s4985_s27 + $0x30] sm:$0x3f] %v3973_v21  ;;  %v3974_v29 = vmax.f32 %v2651_v22, 0.0  ;;  %3449 = vmatpush1.bf16.msra.mxu1 %v4219_v10  ;;  %v4221_v9 = vcombine.low %v197_v50, %v233_v51 }
 0x103   : > { %v2612_v30 = vpop.f32.mrf.mxu0  ;;  %3481 = vmatprep.subr.bf16.mxu0 %v2423_v14  ;;  %v2653_v33 = vpop.f32.mrf.mxu1  ;;  %3522 = vmatprep.subr.bf16.mxu1 %v2429_v19  ;;  %v4223_v10 = vcombine.low %v198_v53, %v234_v57  ;;  %v2435_v14 = vand.u32 %v4514_v2, %v4640_v6  ;;  %v2441_v19 = vand.u32 %v4516_v4, %v4640_v6  ;;  %v199_v50 = vld [vmem:[%s4636_s19 + $0xd0] sm:$0xff]  ;;  %v200_v53 = vld [vmem:[%s4636_s19 + $0xd8] sm:$0xff] }
 0x104   : > { %4044 = vst [vmem:[%s4985_s27 + $0x28] sm:$0x3f] %v3972_v26  ;;  %4046 = vst [vmem:[%s4985_s27 + $0x38] sm:$0x3f] %v3974_v29  ;;  %v235_v51 = vld [vmem:[%s4636_s19 + $0x1f0] sm:$0xff]  ;;  %v236_v57 = vld [vmem:[%s4636_s19 + $0x1f8] sm:$0xff]  ;;  %v4518_v2 = vcombine.high %v489_v55, %v525_v56  ;;  %v4520_v4 = vcombine.high %v490_v58, %v526_v59 }
 0x105   : > { %4555 = vmatmul.mubr.msk.bf16.vlgmr.msra.gmra.mxu0 %vm2267_vm2, %v4926_v54  ;;  %4556 = vmatmul.mubr.msk.bf16.vlgmr.msra.gmra.mxu1 %vm2267_vm2, %v4926_v54 }
 0x106   : > { %3482 = vmatpush1.bf16.msra.mxu0 %v2420_v28  ;;  %3523 = vmatpush1.bf16.msra.mxu1 %v2426_v31  ;;  %v2432_v28 = vand.u32 %v4513_v11, %v4640_v6  ;;  %v2438_v31 = vand.u32 %v4515_v15, %v4640_v6  ;;  %v4517_v11 = vcombine.low %v489_v55, %v525_v56  ;;  %v491_v55 = vld [vmem:[%s4636_s19 + $0x9f0] sm:$0xff] }
 0x107   : > { %3483 = vmatprep.subr.bf16.mxu0 %v4438_v32  ;;  %3524 = vmatprep.subr.bf16.mxu1 %v4440_v34  ;;  %v4442_v32 = vcombine.high %v415_v63, %v451_v20  ;;  %v4444_v34 = vcombine.high %v416_v24, %v452_v25  ;;  %v4519_v15 = vcombine.low %v490_v58, %v526_v59  ;;  %v527_v56 = vld [vmem:[%s4636_s19 + $0xb10] sm:$0x33]  ;;  %v492_v58 = vld [vmem:[%s4636_s19 + $0x9f8] sm:$0xff] }
 0x108   : > { %3507 = vmatprep.mubr.bf16.mxu0 %v4594_v0  ;;  %3548 = vmatprep.mubr.bf16.mxu1 %v4594_v0  ;;  %v528_v59 = vld [vmem:[%s4636_s19 + $0xb18] sm:$0x33] }
 0x10a   : > { %3484 = vmatpush1.bf16.msra.mxu0 %v4437_v39  ;;  %3525 = vmatpush1.bf16.msra.mxu1 %v4439_v40  ;;  %v4441_v39 = vcombine.low %v415_v63, %v451_v20  ;;  %v4443_v40 = vcombine.low %v416_v24, %v452_v25  ;;  %v417_v63 = vld [vmem:[%s4636_s19 + $0x7a0] sm:$0xff]  ;;  %v418_v24 = vld [vmem:[%s4636_s19 + $0x7a8] sm:$0xff] }
 0x10b   : > { %3485 = vmatprep.subr.bf16.mxu0 %v4366_v41  ;;  %3526 = vmatprep.subr.bf16.mxu1 %v4368_v42  ;;  %v4370_v41 = vcombine.high %v343_v35, %v379_v36  ;;  %v4372_v42 = vcombine.high %v344_v37, %v380_v38  ;;  %v453_v20 = vld [vmem:[%s4636_s19 + $0x8c0] sm:$0xff]  ;;  %v454_v25 = vld [vmem:[%s4636_s19 + $0x8c8] sm:$0xff] }
 0x10e   : > { %3486 = vmatpush1.bf16.msra.mxu0 %v4365_v47  ;;  %3527 = vmatpush1.bf16.msra.mxu1 %v4367_v48  ;;  %v4369_v47 = vcombine.low %v343_v35, %v379_v36  ;;  %v4371_v48 = vcombine.low %v344_v37, %v380_v38  ;;  %v345_v35 = vld [vmem:[%s4636_s19 + $0x560] sm:$0xff]  ;;  %v346_v37 = vld [vmem:[%s4636_s19 + $0x568] sm:$0xff] }
 0x10f   : > { %3487 = vmatprep.subr.bf16.mxu0 %v4294_v49  ;;  %3528 = vmatprep.subr.bf16.mxu1 %v4296_v52  ;;  %v4298_v49 = vcombine.high %v271_v43, %v307_v44  ;;  %v4300_v52 = vcombine.high %v272_v45, %v308_v46  ;;  %v381_v36 = vld [vmem:[%s4636_s19 + $0x680] sm:$0xff]  ;;  %v382_v38 = vld [vmem:[%s4636_s19 + $0x688] sm:$0xff] }
 0x111   : > { %v2689_v5 = vpop.f32.mrf.mxu0  ;;  %v2730_v8 = vpop.f32.mrf.mxu1 }
 0x112   : > { %v2690_v7 = vadd.f32 %v2689_v5, %v4978_v62  ;;  %3488 = vmatpush1.bf16.msra.mxu0 %v4293_v60  ;;  %v2731_v12 = vadd.f32 %v2730_v8, %v4978_v62  ;;  %3529 = vmatpush1.bf16.msra.mxu1 %v4295_v61  ;;  %v4297_v60 = vcombine.low %v271_v43, %v307_v44  ;;  %v273_v43 = vld [vmem:[%s4636_s19 + $0x320] sm:$0xff] }
 0x113   : > { %v2691_v13 = vpop.f32.mrf.mxu0  ;;  %3489 = vmatprep.subr.bf16.mxu0 %v4222_v1  ;;  %v2732_v18 = vpop.f32.mrf.mxu1  ;;  %3530 = vmatprep.subr.bf16.mxu1 %v4224_v3  ;;  %v4299_v61 = vcombine.low %v272_v45, %v308_v46  ;;  %v4226_v1 = vcombine.high %v199_v50, %v235_v51  ;;  %v4228_v3 = vcombine.high %v200_v53, %v236_v57  ;;  %v309_v44 = vld [vmem:[%s4636_s19 + $0x440] sm:$0xff]  ;;  %v274_v45 = vld [vmem:[%s4636_s19 + $0x328] sm:$0xff] }
 0x114   : > { %v3975_v16 = vmax.f32 %v2690_v7, 0.0  ;;  %v2692_v17 = vadd.f32 %v2691_v13, %v4978_v62  ;;  %v3977_v21 = vmax.f32 %v2731_v12, 0.0  ;;  %v2733_v22 = vadd.f32 %v2732_v18, %v4978_v62  ;;  %v310_v46 = vld [vmem:[%s4636_s19 + $0x448] sm:$0xff] }
 0x115   : > { %v2693_v23 = vpop.f32.mrf.mxu0  ;;  %v2734_v27 = vpop.f32.mrf.mxu1 }
 0x116   : > { %4047 = vst [vmem:[%s4985_s27 + $0x40] sm:$0x3f] %v3975_v16  ;;  %v3976_v26 = vmax.f32 %v2692_v17, 0.0  ;;  %3490 = vmatpush1.bf16.msra.mxu0 %v4221_v9  ;;  %4049 = vst [vmem:[%s4985_s27 + $0x50] sm:$0x3f] %v3977_v21  ;;  %v3978_v29 = vmax.f32 %v2733_v22, 0.0  ;;  %3531 = vmatpush1.bf16.msra.mxu1 %v4223_v10  ;;  %v4225_v9 = vcombine.low %v199_v50, %v235_v51 }
 0x117   : > { %v2694_v30 = vpop.f32.mrf.mxu0  ;;  %3563 = vmatprep.subr.bf16.mxu0 %v2435_v14  ;;  %v2735_v33 = vpop.f32.mrf.mxu1  ;;  %3604 = vmatprep.subr.bf16.mxu1 %v2441_v19  ;;  %v4227_v10 = vcombine.low %v200_v53, %v236_v57  ;;  %v2447_v14 = vand.u32 %v4518_v2, %v4640_v6  ;;  %v2453_v19 = vand.u32 %v4520_v4, %v4640_v6  ;;  %v201_v50 = vld [vmem:[%s4636_s19 + $0xe0] sm:$0xff]  ;;  %v202_v53 = vld [vmem:[%s4636_s19 + $0xe8] sm:$0xff] }
 0x118   : > { %4048 = vst [vmem:[%s4985_s27 + $0x48] sm:$0x3f] %v3976_v26  ;;  %4050 = vst [vmem:[%s4985_s27 + $0x58] sm:$0x3f] %v3978_v29  ;;  %v237_v51 = vld [vmem:[%s4636_s19 + $0x200] sm:$0xff]  ;;  %v238_v57 = vld [vmem:[%s4636_s19 + $0x208] sm:$0xff]  ;;  %v4522_v2 = vcombine.high %v491_v55, %v527_v56  ;;  %v4524_v4 = vcombine.high %v492_v58, %v528_v59 }
 0x119   : > { %4557 = vmatmul.mubr.msk.bf16.vlgmr.msra.gmra.mxu0 %vm2267_vm2, %v4926_v54  ;;  %4558 = vmatmul.mubr.msk.bf16.vlgmr.msra.gmra.mxu1 %vm2267_vm2, %v4926_v54 }
 0x11a   : > { %3564 = vmatpush1.bf16.msra.mxu0 %v2432_v28  ;;  %3605 = vmatpush1.bf16.msra.mxu1 %v2438_v31  ;;  %v2444_v28 = vand.u32 %v4517_v11, %v4640_v6  ;;  %v2450_v31 = vand.u32 %v4519_v15, %v4640_v6  ;;  %v4521_v11 = vcombine.low %v491_v55, %v527_v56  ;;  %v493_v55 = vld [vmem:[%s4636_s19 + $0xa00] sm:$0xff] }
 0x11b   : > { %3565 = vmatprep.subr.bf16.mxu0 %v4442_v32  ;;  %3606 = vmatprep.subr.bf16.mxu1 %v4444_v34  ;;  %v4446_v32 = vcombine.high %v417_v63, %v453_v20  ;;  %v4448_v34 = vcombine.high %v418_v24, %v454_v25  ;;  %v4523_v15 = vcombine.low %v492_v58, %v528_v59  ;;  %v529_v56 = vld [vmem:[%s4636_s19 + $0xb20] sm:$0x33]  ;;  %v494_v58 = vld [vmem:[%s4636_s19 + $0xa08] sm:$0xff] }
 0x11c   : > { %3589 = vmatprep.mubr.bf16.mxu0 %v4594_v0  ;;  %3630 = vmatprep.mubr.bf16.mxu1 %v4594_v0  ;;  %v530_v59 = vld [vmem:[%s4636_s19 + $0xb28] sm:$0x33] }
 0x11e   : > { %3566 = vmatpush1.bf16.msra.mxu0 %v4441_v39  ;;  %3607 = vmatpush1.bf16.msra.mxu1 %v4443_v40  ;;  %v4445_v39 = vcombine.low %v417_v63, %v453_v20  ;;  %v4447_v40 = vcombine.low %v418_v24, %v454_v25  ;;  %v419_v63 = vld [vmem:[%s4636_s19 + $0x7b0] sm:$0xff]  ;;  %v420_v24 = vld [vmem:[%s4636_s19 + $0x7b8] sm:$0xff] }
 0x11f   : > { %3567 = vmatprep.subr.bf16.mxu0 %v4370_v41  ;;  %3608 = vmatprep.subr.bf16.mxu1 %v4372_v42  ;;  %v4374_v41 = vcombine.high %v345_v35, %v381_v36  ;;  %v4376_v42 = vcombine.high %v346_v37, %v382_v38  ;;  %v455_v20 = vld [vmem:[%s4636_s19 + $0x8d0] sm:$0xff]  ;;  %v456_v25 = vld [vmem:[%s4636_s19 + $0x8d8] sm:$0xff] }
 0x122   : > { %3568 = vmatpush1.bf16.msra.mxu0 %v4369_v47  ;;  %3609 = vmatpush1.bf16.msra.mxu1 %v4371_v48  ;;  %v4373_v47 = vcombine.low %v345_v35, %v381_v36  ;;  %v4375_v48 = vcombine.low %v346_v37, %v382_v38  ;;  %v347_v35 = vld [vmem:[%s4636_s19 + $0x570] sm:$0xff]  ;;  %v348_v37 = vld [vmem:[%s4636_s19 + $0x578] sm:$0xff] }
 0x123   : > { %3569 = vmatprep.subr.bf16.mxu0 %v4298_v49  ;;  %3610 = vmatprep.subr.bf16.mxu1 %v4300_v52  ;;  %v4302_v49 = vcombine.high %v273_v43, %v309_v44  ;;  %v4304_v52 = vcombine.high %v274_v45, %v310_v46  ;;  %v383_v36 = vld [vmem:[%s4636_s19 + $0x690] sm:$0xff]  ;;  %v384_v38 = vld [vmem:[%s4636_s19 + $0x698] sm:$0xff] }
 0x125   : > { %v2771_v5 = vpop.f32.mrf.mxu0  ;;  %v2812_v8 = vpop.f32.mrf.mxu1 }
 0x126   : > { %v2772_v7 = vadd.f32 %v2771_v5, %v4978_v62  ;;  %3570 = vmatpush1.bf16.msra.mxu0 %v4297_v60  ;;  %v2813_v12 = vadd.f32 %v2812_v8, %v4978_v62  ;;  %3611 = vmatpush1.bf16.msra.mxu1 %v4299_v61  ;;  %v4301_v60 = vcombine.low %v273_v43, %v309_v44  ;;  %v275_v43 = vld [vmem:[%s4636_s19 + $0x330] sm:$0xff] }
 0x127   : > { %v2773_v13 = vpop.f32.mrf.mxu0  ;;  %3571 = vmatprep.subr.bf16.mxu0 %v4226_v1  ;;  %v2814_v18 = vpop.f32.mrf.mxu1  ;;  %3612 = vmatprep.subr.bf16.mxu1 %v4228_v3  ;;  %v4303_v61 = vcombine.low %v274_v45, %v310_v46  ;;  %v4230_v1 = vcombine.high %v201_v50, %v237_v51  ;;  %v4232_v3 = vcombine.high %v202_v53, %v238_v57  ;;  %v311_v44 = vld [vmem:[%s4636_s19 + $0x450] sm:$0xff]  ;;  %v276_v45 = vld [vmem:[%s4636_s19 + $0x338] sm:$0xff] }
 0x128   : > { %v3979_v16 = vmax.f32 %v2772_v7, 0.0  ;;  %v2774_v17 = vadd.f32 %v2773_v13, %v4978_v62  ;;  %v3981_v21 = vmax.f32 %v2813_v12, 0.0  ;;  %v2815_v22 = vadd.f32 %v2814_v18, %v4978_v62  ;;  %v312_v46 = vld [vmem:[%s4636_s19 + $0x458] sm:$0xff] }
 0x129   : > { %v2775_v23 = vpop.f32.mrf.mxu0  ;;  %v2816_v27 = vpop.f32.mrf.mxu1 }
 0x12a   : > { %4051 = vst [vmem:[%s4985_s27 + $0x60] sm:$0x3f] %v3979_v16  ;;  %v3980_v26 = vmax.f32 %v2774_v17, 0.0  ;;  %3572 = vmatpush1.bf16.msra.mxu0 %v4225_v9  ;;  %4053 = vst [vmem:[%s4985_s27 + $0x70] sm:$0x3f] %v3981_v21  ;;  %v3982_v29 = vmax.f32 %v2815_v22, 0.0  ;;  %3613 = vmatpush1.bf16.msra.mxu1 %v4227_v10  ;;  %v4229_v9 = vcombine.low %v201_v50, %v237_v51 }
 0x12b   : > { %v2776_v30 = vpop.f32.mrf.mxu0  ;;  %3645 = vmatprep.subr.bf16.mxu0 %v2447_v14  ;;  %v2817_v33 = vpop.f32.mrf.mxu1  ;;  %3686 = vmatprep.subr.bf16.mxu1 %v2453_v19  ;;  %v4231_v10 = vcombine.low %v202_v53, %v238_v57  ;;  %v2459_v14 = vand.u32 %v4522_v2, %v4640_v6  ;;  %v2465_v19 = vand.u32 %v4524_v4, %v4640_v6  ;;  %v203_v50 = vld [vmem:[%s4636_s19 + $0xf0] sm:$0xff]  ;;  %v204_v53 = vld [vmem:[%s4636_s19 + $0xf8] sm:$0xff] }
 0x12c   : > { %4052 = vst [vmem:[%s4985_s27 + $0x68] sm:$0x3f] %v3980_v26  ;;  %4054 = vst [vmem:[%s4985_s27 + $0x78] sm:$0x3f] %v3982_v29  ;;  %v239_v51 = vld [vmem:[%s4636_s19 + $0x210] sm:$0xff]  ;;  %v240_v57 = vld [vmem:[%s4636_s19 + $0x218] sm:$0xff]  ;;  %v4526_v2 = vcombine.high %v493_v55, %v529_v56  ;;  %v4528_v4 = vcombine.high %v494_v58, %v530_v59 }
 0x12d   : > { %4559 = vmatmul.mubr.msk.bf16.vlgmr.msra.gmra.mxu0 %vm2267_vm2, %v4926_v54  ;;  %4560 = vmatmul.mubr.msk.bf16.vlgmr.msra.gmra.mxu1 %vm2267_vm2, %v4926_v54 }
 0x12e   : > { %3646 = vmatpush1.bf16.msra.mxu0 %v2444_v28  ;;  %3687 = vmatpush1.bf16.msra.mxu1 %v2450_v31  ;;  %v2456_v28 = vand.u32 %v4521_v11, %v4640_v6  ;;  %v2462_v31 = vand.u32 %v4523_v15, %v4640_v6  ;;  %v4525_v11 = vcombine.low %v493_v55, %v529_v56  ;;  %v495_v55 = vld [vmem:[%s4636_s19 + $0xa10] sm:$0xff] }
 0x12f   : > { %3647 = vmatprep.subr.bf16.mxu0 %v4446_v32  ;;  %3688 = vmatprep.subr.bf16.mxu1 %v4448_v34  ;;  %v4450_v32 = vcombine.high %v419_v63, %v455_v20  ;;  %v4452_v34 = vcombine.high %v420_v24, %v456_v25  ;;  %v4527_v15 = vcombine.low %v494_v58, %v530_v59  ;;  %v531_v56 = vld [vmem:[%s4636_s19 + $0xb30] sm:$0x33]  ;;  %v496_v58 = vld [vmem:[%s4636_s19 + $0xa18] sm:$0xff] }
 0x130   : > { %3671 = vmatprep.mubr.bf16.mxu0 %v4594_v0  ;;  %3712 = vmatprep.mubr.bf16.mxu1 %v4594_v0  ;;  %v532_v59 = vld [vmem:[%s4636_s19 + $0xb38] sm:$0x33] }
 0x132   : > { %3648 = vmatpush1.bf16.msra.mxu0 %v4445_v39  ;;  %3689 = vmatpush1.bf16.msra.mxu1 %v4447_v40  ;;  %v5163_v39 = vld [vmem:[%s5348_s0] sm:$0x7]  ;;  %v4449_v40 = vcombine.low %v419_v63, %v455_v20 }
 0x133   : > { %3649 = vmatprep.subr.bf16.mxu0 %v4374_v41  ;;  %3690 = vmatprep.subr.bf16.mxu1 %v4376_v42  ;;  %v4451_v41 = vcombine.low %v420_v24, %v456_v25  ;;  %v4378_v42 = vcombine.high %v347_v35, %v383_v36  ;;  %v421_v63 = vld [vmem:[%s4636_s19 + $0x7c0] sm:$0xff]  ;;  %v422_v24 = vld [vmem:[%s4636_s19 + $0x7c8] sm:$0xff] }
 0x134   : > { %v457_v20 = vld [vmem:[%s4636_s19 + $0x8e0] sm:$0xff]  ;;  %v458_v25 = vld [vmem:[%s4636_s19 + $0x8e8] sm:$0xff] }
 0x136   : > { %3650 = vmatpush1.bf16.msra.mxu0 %v4373_v47  ;;  %3691 = vmatpush1.bf16.msra.mxu1 %v4375_v48  ;;  %v4377_v47 = vcombine.low %v347_v35, %v383_v36  ;;  %v4379_v48 = vcombine.low %v348_v37, %v384_v38  ;;  %v349_v35 = vld [vmem:[%s4636_s19 + $0x580] sm:$0xff] }
 0x137   : > { %3651 = vmatprep.subr.bf16.mxu0 %v4302_v49  ;;  %3692 = vmatprep.subr.bf16.mxu1 %v4304_v52  ;;  %v4306_v49 = vcombine.high %v275_v43, %v311_v44  ;;  %v4308_v52 = vcombine.high %v276_v45, %v312_v46  ;;  %v385_v36 = vld [vmem:[%s4636_s19 + $0x6a0] sm:$0xff] }
 0x139   : > { %v2853_v5 = vpop.f32.mrf.mxu0  ;;  %v2894_v8 = vpop.f32.mrf.mxu1 }
 0x13a   : > { %v2854_v7 = vadd.f32 %v2853_v5, %v4978_v62  ;;  %3652 = vmatpush1.bf16.msra.mxu0 %v4301_v60  ;;  %v2895_v12 = vadd.f32 %v2894_v8, %v4978_v62  ;;  %3693 = vmatpush1.bf16.msra.mxu1 %v4303_v61  ;;  %v4305_v60 = vcombine.low %v275_v43, %v311_v44  ;;  %v277_v43 = vld [vmem:[%s4636_s19 + $0x340] sm:$0xff] }
 0x13b   : > { %v2855_v13 = vpop.f32.mrf.mxu0  ;;  %3653 = vmatprep.subr.bf16.mxu0 %v4230_v1  ;;  %v2896_v18 = vpop.f32.mrf.mxu1  ;;  %3694 = vmatprep.subr.bf16.mxu1 %v4232_v3  ;;  %v4307_v61 = vcombine.low %v276_v45, %v312_v46  ;;  %v4234_v1 = vcombine.high %v203_v50, %v239_v51  ;;  %v4236_v3 = vcombine.high %v204_v53, %v240_v57  ;;  %v313_v44 = vld [vmem:[%s4636_s19 + $0x460] sm:$0xff]  ;;  %v278_v45 = vld [vmem:[%s4636_s19 + $0x348] sm:$0xff] }
 0x13c   : > { %v3983_v16 = vmax.f32 %v2854_v7, 0.0  ;;  %v2856_v17 = vadd.f32 %v2855_v13, %v4978_v62  ;;  %v3985_v21 = vmax.f32 %v2895_v12, 0.0  ;;  %v2897_v22 = vadd.f32 %v2896_v18, %v4978_v62  ;;  %v314_v46 = vld [vmem:[%s4636_s19 + $0x468] sm:$0xff] }
 0x13d   : > { %v2857_v23 = vpop.f32.mrf.mxu0  ;;  %v2898_v27 = vpop.f32.mrf.mxu1 }
 0x13e   : > { %4055 = vst [vmem:[%s4985_s27 + $0x80] sm:$0x3f] %v3983_v16  ;;  %v3984_v26 = vmax.f32 %v2856_v17, 0.0  ;;  %3654 = vmatpush1.bf16.msra.mxu0 %v4229_v9  ;;  %4057 = vst [vmem:[%s4985_s27 + $0x90] sm:$0x3f] %v3985_v21  ;;  %v3986_v29 = vmax.f32 %v2897_v22, 0.0  ;;  %3695 = vmatpush1.bf16.msra.mxu1 %v4231_v10  ;;  %v4233_v9 = vcombine.low %v203_v50, %v239_v51 }
 0x13f   : > { %v2858_v30 = vpop.f32.mrf.mxu0  ;;  %3727 = vmatprep.subr.bf16.mxu0 %v2459_v14  ;;  %v2899_v33 = vpop.f32.mrf.mxu1  ;;  %3768 = vmatprep.subr.bf16.mxu1 %v2465_v19  ;;  %v4235_v10 = vcombine.low %v204_v53, %v240_v57  ;;  %v2471_v14 = vand.u32 %v4526_v2, %v4640_v6  ;;  %v2477_v19 = vand.u32 %v4528_v4, %v4640_v6  ;;  %v205_v50 = vld [vmem:[%s4636_s19 + $0x100] sm:$0xff]  ;;  %v206_v53 = vld [vmem:[%s4636_s19 + $0x108] sm:$0xff] }
 0x140   : > { %4056 = vst [vmem:[%s4985_s27 + $0x88] sm:$0x3f] %v3984_v26  ;;  %4058 = vst [vmem:[%s4985_s27 + $0x98] sm:$0x3f] %v3986_v29  ;;  %v241_v51 = vld [vmem:[%s4636_s19 + $0x220] sm:$0xff]  ;;  %v242_v57 = vld [vmem:[%s4636_s19 + $0x228] sm:$0xff]  ;;  %v4530_v2 = vcombine.high %v495_v55, %v531_v56  ;;  %v4532_v4 = vcombine.high %v496_v58, %v532_v59 }
 0x141   : > { %4561 = vmatmul.mubr.msk.bf16.vlgmr.msra.gmra.mxu0 %vm2267_vm2, %v4926_v54  ;;  %4562 = vmatmul.mubr.msk.bf16.vlgmr.msra.gmra.mxu1 %vm2267_vm2, %v5163_v39  ;;  %v4380_v54 = vcombine.high %v348_v37, %v384_v38  ;;  %v350_v37 = vld [vmem:[%s4636_s19 + $0x588] sm:$0xff] }
 0x142   : > { %3728 = vmatpush1.bf16.msra.mxu0 %v2456_v28  ;;  %3769 = vmatpush1.bf16.msra.mxu1 %v2462_v31  ;;  %v2468_v28 = vand.u32 %v4525_v11, %v4640_v6  ;;  %v2474_v31 = vand.u32 %v4527_v15, %v4640_v6  ;;  %v386_v38 = vld [vmem:[%s4636_s19 + $0x6a8] sm:$0xff]  ;;  %v4529_v11 = vcombine.low %v495_v55, %v531_v56 }
 0x143   : > { %3729 = vmatprep.subr.bf16.mxu0 %v4450_v32  ;;  %3770 = vmatprep.subr.bf16.mxu1 %v4452_v34  ;;  %v4454_v32 = vcombine.high %v421_v63, %v457_v20  ;;  %v4456_v34 = vcombine.high %v422_v24, %v458_v25  ;;  %v4531_v15 = vcombine.low %v496_v58, %v532_v59 }
 0x144   : > { %3753 = vmatprep.mubr.bf16.mxu0 %v4594_v0  ;;  %3794 = vmatprep.mubr.bf16.mxu1 %v4594_v0 }
 0x146   : > { %3730 = vmatpush1.bf16.msra.mxu0 %v4449_v40  ;;  %3771 = vmatpush1.bf16.msra.mxu1 %v4451_v41  ;;  %v4453_v40 = vcombine.low %v421_v63, %v457_v20  ;;  %v4455_v41 = vcombine.low %v422_v24, %v458_v25  ;;  %v423_v63 = vld [vmem:[%s4636_s19 + $0x7d0] sm:$0xff]  ;;  %v424_v24 = vld [vmem:[%s4636_s19 + $0x7d8] sm:$0xff] }
 0x147   : > { %3731 = vmatprep.subr.bf16.mxu0 %v4378_v42  ;;  %3772 = vmatprep.subr.bf16.mxu1 %v4380_v54  ;;  %v4382_v42 = vcombine.high %v349_v35, %v385_v36  ;;  %v4384_v54 = vcombine.high %v350_v37, %v386_v38  ;;  %v459_v20 = vld [vmem:[%s4636_s19 + $0x8f0] sm:$0xff]  ;;  %v460_v25 = vld [vmem:[%s4636_s19 + $0x8f8] sm:$0xff] }
 0x14a   : > { %3732 = vmatpush1.bf16.msra.mxu0 %v4377_v47  ;;  %3773 = vmatpush1.bf16.msra.mxu1 %v4379_v48  ;;  %v4381_v47 = vcombine.low %v349_v35, %v385_v36  ;;  %v4383_v48 = vcombine.low %v350_v37, %v386_v38  ;;  %v351_v35 = vld [vmem:[%s4636_s19 + $0x590] sm:$0xff]  ;;  %v352_v37 = vld [vmem:[%s4636_s19 + $0x598] sm:$0xff] }
 0x14b   : > { %3733 = vmatprep.subr.bf16.mxu0 %v4306_v49  ;;  %3774 = vmatprep.subr.bf16.mxu1 %v4308_v52  ;;  %v4310_v49 = vcombine.high %v277_v43, %v313_v44  ;;  %v4312_v52 = vcombine.high %v278_v45, %v314_v46  ;;  %v387_v36 = vld [vmem:[%s4636_s19 + $0x6b0] sm:$0xff]  ;;  %v388_v38 = vld [vmem:[%s4636_s19 + $0x6b8] sm:$0xff] }
 0x14d   : > { %v2935_v5 = vpop.f32.mrf.mxu0  ;;  %v2976_v8 = vpop.f32.mrf.mxu1 }
 0x14e   : > { %v2936_v7 = vadd.f32 %v2935_v5, %v4978_v62  ;;  %3734 = vmatpush1.bf16.msra.mxu0 %v4305_v60  ;;  %v2977_v12 = vadd.f32 %v2976_v8, %v4978_v62  ;;  %3775 = vmatpush1.bf16.msra.mxu1 %v4307_v61  ;;  %v4309_v60 = vcombine.low %v277_v43, %v313_v44  ;;  %v315_v43 = vld [vmem:[%s4636_s19 + $0x470] sm:$0xff]  ;;  %v280_v44 = vld [vmem:[%s4636_s19 + $0x358] sm:$0xff] }
 0x14f   : > { %v2937_v13 = vpop.f32.mrf.mxu0  ;;  %3735 = vmatprep.subr.bf16.mxu0 %v4234_v1  ;;  %v2978_v18 = vpop.f32.mrf.mxu1  ;;  %3776 = vmatprep.subr.bf16.mxu1 %v4236_v3  ;;  %v4311_v61 = vcombine.low %v278_v45, %v314_v46  ;;  %v4238_v1 = vcombine.high %v205_v50, %v241_v51  ;;  %v4240_v3 = vcombine.high %v206_v53, %v242_v57  ;;  %v316_v45 = vld [vmem:[%s4636_s19 + $0x478] sm:$0xff] }
 0x150   : > { %v3987_v16 = vmax.f32 %v2936_v7, 0.0  ;;  %v2938_v17 = vadd.f32 %v2937_v13, %v4978_v62  ;;  %v3989_v21 = vmax.f32 %v2977_v12, 0.0  ;;  %v2979_v22 = vadd.f32 %v2978_v18, %v4978_v62 }
 0x151   : > { %v2939_v23 = vpop.f32.mrf.mxu0  ;;  %v2980_v27 = vpop.f32.mrf.mxu1  ;;  %v4385_v46 = vcombine.low %v351_v35, %v387_v36  ;;  %v4315_v56 = vcombine.low %v280_v44, %v316_v45 }
 0x152   : > { %4059 = vst [vmem:[%s4985_s27 + $0xa0] sm:$0x3f] %v3987_v16  ;;  %v3988_v26 = vmax.f32 %v2938_v17, 0.0  ;;  %3736 = vmatpush1.bf16.msra.mxu0 %v4233_v9  ;;  %4061 = vst [vmem:[%s4985_s27 + $0xb0] sm:$0x3f] %v3989_v21  ;;  %v3990_v29 = vmax.f32 %v2979_v22, 0.0  ;;  %3777 = vmatpush1.bf16.msra.mxu1 %v4235_v10  ;;  %v4237_v9 = vcombine.low %v205_v50, %v241_v51 }
 0x153   : > { %v2940_v30 = vpop.f32.mrf.mxu0  ;;  %3809 = vmatprep.subr.bf16.mxu0 %v2471_v14  ;;  %v2981_v33 = vpop.f32.mrf.mxu1  ;;  %3850 = vmatprep.subr.bf16.mxu1 %v2477_v19  ;;  %v4239_v10 = vcombine.low %v206_v53, %v242_v57  ;;  %v2483_v14 = vand.u32 %v4530_v2, %v4640_v6  ;;  %v2489_v19 = vand.u32 %v4532_v4, %v4640_v6  ;;  %v207_v50 = vld [vmem:[%s4636_s19 + $0x110] sm:$0xff]  ;;  %v244_v53 = vld [vmem:[%s4636_s19 + $0x238] sm:$0xff] }
 0x154   : > { %4060 = vst [vmem:[%s4985_s27 + $0xa8] sm:$0x3f] %v3988_v26  ;;  %4062 = vst [vmem:[%s4985_s27 + $0xb8] sm:$0x3f] %v3990_v29  ;;  %v243_v51 = vld [vmem:[%s4636_s19 + $0x230] sm:$0xff] }
 0x155   : > { %4563 = vmatmul.mubr.msk.bf16.vlgmr.msra.gmra.mxu0 %vm2267_vm2, %v5163_v39  ;;  %4564 = vmatmul.mubr.msk.bf16.vlgmr.msra.gmra.mxu1 %vm2267_vm2, %v5163_v39  ;;  %v4242_v57 = vcombine.high %v207_v50, %v243_v51 }
 0x156   : > { %3810 = vmatpush1.bf16.msra.mxu0 %v2468_v28  ;;  %3851 = vmatpush1.bf16.msra.mxu1 %v2474_v31  ;;  %v2480_v28 = vand.u32 %v4529_v11, %v4640_v6  ;;  %v2486_v31 = vand.u32 %v4531_v15, %v4640_v6  ;;  %v4457_v6 = vcombine.low %v423_v63, %v459_v20 }
 0x157   : > { %3811 = vmatprep.subr.bf16.mxu0 %v4454_v32  ;;  %3852 = vmatprep.subr.bf16.mxu1 %v4456_v34  ;;  %v4458_v32 = vcombine.high %v423_v63, %v459_v20  ;;  %v4460_v34 = vcombine.high %v424_v24, %v460_v25 }
 0x158   : > { %3835 = vmatprep.mubr.bf16.mxu0 %v4594_v0  ;;  %3876 = vmatprep.mubr.bf16.mxu1 %v4594_v0 }
 0x15a   : > { %3812 = vmatpush1.bf16.msra.mxu0 %v4453_v40  ;;  %3853 = vmatpush1.bf16.msra.mxu1 %v4455_v41  ;;  %v4459_v40 = vcombine.low %v424_v24, %v460_v25  ;;  %v4386_v41 = vcombine.high %v351_v35, %v387_v36 }
 0x15b   : > { %3813 = vmatprep.subr.bf16.mxu0 %v4382_v42  ;;  %3854 = vmatprep.subr.bf16.mxu1 %v4384_v54  ;;  %v4388_v42 = vcombine.high %v352_v37, %v388_v38  ;;  %v279_v54 = vld [vmem:[%s4636_s19 + $0x350] sm:$0xff] }
 0x15c   : > { %v4313_v55 = vcombine.low %v279_v54, %v315_v43 }
 0x15e   : > { %3814 = vmatpush1.bf16.msra.mxu0 %v4381_v47  ;;  %3855 = vmatpush1.bf16.msra.mxu1 %v4383_v48  ;;  %v4387_v47 = vcombine.low %v352_v37, %v388_v38  ;;  %v4314_v48 = vcombine.high %v279_v54, %v315_v43 }
 0x15f   : > { %3815 = vmatprep.subr.bf16.mxu0 %v4310_v49  ;;  %3856 = vmatprep.subr.bf16.mxu1 %v4312_v52  ;;  %v4316_v49 = vcombine.high %v280_v44, %v316_v45  ;;  %v208_v52 = vld [vmem:[%s4636_s19 + $0x118] sm:$0xff] }
 0x161   : > { %v3017_v5 = vpop.f32.mrf.mxu0  ;;  %v3058_v8 = vpop.f32.mrf.mxu1 }
 0x162   : > { %v3018_v7 = vadd.f32 %v3017_v5, %v4978_v62  ;;  %3816 = vmatpush1.bf16.msra.mxu0 %v4309_v60  ;;  %v3059_v12 = vadd.f32 %v3058_v8, %v4978_v62  ;;  %3857 = vmatpush1.bf16.msra.mxu1 %v4311_v61  ;;  %v4241_v61 = vcombine.low %v207_v50, %v243_v51 }
 0x163   : > { %v3019_v13 = vpop.f32.mrf.mxu0  ;;  %3817 = vmatprep.subr.bf16.mxu0 %v4238_v1  ;;  %v3060_v18 = vpop.f32.mrf.mxu1  ;;  %3858 = vmatprep.subr.bf16.mxu1 %v4240_v3  ;;  %v4243_v3 = vcombine.low %v208_v52, %v244_v53 }
 0x164   : > { %v3991_v16 = vmax.f32 %v3018_v7, 0.0  ;;  %v3020_v17 = vadd.f32 %v3019_v13, %v4978_v62  ;;  %v3993_v21 = vmax.f32 %v3059_v12, 0.0  ;;  %v3061_v22 = vadd.f32 %v3060_v18, %v4978_v62 }
 0x165   : > { %v3021_v23 = vpop.f32.mrf.mxu0  ;;  %v3062_v27 = vpop.f32.mrf.mxu1 }
 0x166   : > { %4063 = vst [vmem:[%s4985_s27 + $0xc0] sm:$0x3f] %v3991_v16  ;;  %v3992_v26 = vmax.f32 %v3020_v17, 0.0  ;;  %3818 = vmatpush1.bf16.msra.mxu0 %v4237_v9  ;;  %4065 = vst [vmem:[%s4985_s27 + $0xd0] sm:$0x3f] %v3993_v21  ;;  %v3994_v29 = vmax.f32 %v3061_v22, 0.0  ;;  %3859 = vmatpush1.bf16.msra.mxu1 %v4239_v10 }
 0x167   : > { %v3022_v30 = vpop.f32.mrf.mxu0  ;;  %3891 = vmatprep.subr.bf16.mxu0 %v2483_v14  ;;  %v3063_v33 = vpop.f32.mrf.mxu1  ;;  %3932 = vmatprep.subr.bf16.mxu1 %v2489_v19 }
 0x168   : > { %4064 = vst [vmem:[%s4985_s27 + $0xc8] sm:$0x3f] %v3992_v26  ;;  %4066 = vst [vmem:[%s4985_s27 + $0xd8] sm:$0x3f] %v3994_v29 }
 0x169   : > { %4565 = vmatmul.mubr.msk.bf16.vlgmr.msra.gmra.mxu0 %vm2267_vm2, %v5163_v39  ;;  %4566 = vmatmul.mubr.msk.bf16.vlgmr.msra.gmra.mxu1 %vm2267_vm2, %v5163_v39 }
 0x16a   : > { %3892 = vmatpush1.bf16.msra.mxu0 %v2480_v28  ;;  %3933 = vmatpush1.bf16.msra.mxu1 %v2486_v31 }
 0x16b   : > { %3893 = vmatprep.subr.bf16.mxu0 %v4458_v32  ;;  %3934 = vmatprep.subr.bf16.mxu1 %v4460_v34 }
 0x16c   : > { %3917 = vmatprep.mubr.bf16.mxu0 %v4594_v0  ;;  %3958 = vmatprep.mubr.bf16.mxu1 %v4594_v0  ;;  %v4244_v0 = vcombine.high %v208_v52, %v244_v53 }
 0x16e   : > { %3894 = vmatpush1.bf16.msra.mxu0 %v4457_v6  ;;  %3935 = vmatpush1.bf16.msra.mxu1 %v4459_v40 }
 0x16f   : > { %3895 = vmatprep.subr.bf16.mxu0 %v4386_v41  ;;  %3936 = vmatprep.subr.bf16.mxu1 %v4388_v42 }
 0x172   : > { %3896 = vmatpush1.bf16.msra.mxu0 %v4385_v46  ;;  %3937 = vmatpush1.bf16.msra.mxu1 %v4387_v47 }
 0x173   : > { %3897 = vmatprep.subr.bf16.mxu0 %v4314_v48  ;;  %3938 = vmatprep.subr.bf16.mxu1 %v4316_v49 }
 0x175   : > { %v3099_v58 = vpop.f32.mrf.mxu0  ;;  %v3140_v60 = vpop.f32.mrf.mxu1 }
 0x176   : > { %v3100_v59 = vadd.f32 %v3099_v58, %v4978_v62  ;;  %3898 = vmatpush1.bf16.msra.mxu0 %v4313_v55  ;;  %v3141_v1 = vadd.f32 %v3140_v60, %v4978_v62  ;;  %3939 = vmatpush1.bf16.msra.mxu1 %v4315_v56 }
 0x177   : > { %v3101_v2 = vpop.f32.mrf.mxu0  ;;  %3899 = vmatprep.subr.bf16.mxu0 %v4242_v57  ;;  %v3142_v7 = vpop.f32.mrf.mxu1  ;;  %3940 = vmatprep.subr.bf16.mxu1 %v4244_v0 }
 0x178   : > { %v3995_v4 = vmax.f32 %v3100_v59, 0.0  ;;  %v3102_v5 = vadd.f32 %v3101_v2, %v4978_v62  ;;  %v3997_v8 = vmax.f32 %v3141_v1, 0.0  ;;  %v3143_v9 = vadd.f32 %v3142_v7, %v4978_v62 }
 0x179   : > { %v3103_v10 = vpop.f32.mrf.mxu0  ;;  %v3144_v12 = vpop.f32.mrf.mxu1 }
 0x17a   : > { %4067 = vst [vmem:[%s4985_s27 + $0xe0] sm:$0x3f] %v3995_v4  ;;  %v3996_v11 = vmax.f32 %v3102_v5, 0.0  ;;  %3900 = vmatpush1.bf16.msra.mxu0 %v4241_v61  ;;  %4069 = vst [vmem:[%s4985_s27 + $0xf0] sm:$0x3f] %v3997_v8  ;;  %v3998_v13 = vmax.f32 %v3143_v9, 0.0  ;;  %3941 = vmatpush1.bf16.msra.mxu1 %v4243_v3 }
 0x17b   : > { %v3104_v14 = vpop.f32.mrf.mxu0  ;;  %v3145_v15 = vpop.f32.mrf.mxu1 }
 0x17c   : > { %4068 = vst [vmem:[%s4985_s27 + $0xe8] sm:$0x3f] %v3996_v11  ;;  %4070 = vst [vmem:[%s4985_s27 + $0xf8] sm:$0x3f] %v3998_v13 }
 0x17d   : > { %4567 = vmatmul.mubr.msk.bf16.vlgmr.msra.gmra.mxu0 %vm2267_vm2, %v5163_v39  ;;  %4568 = vmatmul.mubr.msk.bf16.vlgmr.msra.gmra.mxu1 %vm2267_vm2, %v5163_v39 }
 0x189   : > { %v3181_v16 = vpop.f32.mrf.mxu0  ;;  %v3222_v18 = vpop.f32.mrf.mxu1 }
 0x18a   : > { %v3182_v17 = vadd.f32 %v3181_v16, %v4978_v62  ;;  %v3223_v19 = vadd.f32 %v3222_v18, %v4978_v62 }
 0x18b   : > { %v3183_v63 = vpop.f32.mrf.mxu0  ;;  %v3224_v22 = vpop.f32.mrf.mxu1 }
 0x18c   : > { %v3999_v20 = vmax.f32 %v3182_v17, 0.0  ;;  %v3184_v21 = vadd.f32 %v3183_v63, %v4978_v62  ;;  %v4001_v23 = vmax.f32 %v3223_v19, 0.0  ;;  %v3225_v24 = vadd.f32 %v3224_v22, %v4978_v62 }
 0x18d   : > { %v3185_v25 = vpop.f32.mrf.mxu0  ;;  %v3226_v39 = vpop.f32.mrf.mxu1 }
 0x18e   : > { %4071 = vst [vmem:[%s4985_s27 + $0x100] sm:$0x3f] %v3999_v20  ;;  %v4000_v26 = vmax.f32 %v3184_v21, 0.0  ;;  %4073 = vst [vmem:[%s4985_s27 + $0x110] sm:$0x3f] %v4001_v23  ;;  %v4002_v27 = vmax.f32 %v3225_v24, 0.0 }
 0x18f   : > { %v3186_v28 = vpop.f32.mrf.mxu0  ;;  %v3227_v29 = vpop.f32.mrf.mxu1 }
 0x190   : > { %4072 = vst [vmem:[%s4985_s27 + $0x108] sm:$0x3f] %v4000_v26  ;;  %4074 = vst [vmem:[%s4985_s27 + $0x118] sm:$0x3f] %v4002_v27 }
 0x19d   : > { %v3263_v30 = vpop.f32.mrf.mxu0  ;;  %v3304_v32 = vpop.f32.mrf.mxu1 }
 0x19e   : > { %v3264_v31 = vadd.f32 %v3263_v30, %v4978_v62  ;;  %v3305_v33 = vadd.f32 %v3304_v32, %v4978_v62 }
 0x19f   : > { %v3265_v34 = vpop.f32.mrf.mxu0  ;;  %v3306_v37 = vpop.f32.mrf.mxu1 }
 0x1a0   : > { %v4003_v35 = vmax.f32 %v3264_v31, 0.0  ;;  %v3266_v36 = vadd.f32 %v3265_v34, %v4978_v62  ;;  %v4005_v38 = vmax.f32 %v3305_v33, 0.0  ;;  %v3307_v6 = vadd.f32 %v3306_v37, %v4978_v62 }
 0x1a1   : > { %v3267_v40 = vpop.f32.mrf.mxu0  ;;  %v3308_v42 = vpop.f32.mrf.mxu1 }
 0x1a2   : > { %4075 = vst [vmem:[%s4985_s27 + $0x120] sm:$0x3f] %v4003_v35  ;;  %v4004_v41 = vmax.f32 %v3266_v36, 0.0  ;;  %4077 = vst [vmem:[%s4985_s27 + $0x130] sm:$0x3f] %v4005_v38  ;;  %v4006_v54 = vmax.f32 %v3307_v6, 0.0 }
 0x1a3   : > { %v3268_v43 = vpop.f32.mrf.mxu0  ;;  %v3309_v44 = vpop.f32.mrf.mxu1 }
 0x1a4   : > { %4076 = vst [vmem:[%s4985_s27 + $0x128] sm:$0x3f] %v4004_v41  ;;  %4078 = vst [vmem:[%s4985_s27 + $0x138] sm:$0x3f] %v4006_v54 }
 0x1b1   : > { %v3345_v45 = vpop.f32.mrf.mxu0  ;;  %v3386_v47 = vpop.f32.mrf.mxu1 }
 0x1b2   : > { %v3346_v46 = vadd.f32 %v3345_v45, %v4978_v62  ;;  %v3387_v48 = vadd.f32 %v3386_v47, %v4978_v62 }
 0x1b3   : > { %v3347_v49 = vpop.f32.mrf.mxu0  ;;  %v3388_v52 = vpop.f32.mrf.mxu1 }
 0x1b4   : > { %v4007_v50 = vmax.f32 %v3346_v46, 0.0  ;;  %v3348_v51 = vadd.f32 %v3347_v49, %v4978_v62  ;;  %v4009_v53 = vmax.f32 %v3387_v48, 0.0  ;;  %v3389_v55 = vadd.f32 %v3388_v52, %v4978_v62 }
 0x1b5   : > { %v3349_v56 = vpop.f32.mrf.mxu0  ;;  %v3390_v0 = vpop.f32.mrf.mxu1 }
 0x1b6   : > { %4079 = vst [vmem:[%s4985_s27 + $0x140] sm:$0x3f] %v4007_v50  ;;  %v4008_v57 = vmax.f32 %v3348_v51, 0.0  ;;  %4081 = vst [vmem:[%s4985_s27 + $0x150] sm:$0x3f] %v4009_v53  ;;  %v4010_v58 = vmax.f32 %v3389_v55, 0.0 }
 0x1b7   : > { %v3350_v59 = vpop.f32.mrf.mxu0  ;;  %v3391_v60 = vpop.f32.mrf.mxu1 }
 0x1b8   : > { %4080 = vst [vmem:[%s4985_s27 + $0x148] sm:$0x3f] %v4008_v57  ;;  %4082 = vst [vmem:[%s4985_s27 + $0x158] sm:$0x3f] %v4010_v58 }
 0x1c5   : > { %v3427_v61 = vpop.f32.mrf.mxu0  ;;  %v3468_v2 = vpop.f32.mrf.mxu1 }
 0x1c6   : > { %v3428_v1 = vadd.f32 %v3427_v61, %v4978_v62  ;;  %v3469_v3 = vadd.f32 %v3468_v2, %v4978_v62 }
 0x1c7   : > { %v3429_v4 = vpop.f32.mrf.mxu0  ;;  %v3470_v8 = vpop.f32.mrf.mxu1 }
 0x1c8   : > { %v4011_v5 = vmax.f32 %v3428_v1, 0.0  ;;  %v3430_v7 = vadd.f32 %v3429_v4, %v4978_v62  ;;  %v4013_v9 = vmax.f32 %v3469_v3, 0.0  ;;  %v3471_v10 = vadd.f32 %v3470_v8, %v4978_v62 }
 0x1c9   : > { %v3431_v11 = vpop.f32.mrf.mxu0  ;;  %v3472_v13 = vpop.f32.mrf.mxu1 }
 0x1ca   : > { %4083 = vst [vmem:[%s4985_s27 + $0x160] sm:$0x3f] %v4011_v5  ;;  %v4012_v12 = vmax.f32 %v3430_v7, 0.0  ;;  %4085 = vst [vmem:[%s4985_s27 + $0x170] sm:$0x3f] %v4013_v9  ;;  %v4014_v14 = vmax.f32 %v3471_v10, 0.0 }
 0x1cb   : > { %v3432_v15 = vpop.f32.mrf.mxu0  ;;  %v3473_v16 = vpop.f32.mrf.mxu1 }
 0x1cc   : > { %4084 = vst [vmem:[%s4985_s27 + $0x168] sm:$0x3f] %v4012_v12  ;;  %4086 = vst [vmem:[%s4985_s27 + $0x178] sm:$0x3f] %v4014_v14 }
 0x1d9   : > { %v3509_v17 = vpop.f32.mrf.mxu0  ;;  %v3550_v19 = vpop.f32.mrf.mxu1 }
 0x1da   : > { %v3510_v18 = vadd.f32 %v3509_v17, %v4978_v62  ;;  %v3551_v63 = vadd.f32 %v3550_v19, %v4978_v62 }
 0x1db   : > { %v3511_v20 = vpop.f32.mrf.mxu0  ;;  %v3552_v23 = vpop.f32.mrf.mxu1 }
 0x1dc   : > { %v4015_v21 = vmax.f32 %v3510_v18, 0.0  ;;  %v3512_v22 = vadd.f32 %v3511_v20, %v4978_v62  ;;  %v4017_v24 = vmax.f32 %v3551_v63, 0.0  ;;  %v3553_v25 = vadd.f32 %v3552_v23, %v4978_v62 }
 0x1dd   : > { %v3513_v26 = vpop.f32.mrf.mxu0  ;;  %v3554_v27 = vpop.f32.mrf.mxu1 }
 0x1de   : > { %4087 = vst [vmem:[%s4985_s27 + $0x180] sm:$0x3f] %v4015_v21  ;;  %v4016_v39 = vmax.f32 %v3512_v22, 0.0  ;;  %4089 = vst [vmem:[%s4985_s27 + $0x190] sm:$0x3f] %v4017_v24  ;;  %v4018_v28 = vmax.f32 %v3553_v25, 0.0 }
 0x1df   : > { %v3514_v29 = vpop.f32.mrf.mxu0  ;;  %v3555_v30 = vpop.f32.mrf.mxu1 }
 0x1e0   : > { %4088 = vst [vmem:[%s4985_s27 + $0x188] sm:$0x3f] %v4016_v39  ;;  %4090 = vst [vmem:[%s4985_s27 + $0x198] sm:$0x3f] %v4018_v28 }
 0x1ed   : > { %v3591_v31 = vpop.f32.mrf.mxu0  ;;  %v3632_v33 = vpop.f32.mrf.mxu1 }
 0x1ee   : > { %v3592_v32 = vadd.f32 %v3591_v31, %v4978_v62  ;;  %v3633_v34 = vadd.f32 %v3632_v33, %v4978_v62 }
 0x1ef   : > { %v3593_v35 = vpop.f32.mrf.mxu0  ;;  %v3634_v38 = vpop.f32.mrf.mxu1 }
 0x1f0   : > { %v4019_v36 = vmax.f32 %v3592_v32, 0.0  ;;  %v3594_v37 = vadd.f32 %v3593_v35, %v4978_v62  ;;  %v4021_v6 = vmax.f32 %v3633_v34, 0.0  ;;  %v3635_v40 = vadd.f32 %v3634_v38, %v4978_v62 }
 0x1f1   : > { %v3595_v41 = vpop.f32.mrf.mxu0  ;;  %v3636_v54 = vpop.f32.mrf.mxu1 }
 0x1f2   : > { %4091 = vst [vmem:[%s4985_s27 + $0x1a0] sm:$0x3f] %v4019_v36  ;;  %v4020_v42 = vmax.f32 %v3594_v37, 0.0  ;;  %4093 = vst [vmem:[%s4985_s27 + $0x1b0] sm:$0x3f] %v4021_v6  ;;  %v4022_v43 = vmax.f32 %v3635_v40, 0.0 }
 0x1f3   : > { %v3596_v44 = vpop.f32.mrf.mxu0  ;;  %v3637_v45 = vpop.f32.mrf.mxu1 }
 0x1f4   : > { %4092 = vst [vmem:[%s4985_s27 + $0x1a8] sm:$0x3f] %v4020_v42  ;;  %4094 = vst [vmem:[%s4985_s27 + $0x1b8] sm:$0x3f] %v4022_v43 }
 0x201   : > { %v3673_v46 = vpop.f32.mrf.mxu0  ;;  %v3714_v48 = vpop.f32.mrf.mxu1 }
 0x202   : > { %v3674_v47 = vadd.f32 %v3673_v46, %v4978_v62  ;;  %v3715_v49 = vadd.f32 %v3714_v48, %v4978_v62 }
 0x203   : > { %v3675_v50 = vpop.f32.mrf.mxu0  ;;  %v3716_v53 = vpop.f32.mrf.mxu1 }
 0x204   : > { %v4023_v51 = vmax.f32 %v3674_v47, 0.0  ;;  %v3676_v52 = vadd.f32 %v3675_v50, %v4978_v62  ;;  %v4025_v55 = vmax.f32 %v3715_v49, 0.0  ;;  %v3717_v56 = vadd.f32 %v3716_v53, %v4978_v62 }
 0x205   : > { %v3677_v57 = vpop.f32.mrf.mxu0  ;;  %v3718_v58 = vpop.f32.mrf.mxu1 }
 0x206   : > { %4095 = vst [vmem:[%s4985_s27 + $0x1c0] sm:$0x3f] %v4023_v51  ;;  %v4024_v0 = vmax.f32 %v3676_v52, 0.0  ;;  %4097 = vst [vmem:[%s4985_s27 + $0x1d0] sm:$0x3f] %v4025_v55  ;;  %v4026_v59 = vmax.f32 %v3717_v56, 0.0 }
 0x207   : > { %v3678_v60 = vpop.f32.mrf.mxu0  ;;  %v3719_v61 = vpop.f32.mrf.mxu1 }
 0x208   : > { %4096 = vst [vmem:[%s4985_s27 + $0x1c8] sm:$0x3f] %v4024_v0  ;;  %4098 = vst [vmem:[%s4985_s27 + $0x1d8] sm:$0x3f] %v4026_v59 }
 0x215   : > { %v3755_v1 = vpop.f32.mrf.mxu0  ;;  %v3796_v3 = vpop.f32.mrf.mxu1 }
 0x216   : > { %v3756_v2 = vadd.f32 %v3755_v1, %v4978_v62  ;;  %v3797_v4 = vadd.f32 %v3796_v3, %v4978_v62 }
 0x217   : > { %v3757_v5 = vpop.f32.mrf.mxu0  ;;  %v3798_v9 = vpop.f32.mrf.mxu1 }
 0x218   : > { %v4027_v7 = vmax.f32 %v3756_v2, 0.0  ;;  %v3758_v8 = vadd.f32 %v3757_v5, %v4978_v62  ;;  %v4029_v10 = vmax.f32 %v3797_v4, 0.0  ;;  %v3799_v11 = vadd.f32 %v3798_v9, %v4978_v62 }
 0x219   : > { %v3759_v12 = vpop.f32.mrf.mxu0  ;;  %v3800_v14 = vpop.f32.mrf.mxu1 }
 0x21a   : > { %4099 = vst [vmem:[%s4985_s27 + $0x1e0] sm:$0x3f] %v4027_v7  ;;  %v4028_v13 = vmax.f32 %v3758_v8, 0.0  ;;  %4101 = vst [vmem:[%s4985_s27 + $0x1f0] sm:$0x3f] %v4029_v10  ;;  %v4030_v15 = vmax.f32 %v3799_v11, 0.0 }
 0x21b   : > { %v3760_v16 = vpop.f32.mrf.mxu0  ;;  %v3801_v17 = vpop.f32.mrf.mxu1 }
 0x21c   : > { %4100 = vst [vmem:[%s4985_s27 + $0x1e8] sm:$0x3f] %v4028_v13  ;;  %4102 = vst [vmem:[%s4985_s27 + $0x1f8] sm:$0x3f] %v4030_v15 }
 0x229   : > { %v3837_v18 = vpop.f32.mrf.mxu0  ;;  %v3878_v63 = vpop.f32.mrf.mxu1 }
 0x22a   : > { %v3838_v19 = vadd.f32 %v3837_v18, %v4978_v62  ;;  %v3879_v20 = vadd.f32 %v3878_v63, %v4978_v62 }
 0x22b   : > { %v3839_v21 = vpop.f32.mrf.mxu0  ;;  %v3880_v24 = vpop.f32.mrf.mxu1 }
 0x22c   : > { %v4031_v22 = vmax.f32 %v3838_v19, 0.0  ;;  %v3840_v23 = vadd.f32 %v3839_v21, %v4978_v62  ;;  %v4033_v25 = vmax.f32 %v3879_v20, 0.0  ;;  %v3881_v26 = vadd.f32 %v3880_v24, %v4978_v62 }
 0x22d   : > { %v3841_v39 = vpop.f32.mrf.mxu0  ;;  %v3882_v28 = vpop.f32.mrf.mxu1 }
 0x22e   : > { %4103 = vst [vmem:[%s4985_s27 + $0x200] sm:$0x3f] %v4031_v22  ;;  %v4032_v27 = vmax.f32 %v3840_v23, 0.0  ;;  %4105 = vst [vmem:[%s4985_s27 + $0x210] sm:$0x3f] %v4033_v25  ;;  %v4034_v29 = vmax.f32 %v3881_v26, 0.0 }
 0x22f   : > { %v3842_v30 = vpop.f32.mrf.mxu0  ;;  %v3883_v31 = vpop.f32.mrf.mxu1 }
 0x230   : > { %4104 = vst [vmem:[%s4985_s27 + $0x208] sm:$0x3f] %v4032_v27  ;;  %4106 = vst [vmem:[%s4985_s27 + $0x218] sm:$0x3f] %v4034_v29 }
 0x23d   : > { %v3919_v32 = vpop.f32.mrf.mxu0  ;;  %v3960_v34 = vpop.f32.mrf.mxu1 }
 0x23e   : > { %v3920_v33 = vadd.f32 %v3919_v32, %v4978_v62  ;;  %v3961_v35 = vadd.f32 %v3960_v34, %v4978_v62 }
 0x23f   : > { %v3921_v36 = vpop.f32.mrf.mxu0  ;;  %v3962_v6 = vpop.f32.mrf.mxu1 }
 0x240   : > { %v4035_v37 = vmax.f32 %v3920_v33, 0.0  ;;  %v3922_v38 = vadd.f32 %v3921_v36, %v4978_v62  ;;  %v4037_v40 = vmax.f32 %v3961_v35, 0.0  ;;  %v3963_v41 = vadd.f32 %v3962_v6, %v4978_v62 }
 0x241   : > { %v3923_v42 = vpop.f32.mrf.mxu0  ;;  %v3964_v43 = vpop.f32.mrf.mxu1 }
 0x242   : > { %4107 = vst [vmem:[%s4985_s27 + $0x220] sm:$0x3f] %v4035_v37  ;;  %v4036_v54 = vmax.f32 %v3922_v38, 0.0  ;;  %4109 = vst [vmem:[%s4985_s27 + $0x230] sm:$0x3f] %v4037_v40  ;;  %v4038_v44 = vmax.f32 %v3963_v41, 0.0 }
 0x243   : > { %v3924_v45 = vpop.f32.mrf.mxu0  ;;  %v3965_v46 = vpop.f32.mrf.mxu1 }
 0x244   : > { %4108 = vst [vmem:[%s4985_s27 + $0x228] sm:$0x3f] %v4036_v54  ;;  %4110 = vst [vmem:[%s4985_s27 + $0x238] sm:$0x3f] %v4038_v44 }
 0x245 PF: > { %s13_s12 = sadd.s32 1, %s4592_s12  }
 0x246   : > { %p10_p4 = scmp.ge.s32.totalorder %s13_s12, 4  }
 0x248   :  { %12 = sbr.rel (!%p10_p4) target bundleno = 1 (0x1), region = 62 }

// kernel: food101_forward.6
= control target key start
LH: loop header
LB: loop body
LE: loop exit
PB: predicated region body
PF: predicated region fallthrough
CT: control target
= control target key end

     0   :  { %s3498_s12 = smov 0   ;;  %s4328_s0 = inlined_call_operand.vmem [shape: f32[576,2,96], index: 0, kind: input, shape index: {}]   ;;  %s4329_s1 = inlined_call_operand.vmem [shape: f32[96,48], index: 1, kind: input, shape index: {}]   ;;  %s4330_s2 = inlined_call_operand.vmem [shape: f32[96,48], index: 2, kind: input, shape index: {}]   ;;  %s4331_s3 = inlined_call_operand.vmem [shape: f32[576,48], index: 3, kind: output, shape index: {}]  }
   0x1 LB: > { %s3129_s13 = sadd.s32 4294967295, %s3476_s12   ;;  %p3133_p0 = scmp.ge.s32.totalorder %s3476_s12, 1  ;;  %s3476_s12 = sphi %s3498_s12, %s13_s12  }
   0x2   : > { %p138_p1 = scmp.lt.s32.totalorder %s3476_s12, 3 }
   0x4   : > { %p139_p2 = pnand %p3133_p0, %p138_p1 }
   0x5   : > { %s162_s20 = smul.u32 (!%p139_p2), 288, %s3129_s13 }
   0x6   : > { %142 = sbr.rel (%p139_p2) target bundleno = 492 (0x1ec), region = 32 }
   0x7   : > { %p163_p3 = scmp.lt.s32.totalorder (!%p139_p2), %s162_s20, 575  ;;  %s4177_s18 = smul.u32 (!%p139_p2), 36, %s3129_s13 }
   0x9   : > { %p169_p4 = scmp.lt.s32.totalorder (!%p139_p2), %s4177_s18, 71 }
   0xb   : > { %v1625_v0 = vld [vmem:[%s4329_s1 + $0x58] sm:$0xff]  ;;  %v1624_v2 = vld [vmem:[%s4329_s1 + $0x50] sm:$0xff]  ;;  %v1623_v4 = vld [vmem:[%s4329_s1 + $0x48] sm:$0xff]  ;;  %s4333_s20 = smov (!%p163_p3, %s162_s20), 575  ;;  %vm1915_vm0 = vcmask 1041409   ;;  %vm1918_vm1 = vcmask 1042434  }
   0xc   : > { %v2754_v1 = vld [vmem:[%s4330_s2 + $0x58] sm:$0xff]  ;;  %3306 = vmatprep.subr.mxu0 %v1625_v0  ;;  %v2753_v3 = vld [vmem:[%s4330_s2 + $0x50] sm:$0xff]  ;;  %v2752_v5 = vld [vmem:[%s4330_s2 + $0x48] sm:$0xff]  ;;  %s3134_s8 = sshll.u32 %s4333_s20, 1  ;;  %vm1921_vm2 = vcmask 1043459   ;;  %vm1924_vm3 = vcmask 1044484  }
   0xd   : > { %3384 = vmatprep.subr.mxu1 %v2754_v1  ;;  %3307 = vmatpush3.msra.mxu0 %v1625_v0  ;;  %v1622_v6 = vld [vmem:[%s4329_s1 + $0x40] sm:$0xff]  ;;  %v1621_v8 = vld [vmem:[%s4329_s1 + $0x38] sm:$0xff]  ;;  %v1620_v10 = vld [vmem:[%s4329_s1 + $0x30] sm:$0xff]  ;;  %s3547_s17 = scalar_lea.vmem %s4328_s0, %s3134_s8  ;;  %vm1927_vm4 = vcmask 1045509   ;;  %vm1930_vm5 = vcmask 1046534   ;;  %vm1933_vm6 = vcmask 1047559  }
   0xe   : > { %3385 = vmatpush3.msra.mxu1 %v2754_v1  ;;  %3308 = vmatprep.subr.mxu0 %v1624_v2  ;;  %v2751_v7 = vld [vmem:[%s4330_s2 + $0x40] sm:$0xff]  ;;  %v2750_v9 = vld [vmem:[%s4330_s2 + $0x38] sm:$0xff]  ;;  %v2749_v11 = vld [vmem:[%s4330_s2 + $0x30] sm:$0xff]  ;;  %vm2425_vm7 = vcmask 785408   ;;  %s4335_s18 = smov (!%p169_p4, %s4177_s18), 71  ;;  %vm3036_vm8 = vcmask 392192  }
   0xf   : > { %3386 = vmatprep.subr.mxu1 %v2753_v3  ;;  %3309 = vmatpush3.msra.mxu0 %v1624_v2  ;;  %v1619_v12 = vld [vmem:[%s4329_s1 + $0x28] sm:$0xff]  ;;  %v174_v14 = vld [vmem:[%s3547_s17] sm:$0x3]  ;;  %v175_v15 = vld [vmem:[%s3547_s17 + $0x2] sm:$0x3]  ;;  %s3135_s13 = sshll.u32 %s4335_s18, 3 }
  0x10   : > { %3387 = vmatpush3.msra.mxu1 %v2753_v3  ;;  %3310 = vmatprep.subr.mxu0 %v1623_v4  ;;  %v2748_v13 = vld [vmem:[%s4330_s2 + $0x28] sm:$0xff]  ;;  %v176_v16 = vld [vmem:[%s3547_s17 + $0x4] sm:$0x3]  ;;  %v177_v17 = vld [vmem:[%s3547_s17 + $0x6] sm:$0x3]  ;;  %v750_v22 = vrot.slane %v174_v14, 1  ;;  %s4230_s20 = scalar_lea.vmem %s4331_s3, %s3135_s13 }
  0x11   : > { %3388 = vmatprep.subr.mxu1 %v2752_v5  ;;  %3311 = vmatpush3.msra.mxu0 %v1623_v4  ;;  %v178_v18 = vld [vmem:[%s3547_s17 + $0x8] sm:$0x3]  ;;  %v179_v19 = vld [vmem:[%s3547_s17 + $0xa] sm:$0x3]  ;;  %v180_v20 = vld [vmem:[%s3547_s17 + $0xc] sm:$0x3] }
  0x12   : > { %3389 = vmatpush3.msra.mxu1 %v2752_v5  ;;  %3312 = vmatprep.subr.mxu0 %v1622_v6  ;;  %v181_v21 = vld [vmem:[%s3547_s17 + $0xe] sm:$0x3]  ;;  %v751_v23 = vrot.slane %v175_v15, 1  ;;  %v1618_v24 = vld [vmem:[%s4329_s1 + $0x20] sm:$0xff]  ;;  %v752_v26 = vrot.slane %v176_v16, 1  ;;  %v753_v27 = vrot.slane %v177_v17, 1  ;;  %v1326_v34 = vmax.f32 %v174_v14, %v750_v22 }
  0x13   : > { %3390 = vmatprep.subr.mxu1 %v2751_v7  ;;  %3313 = vmatpush3.msra.mxu0 %v1622_v6  ;;  %v2747_v25 = vld [vmem:[%s4330_s2 + $0x20] sm:$0xff]  ;;  %v754_v28 = vrot.slane %v178_v18, 1  ;;  %v755_v29 = vrot.slane %v179_v19, 1  ;;  %v1617_v30 = vld [vmem:[%s4329_s1 + $0x18] sm:$0xff]  ;;  %v756_v32 = vrot.slane %v180_v20, 1  ;;  %v757_v33 = vrot.slane %v181_v21, 1 }
  0x14   : > { %3391 = vmatpush3.msra.mxu1 %v2751_v7  ;;  %3314 = vmatprep.subr.mxu0 %v1621_v8  ;;  %v2746_v31 = vld [vmem:[%s4330_s2 + $0x18] sm:$0xff]  ;;  %v1327_v35 = vmax.f32 %v175_v15, %v751_v23  ;;  %v182_v36 = vld [vmem:[%s3547_s17 + $0x10] sm:$0x3]  ;;  %v1328_v37 = vmax.f32 %v176_v16, %v752_v26  ;;  %v1329_v38 = vmax.f32 %v177_v17, %v753_v27  ;;  %v183_v40 = vld [vmem:[%s3547_s17 + $0x12] sm:$0x3] }
  0x15   : > { %3392 = vmatprep.subr.mxu1 %v2750_v9  ;;  %3315 = vmatpush3.msra.mxu0 %v1621_v8  ;;  %v1330_v39 = vmax.f32 %v178_v18, %v754_v28  ;;  %v184_v41 = vld [vmem:[%s3547_s17 + $0x14] sm:$0x3]  ;;  %v185_v42 = vld [vmem:[%s3547_s17 + $0x16] sm:$0x3]  ;;  %v1331_v44 = vmax.f32 %v179_v19, %v755_v29  ;;  %v1332_v45 = vmax.f32 %v180_v20, %v756_v32  ;;  %v186_v48 = vld [vmem:[%s3547_s17 + $0x18] sm:$0x3] }
  0x16   : > { %3393 = vmatpush3.msra.mxu1 %v2750_v9  ;;  %3316 = vmatprep.subr.mxu0 %v1620_v10  ;;  %v1616_v43 = vld [vmem:[%s4329_s1 + $0x10] sm:$0xff]  ;;  %v1333_v46 = vmax.f32 %v181_v21, %v757_v33  ;;  %v1914_v47 = vrot.slane %v1327_v35, 7  ;;  %v187_v49 = vld [vmem:[%s3547_s17 + $0x1a] sm:$0x3]  ;;  %v1917_v50 = vrot.slane %v1328_v37, 6  ;;  %v1920_v51 = vrot.slane %v1329_v38, 5 }
  0x17   : > { %3394 = vmatprep.subr.mxu1 %v2749_v11  ;;  %3317 = vmatpush3.msra.mxu0 %v1620_v10  ;;  %v1923_v52 = vrot.slane %v1330_v39, 4  ;;  %v188_v53 = vld [vmem:[%s3547_s17 + $0x1c] sm:$0x3]  ;;  %v758_v54 = vrot.slane %v182_v36, 1  ;;  %v2745_v55 = vld [vmem:[%s4330_s2 + $0x10] sm:$0xff]  ;;  %v1926_v57 = vrot.slane %v1331_v44, 3 }
  0x18   : > { %3395 = vmatpush3.msra.mxu1 %v2749_v11  ;;  %3318 = vmatprep.subr.mxu0 %v1619_v12  ;;  %v1916_v56 = vsel %vm1915_vm0, %v1914_v47, %v1326_v34  ;;  %v1929_v58 = vrot.slane %v1332_v45, 2  ;;  %v1932_v59 = vrot.slane %v1333_v46, 1  ;;  %v189_v60 = vld [vmem:[%s3547_s17 + $0x1e] sm:$0x3]  ;;  %v759_v62 = vrot.slane %v183_v40, 1  ;;  %v1615_v2 = vld [vmem:[%s4329_s1 + $0x8] sm:$0xff] }
  0x19   : > { %3396 = vmatprep.subr.mxu1 %v2748_v13  ;;  %3319 = vmatpush3.msra.mxu0 %v1619_v12  ;;  %v1919_v61 = vsel %vm1918_vm1, %v1917_v50, %v1916_v56  ;;  %v760_v63 = vrot.slane %v184_v41, 1  ;;  %v761_v0 = vrot.slane %v185_v42, 1  ;;  %v3592_v1 = vld [vmem:[%s3547_s17 + $0x20] sm:$0x3]  ;;  %v2744_v3 = vld [vmem:[%s4330_s2 + $0x8] sm:$0xff]  ;;  %v762_v5 = vrot.slane %v186_v48, 1 }
  0x1a   : > { %3397 = vmatpush3.msra.mxu1 %v2748_v13  ;;  %3320 = vmatprep.subr.mxu0 %v1618_v24  ;;  %v1922_v4 = vsel %vm1921_vm2, %v1920_v51, %v1919_v61  ;;  %v763_v6 = vrot.slane %v187_v49, 1  ;;  %v764_v7 = vrot.slane %v188_v53, 1  ;;  %v1614_v8 = vld [vmem:[%s4329_s1] sm:$0xff]  ;;  %v765_v10 = vrot.slane %v189_v60, 1 }
  0x1b   : > { %3398 = vmatprep.subr.mxu1 %v2747_v25  ;;  %3321 = vmatpush3.msra.mxu0 %v1618_v24  ;;  %v1925_v9 = vsel %vm1924_vm3, %v1923_v52, %v1922_v4  ;;  %v1334_v11 = vmax.f32 %v182_v36, %v758_v54  ;;  %v1335_v12 = vmax.f32 %v183_v40, %v759_v62  ;;  %v2743_v13 = vld [vmem:[%s4330_s2] sm:$0xff]  ;;  %v766_v19 = vrot.slane %v3592_v1, 1  ;;  %v197_v36 = vld [vmem:[%s3547_s17 + $0x2e] sm:$0x3] }
  0x1c   : > { %3399 = vmatpush3.msra.mxu1 %v2747_v25  ;;  %3322 = vmatprep.subr.mxu0 %v1617_v30  ;;  %v1928_v14 = vsel %vm1927_vm4, %v1926_v57, %v1925_v9  ;;  %v1336_v15 = vmax.f32 %v184_v41, %v760_v63  ;;  %v1337_v16 = vmax.f32 %v185_v42, %v761_v0  ;;  %v191_v17 = vld [vmem:[%s3547_s17 + $0x22] sm:$0x3]  ;;  %v192_v18 = vld [vmem:[%s3547_s17 + $0x24] sm:$0x3]  ;;  %v193_v24 = vld [vmem:[%s3547_s17 + $0x26] sm:$0x3] }
  0x1d   : > { %3400 = vmatprep.subr.mxu1 %v2746_v31  ;;  %3323 = vmatpush3.msra.mxu0 %v1617_v30  ;;  %v1931_v20 = vsel %vm1930_vm5, %v1929_v58, %v1928_v14  ;;  %v1338_v21 = vmax.f32 %v186_v48, %v762_v5  ;;  %v1339_v22 = vmax.f32 %v187_v49, %v763_v6  ;;  %v1935_v23 = vrot.slane %v1335_v12, 7  ;;  %v194_v25 = vld [vmem:[%s3547_s17 + $0x28] sm:$0x3]  ;;  %v195_v30 = vld [vmem:[%s3547_s17 + $0x2a] sm:$0x3] }
  0x1e   : > { %3401 = vmatpush3.msra.mxu1 %v2746_v31  ;;  %3324 = vmatprep.subr.mxu0 %v1616_v43  ;;  %v1934_v26 = vsel %vm1933_vm6, %v1932_v59, %v1931_v20  ;;  %v1340_v27 = vmax.f32 %v188_v53, %v764_v7  ;;  %v1341_v28 = vmax.f32 %v189_v60, %v765_v10  ;;  %v1937_v29 = vrot.slane %v1336_v15, 6  ;;  %v196_v31 = vld [vmem:[%s3547_s17 + $0x2c] sm:$0x3]  ;;  %v198_v53 = vld [vmem:[%s3547_s17 + $0x30] sm:$0x3] }
  0x1f   : > { %3402 = vmatprep.subr.mxu1 %v2745_v55  ;;  %3325 = vmatpush3.msra.mxu0 %v1616_v43  ;;  %v1936_v32 = vsel %vm1915_vm0, %v1935_v23, %v1334_v11  ;;  %v1939_v33 = vrot.slane %v1337_v16, 5  ;;  %v1941_v34 = vrot.slane %v1338_v21, 4  ;;  %v1943_v35 = vrot.slane %v1339_v22, 3  ;;  %v199_v58 = vld [vmem:[%s3547_s17 + $0x32] sm:$0x3] }
  0x20   : > { %3403 = vmatpush3.msra.mxu1 %v2745_v55  ;;  %3326 = vmatprep.subr.mxu0 %v1615_v2  ;;  %v1938_v37 = vsel %vm1918_vm1, %v1937_v29, %v1936_v32  ;;  %v1945_v38 = vrot.slane %v1340_v27, 2  ;;  %v1947_v39 = vrot.slane %v1341_v28, 1  ;;  %v767_v40 = vrot.slane %v191_v17, 1  ;;  %v200_v59 = vld [vmem:[%s3547_s17 + $0x34] sm:$0x3] }
  0x21   : > { %3404 = vmatprep.subr.mxu1 %v2744_v3  ;;  %3327 = vmatpush3.msra.mxu0 %v1615_v2  ;;  %v1940_v41 = vsel %vm1921_vm2, %v1939_v33, %v1938_v37  ;;  %v768_v42 = vrot.slane %v192_v18, 1  ;;  %v769_v43 = vrot.slane %v193_v24, 1  ;;  %v770_v44 = vrot.slane %v194_v25, 1  ;;  %v201_v60 = vld [vmem:[%s3547_s17 + $0x36] sm:$0x3] }
  0x22   : > { %3405 = vmatpush3.msra.mxu1 %v2744_v3  ;;  %3328 = vmatprep.subr.mxu0 %v1614_v8  ;;  %v1942_v45 = vsel %vm1924_vm3, %v1941_v34, %v1940_v41  ;;  %v771_v46 = vrot.slane %v195_v30, 1  ;;  %v772_v47 = vrot.slane %v196_v31, 1  ;;  %v773_v48 = vrot.slane %v197_v36, 1  ;;  %v203_v2 = vld [vmem:[%s3547_s17 + $0x3a] sm:$0x3] }
  0x23   : > { %3406 = vmatprep.subr.mxu1 %v2743_v13  ;;  %3329 = vmatpush3.msra.mxu0 %v1614_v8  ;;  %v1944_v49 = vsel %vm1927_vm4, %v1943_v35, %v1942_v45  ;;  %v1342_v50 = vmax.f32 %v3592_v1, %v766_v19  ;;  %v1343_v51 = vmax.f32 %v191_v17, %v767_v40  ;;  %v202_v1 = vld [vmem:[%s3547_s17 + $0x38] sm:$0x3]  ;;  %v204_v7 = vld [vmem:[%s3547_s17 + $0x3c] sm:$0x3]  ;;  %v205_v11 = vld [vmem:[%s3547_s17 + $0x3e] sm:$0x3] }
  0x24   : > { %3330 = vmatprep.mubr.msk.f32.mxu0 %vm2425_vm7, %v1934_v26  ;;  %3407 = vmatpush3.msra.mxu1 %v2743_v13  ;;  %v1344_v52 = vmax.f32 %v192_v18, %v768_v42  ;;  %v1946_v54 = vsel %vm1930_vm5, %v1945_v38, %v1944_v49  ;;  %v1345_v55 = vmax.f32 %v193_v24, %v769_v43  ;;  %v774_v12 = vrot.slane %v198_v53, 1  ;;  %v206_v29 = vld [vmem:[%s3547_s17 + $0x40] sm:$0x3]  ;;  %v210_v37 = vld [vmem:[%s3547_s17 + $0x48] sm:$0x3] }
  0x25   : > { %3408 = vmatprep.mubr.msk.f32.mxu1 %vm2425_vm7, %v1934_v26  ;;  %v1346_v56 = vmax.f32 %v194_v25, %v770_v44  ;;  %v1347_v57 = vmax.f32 %v195_v30, %v771_v46  ;;  %v1948_v61 = vsel %vm1933_vm6, %v1947_v39, %v1946_v54  ;;  %v1348_v62 = vmax.f32 %v196_v31, %v772_v47  ;;  %v207_v30 = vld [vmem:[%s3547_s17 + $0x42] sm:$0x3]  ;;  %v208_v31 = vld [vmem:[%s3547_s17 + $0x44] sm:$0x3]  ;;  %v211_v38 = vld [vmem:[%s3547_s17 + $0x4a] sm:$0x3] }
  0x26   : > { %v1349_v63 = vmax.f32 %v197_v36, %v773_v48  ;;  %v1949_v0 = vrot.slane %v1343_v51, 7  ;;  %3331 = vmatmul.mubr.msk.f32.vlgmr.msra.gmra.mxu0 %vm2425_vm7, %v1948_v61  ;;  %3409 = vmatmul.mubr.msk.f32.vlgmr.msra.gmra.mxu1 %vm2425_vm7, %v1948_v61  ;;  %v1951_v3 = vrot.slane %v1344_v52, 6  ;;  %v1953_v4 = vrot.slane %v1345_v55, 5  ;;  %v209_v36 = vld [vmem:[%s3547_s17 + $0x46] sm:$0x3] }
  0x27   : > { %v1955_v5 = vrot.slane %v1346_v56, 4  ;;  %v1957_v6 = vrot.slane %v1347_v57, 3  ;;  %v1959_v9 = vrot.slane %v1348_v62, 2  ;;  %v775_v14 = vrot.slane %v199_v58, 1  ;;  %v212_v43 = vld [vmem:[%s3547_s17 + $0x4c] sm:$0x3] }
  0x28   : > { %v1950_v8 = vsel %vm1915_vm0, %v1949_v0, %v1342_v50  ;;  %v1961_v10 = vrot.slane %v1349_v63, 1  ;;  %v776_v15 = vrot.slane %v200_v59, 1  ;;  %v777_v16 = vrot.slane %v201_v60, 1  ;;  %v213_v48 = vld [vmem:[%s3547_s17 + $0x4e] sm:$0x3] }
  0x29   : > { %v1952_v13 = vsel %vm1918_vm1, %v1951_v3, %v1950_v8  ;;  %v778_v18 = vrot.slane %v202_v1, 1  ;;  %v779_v19 = vrot.slane %v203_v2, 1  ;;  %v780_v20 = vrot.slane %v204_v7, 1  ;;  %v217_v8 = vld [vmem:[%s3547_s17 + $0x56] sm:$0x3] }
  0x2a   : > { %v1954_v17 = vsel %vm1921_vm2, %v1953_v4, %v1952_v13  ;;  %v781_v22 = vrot.slane %v205_v11, 1  ;;  %v1350_v23 = vmax.f32 %v198_v53, %v774_v12  ;;  %v1351_v24 = vmax.f32 %v199_v58, %v775_v14  ;;  %v218_v13 = vld [vmem:[%s3547_s17 + $0x58] sm:$0x3]  ;;  %v219_v14 = vld [vmem:[%s3547_s17 + $0x5a] sm:$0x3] }
  0x2b   : > { %v1956_v21 = vsel %vm1924_vm3, %v1955_v5, %v1954_v17  ;;  %v1352_v26 = vmax.f32 %v200_v59, %v776_v15  ;;  %v1353_v27 = vmax.f32 %v201_v60, %v777_v16  ;;  %v1354_v28 = vmax.f32 %v202_v1, %v778_v18  ;;  %v214_v1 = vld [vmem:[%s3547_s17 + $0x50] sm:$0x3] }
  0x2c   : > { %v1958_v25 = vsel %vm1927_vm4, %v1957_v6, %v1956_v21  ;;  %v1355_v33 = vmax.f32 %v203_v2, %v779_v19  ;;  %v1356_v34 = vmax.f32 %v204_v7, %v780_v20  ;;  %v1357_v35 = vmax.f32 %v205_v11, %v781_v22  ;;  %v215_v6 = vld [vmem:[%s3547_s17 + $0x52] sm:$0x3]  ;;  %v216_v7 = vld [vmem:[%s3547_s17 + $0x54] sm:$0x3]  ;;  %v220_v19 = vld [vmem:[%s3547_s17 + $0x5c] sm:$0x3] }
  0x2d   : > { %v1960_v32 = vsel %vm1930_vm5, %v1959_v9, %v1958_v25  ;;  %v1963_v40 = vrot.slane %v1351_v24, 7  ;;  %v1965_v41 = vrot.slane %v1352_v26, 6  ;;  %v1967_v42 = vrot.slane %v1353_v27, 5 }
  0x2e   : > { %v1962_v39 = vsel %vm1933_vm6, %v1961_v10, %v1960_v32  ;;  %v1969_v44 = vrot.slane %v1354_v28, 4  ;;  %v1971_v45 = vrot.slane %v1355_v33, 3  ;;  %v1973_v46 = vrot.slane %v1356_v34, 2 }
  0x2f   : > { %3333 = vmatprep.mubr.msk.f32.mxu0 %vm2425_vm7, %v1962_v39  ;;  %3411 = vmatprep.mubr.msk.f32.mxu1 %vm2425_vm7, %v1962_v39  ;;  %v1975_v47 = vrot.slane %v1357_v35, 1  ;;  %v1964_v49 = vsel %vm1915_vm0, %v1963_v40, %v1350_v23  ;;  %v782_v50 = vrot.slane %v206_v29, 1  ;;  %v783_v51 = vrot.slane %v207_v30, 1  ;;  %v221_v23 = vld [vmem:[%s3547_s17 + $0x5e] sm:$0x3] }
  0x30   : > { %v784_v52 = vrot.slane %v208_v31, 1  ;;  %v1966_v53 = vsel %vm1918_vm1, %v1965_v41, %v1964_v49  ;;  %v785_v54 = vrot.slane %v209_v36, 1  ;;  %v786_v55 = vrot.slane %v210_v37, 1  ;;  %v222_v41 = vld [vmem:[%s3547_s17 + $0x60] sm:$0x3] }
  0x31   : > { %v787_v56 = vrot.slane %v211_v38, 1  ;;  %v1968_v57 = vsel %vm1921_vm2, %v1967_v42, %v1966_v53  ;;  %v788_v58 = vrot.slane %v212_v43, 1  ;;  %v789_v59 = vrot.slane %v213_v48, 1  ;;  %v223_v42 = vld [vmem:[%s3547_s17 + $0x62] sm:$0x3] }
  0x32   : > { %v1358_v60 = vmax.f32 %v206_v29, %v782_v50  ;;  %v1970_v61 = vsel %vm1924_vm3, %v1969_v44, %v1968_v57  ;;  %v1359_v62 = vmax.f32 %v207_v30, %v783_v51  ;;  %v1360_v63 = vmax.f32 %v208_v31, %v784_v52  ;;  %v226_v49 = vld [vmem:[%s3547_s17 + $0x68] sm:$0x3]  ;;  %v227_v50 = vld [vmem:[%s3547_s17 + $0x6a] sm:$0x3] }
  0x33   : > { %v1361_v0 = vmax.f32 %v209_v36, %v785_v54  ;;  %v1972_v2 = vsel %vm1927_vm4, %v1971_v45, %v1970_v61  ;;  %v1362_v3 = vmax.f32 %v210_v37, %v786_v55  ;;  %v1363_v4 = vmax.f32 %v211_v38, %v787_v56  ;;  %v228_v55 = vld [vmem:[%s3547_s17 + $0x6c] sm:$0x3] }
  0x34   : > { %v1364_v5 = vmax.f32 %v212_v43, %v788_v58  ;;  %v1974_v9 = vsel %vm1930_vm5, %v1973_v46, %v1972_v2  ;;  %v1365_v10 = vmax.f32 %v213_v48, %v789_v59  ;;  %v1977_v11 = vrot.slane %v1359_v62, 7  ;;  %v224_v43 = vld [vmem:[%s3547_s17 + $0x64] sm:$0x3]  ;;  %v225_v48 = vld [vmem:[%s3547_s17 + $0x66] sm:$0x3] }
  0x35   : > { %v1979_v12 = vrot.slane %v1360_v63, 6  ;;  %v1976_v15 = vsel %vm1933_vm6, %v1975_v47, %v1974_v9  ;;  %v1981_v16 = vrot.slane %v1361_v0, 5  ;;  %v1983_v17 = vrot.slane %v1362_v3, 4 }
  0x36   : > { %v1985_v18 = vrot.slane %v1363_v4, 3  ;;  %3334 = vmatmul.mubr.msk.f32.gmra.mxu0 %vm2425_vm7, %v1976_v15  ;;  %3412 = vmatmul.mubr.msk.f32.gmra.mxu1 %vm2425_vm7, %v1976_v15  ;;  %v1978_v20 = vsel %vm1915_vm0, %v1977_v11, %v1358_v60  ;;  %v1987_v21 = vrot.slane %v1364_v5, 2  ;;  %v1989_v22 = vrot.slane %v1365_v10, 1  ;;  %v229_v60 = vld [vmem:[%s3547_s17 + $0x6e] sm:$0x3] }
  0x37   : > { %v790_v24 = vrot.slane %v214_v1, 1  ;;  %v1980_v25 = vsel %vm1918_vm1, %v1979_v12, %v1978_v20  ;;  %v791_v26 = vrot.slane %v215_v6, 1  ;;  %v792_v27 = vrot.slane %v216_v7, 1  ;;  %v233_v20 = vld [vmem:[%s3547_s17 + $0x76] sm:$0x3] }
  0x38   : > { %v793_v28 = vrot.slane %v217_v8, 1  ;;  %v1982_v29 = vsel %vm1921_vm2, %v1981_v16, %v1980_v25  ;;  %v794_v30 = vrot.slane %v218_v13, 1  ;;  %v795_v31 = vrot.slane %v219_v14, 1  ;;  %v234_v25 = vld [vmem:[%s3547_s17 + $0x78] sm:$0x3] }
  0x39   : > { %v796_v32 = vrot.slane %v220_v19, 1  ;;  %v1984_v33 = vsel %vm1924_vm3, %v1983_v17, %v1982_v29  ;;  %v797_v34 = vrot.slane %v221_v23, 1  ;;  %v1366_v35 = vmax.f32 %v214_v1, %v790_v24 }
  0x3a   : > { %v1367_v36 = vmax.f32 %v215_v6, %v791_v26  ;;  %v1986_v37 = vsel %vm1927_vm4, %v1985_v18, %v1984_v33  ;;  %v1368_v38 = vmax.f32 %v216_v7, %v792_v27  ;;  %v1369_v39 = vmax.f32 %v217_v8, %v793_v28  ;;  %v231_v18 = vld [vmem:[%s3547_s17 + $0x72] sm:$0x3]  ;;  %v235_v26 = vld [vmem:[%s3547_s17 + $0x7a] sm:$0x3] }
  0x3b   : > { %v1370_v40 = vmax.f32 %v218_v13, %v794_v30  ;;  %v1988_v44 = vsel %vm1930_vm5, %v1987_v21, %v1986_v37  ;;  %v1371_v45 = vmax.f32 %v219_v14, %v795_v31  ;;  %v1372_v46 = vmax.f32 %v220_v19, %v796_v32  ;;  %v230_v13 = vld [vmem:[%s3547_s17 + $0x70] sm:$0x3]  ;;  %v232_v19 = vld [vmem:[%s3547_s17 + $0x74] sm:$0x3]  ;;  %v236_v31 = vld [vmem:[%s3547_s17 + $0x7c] sm:$0x3] }
  0x3c   : > { %v1373_v47 = vmax.f32 %v221_v23, %v797_v34  ;;  %v1990_v51 = vsel %vm1933_vm6, %v1989_v22, %v1988_v44  ;;  %v1991_v52 = vrot.slane %v1367_v36, 7  ;;  %v1993_v53 = vrot.slane %v1368_v38, 6 }
  0x3d   : > { %v1995_v54 = vrot.slane %v1369_v39, 5  ;;  %3336 = vmatprep.mubr.msk.f32.mxu0 %vm2425_vm7, %v1990_v51  ;;  %3414 = vmatprep.mubr.msk.f32.mxu1 %vm2425_vm7, %v1990_v51  ;;  %v1997_v56 = vrot.slane %v1370_v40, 4  ;;  %v1999_v57 = vrot.slane %v1371_v45, 3  ;;  %v2001_v58 = vrot.slane %v1372_v46, 2 }
  0x3e   : > { %v2003_v59 = vrot.slane %v1373_v47, 1  ;;  %v1992_v61 = vsel %vm1915_vm0, %v1991_v52, %v1366_v35  ;;  %v798_v62 = vrot.slane %v222_v41, 1  ;;  %v799_v63 = vrot.slane %v223_v42, 1  ;;  %v237_v35 = vld [vmem:[%s3547_s17 + $0x7e] sm:$0x3] }
  0x3f   : > { %v800_v0 = vrot.slane %v224_v43, 1  ;;  %v1994_v1 = vsel %vm1918_vm1, %v1993_v53, %v1992_v61  ;;  %v801_v2 = vrot.slane %v225_v48, 1  ;;  %v802_v3 = vrot.slane %v226_v49, 1  ;;  %v238_v53 = vld [vmem:[%s3547_s17 + $0x80] sm:$0x3] }
  0x40   : > { %v803_v4 = vrot.slane %v227_v50, 1  ;;  %v1996_v5 = vsel %vm1921_vm2, %v1995_v54, %v1994_v1  ;;  %v804_v6 = vrot.slane %v228_v55, 1  ;;  %v805_v7 = vrot.slane %v229_v60, 1  ;;  %v239_v54 = vld [vmem:[%s3547_s17 + $0x82] sm:$0x3] }
  0x41   : > { %v1374_v8 = vmax.f32 %v222_v41, %v798_v62  ;;  %v1998_v9 = vsel %vm1924_vm3, %v1997_v56, %v1996_v5  ;;  %v1375_v10 = vmax.f32 %v223_v42, %v799_v63  ;;  %v1376_v11 = vmax.f32 %v224_v43, %v800_v0  ;;  %v242_v61 = vld [vmem:[%s3547_s17 + $0x88] sm:$0x3]  ;;  %v243_v62 = vld [vmem:[%s3547_s17 + $0x8a] sm:$0x3] }
  0x42   : > { %v1377_v12 = vmax.f32 %v225_v48, %v801_v2  ;;  %v2000_v14 = vsel %vm1927_vm4, %v1999_v57, %v1998_v9  ;;  %v1378_v15 = vmax.f32 %v226_v49, %v802_v3  ;;  %v1379_v16 = vmax.f32 %v227_v50, %v803_v4  ;;  %v244_v3 = vld [vmem:[%s3547_s17 + $0x8c] sm:$0x3] }
  0x43   : > { %v1380_v17 = vmax.f32 %v228_v55, %v804_v6  ;;  %v2002_v21 = vsel %vm1930_vm5, %v2001_v58, %v2000_v14  ;;  %v1381_v22 = vmax.f32 %v229_v60, %v805_v7  ;;  %v2005_v23 = vrot.slane %v1375_v10, 7  ;;  %v240_v55 = vld [vmem:[%s3547_s17 + $0x84] sm:$0x3]  ;;  %v241_v60 = vld [vmem:[%s3547_s17 + $0x86] sm:$0x3] }
  0x44   : > { %v2007_v24 = vrot.slane %v1376_v11, 6  ;;  %v2004_v27 = vsel %vm1933_vm6, %v2003_v59, %v2002_v21  ;;  %v2009_v28 = vrot.slane %v1377_v12, 5  ;;  %v2011_v29 = vrot.slane %v1378_v15, 4 }
  0x45   : > { %v2013_v30 = vrot.slane %v1379_v16, 3  ;;  %3337 = vmatmul.mubr.msk.f32.gmra.mxu0 %vm2425_vm7, %v2004_v27  ;;  %3415 = vmatmul.mubr.msk.f32.gmra.mxu1 %vm2425_vm7, %v2004_v27  ;;  %v2006_v32 = vsel %vm1915_vm0, %v2005_v23, %v1374_v8  ;;  %v2015_v33 = vrot.slane %v1380_v17, 2  ;;  %v2017_v34 = vrot.slane %v1381_v22, 1  ;;  %v245_v8 = vld [vmem:[%s3547_s17 + $0x8e] sm:$0x3] }
  0x46   : > { %v806_v36 = vrot.slane %v230_v13, 1  ;;  %v2008_v37 = vsel %vm1918_vm1, %v2007_v24, %v2006_v32  ;;  %v807_v38 = vrot.slane %v231_v18, 1  ;;  %v808_v39 = vrot.slane %v232_v19, 1  ;;  %v249_v32 = vld [vmem:[%s3547_s17 + $0x96] sm:$0x3] }
  0x47   : > { %v809_v40 = vrot.slane %v233_v20, 1  ;;  %v2010_v41 = vsel %vm1921_vm2, %v2009_v28, %v2008_v37  ;;  %v810_v42 = vrot.slane %v234_v25, 1  ;;  %v811_v43 = vrot.slane %v235_v26, 1  ;;  %v250_v37 = vld [vmem:[%s3547_s17 + $0x98] sm:$0x3] }
  0x48   : > { %v812_v44 = vrot.slane %v236_v31, 1  ;;  %v2012_v45 = vsel %vm1924_vm3, %v2011_v29, %v2010_v41  ;;  %v813_v46 = vrot.slane %v237_v35, 1  ;;  %v1382_v47 = vmax.f32 %v230_v13, %v806_v36 }
  0x49   : > { %v1383_v48 = vmax.f32 %v231_v18, %v807_v38  ;;  %v2014_v49 = vsel %vm1927_vm4, %v2013_v30, %v2012_v45  ;;  %v1384_v50 = vmax.f32 %v232_v19, %v808_v39  ;;  %v1385_v51 = vmax.f32 %v233_v20, %v809_v40  ;;  %v247_v30 = vld [vmem:[%s3547_s17 + $0x92] sm:$0x3]  ;;  %v251_v38 = vld [vmem:[%s3547_s17 + $0x9a] sm:$0x3] }
  0x4a   : > { %v1386_v52 = vmax.f32 %v234_v25, %v810_v42  ;;  %v2016_v56 = vsel %vm1930_vm5, %v2015_v33, %v2014_v49  ;;  %v1387_v57 = vmax.f32 %v235_v26, %v811_v43  ;;  %v1388_v58 = vmax.f32 %v236_v31, %v812_v44  ;;  %v246_v25 = vld [vmem:[%s3547_s17 + $0x90] sm:$0x3]  ;;  %v248_v31 = vld [vmem:[%s3547_s17 + $0x94] sm:$0x3]  ;;  %v252_v43 = vld [vmem:[%s3547_s17 + $0x9c] sm:$0x3] }
  0x4b   : > { %v1389_v59 = vmax.f32 %v237_v35, %v813_v46  ;;  %v2018_v63 = vsel %vm1933_vm6, %v2017_v34, %v2016_v56  ;;  %v2019_v0 = vrot.slane %v1383_v48, 7  ;;  %v2021_v1 = vrot.slane %v1384_v50, 6 }
  0x4c   : > { %v2023_v2 = vrot.slane %v1385_v51, 5  ;;  %3339 = vmatprep.mubr.msk.f32.mxu0 %vm2425_vm7, %v2018_v63  ;;  %3417 = vmatprep.mubr.msk.f32.mxu1 %vm2425_vm7, %v2018_v63  ;;  %v2025_v4 = vrot.slane %v1386_v52, 4  ;;  %v2027_v5 = vrot.slane %v1387_v57, 3  ;;  %v2029_v6 = vrot.slane %v1388_v58, 2 }
  0x4d   : > { %v2031_v7 = vrot.slane %v1389_v59, 1  ;;  %v2020_v9 = vsel %vm1915_vm0, %v2019_v0, %v1382_v47  ;;  %v814_v10 = vrot.slane %v238_v53, 1  ;;  %v815_v11 = vrot.slane %v239_v54, 1  ;;  %v253_v47 = vld [vmem:[%s3547_s17 + $0x9e] sm:$0x3] }
  0x4e   : > { %v816_v12 = vrot.slane %v240_v55, 1  ;;  %v2022_v13 = vsel %vm1918_vm1, %v2021_v1, %v2020_v9  ;;  %v817_v14 = vrot.slane %v241_v60, 1  ;;  %v818_v15 = vrot.slane %v242_v61, 1  ;;  %v254_v1 = vld [vmem:[%s3547_s17 + $0xa0] sm:$0x3] }
  0x4f   : > { %v819_v16 = vrot.slane %v243_v62, 1  ;;  %v2024_v17 = vsel %vm1921_vm2, %v2023_v2, %v2022_v13  ;;  %v820_v18 = vrot.slane %v244_v3, 1  ;;  %v821_v19 = vrot.slane %v245_v8, 1  ;;  %v255_v2 = vld [vmem:[%s3547_s17 + $0xa2] sm:$0x3] }
  0x50   : > { %v1390_v20 = vmax.f32 %v238_v53, %v814_v10  ;;  %v2026_v21 = vsel %vm1924_vm3, %v2025_v4, %v2024_v17  ;;  %v1391_v22 = vmax.f32 %v239_v54, %v815_v11  ;;  %v1392_v23 = vmax.f32 %v240_v55, %v816_v12  ;;  %v258_v9 = vld [vmem:[%s3547_s17 + $0xa8] sm:$0x3]  ;;  %v259_v10 = vld [vmem:[%s3547_s17 + $0xaa] sm:$0x3] }
  0x51   : > { %v1393_v24 = vmax.f32 %v241_v60, %v817_v14  ;;  %v2028_v26 = vsel %vm1927_vm4, %v2027_v5, %v2026_v21  ;;  %v1394_v27 = vmax.f32 %v242_v61, %v818_v15  ;;  %v1395_v28 = vmax.f32 %v243_v62, %v819_v16  ;;  %v260_v15 = vld [vmem:[%s3547_s17 + $0xac] sm:$0x3] }
  0x52   : > { %v1396_v29 = vmax.f32 %v244_v3, %v820_v18  ;;  %v2030_v33 = vsel %vm1930_vm5, %v2029_v6, %v2028_v26  ;;  %v1397_v34 = vmax.f32 %v245_v8, %v821_v19  ;;  %v2033_v35 = vrot.slane %v1391_v22, 7  ;;  %v256_v3 = vld [vmem:[%s3547_s17 + $0xa4] sm:$0x3]  ;;  %v257_v8 = vld [vmem:[%s3547_s17 + $0xa6] sm:$0x3] }
  0x53   : > { %v2035_v36 = vrot.slane %v1392_v23, 6  ;;  %v2032_v39 = vsel %vm1933_vm6, %v2031_v7, %v2030_v33  ;;  %v2037_v40 = vrot.slane %v1393_v24, 5  ;;  %v2039_v41 = vrot.slane %v1394_v27, 4 }
  0x54   : > { %v2041_v42 = vrot.slane %v1395_v28, 3  ;;  %3340 = vmatmul.mubr.msk.f32.gmra.mxu0 %vm2425_vm7, %v2032_v39  ;;  %3418 = vmatmul.mubr.msk.f32.gmra.mxu1 %vm2425_vm7, %v2032_v39  ;;  %v2034_v44 = vsel %vm1915_vm0, %v2033_v35, %v1390_v20  ;;  %v2043_v45 = vrot.slane %v1396_v29, 2  ;;  %v2045_v46 = vrot.slane %v1397_v34, 1  ;;  %v261_v20 = vld [vmem:[%s3547_s17 + $0xae] sm:$0x3] }
  0x55   : > { %v822_v48 = vrot.slane %v246_v25, 1  ;;  %v2036_v49 = vsel %vm1918_vm1, %v2035_v36, %v2034_v44  ;;  %v823_v50 = vrot.slane %v247_v30, 1  ;;  %v824_v51 = vrot.slane %v248_v31, 1  ;;  %v265_v44 = vld [vmem:[%s3547_s17 + $0xb6] sm:$0x3] }
  0x56   : > { %v825_v52 = vrot.slane %v249_v32, 1  ;;  %v2038_v53 = vsel %vm1921_vm2, %v2037_v40, %v2036_v49  ;;  %v826_v54 = vrot.slane %v250_v37, 1  ;;  %v827_v55 = vrot.slane %v251_v38, 1  ;;  %v266_v49 = vld [vmem:[%s3547_s17 + $0xb8] sm:$0x3] }
  0x57   : > { %v828_v56 = vrot.slane %v252_v43, 1  ;;  %v2040_v57 = vsel %vm1924_vm3, %v2039_v41, %v2038_v53  ;;  %v829_v58 = vrot.slane %v253_v47, 1  ;;  %v1398_v59 = vmax.f32 %v246_v25, %v822_v48 }
  0x58   : > { %v1399_v60 = vmax.f32 %v247_v30, %v823_v50  ;;  %v2042_v61 = vsel %vm1927_vm4, %v2041_v42, %v2040_v57  ;;  %v1400_v62 = vmax.f32 %v248_v31, %v824_v51  ;;  %v1401_v63 = vmax.f32 %v249_v32, %v825_v52  ;;  %v263_v42 = vld [vmem:[%s3547_s17 + $0xb2] sm:$0x3]  ;;  %v267_v50 = vld [vmem:[%s3547_s17 + $0xba] sm:$0x3] }
  0x59   : > { %v1402_v0 = vmax.f32 %v250_v37, %v826_v54  ;;  %v2044_v4 = vsel %vm1930_vm5, %v2043_v45, %v2042_v61  ;;  %v1403_v5 = vmax.f32 %v251_v38, %v827_v55  ;;  %v1404_v6 = vmax.f32 %v252_v43, %v828_v56  ;;  %v262_v37 = vld [vmem:[%s3547_s17 + $0xb0] sm:$0x3]  ;;  %v264_v43 = vld [vmem:[%s3547_s17 + $0xb4] sm:$0x3]  ;;  %v268_v55 = vld [vmem:[%s3547_s17 + $0xbc] sm:$0x3] }
  0x5a   : > { %v1405_v7 = vmax.f32 %v253_v47, %v829_v58  ;;  %v2046_v11 = vsel %vm1933_vm6, %v2045_v46, %v2044_v4  ;;  %v2047_v12 = vrot.slane %v1399_v60, 7  ;;  %v2049_v13 = vrot.slane %v1400_v62, 6 }
  0x5b   : > { %v2051_v14 = vrot.slane %v1401_v63, 5  ;;  %3342 = vmatprep.mubr.msk.f32.mxu0 %vm2425_vm7, %v2046_v11  ;;  %3420 = vmatprep.mubr.msk.f32.mxu1 %vm2425_vm7, %v2046_v11  ;;  %v2053_v16 = vrot.slane %v1402_v0, 4  ;;  %v2055_v17 = vrot.slane %v1403_v5, 3  ;;  %v2057_v18 = vrot.slane %v1404_v6, 2 }
  0x5c   : > { %v2059_v19 = vrot.slane %v1405_v7, 1  ;;  %v2048_v21 = vsel %vm1915_vm0, %v2047_v12, %v1398_v59  ;;  %v830_v22 = vrot.slane %v254_v1, 1  ;;  %v831_v23 = vrot.slane %v255_v2, 1  ;;  %v269_v59 = vld [vmem:[%s3547_s17 + $0xbe] sm:$0x3] }
  0x5d   : > { %v832_v24 = vrot.slane %v256_v3, 1  ;;  %v2050_v25 = vsel %vm1918_vm1, %v2049_v13, %v2048_v21  ;;  %v833_v26 = vrot.slane %v257_v8, 1  ;;  %v834_v27 = vrot.slane %v258_v9, 1  ;;  %v270_v13 = vld [vmem:[%s3547_s17 + $0xc0] sm:$0x3] }
  0x5e   : > { %v835_v28 = vrot.slane %v259_v10, 1  ;;  %v2052_v29 = vsel %vm1921_vm2, %v2051_v14, %v2050_v25  ;;  %v836_v30 = vrot.slane %v260_v15, 1  ;;  %v837_v31 = vrot.slane %v261_v20, 1  ;;  %v271_v14 = vld [vmem:[%s3547_s17 + $0xc2] sm:$0x3] }
  0x5f   : > { %v1406_v32 = vmax.f32 %v254_v1, %v830_v22  ;;  %v2054_v33 = vsel %vm1924_vm3, %v2053_v16, %v2052_v29  ;;  %v1407_v34 = vmax.f32 %v255_v2, %v831_v23  ;;  %v1408_v35 = vmax.f32 %v256_v3, %v832_v24  ;;  %v274_v21 = vld [vmem:[%s3547_s17 + $0xc8] sm:$0x3]  ;;  %v275_v22 = vld [vmem:[%s3547_s17 + $0xca] sm:$0x3] }
  0x60   : > { %v1409_v36 = vmax.f32 %v257_v8, %v833_v26  ;;  %v2056_v38 = vsel %vm1927_vm4, %v2055_v17, %v2054_v33  ;;  %v1410_v39 = vmax.f32 %v258_v9, %v834_v27  ;;  %v1411_v40 = vmax.f32 %v259_v10, %v835_v28  ;;  %v276_v27 = vld [vmem:[%s3547_s17 + $0xcc] sm:$0x3] }
  0x61   : > { %v1412_v41 = vmax.f32 %v260_v15, %v836_v30  ;;  %v2058_v45 = vsel %vm1930_vm5, %v2057_v18, %v2056_v38  ;;  %v1413_v46 = vmax.f32 %v261_v20, %v837_v31  ;;  %v2061_v47 = vrot.slane %v1407_v34, 7  ;;  %v272_v15 = vld [vmem:[%s3547_s17 + $0xc4] sm:$0x3]  ;;  %v273_v20 = vld [vmem:[%s3547_s17 + $0xc6] sm:$0x3] }
  0x62   : > { %v2063_v48 = vrot.slane %v1408_v35, 6  ;;  %v2060_v51 = vsel %vm1933_vm6, %v2059_v19, %v2058_v45  ;;  %v2065_v52 = vrot.slane %v1409_v36, 5  ;;  %v2067_v53 = vrot.slane %v1410_v39, 4 }
  0x63   : > { %v2069_v54 = vrot.slane %v1411_v40, 3  ;;  %3343 = vmatmul.mubr.msk.f32.gmra.mxu0 %vm2425_vm7, %v2060_v51  ;;  %3421 = vmatmul.mubr.msk.f32.gmra.mxu1 %vm2425_vm7, %v2060_v51  ;;  %v2062_v56 = vsel %vm1915_vm0, %v2061_v47, %v1406_v32  ;;  %v2071_v57 = vrot.slane %v1412_v41, 2  ;;  %v2073_v58 = vrot.slane %v1413_v46, 1  ;;  %v277_v32 = vld [vmem:[%s3547_s17 + $0xce] sm:$0x3] }
  0x64   : > { %v838_v60 = vrot.slane %v262_v37, 1  ;;  %v2064_v61 = vsel %vm1918_vm1, %v2063_v48, %v2062_v56  ;;  %v839_v62 = vrot.slane %v263_v42, 1  ;;  %v840_v63 = vrot.slane %v264_v43, 1  ;;  %v281_v56 = vld [vmem:[%s3547_s17 + $0xd6] sm:$0x3] }
  0x65   : > { %v841_v0 = vrot.slane %v265_v44, 1  ;;  %v2066_v1 = vsel %vm1921_vm2, %v2065_v52, %v2064_v61  ;;  %v842_v2 = vrot.slane %v266_v49, 1  ;;  %v843_v3 = vrot.slane %v267_v50, 1  ;;  %v282_v61 = vld [vmem:[%s3547_s17 + $0xd8] sm:$0x3] }
  0x66   : > { %v844_v4 = vrot.slane %v268_v55, 1  ;;  %v2068_v5 = vsel %vm1924_vm3, %v2067_v53, %v2066_v1  ;;  %v845_v6 = vrot.slane %v269_v59, 1  ;;  %v1414_v7 = vmax.f32 %v262_v37, %v838_v60 }
  0x67   : > { %v1415_v8 = vmax.f32 %v263_v42, %v839_v62  ;;  %v2070_v9 = vsel %vm1927_vm4, %v2069_v54, %v2068_v5  ;;  %v1416_v10 = vmax.f32 %v264_v43, %v840_v63  ;;  %v1417_v11 = vmax.f32 %v265_v44, %v841_v0  ;;  %v279_v54 = vld [vmem:[%s3547_s17 + $0xd2] sm:$0x3]  ;;  %v283_v62 = vld [vmem:[%s3547_s17 + $0xda] sm:$0x3] }
  0x68   : > { %v1418_v12 = vmax.f32 %v266_v49, %v842_v2  ;;  %v2072_v16 = vsel %vm1930_vm5, %v2071_v57, %v2070_v9  ;;  %v1419_v17 = vmax.f32 %v267_v50, %v843_v3  ;;  %v1420_v18 = vmax.f32 %v268_v55, %v844_v4  ;;  %v278_v49 = vld [vmem:[%s3547_s17 + $0xd0] sm:$0x3]  ;;  %v280_v55 = vld [vmem:[%s3547_s17 + $0xd4] sm:$0x3]  ;;  %v284_v3 = vld [vmem:[%s3547_s17 + $0xdc] sm:$0x3] }
  0x69   : > { %v1421_v19 = vmax.f32 %v269_v59, %v845_v6  ;;  %v2074_v23 = vsel %vm1933_vm6, %v2073_v58, %v2072_v16  ;;  %v2075_v24 = vrot.slane %v1415_v8, 7  ;;  %v2077_v25 = vrot.slane %v1416_v10, 6 }
  0x6a   : > { %v2079_v26 = vrot.slane %v1417_v11, 5  ;;  %3345 = vmatprep.mubr.msk.f32.mxu0 %vm2425_vm7, %v2074_v23  ;;  %3423 = vmatprep.mubr.msk.f32.mxu1 %vm2425_vm7, %v2074_v23  ;;  %v2081_v28 = vrot.slane %v1418_v12, 4  ;;  %v2083_v29 = vrot.slane %v1419_v17, 3  ;;  %v2085_v30 = vrot.slane %v1420_v18, 2 }
  0x6b   : > { %v2087_v31 = vrot.slane %v1421_v19, 1  ;;  %v2076_v33 = vsel %vm1915_vm0, %v2075_v24, %v1414_v7  ;;  %v846_v34 = vrot.slane %v270_v13, 1  ;;  %v847_v35 = vrot.slane %v271_v14, 1  ;;  %v285_v7 = vld [vmem:[%s3547_s17 + $0xde] sm:$0x3] }
  0x6c   : > { %v848_v36 = vrot.slane %v272_v15, 1  ;;  %v2078_v37 = vsel %vm1918_vm1, %v2077_v25, %v2076_v33  ;;  %v849_v38 = vrot.slane %v273_v20, 1  ;;  %v850_v39 = vrot.slane %v274_v21, 1  ;;  %v286_v25 = vld [vmem:[%s3547_s17 + $0xe0] sm:$0x3] }
  0x6d   : > { %v851_v40 = vrot.slane %v275_v22, 1  ;;  %v2080_v41 = vsel %vm1921_vm2, %v2079_v26, %v2078_v37  ;;  %v852_v42 = vrot.slane %v276_v27, 1  ;;  %v853_v43 = vrot.slane %v277_v32, 1  ;;  %v287_v26 = vld [vmem:[%s3547_s17 + $0xe2] sm:$0x3] }
  0x6e   : > { %v1422_v44 = vmax.f32 %v270_v13, %v846_v34  ;;  %v2082_v45 = vsel %vm1924_vm3, %v2081_v28, %v2080_v41  ;;  %v1423_v46 = vmax.f32 %v271_v14, %v847_v35  ;;  %v1424_v47 = vmax.f32 %v272_v15, %v848_v36  ;;  %v290_v33 = vld [vmem:[%s3547_s17 + $0xe8] sm:$0x3]  ;;  %v291_v34 = vld [vmem:[%s3547_s17 + $0xea] sm:$0x3] }
  0x6f   : > { %v1425_v48 = vmax.f32 %v273_v20, %v849_v38  ;;  %v2084_v50 = vsel %vm1927_vm4, %v2083_v29, %v2082_v45  ;;  %v1426_v51 = vmax.f32 %v274_v21, %v850_v39  ;;  %v1427_v52 = vmax.f32 %v275_v22, %v851_v40  ;;  %v292_v39 = vld [vmem:[%s3547_s17 + $0xec] sm:$0x3] }
  0x70   : > { %v1428_v53 = vmax.f32 %v276_v27, %v852_v42  ;;  %v2086_v57 = vsel %vm1930_vm5, %v2085_v30, %v2084_v50  ;;  %v1429_v58 = vmax.f32 %v277_v32, %v853_v43  ;;  %v2089_v59 = vrot.slane %v1423_v46, 7  ;;  %v288_v27 = vld [vmem:[%s3547_s17 + $0xe4] sm:$0x3]  ;;  %v289_v32 = vld [vmem:[%s3547_s17 + $0xe6] sm:$0x3] }
  0x71   : > { %v2091_v60 = vrot.slane %v1424_v47, 6  ;;  %v2088_v63 = vsel %vm1933_vm6, %v2087_v31, %v2086_v57  ;;  %v2093_v0 = vrot.slane %v1425_v48, 5  ;;  %v2095_v1 = vrot.slane %v1426_v51, 4 }
  0x72   : > { %v2097_v2 = vrot.slane %v1427_v52, 3  ;;  %3346 = vmatmul.mubr.msk.f32.gmra.mxu0 %vm2425_vm7, %v2088_v63  ;;  %3424 = vmatmul.mubr.msk.f32.gmra.mxu1 %vm2425_vm7, %v2088_v63  ;;  %v2090_v4 = vsel %vm1915_vm0, %v2089_v59, %v1422_v44  ;;  %v2099_v5 = vrot.slane %v1428_v53, 2  ;;  %v2101_v6 = vrot.slane %v1429_v58, 1  ;;  %v293_v44 = vld [vmem:[%s3547_s17 + $0xee] sm:$0x3] }
  0x73   : > { %v854_v8 = vrot.slane %v278_v49, 1  ;;  %v2092_v9 = vsel %vm1918_vm1, %v2091_v60, %v2090_v4  ;;  %v855_v10 = vrot.slane %v279_v54, 1  ;;  %v856_v11 = vrot.slane %v280_v55, 1  ;;  %v297_v4 = vld [vmem:[%s3547_s17 + $0xf6] sm:$0x3] }
  0x74   : > { %v857_v12 = vrot.slane %v281_v56, 1  ;;  %v2094_v13 = vsel %vm1921_vm2, %v2093_v0, %v2092_v9  ;;  %v858_v14 = vrot.slane %v282_v61, 1  ;;  %v859_v15 = vrot.slane %v283_v62, 1  ;;  %v298_v9 = vld [vmem:[%s3547_s17 + $0xf8] sm:$0x3] }
  0x75   : > { %v860_v16 = vrot.slane %v284_v3, 1  ;;  %v2096_v17 = vsel %vm1924_vm3, %v2095_v1, %v2094_v13  ;;  %v861_v18 = vrot.slane %v285_v7, 1  ;;  %v1430_v19 = vmax.f32 %v278_v49, %v854_v8 }
  0x76   : > { %v1431_v20 = vmax.f32 %v279_v54, %v855_v10  ;;  %v2098_v21 = vsel %vm1927_vm4, %v2097_v2, %v2096_v17  ;;  %v1432_v22 = vmax.f32 %v280_v55, %v856_v11  ;;  %v1433_v23 = vmax.f32 %v281_v56, %v857_v12  ;;  %v295_v2 = vld [vmem:[%s3547_s17 + $0xf2] sm:$0x3]  ;;  %v299_v10 = vld [vmem:[%s3547_s17 + $0xfa] sm:$0x3] }
  0x77   : > { %v1434_v24 = vmax.f32 %v282_v61, %v858_v14  ;;  %v2100_v28 = vsel %vm1930_vm5, %v2099_v5, %v2098_v21  ;;  %v1435_v29 = vmax.f32 %v283_v62, %v859_v15  ;;  %v1436_v30 = vmax.f32 %v284_v3, %v860_v16  ;;  %v294_v61 = vld [vmem:[%s3547_s17 + $0xf0] sm:$0x3]  ;;  %v296_v3 = vld [vmem:[%s3547_s17 + $0xf4] sm:$0x3]  ;;  %v300_v15 = vld [vmem:[%s3547_s17 + $0xfc] sm:$0x3] }
  0x78   : > { %v1437_v31 = vmax.f32 %v285_v7, %v861_v18  ;;  %v2102_v35 = vsel %vm1933_vm6, %v2101_v6, %v2100_v28  ;;  %v2103_v36 = vrot.slane %v1431_v20, 7  ;;  %v2105_v37 = vrot.slane %v1432_v22, 6 }
  0x79   : > { %v2107_v38 = vrot.slane %v1433_v23, 5  ;;  %3348 = vmatprep.mubr.msk.f32.mxu0 %vm2425_vm7, %v2102_v35  ;;  %3426 = vmatprep.mubr.msk.f32.mxu1 %vm2425_vm7, %v2102_v35  ;;  %v2109_v40 = vrot.slane %v1434_v24, 4  ;;  %v2111_v41 = vrot.slane %v1435_v29, 3  ;;  %v2113_v42 = vrot.slane %v1436_v30, 2 }
  0x7a   : > { %v2115_v43 = vrot.slane %v1437_v31, 1  ;;  %v2104_v45 = vsel %vm1915_vm0, %v2103_v36, %v1430_v19  ;;  %v862_v46 = vrot.slane %v286_v25, 1  ;;  %v863_v47 = vrot.slane %v287_v26, 1  ;;  %v301_v19 = vld [vmem:[%s3547_s17 + $0xfe] sm:$0x3] }
  0x7b   : > { %v864_v48 = vrot.slane %v288_v27, 1  ;;  %v2106_v49 = vsel %vm1918_vm1, %v2105_v37, %v2104_v45  ;;  %v865_v50 = vrot.slane %v289_v32, 1  ;;  %v866_v51 = vrot.slane %v290_v33, 1  ;;  %v302_v37 = vld [vmem:[%s3547_s17 + $0x100] sm:$0x3] }
  0x7c   : > { %v867_v52 = vrot.slane %v291_v34, 1  ;;  %v2108_v53 = vsel %vm1921_vm2, %v2107_v38, %v2106_v49  ;;  %v868_v54 = vrot.slane %v292_v39, 1  ;;  %v869_v55 = vrot.slane %v293_v44, 1  ;;  %v303_v38 = vld [vmem:[%s3547_s17 + $0x102] sm:$0x3] }
  0x7d   : > { %v1438_v56 = vmax.f32 %v286_v25, %v862_v46  ;;  %v2110_v57 = vsel %vm1924_vm3, %v2109_v40, %v2108_v53  ;;  %v1439_v58 = vmax.f32 %v287_v26, %v863_v47  ;;  %v1440_v59 = vmax.f32 %v288_v27, %v864_v48  ;;  %v306_v45 = vld [vmem:[%s3547_s17 + $0x108] sm:$0x3]  ;;  %v307_v46 = vld [vmem:[%s3547_s17 + $0x10a] sm:$0x3] }
  0x7e   : > { %v1441_v60 = vmax.f32 %v289_v32, %v865_v50  ;;  %v2112_v62 = vsel %vm1927_vm4, %v2111_v41, %v2110_v57  ;;  %v1442_v63 = vmax.f32 %v290_v33, %v866_v51  ;;  %v1443_v0 = vmax.f32 %v291_v34, %v867_v52  ;;  %v308_v51 = vld [vmem:[%s3547_s17 + $0x10c] sm:$0x3] }
  0x7f   : > { %v1444_v1 = vmax.f32 %v292_v39, %v868_v54  ;;  %v2114_v5 = vsel %vm1930_vm5, %v2113_v42, %v2112_v62  ;;  %v1445_v6 = vmax.f32 %v293_v44, %v869_v55  ;;  %v2117_v7 = vrot.slane %v1439_v58, 7  ;;  %v304_v39 = vld [vmem:[%s3547_s17 + $0x104] sm:$0x3]  ;;  %v305_v44 = vld [vmem:[%s3547_s17 + $0x106] sm:$0x3] }
  0x80   : > { %v2119_v8 = vrot.slane %v1440_v59, 6  ;;  %v2116_v11 = vsel %vm1933_vm6, %v2115_v43, %v2114_v5  ;;  %v2121_v12 = vrot.slane %v1441_v60, 5  ;;  %v2123_v13 = vrot.slane %v1442_v63, 4 }
  0x81   : > { %v2125_v14 = vrot.slane %v1443_v0, 3  ;;  %3349 = vmatmul.mubr.msk.f32.gmra.mxu0 %vm2425_vm7, %v2116_v11  ;;  %3427 = vmatmul.mubr.msk.f32.gmra.mxu1 %vm2425_vm7, %v2116_v11  ;;  %v2118_v16 = vsel %vm1915_vm0, %v2117_v7, %v1438_v56  ;;  %v2127_v17 = vrot.slane %v1444_v1, 2  ;;  %v2129_v18 = vrot.slane %v1445_v6, 1  ;;  %v309_v56 = vld [vmem:[%s3547_s17 + $0x10e] sm:$0x3] }
  0x82   : > { %v870_v20 = vrot.slane %v294_v61, 1  ;;  %v2120_v21 = vsel %vm1918_vm1, %v2119_v8, %v2118_v16  ;;  %v871_v22 = vrot.slane %v295_v2, 1  ;;  %v872_v23 = vrot.slane %v296_v3, 1  ;;  %v313_v16 = vld [vmem:[%s3547_s17 + $0x116] sm:$0x3] }
  0x83   : > { %v873_v24 = vrot.slane %v297_v4, 1  ;;  %v2122_v25 = vsel %vm1921_vm2, %v2121_v12, %v2120_v21  ;;  %v874_v26 = vrot.slane %v298_v9, 1  ;;  %v875_v27 = vrot.slane %v299_v10, 1  ;;  %v314_v21 = vld [vmem:[%s3547_s17 + $0x118] sm:$0x3] }
  0x84   : > { %v876_v28 = vrot.slane %v300_v15, 1  ;;  %v2124_v29 = vsel %vm1924_vm3, %v2123_v13, %v2122_v25  ;;  %v877_v30 = vrot.slane %v301_v19, 1  ;;  %v1446_v31 = vmax.f32 %v294_v61, %v870_v20 }
  0x85   : > { %v1447_v32 = vmax.f32 %v295_v2, %v871_v22  ;;  %v2126_v33 = vsel %vm1927_vm4, %v2125_v14, %v2124_v29  ;;  %v1448_v34 = vmax.f32 %v296_v3, %v872_v23  ;;  %v1449_v35 = vmax.f32 %v297_v4, %v873_v24  ;;  %v311_v14 = vld [vmem:[%s3547_s17 + $0x112] sm:$0x3]  ;;  %v315_v22 = vld [vmem:[%s3547_s17 + $0x11a] sm:$0x3] }
  0x86   : > { %v1450_v36 = vmax.f32 %v298_v9, %v874_v26  ;;  %v2128_v40 = vsel %vm1930_vm5, %v2127_v17, %v2126_v33  ;;  %v1451_v41 = vmax.f32 %v299_v10, %v875_v27  ;;  %v1452_v42 = vmax.f32 %v300_v15, %v876_v28  ;;  %v310_v9 = vld [vmem:[%s3547_s17 + $0x110] sm:$0x3]  ;;  %v312_v15 = vld [vmem:[%s3547_s17 + $0x114] sm:$0x3]  ;;  %v316_v27 = vld [vmem:[%s3547_s17 + $0x11c] sm:$0x3] }
  0x87   : > { %v1453_v43 = vmax.f32 %v301_v19, %v877_v30  ;;  %v2130_v47 = vsel %vm1933_vm6, %v2129_v18, %v2128_v40  ;;  %v2131_v48 = vrot.slane %v1447_v32, 7  ;;  %v2133_v49 = vrot.slane %v1448_v34, 6 }
  0x88   : > { %v2135_v50 = vrot.slane %v1449_v35, 5  ;;  %3351 = vmatprep.mubr.msk.f32.mxu0 %vm2425_vm7, %v2130_v47  ;;  %3429 = vmatprep.mubr.msk.f32.mxu1 %vm2425_vm7, %v2130_v47  ;;  %v2137_v52 = vrot.slane %v1450_v36, 4  ;;  %v2139_v53 = vrot.slane %v1451_v41, 3  ;;  %v2141_v54 = vrot.slane %v1452_v42, 2 }
  0x89   : > { %v2143_v55 = vrot.slane %v1453_v43, 1  ;;  %v2132_v57 = vsel %vm1915_vm0, %v2131_v48, %v1446_v31  ;;  %v878_v58 = vrot.slane %v302_v37, 1  ;;  %v879_v59 = vrot.slane %v303_v38, 1  ;;  %v317_v31 = vld [vmem:[%s3547_s17 + $0x11e] sm:$0x3] }
  0x8a   : > { %v880_v60 = vrot.slane %v304_v39, 1  ;;  %v2134_v61 = vsel %vm1918_vm1, %v2133_v49, %v2132_v57  ;;  %v881_v62 = vrot.slane %v305_v44, 1  ;;  %v882_v63 = vrot.slane %v306_v45, 1  ;;  %v318_v49 = vld [vmem:[%s3547_s17 + $0x120] sm:$0x3] }
  0x8b   : > { %v883_v0 = vrot.slane %v307_v46, 1  ;;  %v2136_v1 = vsel %vm1921_vm2, %v2135_v50, %v2134_v61  ;;  %v884_v2 = vrot.slane %v308_v51, 1  ;;  %v885_v3 = vrot.slane %v309_v56, 1  ;;  %v319_v50 = vld [vmem:[%s3547_s17 + $0x122] sm:$0x3] }
  0x8c   : > { %v1454_v4 = vmax.f32 %v302_v37, %v878_v58  ;;  %v2138_v5 = vsel %vm1924_vm3, %v2137_v52, %v2136_v1  ;;  %v1455_v6 = vmax.f32 %v303_v38, %v879_v59  ;;  %v1456_v7 = vmax.f32 %v304_v39, %v880_v60  ;;  %v322_v57 = vld [vmem:[%s3547_s17 + $0x128] sm:$0x3]  ;;  %v323_v58 = vld [vmem:[%s3547_s17 + $0x12a] sm:$0x3] }
  0x8d   : > { %v1457_v8 = vmax.f32 %v305_v44, %v881_v62  ;;  %v2140_v10 = vsel %vm1927_vm4, %v2139_v53, %v2138_v5  ;;  %v1458_v11 = vmax.f32 %v306_v45, %v882_v63  ;;  %v1459_v12 = vmax.f32 %v307_v46, %v883_v0  ;;  %v324_v63 = vld [vmem:[%s3547_s17 + $0x12c] sm:$0x3] }
  0x8e   : > { %v1460_v13 = vmax.f32 %v308_v51, %v884_v2  ;;  %v2142_v17 = vsel %vm1930_vm5, %v2141_v54, %v2140_v10  ;;  %v1461_v18 = vmax.f32 %v309_v56, %v885_v3  ;;  %v2145_v19 = vrot.slane %v1455_v6, 7  ;;  %v320_v51 = vld [vmem:[%s3547_s17 + $0x124] sm:$0x3]  ;;  %v321_v56 = vld [vmem:[%s3547_s17 + $0x126] sm:$0x3] }
  0x8f   : > { %v2147_v20 = vrot.slane %v1456_v7, 6  ;;  %v2144_v23 = vsel %vm1933_vm6, %v2143_v55, %v2142_v17  ;;  %v2149_v24 = vrot.slane %v1457_v8, 5  ;;  %v2151_v25 = vrot.slane %v1458_v11, 4 }
  0x90   : > { %v2153_v26 = vrot.slane %v1459_v12, 3  ;;  %3352 = vmatmul.mubr.msk.f32.gmra.mxu0 %vm2425_vm7, %v2144_v23  ;;  %3430 = vmatmul.mubr.msk.f32.gmra.mxu1 %vm2425_vm7, %v2144_v23  ;;  %v2146_v28 = vsel %vm1915_vm0, %v2145_v19, %v1454_v4  ;;  %v2155_v29 = vrot.slane %v1460_v13, 2  ;;  %v2157_v30 = vrot.slane %v1461_v18, 1  ;;  %v325_v4 = vld [vmem:[%s3547_s17 + $0x12e] sm:$0x3] }
  0x91   : > { %v886_v32 = vrot.slane %v310_v9, 1  ;;  %v2148_v33 = vsel %vm1918_vm1, %v2147_v20, %v2146_v28  ;;  %v887_v34 = vrot.slane %v311_v14, 1  ;;  %v888_v35 = vrot.slane %v312_v15, 1  ;;  %v329_v28 = vld [vmem:[%s3547_s17 + $0x136] sm:$0x3] }
  0x92   : > { %v889_v36 = vrot.slane %v313_v16, 1  ;;  %v2150_v37 = vsel %vm1921_vm2, %v2149_v24, %v2148_v33  ;;  %v890_v38 = vrot.slane %v314_v21, 1  ;;  %v891_v39 = vrot.slane %v315_v22, 1  ;;  %v330_v33 = vld [vmem:[%s3547_s17 + $0x138] sm:$0x3] }
  0x93   : > { %v892_v40 = vrot.slane %v316_v27, 1  ;;  %v2152_v41 = vsel %vm1924_vm3, %v2151_v25, %v2150_v37  ;;  %v893_v42 = vrot.slane %v317_v31, 1  ;;  %v1462_v43 = vmax.f32 %v310_v9, %v886_v32 }
  0x94   : > { %v1463_v44 = vmax.f32 %v311_v14, %v887_v34  ;;  %v2154_v45 = vsel %vm1927_vm4, %v2153_v26, %v2152_v41  ;;  %v1464_v46 = vmax.f32 %v312_v15, %v888_v35  ;;  %v1465_v47 = vmax.f32 %v313_v16, %v889_v36  ;;  %v327_v26 = vld [vmem:[%s3547_s17 + $0x132] sm:$0x3]  ;;  %v331_v34 = vld [vmem:[%s3547_s17 + $0x13a] sm:$0x3] }
  0x95   : > { %v1466_v48 = vmax.f32 %v314_v21, %v890_v38  ;;  %v2156_v52 = vsel %vm1930_vm5, %v2155_v29, %v2154_v45  ;;  %v1467_v53 = vmax.f32 %v315_v22, %v891_v39  ;;  %v1468_v54 = vmax.f32 %v316_v27, %v892_v40  ;;  %v326_v21 = vld [vmem:[%s3547_s17 + $0x130] sm:$0x3]  ;;  %v328_v27 = vld [vmem:[%s3547_s17 + $0x134] sm:$0x3]  ;;  %v332_v39 = vld [vmem:[%s3547_s17 + $0x13c] sm:$0x3] }
  0x96   : > { %v1469_v55 = vmax.f32 %v317_v31, %v893_v42  ;;  %v2158_v59 = vsel %vm1933_vm6, %v2157_v30, %v2156_v52  ;;  %v2159_v60 = vrot.slane %v1463_v44, 7  ;;  %v2161_v61 = vrot.slane %v1464_v46, 6 }
  0x97   : > { %v2163_v62 = vrot.slane %v1465_v47, 5  ;;  %3354 = vmatprep.mubr.msk.f32.mxu0 %vm2425_vm7, %v2158_v59  ;;  %3432 = vmatprep.mubr.msk.f32.mxu1 %vm2425_vm7, %v2158_v59  ;;  %v2165_v0 = vrot.slane %v1466_v48, 4  ;;  %v2167_v1 = vrot.slane %v1467_v53, 3  ;;  %v2169_v2 = vrot.slane %v1468_v54, 2 }
  0x98   : > { %v2171_v3 = vrot.slane %v1469_v55, 1  ;;  %v2160_v5 = vsel %vm1915_vm0, %v2159_v60, %v1462_v43  ;;  %v894_v6 = vrot.slane %v318_v49, 1  ;;  %v895_v7 = vrot.slane %v319_v50, 1  ;;  %v333_v43 = vld [vmem:[%s3547_s17 + $0x13e] sm:$0x3] }
  0x99   : > { %v896_v8 = vrot.slane %v320_v51, 1  ;;  %v2162_v9 = vsel %vm1918_vm1, %v2161_v61, %v2160_v5  ;;  %v897_v10 = vrot.slane %v321_v56, 1  ;;  %v898_v11 = vrot.slane %v322_v57, 1  ;;  %v334_v61 = vld [vmem:[%s3547_s17 + $0x140] sm:$0x3] }
  0x9a   : > { %v899_v12 = vrot.slane %v323_v58, 1  ;;  %v2164_v13 = vsel %vm1921_vm2, %v2163_v62, %v2162_v9  ;;  %v900_v14 = vrot.slane %v324_v63, 1  ;;  %v901_v15 = vrot.slane %v325_v4, 1  ;;  %v335_v62 = vld [vmem:[%s3547_s17 + $0x142] sm:$0x3] }
  0x9b   : > { %v1470_v16 = vmax.f32 %v318_v49, %v894_v6  ;;  %v2166_v17 = vsel %vm1924_vm3, %v2165_v0, %v2164_v13  ;;  %v1471_v18 = vmax.f32 %v319_v50, %v895_v7  ;;  %v1472_v19 = vmax.f32 %v320_v51, %v896_v8  ;;  %v338_v5 = vld [vmem:[%s3547_s17 + $0x148] sm:$0x3]  ;;  %v339_v6 = vld [vmem:[%s3547_s17 + $0x14a] sm:$0x3] }
  0x9c   : > { %v1473_v20 = vmax.f32 %v321_v56, %v897_v10  ;;  %v2168_v22 = vsel %vm1927_vm4, %v2167_v1, %v2166_v17  ;;  %v1474_v23 = vmax.f32 %v322_v57, %v898_v11  ;;  %v1475_v24 = vmax.f32 %v323_v58, %v899_v12  ;;  %v340_v11 = vld [vmem:[%s3547_s17 + $0x14c] sm:$0x3] }
  0x9d   : > { %v1476_v25 = vmax.f32 %v324_v63, %v900_v14  ;;  %v2170_v29 = vsel %vm1930_vm5, %v2169_v2, %v2168_v22  ;;  %v1477_v30 = vmax.f32 %v325_v4, %v901_v15  ;;  %v2173_v31 = vrot.slane %v1471_v18, 7  ;;  %v336_v63 = vld [vmem:[%s3547_s17 + $0x144] sm:$0x3]  ;;  %v337_v4 = vld [vmem:[%s3547_s17 + $0x146] sm:$0x3] }
  0x9e   : > { %v2175_v32 = vrot.slane %v1472_v19, 6  ;;  %v2172_v35 = vsel %vm1933_vm6, %v2171_v3, %v2170_v29  ;;  %v2177_v36 = vrot.slane %v1473_v20, 5  ;;  %v2179_v37 = vrot.slane %v1474_v23, 4 }
  0x9f   : > { %v2181_v38 = vrot.slane %v1475_v24, 3  ;;  %3355 = vmatmul.mubr.msk.f32.gmra.mxu0 %vm2425_vm7, %v2172_v35  ;;  %3433 = vmatmul.mubr.msk.f32.gmra.mxu1 %vm2425_vm7, %v2172_v35  ;;  %v2174_v40 = vsel %vm1915_vm0, %v2173_v31, %v1470_v16  ;;  %v2183_v41 = vrot.slane %v1476_v25, 2  ;;  %v2185_v42 = vrot.slane %v1477_v30, 1  ;;  %v341_v16 = vld [vmem:[%s3547_s17 + $0x14e] sm:$0x3] }
  0xa0   : > { %v902_v44 = vrot.slane %v326_v21, 1  ;;  %v2176_v45 = vsel %vm1918_vm1, %v2175_v32, %v2174_v40  ;;  %v903_v46 = vrot.slane %v327_v26, 1  ;;  %v904_v47 = vrot.slane %v328_v27, 1  ;;  %v345_v40 = vld [vmem:[%s3547_s17 + $0x156] sm:$0x3] }
  0xa1   : > { %v905_v48 = vrot.slane %v329_v28, 1  ;;  %v2178_v49 = vsel %vm1921_vm2, %v2177_v36, %v2176_v45  ;;  %v906_v50 = vrot.slane %v330_v33, 1  ;;  %v907_v51 = vrot.slane %v331_v34, 1  ;;  %v346_v45 = vld [vmem:[%s3547_s17 + $0x158] sm:$0x3] }
  0xa2   : > { %v908_v52 = vrot.slane %v332_v39, 1  ;;  %v2180_v53 = vsel %vm1924_vm3, %v2179_v37, %v2178_v49  ;;  %v909_v54 = vrot.slane %v333_v43, 1  ;;  %v1478_v55 = vmax.f32 %v326_v21, %v902_v44 }
  0xa3   : > { %v1479_v56 = vmax.f32 %v327_v26, %v903_v46  ;;  %v2182_v57 = vsel %vm1927_vm4, %v2181_v38, %v2180_v53  ;;  %v1480_v58 = vmax.f32 %v328_v27, %v904_v47  ;;  %v1481_v59 = vmax.f32 %v329_v28, %v905_v48  ;;  %v343_v38 = vld [vmem:[%s3547_s17 + $0x152] sm:$0x3]  ;;  %v347_v46 = vld [vmem:[%s3547_s17 + $0x15a] sm:$0x3] }
  0xa4   : > { %v1482_v60 = vmax.f32 %v330_v33, %v906_v50  ;;  %v2184_v0 = vsel %vm1930_vm5, %v2183_v41, %v2182_v57  ;;  %v1483_v1 = vmax.f32 %v331_v34, %v907_v51  ;;  %v1484_v2 = vmax.f32 %v332_v39, %v908_v52  ;;  %v342_v33 = vld [vmem:[%s3547_s17 + $0x150] sm:$0x3]  ;;  %v344_v39 = vld [vmem:[%s3547_s17 + $0x154] sm:$0x3]  ;;  %v348_v51 = vld [vmem:[%s3547_s17 + $0x15c] sm:$0x3] }
  0xa5   : > { %v1485_v3 = vmax.f32 %v333_v43, %v909_v54  ;;  %v2186_v7 = vsel %vm1933_vm6, %v2185_v42, %v2184_v0  ;;  %v2187_v8 = vrot.slane %v1479_v56, 7  ;;  %v2189_v9 = vrot.slane %v1480_v58, 6 }
  0xa6   : > { %v2191_v10 = vrot.slane %v1481_v59, 5  ;;  %3357 = vmatprep.mubr.msk.f32.mxu0 %vm2425_vm7, %v2186_v7  ;;  %3435 = vmatprep.mubr.msk.f32.mxu1 %vm2425_vm7, %v2186_v7  ;;  %v2193_v12 = vrot.slane %v1482_v60, 4  ;;  %v2195_v13 = vrot.slane %v1483_v1, 3  ;;  %v2197_v14 = vrot.slane %v1484_v2, 2 }
  0xa7   : > { %v2199_v15 = vrot.slane %v1485_v3, 1  ;;  %v2188_v17 = vsel %vm1915_vm0, %v2187_v8, %v1478_v55  ;;  %v910_v18 = vrot.slane %v334_v61, 1  ;;  %v911_v19 = vrot.slane %v335_v62, 1  ;;  %v349_v55 = vld [vmem:[%s3547_s17 + $0x15e] sm:$0x3] }
  0xa8   : > { %v912_v20 = vrot.slane %v336_v63, 1  ;;  %v2190_v21 = vsel %vm1918_vm1, %v2189_v9, %v2188_v17  ;;  %v913_v22 = vrot.slane %v337_v4, 1  ;;  %v914_v23 = vrot.slane %v338_v5, 1  ;;  %v350_v9 = vld [vmem:[%s3547_s17 + $0x160] sm:$0x3] }
  0xa9   : > { %v915_v24 = vrot.slane %v339_v6, 1  ;;  %v2192_v25 = vsel %vm1921_vm2, %v2191_v10, %v2190_v21  ;;  %v916_v26 = vrot.slane %v340_v11, 1  ;;  %v917_v27 = vrot.slane %v341_v16, 1  ;;  %v351_v10 = vld [vmem:[%s3547_s17 + $0x162] sm:$0x3] }
  0xaa   : > { %v1486_v28 = vmax.f32 %v334_v61, %v910_v18  ;;  %v2194_v29 = vsel %vm1924_vm3, %v2193_v12, %v2192_v25  ;;  %v1487_v30 = vmax.f32 %v335_v62, %v911_v19  ;;  %v1488_v31 = vmax.f32 %v336_v63, %v912_v20  ;;  %v354_v17 = vld [vmem:[%s3547_s17 + $0x168] sm:$0x3]  ;;  %v355_v18 = vld [vmem:[%s3547_s17 + $0x16a] sm:$0x3] }
  0xab   : > { %v1489_v32 = vmax.f32 %v337_v4, %v913_v22  ;;  %v2196_v34 = vsel %vm1927_vm4, %v2195_v13, %v2194_v29  ;;  %v1490_v35 = vmax.f32 %v338_v5, %v914_v23  ;;  %v1491_v36 = vmax.f32 %v339_v6, %v915_v24  ;;  %v356_v23 = vld [vmem:[%s3547_s17 + $0x16c] sm:$0x3] }
  0xac   : > { %v1492_v37 = vmax.f32 %v340_v11, %v916_v26  ;;  %v2198_v41 = vsel %vm1930_vm5, %v2197_v14, %v2196_v34  ;;  %v1493_v42 = vmax.f32 %v341_v16, %v917_v27  ;;  %v2201_v43 = vrot.slane %v1487_v30, 7  ;;  %v352_v11 = vld [vmem:[%s3547_s17 + $0x164] sm:$0x3]  ;;  %v353_v16 = vld [vmem:[%s3547_s17 + $0x166] sm:$0x3] }
  0xad   : > { %v2203_v44 = vrot.slane %v1488_v31, 6  ;;  %v2200_v47 = vsel %vm1933_vm6, %v2199_v15, %v2198_v41  ;;  %v2205_v48 = vrot.slane %v1489_v32, 5  ;;  %v2207_v49 = vrot.slane %v1490_v35, 4 }
  0xae   : > { %v2209_v50 = vrot.slane %v1491_v36, 3  ;;  %3358 = vmatmul.mubr.msk.f32.gmra.mxu0 %vm2425_vm7, %v2200_v47  ;;  %3436 = vmatmul.mubr.msk.f32.gmra.mxu1 %vm2425_vm7, %v2200_v47  ;;  %v2202_v52 = vsel %vm1915_vm0, %v2201_v43, %v1486_v28  ;;  %v2211_v53 = vrot.slane %v1492_v37, 2  ;;  %v2213_v54 = vrot.slane %v1493_v42, 1  ;;  %v357_v28 = vld [vmem:[%s3547_s17 + $0x16e] sm:$0x3] }
  0xaf   : > { %v918_v56 = vrot.slane %v342_v33, 1  ;;  %v2204_v57 = vsel %vm1918_vm1, %v2203_v44, %v2202_v52  ;;  %v919_v58 = vrot.slane %v343_v38, 1  ;;  %v920_v59 = vrot.slane %v344_v39, 1  ;;  %v361_v52 = vld [vmem:[%s3547_s17 + $0x176] sm:$0x3] }
  0xb0   : > { %v921_v60 = vrot.slane %v345_v40, 1  ;;  %v2206_v61 = vsel %vm1921_vm2, %v2205_v48, %v2204_v57  ;;  %v922_v62 = vrot.slane %v346_v45, 1  ;;  %v923_v63 = vrot.slane %v347_v46, 1  ;;  %v362_v57 = vld [vmem:[%s3547_s17 + $0x178] sm:$0x3] }
  0xb1   : > { %v924_v0 = vrot.slane %v348_v51, 1  ;;  %v2208_v1 = vsel %vm1924_vm3, %v2207_v49, %v2206_v61  ;;  %v925_v2 = vrot.slane %v349_v55, 1  ;;  %v1494_v3 = vmax.f32 %v342_v33, %v918_v56 }
  0xb2   : > { %v1495_v4 = vmax.f32 %v343_v38, %v919_v58  ;;  %v2210_v5 = vsel %vm1927_vm4, %v2209_v50, %v2208_v1  ;;  %v1496_v6 = vmax.f32 %v344_v39, %v920_v59  ;;  %v1497_v7 = vmax.f32 %v345_v40, %v921_v60  ;;  %v359_v50 = vld [vmem:[%s3547_s17 + $0x172] sm:$0x3]  ;;  %v363_v58 = vld [vmem:[%s3547_s17 + $0x17a] sm:$0x3] }
  0xb3   : > { %v1498_v8 = vmax.f32 %v346_v45, %v922_v62  ;;  %v2212_v12 = vsel %vm1930_vm5, %v2211_v53, %v2210_v5  ;;  %v1499_v13 = vmax.f32 %v347_v46, %v923_v63  ;;  %v1500_v14 = vmax.f32 %v348_v51, %v924_v0  ;;  %v358_v45 = vld [vmem:[%s3547_s17 + $0x170] sm:$0x3]  ;;  %v360_v51 = vld [vmem:[%s3547_s17 + $0x174] sm:$0x3]  ;;  %v364_v63 = vld [vmem:[%s3547_s17 + $0x17c] sm:$0x3] }
  0xb4   : > { %v1501_v15 = vmax.f32 %v349_v55, %v925_v2  ;;  %v2214_v19 = vsel %vm1933_vm6, %v2213_v54, %v2212_v12  ;;  %v2215_v20 = vrot.slane %v1495_v4, 7  ;;  %v2217_v21 = vrot.slane %v1496_v6, 6 }
  0xb5   : > { %v2219_v22 = vrot.slane %v1497_v7, 5  ;;  %3360 = vmatprep.mubr.msk.f32.mxu0 %vm2425_vm7, %v2214_v19  ;;  %3438 = vmatprep.mubr.msk.f32.mxu1 %vm2425_vm7, %v2214_v19  ;;  %v2221_v24 = vrot.slane %v1498_v8, 4  ;;  %v2223_v25 = vrot.slane %v1499_v13, 3  ;;  %v2225_v26 = vrot.slane %v1500_v14, 2 }
  0xb6   : > { %v2227_v27 = vrot.slane %v1501_v15, 1  ;;  %v2216_v29 = vsel %vm1915_vm0, %v2215_v20, %v1494_v3  ;;  %v926_v30 = vrot.slane %v350_v9, 1  ;;  %v927_v31 = vrot.slane %v351_v10, 1  ;;  %v365_v3 = vld [vmem:[%s3547_s17 + $0x17e] sm:$0x3] }
  0xb7   : > { %v928_v32 = vrot.slane %v352_v11, 1  ;;  %v2218_v33 = vsel %vm1918_vm1, %v2217_v21, %v2216_v29  ;;  %v929_v34 = vrot.slane %v353_v16, 1  ;;  %v930_v35 = vrot.slane %v354_v17, 1  ;;  %v366_v21 = vld [vmem:[%s3547_s17 + $0x180] sm:$0x3] }
  0xb8   : > { %v931_v36 = vrot.slane %v355_v18, 1  ;;  %v2220_v37 = vsel %vm1921_vm2, %v2219_v22, %v2218_v33  ;;  %v932_v38 = vrot.slane %v356_v23, 1  ;;  %v933_v39 = vrot.slane %v357_v28, 1  ;;  %v367_v22 = vld [vmem:[%s3547_s17 + $0x182] sm:$0x3] }
  0xb9   : > { %v1502_v40 = vmax.f32 %v350_v9, %v926_v30  ;;  %v2222_v41 = vsel %vm1924_vm3, %v2221_v24, %v2220_v37  ;;  %v1503_v42 = vmax.f32 %v351_v10, %v927_v31  ;;  %v1504_v43 = vmax.f32 %v352_v11, %v928_v32  ;;  %v370_v29 = vld [vmem:[%s3547_s17 + $0x188] sm:$0x3]  ;;  %v371_v30 = vld [vmem:[%s3547_s17 + $0x18a] sm:$0x3] }
  0xba   : > { %v1505_v44 = vmax.f32 %v353_v16, %v929_v34  ;;  %v2224_v46 = vsel %vm1927_vm4, %v2223_v25, %v2222_v41  ;;  %v1506_v47 = vmax.f32 %v354_v17, %v930_v35  ;;  %v1507_v48 = vmax.f32 %v355_v18, %v931_v36  ;;  %v372_v35 = vld [vmem:[%s3547_s17 + $0x18c] sm:$0x3] }
  0xbb   : > { %v1508_v49 = vmax.f32 %v356_v23, %v932_v38  ;;  %v2226_v53 = vsel %vm1930_vm5, %v2225_v26, %v2224_v46  ;;  %v1509_v54 = vmax.f32 %v357_v28, %v933_v39  ;;  %v2229_v55 = vrot.slane %v1503_v42, 7  ;;  %v368_v23 = vld [vmem:[%s3547_s17 + $0x184] sm:$0x3]  ;;  %v369_v28 = vld [vmem:[%s3547_s17 + $0x186] sm:$0x3] }
  0xbc   : > { %v2231_v56 = vrot.slane %v1504_v43, 6  ;;  %v2228_v59 = vsel %vm1933_vm6, %v2227_v27, %v2226_v53  ;;  %v2233_v60 = vrot.slane %v1505_v44, 5  ;;  %v2235_v61 = vrot.slane %v1506_v47, 4 }
  0xbd   : > { %v2237_v62 = vrot.slane %v1507_v48, 3  ;;  %3361 = vmatmul.mubr.msk.f32.gmra.mxu0 %vm2425_vm7, %v2228_v59  ;;  %3439 = vmatmul.mubr.msk.f32.gmra.mxu1 %vm2425_vm7, %v2228_v59  ;;  %v2230_v0 = vsel %vm1915_vm0, %v2229_v55, %v1502_v40  ;;  %v2239_v1 = vrot.slane %v1508_v49, 2  ;;  %v2241_v2 = vrot.slane %v1509_v54, 1  ;;  %v373_v40 = vld [vmem:[%s3547_s17 + $0x18e] sm:$0x3] }
  0xbe   : > { %v934_v4 = vrot.slane %v358_v45, 1  ;;  %v2232_v5 = vsel %vm1918_vm1, %v2231_v56, %v2230_v0  ;;  %v935_v6 = vrot.slane %v359_v50, 1  ;;  %v936_v7 = vrot.slane %v360_v51, 1  ;;  %v377_v0 = vld [vmem:[%s3547_s17 + $0x196] sm:$0x3] }
  0xbf   : > { %v937_v8 = vrot.slane %v361_v52, 1  ;;  %v2234_v9 = vsel %vm1921_vm2, %v2233_v60, %v2232_v5  ;;  %v938_v10 = vrot.slane %v362_v57, 1  ;;  %v939_v11 = vrot.slane %v363_v58, 1  ;;  %v378_v5 = vld [vmem:[%s3547_s17 + $0x198] sm:$0x3] }
  0xc0   : > { %v940_v12 = vrot.slane %v364_v63, 1  ;;  %v2236_v13 = vsel %vm1924_vm3, %v2235_v61, %v2234_v9  ;;  %v941_v14 = vrot.slane %v365_v3, 1  ;;  %v1510_v15 = vmax.f32 %v358_v45, %v934_v4 }
  0xc1   : > { %v1511_v16 = vmax.f32 %v359_v50, %v935_v6  ;;  %v2238_v17 = vsel %vm1927_vm4, %v2237_v62, %v2236_v13  ;;  %v1512_v18 = vmax.f32 %v360_v51, %v936_v7  ;;  %v1513_v19 = vmax.f32 %v361_v52, %v937_v8  ;;  %v375_v62 = vld [vmem:[%s3547_s17 + $0x192] sm:$0x3]  ;;  %v379_v6 = vld [vmem:[%s3547_s17 + $0x19a] sm:$0x3] }
  0xc2   : > { %v1514_v20 = vmax.f32 %v362_v57, %v938_v10  ;;  %v2240_v24 = vsel %vm1930_vm5, %v2239_v1, %v2238_v17  ;;  %v1515_v25 = vmax.f32 %v363_v58, %v939_v11  ;;  %v1516_v26 = vmax.f32 %v364_v63, %v940_v12  ;;  %v374_v57 = vld [vmem:[%s3547_s17 + $0x190] sm:$0x3]  ;;  %v376_v63 = vld [vmem:[%s3547_s17 + $0x194] sm:$0x3]  ;;  %v380_v11 = vld [vmem:[%s3547_s17 + $0x19c] sm:$0x3] }
  0xc3   : > { %v1517_v27 = vmax.f32 %v365_v3, %v941_v14  ;;  %v2242_v31 = vsel %vm1933_vm6, %v2241_v2, %v2240_v24  ;;  %v2243_v32 = vrot.slane %v1511_v16, 7  ;;  %v2245_v33 = vrot.slane %v1512_v18, 6 }
  0xc4   : > { %v2247_v34 = vrot.slane %v1513_v19, 5  ;;  %3363 = vmatprep.mubr.msk.f32.mxu0 %vm2425_vm7, %v2242_v31  ;;  %3441 = vmatprep.mubr.msk.f32.mxu1 %vm2425_vm7, %v2242_v31  ;;  %v2249_v36 = vrot.slane %v1514_v20, 4  ;;  %v2251_v37 = vrot.slane %v1515_v25, 3  ;;  %v2253_v38 = vrot.slane %v1516_v26, 2 }
  0xc5   : > { %v2255_v39 = vrot.slane %v1517_v27, 1  ;;  %v2244_v41 = vsel %vm1915_vm0, %v2243_v32, %v1510_v15  ;;  %v942_v42 = vrot.slane %v366_v21, 1  ;;  %v943_v43 = vrot.slane %v367_v22, 1  ;;  %v381_v15 = vld [vmem:[%s3547_s17 + $0x19e] sm:$0x3] }
  0xc6   : > { %v944_v44 = vrot.slane %v368_v23, 1  ;;  %v2246_v45 = vsel %vm1918_vm1, %v2245_v33, %v2244_v41  ;;  %v945_v46 = vrot.slane %v369_v28, 1  ;;  %v946_v47 = vrot.slane %v370_v29, 1  ;;  %v382_v33 = vld [vmem:[%s3547_s17 + $0x1a0] sm:$0x3] }
  0xc7   : > { %v947_v48 = vrot.slane %v371_v30, 1  ;;  %v2248_v49 = vsel %vm1921_vm2, %v2247_v34, %v2246_v45  ;;  %v948_v50 = vrot.slane %v372_v35, 1  ;;  %v949_v51 = vrot.slane %v373_v40, 1  ;;  %v383_v34 = vld [vmem:[%s3547_s17 + $0x1a2] sm:$0x3] }
  0xc8   : > { %v1518_v52 = vmax.f32 %v366_v21, %v942_v42  ;;  %v2250_v53 = vsel %vm1924_vm3, %v2249_v36, %v2248_v49  ;;  %v1519_v54 = vmax.f32 %v367_v22, %v943_v43  ;;  %v1520_v55 = vmax.f32 %v368_v23, %v944_v44  ;;  %v386_v41 = vld [vmem:[%s3547_s17 + $0x1a8] sm:$0x3]  ;;  %v387_v42 = vld [vmem:[%s3547_s17 + $0x1aa] sm:$0x3] }
  0xc9   : > { %v1521_v56 = vmax.f32 %v369_v28, %v945_v46  ;;  %v2252_v58 = vsel %vm1927_vm4, %v2251_v37, %v2250_v53  ;;  %v1522_v59 = vmax.f32 %v370_v29, %v946_v47  ;;  %v1523_v60 = vmax.f32 %v371_v30, %v947_v48  ;;  %v388_v47 = vld [vmem:[%s3547_s17 + $0x1ac] sm:$0x3] }
  0xca   : > { %v1524_v61 = vmax.f32 %v372_v35, %v948_v50  ;;  %v2254_v1 = vsel %vm1930_vm5, %v2253_v38, %v2252_v58  ;;  %v1525_v2 = vmax.f32 %v373_v40, %v949_v51  ;;  %v2257_v3 = vrot.slane %v1519_v54, 7  ;;  %v384_v35 = vld [vmem:[%s3547_s17 + $0x1a4] sm:$0x3]  ;;  %v385_v40 = vld [vmem:[%s3547_s17 + $0x1a6] sm:$0x3] }
  0xcb   : > { %v2259_v4 = vrot.slane %v1520_v55, 6  ;;  %v2256_v7 = vsel %vm1933_vm6, %v2255_v39, %v2254_v1  ;;  %v2261_v8 = vrot.slane %v1521_v56, 5  ;;  %v2263_v9 = vrot.slane %v1522_v59, 4 }
  0xcc   : > { %v2265_v10 = vrot.slane %v1523_v60, 3  ;;  %3364 = vmatmul.mubr.msk.f32.gmra.mxu0 %vm2425_vm7, %v2256_v7  ;;  %3442 = vmatmul.mubr.msk.f32.gmra.mxu1 %vm2425_vm7, %v2256_v7  ;;  %v2258_v12 = vsel %vm1915_vm0, %v2257_v3, %v1518_v52  ;;  %v2267_v13 = vrot.slane %v1524_v61, 2  ;;  %v2269_v14 = vrot.slane %v1525_v2, 1  ;;  %v389_v52 = vld [vmem:[%s3547_s17 + $0x1ae] sm:$0x3] }
  0xcd   : > { %v950_v16 = vrot.slane %v374_v57, 1  ;;  %v2260_v17 = vsel %vm1918_vm1, %v2259_v4, %v2258_v12  ;;  %v951_v18 = vrot.slane %v375_v62, 1  ;;  %v952_v19 = vrot.slane %v376_v63, 1  ;;  %v393_v12 = vld [vmem:[%s3547_s17 + $0x1b6] sm:$0x3] }
  0xce   : > { %v953_v20 = vrot.slane %v377_v0, 1  ;;  %v2262_v21 = vsel %vm1921_vm2, %v2261_v8, %v2260_v17  ;;  %v954_v22 = vrot.slane %v378_v5, 1  ;;  %v955_v23 = vrot.slane %v379_v6, 1  ;;  %v394_v17 = vld [vmem:[%s3547_s17 + $0x1b8] sm:$0x3] }
  0xcf   : > { %v956_v24 = vrot.slane %v380_v11, 1  ;;  %v2264_v25 = vsel %vm1924_vm3, %v2263_v9, %v2262_v21  ;;  %v957_v26 = vrot.slane %v381_v15, 1  ;;  %v1526_v27 = vmax.f32 %v374_v57, %v950_v16 }
  0xd0   : > { %v1527_v28 = vmax.f32 %v375_v62, %v951_v18  ;;  %v2266_v29 = vsel %vm1927_vm4, %v2265_v10, %v2264_v25  ;;  %v1528_v30 = vmax.f32 %v376_v63, %v952_v19  ;;  %v1529_v31 = vmax.f32 %v377_v0, %v953_v20  ;;  %v391_v10 = vld [vmem:[%s3547_s17 + $0x1b2] sm:$0x3]  ;;  %v395_v18 = vld [vmem:[%s3547_s17 + $0x1ba] sm:$0x3] }
  0xd1   : > { %v1530_v32 = vmax.f32 %v378_v5, %v954_v22  ;;  %v2268_v36 = vsel %vm1930_vm5, %v2267_v13, %v2266_v29  ;;  %v1531_v37 = vmax.f32 %v379_v6, %v955_v23  ;;  %v1532_v38 = vmax.f32 %v380_v11, %v956_v24  ;;  %v390_v5 = vld [vmem:[%s3547_s17 + $0x1b0] sm:$0x3]  ;;  %v392_v11 = vld [vmem:[%s3547_s17 + $0x1b4] sm:$0x3]  ;;  %v396_v23 = vld [vmem:[%s3547_s17 + $0x1bc] sm:$0x3] }
  0xd2   : > { %v1533_v39 = vmax.f32 %v381_v15, %v957_v26  ;;  %v2270_v43 = vsel %vm1933_vm6, %v2269_v14, %v2268_v36  ;;  %v2271_v44 = vrot.slane %v1527_v28, 7  ;;  %v2273_v45 = vrot.slane %v1528_v30, 6 }
  0xd3   : > { %v2275_v46 = vrot.slane %v1529_v31, 5  ;;  %3366 = vmatprep.mubr.msk.f32.mxu0 %vm2425_vm7, %v2270_v43  ;;  %3444 = vmatprep.mubr.msk.f32.mxu1 %vm2425_vm7, %v2270_v43  ;;  %v2277_v48 = vrot.slane %v1530_v32, 4  ;;  %v2279_v49 = vrot.slane %v1531_v37, 3  ;;  %v2281_v50 = vrot.slane %v1532_v38, 2 }
  0xd4   : > { %v2283_v51 = vrot.slane %v1533_v39, 1  ;;  %v2272_v53 = vsel %vm1915_vm0, %v2271_v44, %v1526_v27  ;;  %v958_v54 = vrot.slane %v382_v33, 1  ;;  %v959_v55 = vrot.slane %v383_v34, 1  ;;  %v397_v27 = vld [vmem:[%s3547_s17 + $0x1be] sm:$0x3] }
  0xd5   : > { %v960_v56 = vrot.slane %v384_v35, 1  ;;  %v2274_v57 = vsel %vm1918_vm1, %v2273_v45, %v2272_v53  ;;  %v961_v58 = vrot.slane %v385_v40, 1  ;;  %v962_v59 = vrot.slane %v386_v41, 1  ;;  %v398_v45 = vld [vmem:[%s3547_s17 + $0x1c0] sm:$0x3] }
  0xd6   : > { %v963_v60 = vrot.slane %v387_v42, 1  ;;  %v2276_v61 = vsel %vm1921_vm2, %v2275_v46, %v2274_v57  ;;  %v964_v62 = vrot.slane %v388_v47, 1  ;;  %v965_v63 = vrot.slane %v389_v52, 1  ;;  %v399_v46 = vld [vmem:[%s3547_s17 + $0x1c2] sm:$0x3] }
  0xd7   : > { %v1534_v0 = vmax.f32 %v382_v33, %v958_v54  ;;  %v2278_v1 = vsel %vm1924_vm3, %v2277_v48, %v2276_v61  ;;  %v1535_v2 = vmax.f32 %v383_v34, %v959_v55  ;;  %v1536_v3 = vmax.f32 %v384_v35, %v960_v56  ;;  %v402_v53 = vld [vmem:[%s3547_s17 + $0x1c8] sm:$0x3]  ;;  %v403_v54 = vld [vmem:[%s3547_s17 + $0x1ca] sm:$0x3] }
  0xd8   : > { %v1537_v4 = vmax.f32 %v385_v40, %v961_v58  ;;  %v2280_v6 = vsel %vm1927_vm4, %v2279_v49, %v2278_v1  ;;  %v1538_v7 = vmax.f32 %v386_v41, %v962_v59  ;;  %v1539_v8 = vmax.f32 %v387_v42, %v963_v60  ;;  %v404_v59 = vld [vmem:[%s3547_s17 + $0x1cc] sm:$0x3] }
  0xd9   : > { %v1540_v9 = vmax.f32 %v388_v47, %v964_v62  ;;  %v2282_v13 = vsel %vm1930_vm5, %v2281_v50, %v2280_v6  ;;  %v1541_v14 = vmax.f32 %v389_v52, %v965_v63  ;;  %v2285_v15 = vrot.slane %v1535_v2, 7  ;;  %v400_v47 = vld [vmem:[%s3547_s17 + $0x1c4] sm:$0x3]  ;;  %v401_v52 = vld [vmem:[%s3547_s17 + $0x1c6] sm:$0x3] }
  0xda   : > { %v2287_v16 = vrot.slane %v1536_v3, 6  ;;  %v2284_v19 = vsel %vm1933_vm6, %v2283_v51, %v2282_v13  ;;  %v2289_v20 = vrot.slane %v1537_v4, 5  ;;  %v2291_v21 = vrot.slane %v1538_v7, 4 }
  0xdb   : > { %v2293_v22 = vrot.slane %v1539_v8, 3  ;;  %3367 = vmatmul.mubr.msk.f32.gmra.mxu0 %vm2425_vm7, %v2284_v19  ;;  %3445 = vmatmul.mubr.msk.f32.gmra.mxu1 %vm2425_vm7, %v2284_v19  ;;  %v2286_v24 = vsel %vm1915_vm0, %v2285_v15, %v1534_v0  ;;  %v2295_v25 = vrot.slane %v1540_v9, 2  ;;  %v2297_v26 = vrot.slane %v1541_v14, 1  ;;  %v405_v0 = vld [vmem:[%s3547_s17 + $0x1ce] sm:$0x3] }
  0xdc   : > { %v966_v28 = vrot.slane %v390_v5, 1  ;;  %v2288_v29 = vsel %vm1918_vm1, %v2287_v16, %v2286_v24  ;;  %v967_v30 = vrot.slane %v391_v10, 1  ;;  %v968_v31 = vrot.slane %v392_v11, 1  ;;  %v409_v24 = vld [vmem:[%s3547_s17 + $0x1d6] sm:$0x3] }
  0xdd   : > { %v969_v32 = vrot.slane %v393_v12, 1  ;;  %v2290_v33 = vsel %vm1921_vm2, %v2289_v20, %v2288_v29  ;;  %v970_v34 = vrot.slane %v394_v17, 1  ;;  %v971_v35 = vrot.slane %v395_v18, 1  ;;  %v410_v29 = vld [vmem:[%s3547_s17 + $0x1d8] sm:$0x3] }
  0xde   : > { %v972_v36 = vrot.slane %v396_v23, 1  ;;  %v2292_v37 = vsel %vm1924_vm3, %v2291_v21, %v2290_v33  ;;  %v973_v38 = vrot.slane %v397_v27, 1  ;;  %v1542_v39 = vmax.f32 %v390_v5, %v966_v28 }
  0xdf   : > { %v1543_v40 = vmax.f32 %v391_v10, %v967_v30  ;;  %v2294_v41 = vsel %vm1927_vm4, %v2293_v22, %v2292_v37  ;;  %v1544_v42 = vmax.f32 %v392_v11, %v968_v31  ;;  %v1545_v43 = vmax.f32 %v393_v12, %v969_v32  ;;  %v407_v22 = vld [vmem:[%s3547_s17 + $0x1d2] sm:$0x3]  ;;  %v411_v30 = vld [vmem:[%s3547_s17 + $0x1da] sm:$0x3] }
  0xe0   : > { %v1546_v44 = vmax.f32 %v394_v17, %v970_v34  ;;  %v2296_v48 = vsel %vm1930_vm5, %v2295_v25, %v2294_v41  ;;  %v1547_v49 = vmax.f32 %v395_v18, %v971_v35  ;;  %v1548_v50 = vmax.f32 %v396_v23, %v972_v36  ;;  %v406_v17 = vld [vmem:[%s3547_s17 + $0x1d0] sm:$0x3]  ;;  %v408_v23 = vld [vmem:[%s3547_s17 + $0x1d4] sm:$0x3]  ;;  %v412_v35 = vld [vmem:[%s3547_s17 + $0x1dc] sm:$0x3] }
  0xe1   : > { %v1549_v51 = vmax.f32 %v397_v27, %v973_v38  ;;  %v2298_v55 = vsel %vm1933_vm6, %v2297_v26, %v2296_v48  ;;  %v2299_v56 = vrot.slane %v1543_v40, 7  ;;  %v2301_v57 = vrot.slane %v1544_v42, 6 }
  0xe2   : > { %v2303_v58 = vrot.slane %v1545_v43, 5  ;;  %3369 = vmatprep.mubr.msk.f32.mxu0 %vm2425_vm7, %v2298_v55  ;;  %3447 = vmatprep.mubr.msk.f32.mxu1 %vm2425_vm7, %v2298_v55  ;;  %v2305_v60 = vrot.slane %v1546_v44, 4  ;;  %v2307_v61 = vrot.slane %v1547_v49, 3  ;;  %v2309_v62 = vrot.slane %v1548_v50, 2 }
  0xe3   : > { %v2311_v63 = vrot.slane %v1549_v51, 1  ;;  %v2300_v1 = vsel %vm1915_vm0, %v2299_v56, %v1542_v39  ;;  %v974_v2 = vrot.slane %v398_v45, 1  ;;  %v975_v3 = vrot.slane %v399_v46, 1  ;;  %v413_v39 = vld [vmem:[%s3547_s17 + $0x1de] sm:$0x3] }
  0xe4   : > { %v976_v4 = vrot.slane %v400_v47, 1  ;;  %v2302_v5 = vsel %vm1918_vm1, %v2301_v57, %v2300_v1  ;;  %v977_v6 = vrot.slane %v401_v52, 1  ;;  %v978_v7 = vrot.slane %v402_v53, 1  ;;  %v414_v57 = vld [vmem:[%s3547_s17 + $0x1e0] sm:$0x3] }
  0xe5   : > { %v979_v8 = vrot.slane %v403_v54, 1  ;;  %v2304_v9 = vsel %vm1921_vm2, %v2303_v58, %v2302_v5  ;;  %v980_v10 = vrot.slane %v404_v59, 1  ;;  %v981_v11 = vrot.slane %v405_v0, 1  ;;  %v415_v58 = vld [vmem:[%s3547_s17 + $0x1e2] sm:$0x3] }
  0xe6   : > { %v1550_v12 = vmax.f32 %v398_v45, %v974_v2  ;;  %v2306_v13 = vsel %vm1924_vm3, %v2305_v60, %v2304_v9  ;;  %v1551_v14 = vmax.f32 %v399_v46, %v975_v3  ;;  %v1552_v15 = vmax.f32 %v400_v47, %v976_v4  ;;  %v418_v1 = vld [vmem:[%s3547_s17 + $0x1e8] sm:$0x3]  ;;  %v419_v2 = vld [vmem:[%s3547_s17 + $0x1ea] sm:$0x3] }
  0xe7   : > { %v1553_v16 = vmax.f32 %v401_v52, %v977_v6  ;;  %v2308_v18 = vsel %vm1927_vm4, %v2307_v61, %v2306_v13  ;;  %v1554_v19 = vmax.f32 %v402_v53, %v978_v7  ;;  %v1555_v20 = vmax.f32 %v403_v54, %v979_v8  ;;  %v420_v7 = vld [vmem:[%s3547_s17 + $0x1ec] sm:$0x3] }
  0xe8   : > { %v1556_v21 = vmax.f32 %v404_v59, %v980_v10  ;;  %v2310_v25 = vsel %vm1930_vm5, %v2309_v62, %v2308_v18  ;;  %v1557_v26 = vmax.f32 %v405_v0, %v981_v11  ;;  %v2313_v27 = vrot.slane %v1551_v14, 7  ;;  %v416_v59 = vld [vmem:[%s3547_s17 + $0x1e4] sm:$0x3]  ;;  %v417_v0 = vld [vmem:[%s3547_s17 + $0x1e6] sm:$0x3] }
  0xe9   : > { %v2315_v28 = vrot.slane %v1552_v15, 6  ;;  %v2312_v31 = vsel %vm1933_vm6, %v2311_v63, %v2310_v25  ;;  %v2317_v32 = vrot.slane %v1553_v16, 5  ;;  %v2319_v33 = vrot.slane %v1554_v19, 4 }
  0xea   : > { %v2321_v34 = vrot.slane %v1555_v20, 3  ;;  %3370 = vmatmul.mubr.msk.f32.gmra.mxu0 %vm2425_vm7, %v2312_v31  ;;  %3448 = vmatmul.mubr.msk.f32.gmra.mxu1 %vm2425_vm7, %v2312_v31  ;;  %v2314_v36 = vsel %vm1915_vm0, %v2313_v27, %v1550_v12  ;;  %v2323_v37 = vrot.slane %v1556_v21, 2  ;;  %v2325_v38 = vrot.slane %v1557_v26, 1  ;;  %v421_v12 = vld [vmem:[%s3547_s17 + $0x1ee] sm:$0x3] }
  0xeb   : > { %v982_v40 = vrot.slane %v406_v17, 1  ;;  %v2316_v41 = vsel %vm1918_vm1, %v2315_v28, %v2314_v36  ;;  %v983_v42 = vrot.slane %v407_v22, 1  ;;  %v984_v43 = vrot.slane %v408_v23, 1  ;;  %v425_v36 = vld [vmem:[%s3547_s17 + $0x1f6] sm:$0x3] }
  0xec   : > { %v985_v44 = vrot.slane %v409_v24, 1  ;;  %v2318_v45 = vsel %vm1921_vm2, %v2317_v32, %v2316_v41  ;;  %v986_v46 = vrot.slane %v410_v29, 1  ;;  %v987_v47 = vrot.slane %v411_v30, 1  ;;  %v426_v41 = vld [vmem:[%s3547_s17 + $0x1f8] sm:$0x3] }
  0xed   : > { %v988_v48 = vrot.slane %v412_v35, 1  ;;  %v2320_v49 = vsel %vm1924_vm3, %v2319_v33, %v2318_v45  ;;  %v989_v50 = vrot.slane %v413_v39, 1  ;;  %v1558_v51 = vmax.f32 %v406_v17, %v982_v40 }
  0xee   : > { %v1559_v52 = vmax.f32 %v407_v22, %v983_v42  ;;  %v2322_v53 = vsel %vm1927_vm4, %v2321_v34, %v2320_v49  ;;  %v1560_v54 = vmax.f32 %v408_v23, %v984_v43  ;;  %v1561_v55 = vmax.f32 %v409_v24, %v985_v44  ;;  %v423_v34 = vld [vmem:[%s3547_s17 + $0x1f2] sm:$0x3]  ;;  %v427_v42 = vld [vmem:[%s3547_s17 + $0x1fa] sm:$0x3] }
  0xef   : > { %v1562_v56 = vmax.f32 %v410_v29, %v986_v46  ;;  %v2324_v60 = vsel %vm1930_vm5, %v2323_v37, %v2322_v53  ;;  %v1563_v61 = vmax.f32 %v411_v30, %v987_v47  ;;  %v1564_v62 = vmax.f32 %v412_v35, %v988_v48  ;;  %v422_v29 = vld [vmem:[%s3547_s17 + $0x1f0] sm:$0x3]  ;;  %v424_v35 = vld [vmem:[%s3547_s17 + $0x1f4] sm:$0x3]  ;;  %v428_v47 = vld [vmem:[%s3547_s17 + $0x1fc] sm:$0x3] }
  0xf0   : > { %v1565_v63 = vmax.f32 %v413_v39, %v989_v50  ;;  %v2326_v3 = vsel %vm1933_vm6, %v2325_v38, %v2324_v60  ;;  %v2327_v4 = vrot.slane %v1559_v52, 7  ;;  %v2329_v5 = vrot.slane %v1560_v54, 6 }
  0xf1   : > { %v2331_v6 = vrot.slane %v1561_v55, 5  ;;  %3372 = vmatprep.mubr.msk.f32.mxu0 %vm2425_vm7, %v2326_v3  ;;  %3450 = vmatprep.mubr.msk.f32.mxu1 %vm2425_vm7, %v2326_v3  ;;  %v2333_v8 = vrot.slane %v1562_v56, 4  ;;  %v2335_v9 = vrot.slane %v1563_v61, 3  ;;  %v2337_v10 = vrot.slane %v1564_v62, 2 }
  0xf2   : > { %v2339_v11 = vrot.slane %v1565_v63, 1  ;;  %v2328_v13 = vsel %vm1915_vm0, %v2327_v4, %v1558_v51  ;;  %v990_v14 = vrot.slane %v414_v57, 1  ;;  %v991_v15 = vrot.slane %v415_v58, 1  ;;  %v429_v51 = vld [vmem:[%s3547_s17 + $0x1fe] sm:$0x3] }
  0xf3   : > { %v992_v16 = vrot.slane %v416_v59, 1  ;;  %v2330_v17 = vsel %vm1918_vm1, %v2329_v5, %v2328_v13  ;;  %v993_v18 = vrot.slane %v417_v0, 1  ;;  %v994_v19 = vrot.slane %v418_v1, 1  ;;  %v430_v5 = vld [vmem:[%s3547_s17 + $0x200] sm:$0x3] }
  0xf4   : > { %v995_v20 = vrot.slane %v419_v2, 1  ;;  %v2332_v21 = vsel %vm1921_vm2, %v2331_v6, %v2330_v17  ;;  %v996_v22 = vrot.slane %v420_v7, 1  ;;  %v997_v23 = vrot.slane %v421_v12, 1  ;;  %v431_v6 = vld [vmem:[%s3547_s17 + $0x202] sm:$0x3] }
  0xf5   : > { %v1566_v24 = vmax.f32 %v414_v57, %v990_v14  ;;  %v2334_v25 = vsel %vm1924_vm3, %v2333_v8, %v2332_v21  ;;  %v1567_v26 = vmax.f32 %v415_v58, %v991_v15  ;;  %v1568_v27 = vmax.f32 %v416_v59, %v992_v16  ;;  %v434_v13 = vld [vmem:[%s3547_s17 + $0x208] sm:$0x3]  ;;  %v435_v14 = vld [vmem:[%s3547_s17 + $0x20a] sm:$0x3] }
  0xf6   : > { %v1569_v28 = vmax.f32 %v417_v0, %v993_v18  ;;  %v2336_v30 = vsel %vm1927_vm4, %v2335_v9, %v2334_v25  ;;  %v1570_v31 = vmax.f32 %v418_v1, %v994_v19  ;;  %v1571_v32 = vmax.f32 %v419_v2, %v995_v20  ;;  %v436_v19 = vld [vmem:[%s3547_s17 + $0x20c] sm:$0x3] }
  0xf7   : > { %v1572_v33 = vmax.f32 %v420_v7, %v996_v22  ;;  %v2338_v37 = vsel %vm1930_vm5, %v2337_v10, %v2336_v30  ;;  %v1573_v38 = vmax.f32 %v421_v12, %v997_v23  ;;  %v2341_v39 = vrot.slane %v1567_v26, 7  ;;  %v432_v7 = vld [vmem:[%s3547_s17 + $0x204] sm:$0x3]  ;;  %v433_v12 = vld [vmem:[%s3547_s17 + $0x206] sm:$0x3] }
  0xf8   : > { %v2343_v40 = vrot.slane %v1568_v27, 6  ;;  %v2340_v43 = vsel %vm1933_vm6, %v2339_v11, %v2338_v37  ;;  %v2345_v44 = vrot.slane %v1569_v28, 5  ;;  %v2347_v45 = vrot.slane %v1570_v31, 4 }
  0xf9   : > { %v2349_v46 = vrot.slane %v1571_v32, 3  ;;  %3373 = vmatmul.mubr.msk.f32.gmra.mxu0 %vm2425_vm7, %v2340_v43  ;;  %3451 = vmatmul.mubr.msk.f32.gmra.mxu1 %vm2425_vm7, %v2340_v43  ;;  %v2342_v48 = vsel %vm1915_vm0, %v2341_v39, %v1566_v24  ;;  %v2351_v49 = vrot.slane %v1572_v33, 2  ;;  %v2353_v50 = vrot.slane %v1573_v38, 1  ;;  %v437_v24 = vld [vmem:[%s3547_s17 + $0x20e] sm:$0x3]  ;;  %v4134_v33 = vpop.f32.mrf.mxu0 }
  0xfa   : > { %v998_v52 = vrot.slane %v422_v29, 1  ;;  %v2344_v53 = vsel %vm1918_vm1, %v2343_v40, %v2342_v48  ;;  %v999_v54 = vrot.slane %v423_v34, 1  ;;  %v1000_v55 = vrot.slane %v424_v35, 1  ;;  %v438_v43 = vld [vmem:[%s3547_s17 + $0x210] sm:$0x3] }
  0xfb   : > { %v1001_v56 = vrot.slane %v425_v36, 1  ;;  %v2346_v57 = vsel %vm1921_vm2, %v2345_v44, %v2344_v53  ;;  %v1002_v58 = vrot.slane %v426_v41, 1  ;;  %v1003_v59 = vrot.slane %v427_v42, 1  ;;  %v439_v48 = vld [vmem:[%s3547_s17 + $0x212] sm:$0x3] }
  0xfc   : > { %v1004_v60 = vrot.slane %v428_v47, 1  ;;  %v2348_v61 = vsel %vm1924_vm3, %v2347_v45, %v2346_v57  ;;  %v1005_v62 = vrot.slane %v429_v51, 1  ;;  %v1574_v63 = vmax.f32 %v422_v29, %v998_v52  ;;  %v4148_v57 = vpop.f32.mrf.mxu0 }
  0xfd   : > { %v1575_v0 = vmax.f32 %v423_v34, %v999_v54  ;;  %v2350_v1 = vsel %vm1927_vm4, %v2349_v46, %v2348_v61  ;;  %v1576_v2 = vmax.f32 %v424_v35, %v1000_v55  ;;  %v1577_v3 = vmax.f32 %v425_v36, %v1001_v56  ;;  %v4136_v34 = vpop.f32.mrf.mxu1  ;;  %v442_v55 = vld [vmem:[%s3547_s17 + $0x218] sm:$0x3]  ;;  %v443_v56 = vld [vmem:[%s3547_s17 + $0x21a] sm:$0x3] }
  0xfe   : > { %v1578_v4 = vmax.f32 %v426_v41, %v1002_v58  ;;  %v2352_v8 = vsel %vm1930_vm5, %v2351_v49, %v2350_v1  ;;  %v1579_v9 = vmax.f32 %v427_v42, %v1003_v59  ;;  %v1580_v10 = vmax.f32 %v428_v47, %v1004_v60  ;;  %v440_v49 = vld [vmem:[%s3547_s17 + $0x214] sm:$0x3] }
  0xff   : > { %v1581_v11 = vmax.f32 %v429_v51, %v1005_v62  ;;  %v2354_v15 = vsel %vm1933_vm6, %v2353_v50, %v2352_v8  ;;  %v2355_v16 = vrot.slane %v1575_v0, 7  ;;  %v2357_v17 = vrot.slane %v1576_v2, 6  ;;  %v441_v50 = vld [vmem:[%s3547_s17 + $0x216] sm:$0x3]  ;;  %v4150_v58 = vpop.f32.mrf.mxu1 }
 0x100   : > { %v2359_v18 = vrot.slane %v1577_v3, 5  ;;  %3375 = vmatprep.mubr.msk.f32.mxu0 %vm2425_vm7, %v2354_v15  ;;  %3453 = vmatprep.mubr.msk.f32.mxu1 %vm2425_vm7, %v2354_v15  ;;  %v2361_v20 = vrot.slane %v1578_v4, 4  ;;  %v2363_v21 = vrot.slane %v1579_v9, 3  ;;  %v2365_v22 = vrot.slane %v1580_v10, 2  ;;  %v445_v3 = vld [vmem:[%s3547_s17 + $0x21e] sm:$0x3] }
 0x101   : > { %v2367_v23 = vrot.slane %v1581_v11, 1  ;;  %v2356_v25 = vsel %vm1915_vm0, %v2355_v16, %v1574_v63  ;;  %v1006_v26 = vrot.slane %v430_v5, 1  ;;  %v1007_v27 = vrot.slane %v431_v6, 1  ;;  %v444_v63 = vld [vmem:[%s3547_s17 + $0x21c] sm:$0x3] }
 0x102   : > { %v1008_v28 = vrot.slane %v432_v7, 1  ;;  %v2358_v29 = vsel %vm1918_vm1, %v2357_v17, %v2356_v25  ;;  %v1009_v30 = vrot.slane %v433_v12, 1  ;;  %v1010_v31 = vrot.slane %v434_v13, 1  ;;  %v448_v25 = vld [vmem:[%s3547_s17 + $0x224] sm:$0x3] }
 0x103   : > { %v1011_v32 = vrot.slane %v435_v14, 1  ;;  %v2360_v35 = vsel %vm1921_vm2, %v2359_v18, %v2358_v29  ;;  %v1012_v36 = vrot.slane %v436_v19, 1  ;;  %v1013_v37 = vrot.slane %v437_v24, 1 }
 0x104   : > { %v1582_v38 = vmax.f32 %v430_v5, %v1006_v26  ;;  %v2362_v39 = vsel %vm1924_vm3, %v2361_v20, %v2360_v35  ;;  %v1583_v40 = vmax.f32 %v431_v6, %v1007_v27  ;;  %v1584_v41 = vmax.f32 %v432_v7, %v1008_v28 }
 0x105   : > { %v1585_v42 = vmax.f32 %v433_v12, %v1009_v30  ;;  %v2364_v44 = vsel %vm1927_vm4, %v2363_v21, %v2362_v39  ;;  %v1586_v45 = vmax.f32 %v434_v13, %v1010_v31  ;;  %v1587_v46 = vmax.f32 %v435_v14, %v1011_v32  ;;  %v4160_v13 = vpop.f32.mrf.mxu0  ;;  %v4162_v14 = vpop.f32.mrf.mxu1  ;;  %v449_v30 = vld [vmem:[%s3547_s17 + $0x226] sm:$0x3]  ;;  %v450_v31 = vld [vmem:[%s3547_s17 + $0x228] sm:$0x3]  ;;  %v451_v32 = vld [vmem:[%s3547_s17 + $0x22a] sm:$0x3] }
 0x106   : > { %v1588_v47 = vmax.f32 %v436_v19, %v1012_v36  ;;  %v2366_v51 = vsel %vm1930_vm5, %v2365_v22, %v2364_v44  ;;  %v1589_v52 = vmax.f32 %v437_v24, %v1013_v37  ;;  %v2369_v53 = vrot.slane %v1583_v40, 7  ;;  %v447_v24 = vld [vmem:[%s3547_s17 + $0x222] sm:$0x3]  ;;  %v452_v39 = vld [vmem:[%s3547_s17 + $0x22c] sm:$0x3] }
 0x107   : > { %v2371_v54 = vrot.slane %v1584_v41, 6  ;;  %v2368_v59 = vsel %vm1933_vm6, %v2367_v23, %v2366_v51  ;;  %v2373_v60 = vrot.slane %v1585_v42, 5  ;;  %v2375_v61 = vrot.slane %v1586_v45, 4  ;;  %v446_v23 = vld [vmem:[%s3547_s17 + $0x220] sm:$0x3]  ;;  %v4179_v40 = vpop.f32.mrf.mxu0  ;;  %v4181_v41 = vpop.f32.mrf.mxu1 }
 0x108   : > { %v2377_v62 = vrot.slane %v1587_v46, 3  ;;  %3376 = vmatmul.mubr.msk.f32.gmra.mxu0 %vm2425_vm7, %v2368_v59  ;;  %3454 = vmatmul.mubr.msk.f32.gmra.mxu1 %vm2425_vm7, %v2368_v59  ;;  %v2370_v0 = vsel %vm1915_vm0, %v2369_v53, %v1582_v38  ;;  %v2379_v1 = vrot.slane %v1588_v47, 2  ;;  %v2381_v2 = vrot.slane %v1589_v52, 1  ;;  %v453_v46 = vld [vmem:[%s3547_s17 + $0x22e] sm:$0x3] }
 0x109   : > { %v1014_v4 = vrot.slane %v438_v43, 1  ;;  %v2372_v5 = vsel %vm1918_vm1, %v2371_v54, %v2370_v0  ;;  %v1015_v6 = vrot.slane %v439_v48, 1  ;;  %v1016_v7 = vrot.slane %v440_v49, 1 }
 0x10a   : > { %v1017_v8 = vrot.slane %v441_v50, 1  ;;  %v2374_v9 = vsel %vm1921_vm2, %v2373_v60, %v2372_v5  ;;  %v1018_v10 = vrot.slane %v442_v55, 1  ;;  %v1019_v11 = vrot.slane %v443_v56, 1 }
 0x10b   : > { %v1020_v12 = vrot.slane %v444_v63, 1  ;;  %v2376_v15 = vsel %vm1924_vm3, %v2375_v61, %v2374_v9  ;;  %v1021_v16 = vrot.slane %v445_v3, 1  ;;  %v1590_v17 = vmax.f32 %v438_v43, %v1014_v4  ;;  %v4189_v61 = vpop.f32.mrf.mxu0  ;;  %v456_v9 = vld [vmem:[%s3547_s17 + $0x234] sm:$0x3] }
 0x10c   : > { %v1591_v18 = vmax.f32 %v439_v48, %v1015_v6  ;;  %v2378_v19 = vsel %vm1927_vm4, %v2377_v62, %v2376_v15  ;;  %v1592_v20 = vmax.f32 %v440_v49, %v1016_v7  ;;  %v1593_v21 = vmax.f32 %v441_v50, %v1017_v8  ;;  %v4191_v62 = vpop.f32.mrf.mxu1  ;;  %v455_v8 = vld [vmem:[%s3547_s17 + $0x232] sm:$0x3] }
 0x10d   : > { %v1594_v22 = vmax.f32 %v442_v55, %v1018_v10  ;;  %v2380_v26 = vsel %vm1930_vm5, %v2379_v1, %v2378_v19  ;;  %v1595_v27 = vmax.f32 %v443_v56, %v1019_v11  ;;  %v1596_v28 = vmax.f32 %v444_v63, %v1020_v12  ;;  %v457_v10 = vld [vmem:[%s3547_s17 + $0x236] sm:$0x3] }
 0x10e   : > { %v1597_v29 = vmax.f32 %v445_v3, %v1021_v16  ;;  %v2382_v35 = vsel %vm1933_vm6, %v2381_v2, %v2380_v26  ;;  %v2383_v36 = vrot.slane %v1591_v18, 7  ;;  %v2385_v37 = vrot.slane %v1592_v20, 6  ;;  %v454_v3 = vld [vmem:[%s3547_s17 + $0x230] sm:$0x3]  ;;  %v459_v18 = vld [vmem:[%s3547_s17 + $0x23a] sm:$0x3] }
 0x10f   : > { %v2387_v38 = vrot.slane %v1593_v21, 5  ;;  %3378 = vmatprep.mubr.msk.f32.mxu0 %vm2425_vm7, %v2382_v35  ;;  %3456 = vmatprep.mubr.msk.f32.mxu1 %vm2425_vm7, %v2382_v35  ;;  %v2389_v42 = vrot.slane %v1594_v22, 4  ;;  %v2391_v43 = vrot.slane %v1595_v27, 3  ;;  %v2393_v44 = vrot.slane %v1596_v28, 2 }
 0x110   : > { %v2395_v45 = vrot.slane %v1597_v29, 1  ;;  %v2384_v47 = vsel %vm1915_vm0, %v2383_v36, %v1590_v17  ;;  %v1022_v48 = vrot.slane %v446_v23, 1  ;;  %v1023_v49 = vrot.slane %v447_v24, 1  ;;  %v458_v17 = vld [vmem:[%s3547_s17 + $0x238] sm:$0x3] }
 0x111   : > { %v1024_v50 = vrot.slane %v448_v25, 1  ;;  %v2386_v51 = vsel %vm1918_vm1, %v2385_v37, %v2384_v47  ;;  %v1025_v52 = vrot.slane %v449_v30, 1  ;;  %v1026_v53 = vrot.slane %v450_v31, 1  ;;  %v461_v29 = vld [vmem:[%s3547_s17 + $0x23e] sm:$0x3] }
 0x112   : > { %v1027_v54 = vrot.slane %v451_v32, 1  ;;  %v2388_v55 = vsel %vm1921_vm2, %v2387_v38, %v2386_v51  ;;  %v1028_v56 = vrot.slane %v452_v39, 1  ;;  %v1029_v59 = vrot.slane %v453_v46, 1 }
 0x113   : > { %v1598_v60 = vmax.f32 %v446_v23, %v1022_v48  ;;  %v2390_v63 = vsel %vm1924_vm3, %v2389_v42, %v2388_v55  ;;  %v1599_v0 = vmax.f32 %v447_v24, %v1023_v49  ;;  %v1600_v1 = vmax.f32 %v448_v25, %v1024_v50  ;;  %v460_v23 = vld [vmem:[%s3547_s17 + $0x23c] sm:$0x3]  ;;  %v4205_v24 = vpop.f32.mrf.mxu0  ;;  %v4207_v25 = vpop.f32.mrf.mxu1 }
 0x114   : > { %v1601_v2 = vmax.f32 %v449_v30, %v1025_v52  ;;  %v2392_v4 = vsel %vm1927_vm4, %v2391_v43, %v2390_v63  ;;  %v1602_v5 = vmax.f32 %v450_v31, %v1026_v53  ;;  %v1603_v6 = vmax.f32 %v451_v32, %v1027_v54 }
 0x115   : > { %v1604_v7 = vmax.f32 %v452_v39, %v1028_v56  ;;  %v2394_v11 = vsel %vm1930_vm5, %v2393_v44, %v2392_v4  ;;  %v1605_v12 = vmax.f32 %v453_v46, %v1029_v59  ;;  %v2397_v15 = vrot.slane %v1599_v0, 7  ;;  %v3341_v47 = vpop.f32.mrf.mxu0  ;;  %v3419_v48 = vpop.f32.mrf.mxu1 }
 0x116   : > { %v2399_v16 = vrot.slane %v1600_v1, 6  ;;  %v2396_v19 = vsel %vm1933_vm6, %v2395_v45, %v2394_v11  ;;  %v2401_v20 = vrot.slane %v1601_v2, 5  ;;  %v2403_v21 = vrot.slane %v1602_v5, 4 }
 0x117   : > { %v2405_v22 = vrot.slane %v1603_v6, 3  ;;  %3379 = vmatmul.mubr.msk.f32.gmra.mxu0 %vm2425_vm7, %v2396_v19  ;;  %3457 = vmatmul.mubr.msk.f32.gmra.mxu1 %vm2425_vm7, %v2396_v19  ;;  %v2398_v26 = vsel %vm1915_vm0, %v2397_v15, %v1598_v60  ;;  %v2407_v27 = vrot.slane %v1604_v7, 2  ;;  %v2409_v28 = vrot.slane %v1605_v12, 1  ;;  %v2594_v5 = vpop.f32.mrf.mxu0  ;;  %v2851_v6 = vpop.f32.mrf.mxu1 }
 0x118   : > { %v1030_v30 = vrot.slane %v454_v3, 1  ;;  %v2400_v31 = vsel %vm1918_vm1, %v2399_v16, %v2398_v26  ;;  %v1031_v32 = vrot.slane %v455_v8, 1  ;;  %v1032_v35 = vrot.slane %v456_v9, 1 }
 0x119   : > { %v1033_v36 = vrot.slane %v457_v10, 1  ;;  %v2402_v37 = vsel %vm1921_vm2, %v2401_v20, %v2400_v31  ;;  %v1034_v38 = vrot.slane %v458_v17, 1  ;;  %v1035_v39 = vrot.slane %v459_v18, 1 }
 0x11a   : > { %v1036_v42 = vrot.slane %v460_v23, 1  ;;  %v2404_v43 = vsel %vm1924_vm3, %v2403_v21, %v2402_v37  ;;  %v1037_v44 = vrot.slane %v461_v29, 1  ;;  %v1606_v45 = vmax.f32 %v454_v3, %v1030_v30 }
 0x11b   : > { %v1607_v46 = vmax.f32 %v455_v8, %v1031_v32  ;;  %v2406_v49 = vsel %vm1927_vm4, %v2405_v22, %v2404_v43  ;;  %v1608_v50 = vmax.f32 %v456_v9, %v1032_v35  ;;  %v1609_v51 = vmax.f32 %v457_v10, %v1033_v36 }
 0x11c   : > { %v1610_v52 = vmax.f32 %v458_v17, %v1034_v38  ;;  %v2408_v53 = vsel %vm1930_vm5, %v2407_v27, %v2406_v49  ;;  %v1611_v54 = vmax.f32 %v459_v18, %v1035_v39  ;;  %v1612_v55 = vmax.f32 %v460_v23, %v1036_v42 }
 0x11d   : > { %v1613_v56 = vmax.f32 %v461_v29, %v1037_v44  ;;  %v2410_v59 = vsel %vm1933_vm6, %v2409_v28, %v2408_v53  ;;  %v2411_v60 = vrot.slane %v1607_v46, 7  ;;  %v2413_v63 = vrot.slane %v1608_v50, 6 }
 0x11e   : > { %v2415_v0 = vrot.slane %v1609_v51, 5  ;;  %3381 = vmatprep.mubr.msk.f32.mxu0 %vm2425_vm7, %v2410_v59  ;;  %3459 = vmatprep.mubr.msk.f32.mxu1 %vm2425_vm7, %v2410_v59  ;;  %v2417_v1 = vrot.slane %v1610_v52, 4  ;;  %v2419_v2 = vrot.slane %v1611_v54, 3  ;;  %v2421_v3 = vrot.slane %v1612_v55, 2 }
 0x11f   : > { %v2423_v4 = vrot.slane %v1613_v56, 1  ;;  %v2412_v7 = vsel %vm1915_vm0, %v2411_v60, %v1606_v45  ;;  %v3001_v8 = vmax.f32 %v4134_v33, %v4136_v34  ;;  %v3000_v9 = vmax.f32 %v4148_v57, %v4150_v58 }
 0x120   : > { %v2414_v10 = vsel %vm1918_vm1, %v2413_v63, %v2412_v7  ;;  %v3003_v11 = vmax.f32 %v4160_v13, %v4162_v14  ;;  %v3002_v12 = vmax.f32 %v4179_v40, %v4181_v41  ;;  %v3005_v15 = vmax.f32 %v4189_v61, %v4191_v62 }
 0x121   : > { %v2416_v33 = vsel %vm1921_vm2, %v2415_v0, %v2414_v10  ;;  %3038 = vst.msk [vmem:[%s4230_s20 + $0x8] sm:$0xff] %vm3036_vm8, %v3001_v8  ;;  %3037 = vst.msk [vmem:[%s4230_s20] sm:$0xff] %vm3036_vm8, %v3000_v9  ;;  %v3004_v34 = vmax.f32 %v4205_v24, %v4207_v25  ;;  %v3007_v57 = vmax.f32 %v3341_v47, %v3419_v48 }
 0x122   : > { %v3006_v58 = vmax.f32 %v2594_v5, %v2851_v6  ;;  %v2418_v13 = vsel %vm1924_vm3, %v2417_v1, %v2416_v33  ;;  %3040 = vst.msk [vmem:[%s4230_s20 + $0x18] sm:$0xff] %vm3036_vm8, %v3003_v11  ;;  %3039 = vst.msk [vmem:[%s4230_s20 + $0x10] sm:$0xff] %vm3036_vm8, %v3002_v12 }
 0x123   : > { %3042 = vst.msk [vmem:[%s4230_s20 + $0x28] sm:$0xff] %vm3036_vm8, %v3005_v15  ;;  %v2420_v14 = vsel %vm1927_vm4, %v2419_v2, %v2418_v13  ;;  %3041 = vst.msk [vmem:[%s4230_s20 + $0x20] sm:$0xff] %vm3036_vm8, %v3004_v34  ;;  %v3344_v40 = vpop.f32.mrf.mxu0  ;;  %v3422_v41 = vpop.f32.mrf.mxu1 }
 0x124   : > { %3044 = vst.msk [vmem:[%s4230_s20 + $0x38] sm:$0xff] %vm3036_vm8, %v3007_v57  ;;  %3043 = vst.msk [vmem:[%s4230_s20 + $0x30] sm:$0xff] %vm3036_vm8, %v3006_v58  ;;  %v2422_v61 = vsel %vm1930_vm5, %v2421_v3, %v2420_v14  ;;  %v3009_v62 = vmax.f32 %v3344_v40, %v3422_v41 }
 0x125   : > { %v2424_v16 = vsel %vm1933_vm6, %v2423_v4, %v2422_v61  ;;  %v2604_v17 = vpop.f32.mrf.mxu0  ;;  %v2861_v18 = vpop.f32.mrf.mxu1 }
 0x126   : > { %3382 = vmatmul.mubr.msk.f32.gmra.mxu0 %vm2425_vm7, %v2424_v16  ;;  %3460 = vmatmul.mubr.msk.f32.gmra.mxu1 %vm2425_vm7, %v2424_v16  ;;  %3046 = vst.msk [vmem:[%s4230_s20 + $0x48] sm:$0xff] %vm3036_vm8, %v3009_v62  ;;  %v3008_v19 = vmax.f32 %v2604_v17, %v2861_v18 }
 0x128   : > { %3045 = vst.msk [vmem:[%s4230_s20 + $0x40] sm:$0xff] %vm3036_vm8, %v3008_v19 }
 0x132   : > { %v3347_v20 = vpop.f32.mrf.mxu0  ;;  %v3425_v21 = vpop.f32.mrf.mxu1 }
 0x133   : > { %v3011_v22 = vmax.f32 %v3347_v20, %v3425_v21 }
 0x134   : > { %v2614_v23 = vpop.f32.mrf.mxu0  ;;  %v2871_v24 = vpop.f32.mrf.mxu1 }
 0x135   : > { %3048 = vst.msk [vmem:[%s4230_s20 + $0x58] sm:$0xff] %vm3036_vm8, %v3011_v22  ;;  %v3010_v25 = vmax.f32 %v2614_v23, %v2871_v24 }
 0x137   : > { %3047 = vst.msk [vmem:[%s4230_s20 + $0x50] sm:$0xff] %vm3036_vm8, %v3010_v25 }
 0x141   : > { %v3350_v26 = vpop.f32.mrf.mxu0  ;;  %v3428_v27 = vpop.f32.mrf.mxu1 }
 0x142   : > { %v3013_v28 = vmax.f32 %v3350_v26, %v3428_v27 }
 0x143   : > { %v2624_v29 = vpop.f32.mrf.mxu0  ;;  %v2881_v30 = vpop.f32.mrf.mxu1 }
 0x144   : > { %3050 = vst.msk [vmem:[%s4230_s20 + $0x68] sm:$0xff] %vm3036_vm8, %v3013_v28  ;;  %v3012_v31 = vmax.f32 %v2624_v29, %v2881_v30 }
 0x146   : > { %3049 = vst.msk [vmem:[%s4230_s20 + $0x60] sm:$0xff] %vm3036_vm8, %v3012_v31 }
 0x150   : > { %v3353_v32 = vpop.f32.mrf.mxu0  ;;  %v3431_v35 = vpop.f32.mrf.mxu1 }
 0x151   : > { %v3015_v36 = vmax.f32 %v3353_v32, %v3431_v35 }
 0x152   : > { %v2634_v37 = vpop.f32.mrf.mxu0  ;;  %v2891_v38 = vpop.f32.mrf.mxu1 }
 0x153   : > { %3052 = vst.msk [vmem:[%s4230_s20 + $0x78] sm:$0xff] %vm3036_vm8, %v3015_v36  ;;  %v3014_v39 = vmax.f32 %v2634_v37, %v2891_v38 }
 0x155   : > { %3051 = vst.msk [vmem:[%s4230_s20 + $0x70] sm:$0xff] %vm3036_vm8, %v3014_v39 }
 0x15f   : > { %v3356_v42 = vpop.f32.mrf.mxu0  ;;  %v3434_v43 = vpop.f32.mrf.mxu1 }
 0x160   : > { %v3017_v44 = vmax.f32 %v3356_v42, %v3434_v43 }
 0x161   : > { %v2644_v45 = vpop.f32.mrf.mxu0  ;;  %v2901_v46 = vpop.f32.mrf.mxu1 }
 0x162   : > { %3054 = vst.msk [vmem:[%s4230_s20 + $0x88] sm:$0xff] %vm3036_vm8, %v3017_v44  ;;  %v3016_v47 = vmax.f32 %v2644_v45, %v2901_v46 }
 0x164   : > { %3053 = vst.msk [vmem:[%s4230_s20 + $0x80] sm:$0xff] %vm3036_vm8, %v3016_v47 }
 0x16e   : > { %v3359_v48 = vpop.f32.mrf.mxu0  ;;  %v3437_v49 = vpop.f32.mrf.mxu1 }
 0x16f   : > { %v3019_v50 = vmax.f32 %v3359_v48, %v3437_v49 }
 0x170   : > { %v2654_v51 = vpop.f32.mrf.mxu0  ;;  %v2911_v52 = vpop.f32.mrf.mxu1 }
 0x171   : > { %3056 = vst.msk [vmem:[%s4230_s20 + $0x98] sm:$0xff] %vm3036_vm8, %v3019_v50  ;;  %v3018_v53 = vmax.f32 %v2654_v51, %v2911_v52 }
 0x173   : > { %3055 = vst.msk [vmem:[%s4230_s20 + $0x90] sm:$0xff] %vm3036_vm8, %v3018_v53 }
 0x17d   : > { %v3362_v54 = vpop.f32.mrf.mxu0  ;;  %v3440_v55 = vpop.f32.mrf.mxu1 }
 0x17e   : > { %v3021_v56 = vmax.f32 %v3362_v54, %v3440_v55 }
 0x17f   : > { %v2664_v59 = vpop.f32.mrf.mxu0  ;;  %v2921_v60 = vpop.f32.mrf.mxu1 }
 0x180   : > { %3058 = vst.msk [vmem:[%s4230_s20 + $0xa8] sm:$0xff] %vm3036_vm8, %v3021_v56  ;;  %v3020_v63 = vmax.f32 %v2664_v59, %v2921_v60 }
 0x182   : > { %3057 = vst.msk [vmem:[%s4230_s20 + $0xa0] sm:$0xff] %vm3036_vm8, %v3020_v63 }
 0x18c   : > { %v3365_v0 = vpop.f32.mrf.mxu0  ;;  %v3443_v1 = vpop.f32.mrf.mxu1 }
 0x18d   : > { %v3023_v2 = vmax.f32 %v3365_v0, %v3443_v1 }
 0x18e   : > { %v2674_v3 = vpop.f32.mrf.mxu0  ;;  %v2931_v4 = vpop.f32.mrf.mxu1 }
 0x18f   : > { %3060 = vst.msk [vmem:[%s4230_s20 + $0xb8] sm:$0xff] %vm3036_vm8, %v3023_v2  ;;  %v3022_v5 = vmax.f32 %v2674_v3, %v2931_v4 }
 0x191   : > { %3059 = vst.msk [vmem:[%s4230_s20 + $0xb0] sm:$0xff] %vm3036_vm8, %v3022_v5 }
 0x19b   : > { %v3368_v6 = vpop.f32.mrf.mxu0  ;;  %v3446_v7 = vpop.f32.mrf.mxu1 }
 0x19c   : > { %v3025_v8 = vmax.f32 %v3368_v6, %v3446_v7 }
 0x19d   : > { %v2684_v9 = vpop.f32.mrf.mxu0  ;;  %v2941_v10 = vpop.f32.mrf.mxu1 }
 0x19e   : > { %3062 = vst.msk [vmem:[%s4230_s20 + $0xc8] sm:$0xff] %vm3036_vm8, %v3025_v8  ;;  %v3024_v11 = vmax.f32 %v2684_v9, %v2941_v10 }
 0x1a0   : > { %3061 = vst.msk [vmem:[%s4230_s20 + $0xc0] sm:$0xff] %vm3036_vm8, %v3024_v11 }
 0x1aa   : > { %v3371_v12 = vpop.f32.mrf.mxu0  ;;  %v3449_v15 = vpop.f32.mrf.mxu1 }
 0x1ab   : > { %v3027_v33 = vmax.f32 %v3371_v12, %v3449_v15 }
 0x1ac   : > { %v2694_v34 = vpop.f32.mrf.mxu0  ;;  %v2951_v57 = vpop.f32.mrf.mxu1 }
 0x1ad   : > { %3064 = vst.msk [vmem:[%s4230_s20 + $0xd8] sm:$0xff] %vm3036_vm8, %v3027_v33  ;;  %v3026_v58 = vmax.f32 %v2694_v34, %v2951_v57 }
 0x1af   : > { %3063 = vst.msk [vmem:[%s4230_s20 + $0xd0] sm:$0xff] %vm3036_vm8, %v3026_v58 }
 0x1b9   : > { %v3374_v13 = vpop.f32.mrf.mxu0  ;;  %v3452_v14 = vpop.f32.mrf.mxu1 }
 0x1ba   : > { %v3029_v40 = vmax.f32 %v3374_v13, %v3452_v14 }
 0x1bb   : > { %v2704_v41 = vpop.f32.mrf.mxu0  ;;  %v2961_v61 = vpop.f32.mrf.mxu1 }
 0x1bc   : > { %3066 = vst.msk [vmem:[%s4230_s20 + $0xe8] sm:$0xff] %vm3036_vm8, %v3029_v40  ;;  %v3028_v62 = vmax.f32 %v2704_v41, %v2961_v61 }
 0x1be   : > { %3065 = vst.msk [vmem:[%s4230_s20 + $0xe0] sm:$0xff] %vm3036_vm8, %v3028_v62 }
 0x1c8   : > { %v3377_v16 = vpop.f32.mrf.mxu0  ;;  %v3455_v17 = vpop.f32.mrf.mxu1 }
 0x1c9   : > { %v3031_v18 = vmax.f32 %v3377_v16, %v3455_v17 }
 0x1ca   : > { %v2714_v19 = vpop.f32.mrf.mxu0  ;;  %v2971_v20 = vpop.f32.mrf.mxu1 }
 0x1cb   : > { %3068 = vst.msk [vmem:[%s4230_s20 + $0xf8] sm:$0xff] %vm3036_vm8, %v3031_v18  ;;  %v3030_v21 = vmax.f32 %v2714_v19, %v2971_v20 }
 0x1cd   : > { %3067 = vst.msk [vmem:[%s4230_s20 + $0xf0] sm:$0xff] %vm3036_vm8, %v3030_v21 }
 0x1d7   : > { %v3380_v22 = vpop.f32.mrf.mxu0  ;;  %v3458_v23 = vpop.f32.mrf.mxu1 }
 0x1d8   : > { %v3033_v24 = vmax.f32 %v3380_v22, %v3458_v23 }
 0x1d9   : > { %v2724_v25 = vpop.f32.mrf.mxu0  ;;  %v2981_v26 = vpop.f32.mrf.mxu1 }
 0x1da   : > { %3070 = vst.msk [vmem:[%s4230_s20 + $0x108] sm:$0xff] %vm3036_vm8, %v3033_v24  ;;  %v3032_v27 = vmax.f32 %v2724_v25, %v2981_v26 }
 0x1dc   : > { %3069 = vst.msk [vmem:[%s4230_s20 + $0x100] sm:$0xff] %vm3036_vm8, %v3032_v27 }
 0x1e6   : > { %v3383_v28 = vpop.f32.mrf.mxu0  ;;  %v3461_v29 = vpop.f32.mrf.mxu1 }
 0x1e7   : > { %v3035_v30 = vmax.f32 %v3383_v28, %v3461_v29 }
 0x1e8   : > { %v2734_v31 = vpop.f32.mrf.mxu0  ;;  %v2991_v32 = vpop.f32.mrf.mxu1 }
 0x1e9   : > { %3072 = vst.msk [vmem:[%s4230_s20 + $0x118] sm:$0xff] %vm3036_vm8, %v3035_v30  ;;  %v3034_v35 = vmax.f32 %v2734_v31, %v2991_v32 }
 0x1eb   : > { %3071 = vst.msk [vmem:[%s4230_s20 + $0x110] sm:$0xff] %vm3036_vm8, %v3034_v35 }
 0x1ec PF: > { %s13_s12 = sadd.s32 1, %s3476_s12  }
 0x1ed   : > { %p10_p5 = scmp.ge.s32.totalorder %s13_s12, 4  }
 0x1ef   :  { %12 = sbr.rel (!%p10_p5) target bundleno = 1 (0x1), region = 62 }

// kernel: food101_forward.7
= control target key start
LH: loop header
LB: loop body
LE: loop exit
PB: predicated region body
PF: predicated region fallthrough
CT: control target
= control target key end

     0   :  { %s1872_s12 = smov 0   ;;  %s2175_s0 = inlined_call_operand.vmem [shape: bf16[16,150], index: 0, kind: input, shape index: {}]   ;;  %s2176_s1 = inlined_call_operand.vmem [shape: bf16[2,150,1936], index: 1, kind: input, shape index: {}]   ;;  %s2177_s2 = inlined_call_operand.vmem [shape: f32[16,1], index: 2, kind: input, shape index: {}]   ;;  %s2178_s3 = inlined_call_operand.vmem [shape: f32[2,16,1936], index: 3, kind: output, shape index: {}]  }
   0x1 LB: > { %s1624_s13 = sadd.s32 4294967295, %s1849_s12   ;;  %p1628_p0 = scmp.ge.s32.totalorder %s1849_s12, 1  ;;  %s1849_s12 = sphi %s1872_s12, %s13_s12  }
   0x2   : > { %p137_p1 = scmp.lt.s32.totalorder %s1849_s12, 3 }
   0x4   : > { %p138_p2 = pnand %p1628_p0, %p137_p1 }
   0x5   : > { %p161_p3 = scmp.lt.s32.totalorder (!%p138_p2), %s1624_s13, 1 }
   0x6   : > { %141 = sbr.rel (%p138_p2) target bundleno = 383 (0x17f), region = 32 }
   0xb   : > { %v1883_v0 = vld [vmem:[%s2175_s0 + $0x4] ss:$8 sps:$4 sm:$0xff]   ;;  %vm1107_vm0 = vcmask 179200   ;;  %s2180_s13 = smov (!%p161_p3, %s1624_s13), 1  ;;  %v1851_v2 = vmov 0   ;;  %vm1111_vm1 = vcmask 1042432  }
   0xc   : > { %v326_v1 = vld [vmem:[%s2177_s2] sm:$0xff]  ;;  %1795 = vmatprep.mubr.msk.bf16.mxu0 %vm1107_vm0, %v1883_v0  ;;  %1797 = vmatprep.mubr.msk.bf16.mxu1 %vm1107_vm0, %v1883_v0  ;;  %s1813_s18 = smul.u32 1216, %s2180_s13  ;;  %v327_v3 = vld [vmem:[%s2177_s2 + $0x8] sm:$0xff]  ;;  %s1812_s26 = sshll.u32 %s2180_s13, 8  ;;  %vm1551_vm2 = vcmask 130048  }
   0xd   : > { %1823 = vset.pattern.permute.xlu0 %v1851_v2  ;;  %s2103_s29 = scalar_lea.vmem %s2178_s3, %s1812_s26 }
   0xe   : > { %330 = vperm.xlu0 %1823, %v326_v1   ;;  %s1901_s23 = scalar_lea.vmem %s2176_s1, %s1813_s18 }
   0xf   : > { %v286_v4 = vld [vmem:[%s1901_s23 + $0x380] sm:$0xff]  ;;  %v287_v6 = vld [vmem:[%s1901_s23 + $0x388] sm:$0xff] }
  0x10   : > { %v294_v5 = vld [vmem:[%s1901_s23 + $0x3c0] sm:$0xff]  ;;  %v295_v8 = vld [vmem:[%s1901_s23 + $0x3c8] sm:$0xff] }
  0x11   : > { %v1747_v7 = vcombine.high %v286_v4, %v294_v5  ;;  %v1746_v9 = vcombine.low %v286_v4, %v294_v5  ;;  %v270_v10 = vld [vmem:[%s1901_s23 + $0x300] sm:$0xff]  ;;  %v1749_v12 = vcombine.high %v287_v6, %v295_v8  ;;  %v1748_v13 = vcombine.low %v287_v6, %v295_v8  ;;  %v271_v15 = vld [vmem:[%s1901_s23 + $0x308] sm:$0xff] }
  0x12   : > { %v278_v11 = vld [vmem:[%s1901_s23 + $0x340] sm:$0xff]  ;;  %335 = vperm.xlu0 %1823, %v327_v3   ;;  %v279_v16 = vld [vmem:[%s1901_s23 + $0x348] sm:$0xff] }
  0x13   : > { %v1731_v14 = vcombine.high %v270_v10, %v278_v11  ;;  %v254_v17 = vld [vmem:[%s1901_s23 + $0x280] sm:$0xff]  ;;  %1160 = vmatprep.subr.bf16.mxu0 %v1747_v7  ;;  %v1733_v18 = vcombine.high %v271_v15, %v279_v16  ;;  %v255_v20 = vld [vmem:[%s1901_s23 + $0x288] sm:$0xff]  ;;  %1203 = vmatprep.subr.bf16.mxu1 %v1749_v12  ;;  %v1730_v22 = vcombine.low %v270_v10, %v278_v11 }
  0x14   : > { %v262_v19 = vld [vmem:[%s1901_s23 + $0x2c0] sm:$0xff]  ;;  %v263_v21 = vld [vmem:[%s1901_s23 + $0x2c8] sm:$0xff]  ;;  %1161 = vmatpush1.bf16.msra.mxu0 %v1746_v9  ;;  %1204 = vmatpush1.bf16.msra.mxu1 %v1748_v13  ;;  %v1732_v23 = vcombine.low %v271_v15, %v279_v16 }
  0x15   : > { %1162 = vmatprep.subr.bf16.mxu0 %v1731_v14  ;;  %v1715_v24 = vcombine.high %v254_v17, %v262_v19  ;;  %1205 = vmatprep.subr.bf16.mxu1 %v1733_v18  ;;  %v1717_v25 = vcombine.high %v255_v20, %v263_v21  ;;  %v238_v26 = vld [vmem:[%s1901_s23 + $0x200] sm:$0xff]  ;;  %v239_v28 = vld [vmem:[%s1901_s23 + $0x208] sm:$0xff]  ;;  %v1714_v30 = vcombine.low %v254_v17, %v262_v19  ;;  %v288_v19 = vld [vmem:[%s1901_s23 + $0x390] sm:$0xff] }
  0x16   : > { %v246_v27 = vld [vmem:[%s1901_s23 + $0x240] sm:$0xff]  ;;  %v247_v29 = vld [vmem:[%s1901_s23 + $0x248] sm:$0xff]  ;;  %v1716_v31 = vcombine.low %v255_v20, %v263_v21  ;;  %v296_v20 = vld [vmem:[%s1901_s23 + $0x3d0] sm:$0xff] }
  0x17   : > { %v1699_v32 = vcombine.high %v238_v26, %v246_v27  ;;  %v1701_v33 = vcombine.high %v239_v28, %v247_v29  ;;  %v222_v34 = vld [vmem:[%s1901_s23 + $0x180] sm:$0xff]  ;;  %v223_v36 = vld [vmem:[%s1901_s23 + $0x188] sm:$0xff]  ;;  %v1698_v38 = vcombine.low %v238_v26, %v246_v27  ;;  %v1700_v39 = vcombine.low %v239_v28, %v247_v29  ;;  %v289_v21 = vld [vmem:[%s1901_s23 + $0x398] sm:$0xff] }
  0x18   : > { %1163 = vmatpush1.bf16.msra.mxu0 %v1730_v22  ;;  %1206 = vmatpush1.bf16.msra.mxu1 %v1732_v23  ;;  %v230_v35 = vld [vmem:[%s1901_s23 + $0x1c0] sm:$0xff]  ;;  %v231_v37 = vld [vmem:[%s1901_s23 + $0x1c8] sm:$0xff]  ;;  %v297_v22 = vld [vmem:[%s1901_s23 + $0x3d8] sm:$0xff] }
  0x19   : > { %1164 = vmatprep.subr.bf16.mxu0 %v1715_v24  ;;  %1207 = vmatprep.subr.bf16.mxu1 %v1717_v25  ;;  %v1683_v40 = vcombine.high %v222_v34, %v230_v35  ;;  %v1685_v41 = vcombine.high %v223_v36, %v231_v37  ;;  %v206_v42 = vld [vmem:[%s1901_s23 + $0x100] sm:$0xff]  ;;  %v207_v44 = vld [vmem:[%s1901_s23 + $0x108] sm:$0xff]  ;;  %v1682_v46 = vcombine.low %v222_v34, %v230_v35  ;;  %v272_v27 = vld [vmem:[%s1901_s23 + $0x310] sm:$0xff] }
  0x1a   : > { %v214_v43 = vld [vmem:[%s1901_s23 + $0x140] sm:$0xff]  ;;  %v215_v45 = vld [vmem:[%s1901_s23 + $0x148] sm:$0xff]  ;;  %v1684_v47 = vcombine.low %v223_v36, %v231_v37  ;;  %v1751_v25 = vcombine.high %v288_v19, %v296_v20  ;;  %v1753_v26 = vcombine.high %v289_v21, %v297_v22  ;;  %v280_v28 = vld [vmem:[%s1901_s23 + $0x350] sm:$0xff] }
  0x1b   : > { %v1667_v48 = vcombine.high %v206_v42, %v214_v43  ;;  %v1669_v49 = vcombine.high %v207_v44, %v215_v45  ;;  %v190_v50 = vld [vmem:[%s1901_s23 + $0x80] sm:$0xff]  ;;  %v191_v52 = vld [vmem:[%s1901_s23 + $0x88] sm:$0xff]  ;;  %v1666_v54 = vcombine.low %v206_v42, %v214_v43  ;;  %v1668_v55 = vcombine.low %v207_v44, %v215_v45  ;;  %v256_v36 = vld [vmem:[%s1901_s23 + $0x290] sm:$0xff] }
  0x1c   : > { %1165 = vmatpush1.bf16.msra.mxu0 %v1714_v30  ;;  %1208 = vmatpush1.bf16.msra.mxu1 %v1716_v31  ;;  %v198_v51 = vld [vmem:[%s1901_s23 + $0xc0] sm:$0xff]  ;;  %v199_v53 = vld [vmem:[%s1901_s23 + $0xc8] sm:$0xff]  ;;  %v273_v30 = vld [vmem:[%s1901_s23 + $0x318] sm:$0xff]  ;;  %v1735_v34 = vcombine.high %v272_v27, %v280_v28 }
  0x1d   : > { %1166 = vmatprep.subr.bf16.mxu0 %v1699_v32  ;;  %1209 = vmatprep.subr.bf16.mxu1 %v1701_v33  ;;  %v1651_v56 = vcombine.high %v190_v50, %v198_v51  ;;  %v1653_v57 = vcombine.high %v191_v52, %v199_v53  ;;  %v174_v58 = vld [vmem:[%s1901_s23] sm:$0xff]  ;;  %v175_v60 = vld [vmem:[%s1901_s23 + $0x8] sm:$0xff]  ;;  %v1650_v62 = vcombine.low %v190_v50, %v198_v51  ;;  %v281_v31 = vld [vmem:[%s1901_s23 + $0x358] sm:$0xff] }
  0x1e   : > { %v182_v59 = vld [vmem:[%s1901_s23 + $0x40] sm:$0xff]  ;;  %v183_v61 = vld [vmem:[%s1901_s23 + $0x48] sm:$0xff]  ;;  %v1652_v63 = vcombine.low %v191_v52, %v199_v53  ;;  %v1750_v32 = vcombine.low %v288_v19, %v296_v20  ;;  %v1752_v33 = vcombine.low %v289_v21, %v297_v22  ;;  %v1737_v35 = vcombine.high %v273_v30, %v281_v31  ;;  %v264_v37 = vld [vmem:[%s1901_s23 + $0x2d0] sm:$0xff] }
  0x1f   : > { %v1635_v1 = vcombine.high %v174_v58, %v182_v59  ;;  %v1637_v2 = vcombine.high %v175_v60, %v183_v61  ;;  %v318_v3 = vld [vmem:[%s1901_s23 + $0x480] sm:$0x77]  ;;  %v319_v4 = vld [vmem:[%s1901_s23 + $0x488] sm:$0x77]  ;;  %v1634_v5 = vcombine.low %v174_v58, %v182_v59  ;;  %v1636_v6 = vcombine.low %v175_v60, %v183_v61  ;;  %v240_v44 = vld [vmem:[%s1901_s23 + $0x210] sm:$0xff] }
  0x20   : > { %1167 = vmatpush1.bf16.msra.mxu0 %v1698_v38  ;;  %1210 = vmatpush1.bf16.msra.mxu1 %v1700_v39  ;;  %v1779_v7 = vcombine.high %v318_v3, %v318_v3  ;;  %v1778_v8 = vcombine.low %v318_v3, %v318_v3  ;;  %v1781_v9 = vcombine.high %v319_v4, %v319_v4  ;;  %v302_v11 = vld [vmem:[%s1901_s23 + $0x400] sm:$0xff]  ;;  %v303_v13 = vld [vmem:[%s1901_s23 + $0x408] sm:$0xff]  ;;  %v257_v38 = vld [vmem:[%s1901_s23 + $0x298] sm:$0xff] }
  0x21   : > { %1168 = vmatprep.subr.bf16.mxu0 %v1683_v40  ;;  %1211 = vmatprep.subr.bf16.mxu1 %v1685_v41  ;;  %v1780_v10 = vcombine.low %v319_v4, %v319_v4  ;;  %v310_v12 = vld [vmem:[%s1901_s23 + $0x440] sm:$0xff]  ;;  %v311_v14 = vld [vmem:[%s1901_s23 + $0x448] sm:$0xff]  ;;  %v265_v39 = vld [vmem:[%s1901_s23 + $0x2d8] sm:$0xff]  ;;  %v1734_v40 = vcombine.low %v272_v27, %v280_v28  ;;  %v1736_v41 = vcombine.low %v273_v30, %v281_v31 }
  0x22   : > { %v1113_v15 = vsel %vm1111_vm1, %v1778_v8, 0  ;;  %v1763_v16 = vcombine.high %v302_v11, %v310_v12  ;;  %v1765_v18 = vcombine.high %v303_v13, %v311_v14  ;;  %v1762_v23 = vcombine.low %v302_v11, %v310_v12  ;;  %v1954_v29 = vld [vmem:[%s2175_s0] ss:$8 sps:$4 sm:$0xff]   ;;  %v248_v45 = vld [vmem:[%s1901_s23 + $0x250] sm:$0xff]  ;;  %v201_v8 = vld [vmem:[%s1901_s23 + $0xd8] sm:$0xff] }
  0x23   : > { %v1119_v17 = vsel %vm1111_vm1, %v1780_v10, 0  ;;  %v1764_v24 = vcombine.low %v303_v13, %v311_v14  ;;  %v1719_v42 = vcombine.high %v256_v36, %v264_v37  ;;  %v1721_v43 = vcombine.high %v257_v38, %v265_v39  ;;  %v224_v52 = vld [vmem:[%s1901_s23 + $0x190] sm:$0xff]  ;;  %v321_v22 = vld [vmem:[%s1901_s23 + $0x498] sm:$0x77] }
  0x24   : > { %1169 = vmatpush1.bf16.msra.mxu0 %v1682_v46  ;;  %1212 = vmatpush1.bf16.msra.mxu1 %v1684_v47  ;;  %v241_v46 = vld [vmem:[%s1901_s23 + $0x218] sm:$0xff]  ;;  %v1703_v50 = vcombine.high %v240_v44, %v248_v45  ;;  %v232_v53 = vld [vmem:[%s1901_s23 + $0x1d0] sm:$0xff]  ;;  %v1785_v27 = vcombine.high %v321_v22, %v321_v22  ;;  %v1784_v28 = vcombine.low %v321_v22, %v321_v22 }
  0x25   : > { %1170 = vmatprep.subr.bf16.mxu0 %v1667_v48  ;;  %1213 = vmatprep.subr.bf16.mxu1 %v1669_v49  ;;  %v249_v47 = vld [vmem:[%s1901_s23 + $0x258] sm:$0xff]  ;;  %v1718_v48 = vcombine.low %v256_v36, %v264_v37  ;;  %v1720_v49 = vcombine.low %v257_v38, %v265_v39  ;;  %v1687_v58 = vcombine.high %v224_v52, %v232_v53  ;;  %v208_v60 = vld [vmem:[%s1901_s23 + $0x110] sm:$0xff]  ;;  %v290_v38 = vld [vmem:[%s1901_s23 + $0x3a0] sm:$0xff] }
  0x26   : > { %v1705_v51 = vcombine.high %v241_v46, %v249_v47  ;;  %v216_v61 = vld [vmem:[%s1901_s23 + $0x150] sm:$0xff]  ;;  %v1131_v36 = vsel %vm1111_vm1, %v1784_v28, 0  ;;  %v298_v39 = vld [vmem:[%s1901_s23 + $0x3e0] sm:$0xff] }
  0x27   : > { %v1671_v3 = vcombine.high %v208_v60, %v216_v61  ;;  %v176_v13 = vld [vmem:[%s1901_s23 + $0x10] sm:$0xff] }
  0x28   : > { %1171 = vmatpush1.bf16.msra.mxu0 %v1666_v54  ;;  %1214 = vmatpush1.bf16.msra.mxu1 %v1668_v55  ;;  %v225_v54 = vld [vmem:[%s1901_s23 + $0x198] sm:$0xff]  ;;  %v184_v14 = vld [vmem:[%s1901_s23 + $0x50] sm:$0xff] }
  0x29   : > { %1172 = vmatprep.subr.bf16.mxu0 %v1651_v56  ;;  %1215 = vmatprep.subr.bf16.mxu1 %v1653_v57  ;;  %v233_v55 = vld [vmem:[%s1901_s23 + $0x1d8] sm:$0xff]  ;;  %v1702_v56 = vcombine.low %v240_v44, %v248_v45  ;;  %v1704_v57 = vcombine.low %v241_v46, %v249_v47  ;;  %v1639_v19 = vcombine.high %v176_v13, %v184_v14  ;;  %v320_v21 = vld [vmem:[%s1901_s23 + $0x490] sm:$0x77]  ;;  %v274_v46 = vld [vmem:[%s1901_s23 + $0x320] sm:$0xff] }
  0x2a   : > { %v1689_v59 = vcombine.high %v225_v54, %v233_v55  ;;  %v304_v30 = vld [vmem:[%s1901_s23 + $0x410] sm:$0xff]  ;;  %v1755_v44 = vcombine.high %v290_v38, %v298_v39  ;;  %v282_v47 = vld [vmem:[%s1901_s23 + $0x360] sm:$0xff] }
  0x2b   : > { %v312_v31 = vld [vmem:[%s1901_s23 + $0x450] sm:$0xff] }
  0x2c   : > { %1173 = vmatpush1.bf16.msra.mxu0 %v1650_v62  ;;  %1216 = vmatpush1.bf16.msra.mxu1 %v1652_v63  ;;  %v209_v62 = vld [vmem:[%s1901_s23 + $0x118] sm:$0xff] }
  0x2d   : > { %1174 = vmatprep.subr.bf16.mxu0 %v1635_v1  ;;  %1217 = vmatprep.subr.bf16.mxu1 %v1637_v2  ;;  %v217_v63 = vld [vmem:[%s1901_s23 + $0x158] sm:$0xff]  ;;  %v1686_v1 = vcombine.low %v224_v52, %v232_v53  ;;  %v1688_v2 = vcombine.low %v225_v54, %v233_v55  ;;  %v1739_v52 = vcombine.high %v274_v46, %v282_v47  ;;  %v258_v54 = vld [vmem:[%s1901_s23 + $0x2a0] sm:$0xff] }
  0x2e   : > { %v1673_v4 = vcombine.high %v209_v62, %v217_v63  ;;  %v1672_v10 = vcombine.low %v209_v62, %v217_v63  ;;  %v266_v55 = vld [vmem:[%s1901_s23 + $0x2e0] sm:$0xff] }
  0x2f   : > { %v242_v62 = vld [vmem:[%s1901_s23 + $0x220] sm:$0xff] }
  0x30   : > { %1175 = vmatpush1.bf16.msra.mxu0 %v1634_v5  ;;  %1218 = vmatpush1.bf16.msra.mxu1 %v1636_v6  ;;  %v192_v5 = vld [vmem:[%s1901_s23 + $0x90] sm:$0xff]  ;;  %v250_v63 = vld [vmem:[%s1901_s23 + $0x260] sm:$0xff] }
  0x31   : > { %1794 = vmatprep.subr.msk.bf16.mxu0 %vm1111_vm1, %v1779_v7  ;;  %1796 = vmatprep.subr.msk.bf16.mxu1 %vm1111_vm1, %v1781_v9  ;;  %v200_v6 = vld [vmem:[%s1901_s23 + $0xd0] sm:$0xff]  ;;  %v193_v7 = vld [vmem:[%s1901_s23 + $0x98] sm:$0xff]  ;;  %v1670_v9 = vcombine.low %v208_v60, %v216_v61  ;;  %v1723_v60 = vcombine.high %v258_v54, %v266_v55 }
  0x32   : > { %v1655_v11 = vcombine.high %v192_v5, %v200_v6  ;;  %v1657_v12 = vcombine.high %v193_v7, %v201_v8 }
  0x34   : > { %1189 = vmatpush2.bf16.msra.mxu0 %v1113_v15  ;;  %1232 = vmatpush2.bf16.msra.mxu1 %v1119_v17  ;;  %v177_v15 = vld [vmem:[%s1901_s23 + $0x18] sm:$0xff]  ;;  %v1654_v17 = vcombine.low %v192_v5, %v200_v6  ;;  %v1707_v5 = vcombine.high %v242_v62, %v250_v63 }
  0x35   : > { %1190 = vmatprep.subr.bf16.mxu0 %v1763_v16  ;;  %1233 = vmatprep.subr.bf16.mxu1 %v1765_v18  ;;  %v185_v16 = vld [vmem:[%s1901_s23 + $0x58] sm:$0xff]  ;;  %v1656_v18 = vcombine.low %v193_v7, %v201_v8  ;;  %v226_v7 = vld [vmem:[%s1901_s23 + $0x1a0] sm:$0xff] }
  0x36   : > { %v1641_v20 = vcombine.high %v177_v15, %v185_v16  ;;  %v234_v8 = vld [vmem:[%s1901_s23 + $0x1e0] sm:$0xff] }
  0x38   : > { %1191 = vmatpush2.bf16.msra.mxu0 %v1762_v23  ;;  %1234 = vmatpush2.bf16.msra.mxu1 %v1764_v24  ;;  %v1638_v23 = vcombine.low %v176_v13, %v184_v14  ;;  %v1640_v24 = vcombine.low %v177_v15, %v185_v16  ;;  %v1691_v13 = vcombine.high %v226_v7, %v234_v8  ;;  %v210_v15 = vld [vmem:[%s1901_s23 + $0x120] sm:$0xff] }
  0x39   : > { %1246 = vmatprep.subr.bf16.mxu0 %v1751_v25  ;;  %1289 = vmatprep.subr.bf16.mxu1 %v1753_v26  ;;  %v1783_v25 = vcombine.high %v320_v21, %v320_v21  ;;  %v1782_v26 = vcombine.low %v320_v21, %v320_v21  ;;  %v218_v16 = vld [vmem:[%s1901_s23 + $0x160] sm:$0xff] }
  0x3a   : > { %v1675_v21 = vcombine.high %v210_v15, %v218_v16 }
  0x3b   : > { %1193 = vmatmul.mubr.bf16.vlgmr.msra.gmra.mxu0 %v1954_v29  ;;  %1236 = vmatmul.mubr.bf16.vlgmr.msra.gmra.mxu1 %v1954_v29 }
  0x3c   : > { %1247 = vmatpush1.bf16.msra.mxu0 %v1750_v32  ;;  %1290 = vmatpush1.bf16.msra.mxu1 %v1752_v33  ;;  %v305_v32 = vld [vmem:[%s1901_s23 + $0x418] sm:$0xff] }
  0x3d   : > { %1248 = vmatprep.subr.bf16.mxu0 %v1735_v34  ;;  %1291 = vmatprep.subr.bf16.mxu1 %v1737_v35  ;;  %v313_v33 = vld [vmem:[%s1901_s23 + $0x458] sm:$0xff]  ;;  %v1125_v34 = vsel %vm1111_vm1, %v1782_v26, 0  ;;  %v1767_v35 = vcombine.high %v304_v30, %v312_v31  ;;  %v203_v26 = vld [vmem:[%s1901_s23 + $0xe8] sm:$0xff] }
  0x3e   : > { %1799 = vmatprep.mubr.msk.bf16.mxu0 %vm1107_vm0, %v1883_v0  ;;  %1801 = vmatprep.mubr.msk.bf16.mxu1 %vm1107_vm0, %v1883_v0  ;;  %v1769_v37 = vcombine.high %v305_v32, %v313_v33 }
  0x40   : > { %1249 = vmatpush1.bf16.msra.mxu0 %v1734_v40  ;;  %1292 = vmatpush1.bf16.msra.mxu1 %v1736_v41  ;;  %v291_v40 = vld [vmem:[%s1901_s23 + $0x3a8] sm:$0xff] }
  0x41   : > { %1250 = vmatprep.subr.bf16.mxu0 %v1719_v42  ;;  %1293 = vmatprep.subr.bf16.mxu1 %v1721_v43  ;;  %v299_v41 = vld [vmem:[%s1901_s23 + $0x3e8] sm:$0xff]  ;;  %v1766_v42 = vcombine.low %v304_v30, %v312_v31  ;;  %v1768_v43 = vcombine.low %v305_v32, %v313_v33  ;;  %v178_v32 = vld [vmem:[%s1901_s23 + $0x20] sm:$0xff] }
  0x42   : > { %v1757_v45 = vcombine.high %v291_v40, %v299_v41  ;;  %v186_v33 = vld [vmem:[%s1901_s23 + $0x60] sm:$0xff] }
  0x44   : > { %1251 = vmatpush1.bf16.msra.mxu0 %v1718_v48  ;;  %1294 = vmatpush1.bf16.msra.mxu1 %v1720_v49  ;;  %v275_v48 = vld [vmem:[%s1901_s23 + $0x328] sm:$0xff] }
  0x45   : > { %1252 = vmatprep.subr.bf16.mxu0 %v1703_v50  ;;  %1295 = vmatprep.subr.bf16.mxu1 %v1705_v51  ;;  %v283_v49 = vld [vmem:[%s1901_s23 + $0x368] sm:$0xff]  ;;  %v1754_v50 = vcombine.low %v290_v38, %v298_v39  ;;  %v1756_v51 = vcombine.low %v291_v40, %v299_v41  ;;  %v1643_v38 = vcombine.high %v178_v32, %v186_v33  ;;  %v322_v40 = vld [vmem:[%s1901_s23 + $0x4a0] sm:$0x77] }
  0x46   : > { %v1741_v53 = vcombine.high %v275_v48, %v283_v49  ;;  %v323_v41 = vld [vmem:[%s1901_s23 + $0x4a8] sm:$0x77] }
  0x48   : > { %1253 = vmatpush1.bf16.msra.mxu0 %v1702_v56  ;;  %1296 = vmatpush1.bf16.msra.mxu1 %v1704_v57  ;;  %v259_v56 = vld [vmem:[%s1901_s23 + $0x2a8] sm:$0xff] }
  0x49   : > { %1254 = vmatprep.subr.bf16.mxu0 %v1687_v58  ;;  %1297 = vmatprep.subr.bf16.mxu1 %v1689_v59  ;;  %v267_v57 = vld [vmem:[%s1901_s23 + $0x2e8] sm:$0xff]  ;;  %v1738_v58 = vcombine.low %v274_v46, %v282_v47  ;;  %v1740_v59 = vcombine.low %v275_v48, %v283_v49  ;;  %v1789_v46 = vcombine.high %v323_v41, %v323_v41  ;;  %v306_v48 = vld [vmem:[%s1901_s23 + $0x420] sm:$0xff] }
  0x4a   : > { %v1725_v61 = vcombine.high %v259_v56, %v267_v57  ;;  %v1788_v47 = vcombine.low %v323_v41, %v323_v41  ;;  %v314_v49 = vld [vmem:[%s1901_s23 + $0x460] sm:$0xff]  ;;  %v196_v41 = vld [vmem:[%s1901_s23 + $0xb0] sm:$0xff] }
  0x4c   : > { %1255 = vmatpush1.bf16.msra.mxu0 %v1686_v1  ;;  %1298 = vmatpush1.bf16.msra.mxu1 %v1688_v2  ;;  %v243_v1 = vld [vmem:[%s1901_s23 + $0x228] sm:$0xff] }
  0x4d   : > { %1256 = vmatprep.subr.bf16.mxu0 %v1671_v3  ;;  %1299 = vmatprep.subr.bf16.mxu1 %v1673_v4  ;;  %v251_v2 = vld [vmem:[%s1901_s23 + $0x268] sm:$0xff]  ;;  %v1722_v3 = vcombine.low %v258_v54, %v266_v55  ;;  %v1724_v4 = vcombine.low %v259_v56, %v267_v57  ;;  %v1143_v54 = vsel %vm1111_vm1, %v1788_v47, 0  ;;  %v292_v56 = vld [vmem:[%s1901_s23 + $0x3b0] sm:$0xff] }
  0x4e   : > { %v1709_v6 = vcombine.high %v243_v1, %v251_v2  ;;  %v300_v57 = vld [vmem:[%s1901_s23 + $0x3f0] sm:$0xff] }
  0x50   : > { %1257 = vmatpush1.bf16.msra.mxu0 %v1670_v9  ;;  %1300 = vmatpush1.bf16.msra.mxu1 %v1672_v10  ;;  %v227_v9 = vld [vmem:[%s1901_s23 + $0x1a8] sm:$0xff] }
  0x51   : > { %1258 = vmatprep.subr.bf16.mxu0 %v1655_v11  ;;  %1301 = vmatprep.subr.bf16.mxu1 %v1657_v12  ;;  %v235_v10 = vld [vmem:[%s1901_s23 + $0x1e8] sm:$0xff]  ;;  %v1706_v11 = vcombine.low %v242_v62, %v250_v63  ;;  %v1708_v12 = vcombine.low %v243_v1, %v251_v2  ;;  %v1759_v62 = vcombine.high %v292_v56, %v300_v57  ;;  %v276_v1 = vld [vmem:[%s1901_s23 + $0x330] sm:$0xff] }
  0x52   : > { %v1693_v14 = vcombine.high %v227_v9, %v235_v10  ;;  %v284_v2 = vld [vmem:[%s1901_s23 + $0x370] sm:$0xff] }
  0x54   : > { %1259 = vmatpush1.bf16.msra.mxu0 %v1654_v17  ;;  %1302 = vmatpush1.bf16.msra.mxu1 %v1656_v18  ;;  %v211_v17 = vld [vmem:[%s1901_s23 + $0x128] sm:$0xff] }
  0x55   : > { %1260 = vmatprep.subr.bf16.mxu0 %v1639_v19  ;;  %1303 = vmatprep.subr.bf16.mxu1 %v1641_v20  ;;  %v219_v18 = vld [vmem:[%s1901_s23 + $0x168] sm:$0xff]  ;;  %v1690_v19 = vcombine.low %v226_v7, %v234_v8  ;;  %v1692_v20 = vcombine.low %v227_v9, %v235_v10  ;;  %v1743_v7 = vcombine.high %v276_v1, %v284_v2  ;;  %v260_v9 = vld [vmem:[%s1901_s23 + $0x2b0] sm:$0xff] }
  0x56   : > { %v1677_v22 = vcombine.high %v211_v17, %v219_v18  ;;  %v1676_v28 = vcombine.low %v211_v17, %v219_v18  ;;  %v268_v10 = vld [vmem:[%s1901_s23 + $0x2f0] sm:$0xff] }
  0x57   : > { %v244_v17 = vld [vmem:[%s1901_s23 + $0x230] sm:$0xff] }
  0x58   : > { %1261 = vmatpush1.bf16.msra.mxu0 %v1638_v23  ;;  %1304 = vmatpush1.bf16.msra.mxu1 %v1640_v24  ;;  %v194_v23 = vld [vmem:[%s1901_s23 + $0xa0] sm:$0xff]  ;;  %v252_v18 = vld [vmem:[%s1901_s23 + $0x270] sm:$0xff] }
  0x59   : > { %1798 = vmatprep.subr.msk.bf16.mxu0 %vm1111_vm1, %v1783_v25  ;;  %1800 = vmatprep.subr.msk.bf16.mxu1 %vm1111_vm1, %v1785_v27  ;;  %v202_v24 = vld [vmem:[%s1901_s23 + $0xe0] sm:$0xff]  ;;  %v195_v25 = vld [vmem:[%s1901_s23 + $0xa8] sm:$0xff]  ;;  %v1674_v27 = vcombine.low %v210_v15, %v218_v16  ;;  %v1727_v15 = vcombine.high %v260_v9, %v268_v10 }
  0x5a   : > { %v1659_v30 = vcombine.high %v194_v23, %v202_v24  ;;  %v1661_v31 = vcombine.high %v195_v25, %v203_v26 }
  0x5c   : > { %1275 = vmatpush2.bf16.msra.mxu0 %v1125_v34  ;;  %1318 = vmatpush2.bf16.msra.mxu1 %v1131_v36  ;;  %v179_v34 = vld [vmem:[%s1901_s23 + $0x28] sm:$0xff]  ;;  %v1658_v36 = vcombine.low %v194_v23, %v202_v24  ;;  %v1711_v23 = vcombine.high %v244_v17, %v252_v18 }
  0x5d   : > { %1276 = vmatprep.subr.bf16.mxu0 %v1767_v35  ;;  %1319 = vmatprep.subr.bf16.mxu1 %v1769_v37  ;;  %v187_v35 = vld [vmem:[%s1901_s23 + $0x68] sm:$0xff]  ;;  %v1660_v37 = vcombine.low %v195_v25, %v203_v26  ;;  %v228_v25 = vld [vmem:[%s1901_s23 + $0x1b0] sm:$0xff] }
  0x5e   : > { %v1645_v39 = vcombine.high %v179_v34, %v187_v35  ;;  %v236_v26 = vld [vmem:[%s1901_s23 + $0x1f0] sm:$0xff] }
  0x60   : > { %1277 = vmatpush2.bf16.msra.mxu0 %v1766_v42  ;;  %1320 = vmatpush2.bf16.msra.mxu1 %v1768_v43  ;;  %v1642_v42 = vcombine.low %v178_v32, %v186_v33  ;;  %v1644_v43 = vcombine.low %v179_v34, %v187_v35  ;;  %v212_v33 = vld [vmem:[%s1901_s23 + $0x130] sm:$0xff]  ;;  %v213_v35 = vld [vmem:[%s1901_s23 + $0x138] sm:$0xff] }
  0x61   : > { %1332 = vmatprep.subr.bf16.mxu0 %v1755_v44  ;;  %1375 = vmatprep.subr.bf16.mxu1 %v1757_v45  ;;  %v1787_v44 = vcombine.high %v322_v40, %v322_v40  ;;  %v1786_v45 = vcombine.low %v322_v40, %v322_v40  ;;  %v220_v34 = vld [vmem:[%s1901_s23 + $0x170] sm:$0xff] }
  0x63   : > { %1279 = vmatmul.mubr.bf16.vlgmr.msra.gmra.mxu0 %v1954_v29  ;;  %1322 = vmatmul.mubr.bf16.vlgmr.msra.gmra.mxu1 %v1954_v29 }
  0x64   : > { %1333 = vmatpush1.bf16.msra.mxu0 %v1754_v50  ;;  %1376 = vmatpush1.bf16.msra.mxu1 %v1756_v51  ;;  %v307_v50 = vld [vmem:[%s1901_s23 + $0x428] sm:$0xff] }
  0x65   : > { %1334 = vmatprep.subr.bf16.mxu0 %v1739_v52  ;;  %1377 = vmatprep.subr.bf16.mxu1 %v1741_v53  ;;  %v315_v51 = vld [vmem:[%s1901_s23 + $0x468] sm:$0xff]  ;;  %v1137_v52 = vsel %vm1111_vm1, %v1786_v45, 0  ;;  %v1771_v53 = vcombine.high %v306_v48, %v314_v49  ;;  %v1678_v45 = vcombine.low %v212_v33, %v220_v34 }
  0x66   : > { %1803 = vmatprep.mubr.msk.bf16.mxu0 %vm1107_vm0, %v1883_v0  ;;  %1805 = vmatprep.mubr.msk.bf16.mxu1 %vm1107_vm0, %v1883_v0  ;;  %v1773_v55 = vcombine.high %v307_v50, %v315_v51 }
  0x68   : > { %1335 = vmatpush1.bf16.msra.mxu0 %v1738_v58  ;;  %1378 = vmatpush1.bf16.msra.mxu1 %v1740_v59  ;;  %v293_v58 = vld [vmem:[%s1901_s23 + $0x3b8] sm:$0xff] }
  0x69   : > { %1336 = vmatprep.subr.bf16.mxu0 %v1723_v60  ;;  %1379 = vmatprep.subr.bf16.mxu1 %v1725_v61  ;;  %v301_v59 = vld [vmem:[%s1901_s23 + $0x3f8] sm:$0xff]  ;;  %v1770_v60 = vcombine.low %v306_v48, %v314_v49  ;;  %v1772_v61 = vcombine.low %v307_v50, %v315_v51  ;;  %v180_v49 = vld [vmem:[%s1901_s23 + $0x30] sm:$0xff] }
  0x6a   : > { %v1761_v63 = vcombine.high %v293_v58, %v301_v59  ;;  %v188_v50 = vld [vmem:[%s1901_s23 + $0x70] sm:$0xff]  ;;  %v181_v51 = vld [vmem:[%s1901_s23 + $0x38] sm:$0xff] }
  0x6c   : > { %1337 = vmatpush1.bf16.msra.mxu0 %v1722_v3  ;;  %1380 = vmatpush1.bf16.msra.mxu1 %v1724_v4  ;;  %v277_v3 = vld [vmem:[%s1901_s23 + $0x338] sm:$0xff] }
  0x6d   : > { %1338 = vmatprep.subr.bf16.mxu0 %v1707_v5  ;;  %1381 = vmatprep.subr.bf16.mxu1 %v1709_v6  ;;  %v285_v4 = vld [vmem:[%s1901_s23 + $0x378] sm:$0xff]  ;;  %v1758_v5 = vcombine.low %v292_v56, %v300_v57  ;;  %v1760_v6 = vcombine.low %v293_v58, %v301_v59  ;;  %v324_v57 = vld [vmem:[%s1901_s23 + $0x4b0] sm:$0x77]  ;;  %v1646_v59 = vcombine.low %v180_v49, %v188_v50 }
  0x6e   : > { %v1745_v8 = vcombine.high %v277_v3, %v285_v4  ;;  %v325_v58 = vld [vmem:[%s1901_s23 + $0x4b8] sm:$0x77] }
  0x70   : > { %1339 = vmatpush1.bf16.msra.mxu0 %v1706_v11  ;;  %1382 = vmatpush1.bf16.msra.mxu1 %v1708_v12  ;;  %v261_v11 = vld [vmem:[%s1901_s23 + $0x2b8] sm:$0xff] }
  0x71   : > { %1340 = vmatprep.subr.bf16.mxu0 %v1691_v13  ;;  %1383 = vmatprep.subr.bf16.mxu1 %v1693_v14  ;;  %v269_v12 = vld [vmem:[%s1901_s23 + $0x2f8] sm:$0xff]  ;;  %v1742_v13 = vcombine.low %v276_v1, %v284_v2  ;;  %v1744_v14 = vcombine.low %v277_v3, %v285_v4  ;;  %v1792_v1 = vcombine.low %v325_v58, %v325_v58  ;;  %v308_v2 = vld [vmem:[%s1901_s23 + $0x430] sm:$0xff] }
  0x72   : > { %v1729_v16 = vcombine.high %v261_v11, %v269_v12  ;;  %v316_v3 = vld [vmem:[%s1901_s23 + $0x470] sm:$0xff]  ;;  %v309_v4 = vld [vmem:[%s1901_s23 + $0x438] sm:$0xff] }
  0x74   : > { %1341 = vmatpush1.bf16.msra.mxu0 %v1690_v19  ;;  %1384 = vmatpush1.bf16.msra.mxu1 %v1692_v20  ;;  %v245_v19 = vld [vmem:[%s1901_s23 + $0x238] sm:$0xff] }
  0x75   : > { %1342 = vmatprep.subr.bf16.mxu0 %v1675_v21  ;;  %1385 = vmatprep.subr.bf16.mxu1 %v1677_v22  ;;  %v253_v20 = vld [vmem:[%s1901_s23 + $0x278] sm:$0xff]  ;;  %v1726_v21 = vcombine.low %v260_v9, %v268_v10  ;;  %v1728_v22 = vcombine.low %v261_v11, %v269_v12  ;;  %v1774_v10 = vcombine.low %v308_v2, %v316_v3 }
  0x76   : > { %v1713_v24 = vcombine.high %v245_v19, %v253_v20 }
  0x78   : > { %1343 = vmatpush1.bf16.msra.mxu0 %v1674_v27  ;;  %1386 = vmatpush1.bf16.msra.mxu1 %v1676_v28  ;;  %v229_v27 = vld [vmem:[%s1901_s23 + $0x1b8] sm:$0xff] }
  0x79   : > { %1344 = vmatprep.subr.bf16.mxu0 %v1659_v30  ;;  %1387 = vmatprep.subr.bf16.mxu1 %v1661_v31  ;;  %v237_v28 = vld [vmem:[%s1901_s23 + $0x1f8] sm:$0xff]  ;;  %v1710_v30 = vcombine.low %v244_v17, %v252_v18  ;;  %v1695_v31 = vcombine.high %v228_v25, %v236_v26 }
  0x7a   : > { %v1697_v32 = vcombine.high %v229_v27, %v237_v28 }
  0x7c   : > { %1345 = vmatpush1.bf16.msra.mxu0 %v1658_v36  ;;  %1388 = vmatpush1.bf16.msra.mxu1 %v1660_v37  ;;  %v221_v36 = vld [vmem:[%s1901_s23 + $0x178] sm:$0xff]  ;;  %v1694_v37 = vcombine.low %v228_v25, %v236_v26 }
  0x7d   : > { %1346 = vmatprep.subr.bf16.mxu0 %v1643_v38  ;;  %1389 = vmatprep.subr.bf16.mxu1 %v1645_v39  ;;  %v1696_v38 = vcombine.low %v229_v27, %v237_v28  ;;  %v1679_v39 = vcombine.high %v212_v33, %v220_v34  ;;  %v1681_v40 = vcombine.high %v213_v35, %v221_v36 }
  0x80   : > { %1347 = vmatpush1.bf16.msra.mxu0 %v1642_v42  ;;  %1390 = vmatpush1.bf16.msra.mxu1 %v1644_v43  ;;  %v204_v42 = vld [vmem:[%s1901_s23 + $0xf0] sm:$0xff]  ;;  %v197_v43 = vld [vmem:[%s1901_s23 + $0xb8] sm:$0xff] }
  0x81   : > { %1802 = vmatprep.subr.msk.bf16.mxu0 %vm1111_vm1, %v1787_v44  ;;  %1804 = vmatprep.subr.msk.bf16.mxu1 %vm1111_vm1, %v1789_v46  ;;  %v205_v44 = vld [vmem:[%s1901_s23 + $0xf8] sm:$0xff]  ;;  %v1680_v46 = vcombine.low %v213_v35, %v221_v36  ;;  %v1663_v47 = vcombine.high %v196_v41, %v204_v42 }
  0x82   : > { %v1665_v48 = vcombine.high %v197_v43, %v205_v44 }
  0x84   : > { %1361 = vmatpush2.bf16.msra.mxu0 %v1137_v52  ;;  %1404 = vmatpush2.bf16.msra.mxu1 %v1143_v54  ;;  %v189_v52 = vld [vmem:[%s1901_s23 + $0x78] sm:$0xff]  ;;  %v1664_v54 = vcombine.low %v197_v43, %v205_v44 }
  0x85   : > { %1362 = vmatprep.subr.bf16.mxu0 %v1771_v53  ;;  %1405 = vmatprep.subr.bf16.mxu1 %v1773_v55  ;;  %v1662_v53 = vcombine.low %v196_v41, %v204_v42  ;;  %v1647_v55 = vcombine.high %v180_v49, %v188_v50  ;;  %v1649_v56 = vcombine.high %v181_v51, %v189_v52 }
  0x88   : > { %1363 = vmatpush2.bf16.msra.mxu0 %v1770_v60  ;;  %1406 = vmatpush2.bf16.msra.mxu1 %v1772_v61  ;;  %v1648_v60 = vcombine.low %v181_v51, %v189_v52  ;;  %v1791_v61 = vcombine.high %v324_v57, %v324_v57 }
  0x89   : > { %1418 = vmatprep.subr.bf16.mxu0 %v1759_v62  ;;  %1461 = vmatprep.subr.bf16.mxu1 %v1761_v63  ;;  %v1790_v62 = vcombine.low %v324_v57, %v324_v57  ;;  %v1793_v63 = vcombine.high %v325_v58, %v325_v58  ;;  %v2096_v12 = vpop.permute.xlu0 %330 }
  0x8b   : > { %1365 = vmatmul.mubr.bf16.vlgmr.msra.gmra.mxu0 %v1954_v29  ;;  %1408 = vmatmul.mubr.bf16.vlgmr.msra.gmra.mxu1 %v1954_v29 }
  0x8c   : > { %1419 = vmatpush1.bf16.msra.mxu0 %v1758_v5  ;;  %1462 = vmatpush1.bf16.msra.mxu1 %v1760_v6  ;;  %v317_v5 = vld [vmem:[%s1901_s23 + $0x478] sm:$0xff]  ;;  %v1149_v6 = vsel %vm1111_vm1, %v1790_v62, 0 }
  0x8d   : > { %1420 = vmatprep.subr.bf16.mxu0 %v1743_v7  ;;  %1463 = vmatprep.subr.bf16.mxu1 %v1745_v8  ;;  %v1775_v7 = vcombine.high %v308_v2, %v316_v3  ;;  %v1155_v8 = vsel %vm1111_vm1, %v1792_v1, 0  ;;  %v1777_v9 = vcombine.high %v309_v4, %v317_v5  ;;  %v1776_v11 = vcombine.low %v309_v4, %v317_v5  ;;  %v2106_v18 = vpop.permute.xlu0 %335 }
  0x8e   : > { %1807 = vmatprep.mubr.msk.bf16.mxu0 %vm1107_vm0, %v1883_v0  ;;  %1809 = vmatprep.mubr.msk.bf16.mxu1 %vm1107_vm0, %v1883_v0  ;;  %v1712_v0 = vcombine.low %v245_v19, %v253_v20 }
  0x90   : > { %1421 = vmatpush1.bf16.msra.mxu0 %v1742_v13  ;;  %1464 = vmatpush1.bf16.msra.mxu1 %v1744_v14 }
  0x91   : > { %1422 = vmatprep.subr.bf16.mxu0 %v1727_v15  ;;  %1465 = vmatprep.subr.bf16.mxu1 %v1729_v16 }
  0x94   : > { %1423 = vmatpush1.bf16.msra.mxu0 %v1726_v21  ;;  %1466 = vmatpush1.bf16.msra.mxu1 %v1728_v22 }
  0x95   : > { %1424 = vmatprep.subr.bf16.mxu0 %v1711_v23  ;;  %1467 = vmatprep.subr.bf16.mxu1 %v1713_v24 }
  0x98   : > { %1425 = vmatpush1.bf16.msra.mxu0 %v1710_v30  ;;  %1468 = vmatpush1.bf16.msra.mxu1 %v1712_v0 }
  0x99   : > { %1426 = vmatprep.subr.bf16.mxu0 %v1695_v31  ;;  %1469 = vmatprep.subr.bf16.mxu1 %v1697_v32 }
  0x9c   : > { %1427 = vmatpush1.bf16.msra.mxu0 %v1694_v37  ;;  %1470 = vmatpush1.bf16.msra.mxu1 %v1696_v38 }
  0x9d   : > { %1428 = vmatprep.subr.bf16.mxu0 %v1679_v39  ;;  %1471 = vmatprep.subr.bf16.mxu1 %v1681_v40 }
  0xa0   : > { %1429 = vmatpush1.bf16.msra.mxu0 %v1678_v45  ;;  %1472 = vmatpush1.bf16.msra.mxu1 %v1680_v46 }
  0xa1   : > { %1430 = vmatprep.subr.bf16.mxu0 %v1663_v47  ;;  %1473 = vmatprep.subr.bf16.mxu1 %v1665_v48 }
  0xa4   : > { %1431 = vmatpush1.bf16.msra.mxu0 %v1662_v53  ;;  %1474 = vmatpush1.bf16.msra.mxu1 %v1664_v54 }
  0xa5   : > { %1432 = vmatprep.subr.bf16.mxu0 %v1647_v55  ;;  %1475 = vmatprep.subr.bf16.mxu1 %v1649_v56 }
  0xa8   : > { %1433 = vmatpush1.bf16.msra.mxu0 %v1646_v59  ;;  %1476 = vmatpush1.bf16.msra.mxu1 %v1648_v60 }
  0xa9   : > { %1806 = vmatprep.subr.msk.bf16.mxu0 %vm1111_vm1, %v1791_v61  ;;  %1808 = vmatprep.subr.msk.bf16.mxu1 %vm1111_vm1, %v1793_v63 }
  0xac   : > { %1447 = vmatpush2.bf16.msra.mxu0 %v1149_v6  ;;  %1490 = vmatpush2.bf16.msra.mxu1 %v1155_v8 }
  0xad   : > { %1448 = vmatprep.subr.bf16.mxu0 %v1775_v7  ;;  %1491 = vmatprep.subr.bf16.mxu1 %v1777_v9 }
  0xb0   : > { %1449 = vmatpush2.bf16.msra.mxu0 %v1774_v10  ;;  %1492 = vmatpush2.bf16.msra.mxu1 %v1776_v11 }
  0xb3   : > { %1451 = vmatmul.mubr.bf16.vlgmr.msra.gmra.mxu0 %v1954_v29  ;;  %1494 = vmatmul.mubr.bf16.vlgmr.msra.gmra.mxu1 %v1954_v29 }
  0xfb   : > { %v1194_v13 = vpop.f32.mrf.mxu0  ;;  %v1237_v15 = vpop.f32.mrf.mxu1 }
  0xfc   : > { %v1195_v14 = vadd.f32 %v1194_v13, %v2096_v12  ;;  %v1238_v16 = vadd.f32 %v1237_v15, %v2096_v12 }
  0xfd   : > { %v1196_v17 = vpop.f32.mrf.mxu0  ;;  %v1239_v20 = vpop.f32.mrf.mxu1 }
  0xfe   : > { %v1504_v29 = vmax.f32 %v1195_v14, 0.0  ;;  %v1197_v19 = vadd.f32 %v1196_v17, %v2096_v12  ;;  %v1506_v21 = vmax.f32 %v1238_v16, 0.0  ;;  %v1240_v22 = vadd.f32 %v1239_v20, %v2096_v12 }
  0xff   : > { %v1198_v23 = vpop.f32.mrf.mxu0  ;;  %v1241_v26 = vpop.f32.mrf.mxu1 }
 0x100   : > { %1536 = vst [vmem:[%s2103_s29] sm:$0xff] %v1504_v29  ;;  %v1505_v24 = vmax.f32 %v1197_v19, 0.0  ;;  %v1199_v25 = vadd.f32 %v1198_v23, %v2106_v18  ;;  %1538 = vst [vmem:[%s2103_s29 + $0x10] sm:$0xff] %v1506_v21  ;;  %v1507_v27 = vmax.f32 %v1240_v22, 0.0  ;;  %v1242_v28 = vadd.f32 %v1241_v26, %v2106_v18 }
 0x101   : > { %v1200_v30 = vpop.f32.mrf.mxu0  ;;  %v1243_v32 = vpop.f32.mrf.mxu1 }
 0x102   : > { %1537 = vst [vmem:[%s2103_s29 + $0x8] sm:$0xff] %v1505_v24  ;;  %v1520_v0 = vmax.f32 %v1199_v25, 0.0  ;;  %v1201_v31 = vadd.f32 %v1200_v30, %v2106_v18  ;;  %1539 = vst [vmem:[%s2103_s29 + $0x18] sm:$0xff] %v1507_v27  ;;  %v1522_v33 = vmax.f32 %v1242_v28, 0.0  ;;  %v1244_v34 = vadd.f32 %v1243_v32, %v2106_v18 }
 0x104   : > { %1553 = vst [vmem:[%s2103_s29 + $0x80] sm:$0xff] %v1520_v0  ;;  %v1521_v35 = vmax.f32 %v1201_v31, 0.0  ;;  %1555 = vst [vmem:[%s2103_s29 + $0x90] sm:$0xff] %v1522_v33  ;;  %v1523_v36 = vmax.f32 %v1244_v34, 0.0 }
 0x106   : > { %1554 = vst [vmem:[%s2103_s29 + $0x88] sm:$0xff] %v1521_v35  ;;  %1556 = vst [vmem:[%s2103_s29 + $0x98] sm:$0xff] %v1523_v36 }
 0x123   : > { %v1280_v37 = vpop.f32.mrf.mxu0  ;;  %v1323_v39 = vpop.f32.mrf.mxu1 }
 0x124   : > { %v1281_v38 = vadd.f32 %v1280_v37, %v2096_v12  ;;  %v1324_v40 = vadd.f32 %v1323_v39, %v2096_v12 }
 0x125   : > { %v1282_v41 = vpop.f32.mrf.mxu0  ;;  %v1325_v44 = vpop.f32.mrf.mxu1 }
 0x126   : > { %v1508_v42 = vmax.f32 %v1281_v38, 0.0  ;;  %v1283_v43 = vadd.f32 %v1282_v41, %v2096_v12  ;;  %v1510_v45 = vmax.f32 %v1324_v40, 0.0  ;;  %v1326_v46 = vadd.f32 %v1325_v44, %v2096_v12 }
 0x127   : > { %v1284_v47 = vpop.f32.mrf.mxu0  ;;  %v1327_v50 = vpop.f32.mrf.mxu1 }
 0x128   : > { %1540 = vst [vmem:[%s2103_s29 + $0x20] sm:$0xff] %v1508_v42  ;;  %v1509_v48 = vmax.f32 %v1283_v43, 0.0  ;;  %v1285_v49 = vadd.f32 %v1284_v47, %v2106_v18  ;;  %1542 = vst [vmem:[%s2103_s29 + $0x30] sm:$0xff] %v1510_v45  ;;  %v1511_v51 = vmax.f32 %v1326_v46, 0.0  ;;  %v1328_v52 = vadd.f32 %v1327_v50, %v2106_v18 }
 0x129   : > { %v1286_v53 = vpop.f32.mrf.mxu0  ;;  %v1329_v56 = vpop.f32.mrf.mxu1 }
 0x12a   : > { %1541 = vst [vmem:[%s2103_s29 + $0x28] sm:$0xff] %v1509_v48  ;;  %v1524_v54 = vmax.f32 %v1285_v49, 0.0  ;;  %v1287_v55 = vadd.f32 %v1286_v53, %v2106_v18  ;;  %1543 = vst [vmem:[%s2103_s29 + $0x38] sm:$0xff] %v1511_v51  ;;  %v1526_v57 = vmax.f32 %v1328_v52, 0.0  ;;  %v1330_v58 = vadd.f32 %v1329_v56, %v2106_v18 }
 0x12c   : > { %1557 = vst [vmem:[%s2103_s29 + $0xa0] sm:$0xff] %v1524_v54  ;;  %v1525_v59 = vmax.f32 %v1287_v55, 0.0  ;;  %1559 = vst [vmem:[%s2103_s29 + $0xb0] sm:$0xff] %v1526_v57  ;;  %v1527_v60 = vmax.f32 %v1330_v58, 0.0 }
 0x12e   : > { %1558 = vst [vmem:[%s2103_s29 + $0xa8] sm:$0xff] %v1525_v59  ;;  %1560 = vst [vmem:[%s2103_s29 + $0xb8] sm:$0xff] %v1527_v60 }
 0x14b   : > { %v1366_v61 = vpop.f32.mrf.mxu0  ;;  %v1409_v63 = vpop.f32.mrf.mxu1 }
 0x14c   : > { %v1367_v62 = vadd.f32 %v1366_v61, %v2096_v12  ;;  %v1410_v1 = vadd.f32 %v1409_v63, %v2096_v12 }
 0x14d   : > { %v1368_v2 = vpop.f32.mrf.mxu0  ;;  %v1411_v5 = vpop.f32.mrf.mxu1 }
 0x14e   : > { %v1512_v3 = vmax.f32 %v1367_v62, 0.0  ;;  %v1369_v4 = vadd.f32 %v1368_v2, %v2096_v12  ;;  %v1514_v6 = vmax.f32 %v1410_v1, 0.0  ;;  %v1412_v7 = vadd.f32 %v1411_v5, %v2096_v12 }
 0x14f   : > { %v1370_v8 = vpop.f32.mrf.mxu0  ;;  %v1413_v11 = vpop.f32.mrf.mxu1 }
 0x150   : > { %1544 = vst [vmem:[%s2103_s29 + $0x40] sm:$0xff] %v1512_v3  ;;  %v1513_v9 = vmax.f32 %v1369_v4, 0.0  ;;  %v1371_v10 = vadd.f32 %v1370_v8, %v2106_v18  ;;  %1546 = vst [vmem:[%s2103_s29 + $0x50] sm:$0xff] %v1514_v6  ;;  %v1515_v13 = vmax.f32 %v1412_v7, 0.0  ;;  %v1414_v14 = vadd.f32 %v1413_v11, %v2106_v18 }
 0x151   : > { %v1372_v15 = vpop.f32.mrf.mxu0  ;;  %v1415_v29 = vpop.f32.mrf.mxu1 }
 0x152   : > { %1545 = vst [vmem:[%s2103_s29 + $0x48] sm:$0xff] %v1513_v9  ;;  %v1528_v16 = vmax.f32 %v1371_v10, 0.0  ;;  %v1373_v17 = vadd.f32 %v1372_v15, %v2106_v18  ;;  %1547 = vst [vmem:[%s2103_s29 + $0x58] sm:$0xff] %v1515_v13  ;;  %v1530_v19 = vmax.f32 %v1414_v14, 0.0  ;;  %v1416_v20 = vadd.f32 %v1415_v29, %v2106_v18 }
 0x154   : > { %1561 = vst [vmem:[%s2103_s29 + $0xc0] sm:$0xff] %v1528_v16  ;;  %v1529_v21 = vmax.f32 %v1373_v17, 0.0  ;;  %1563 = vst [vmem:[%s2103_s29 + $0xd0] sm:$0xff] %v1530_v19  ;;  %v1531_v22 = vmax.f32 %v1416_v20, 0.0 }
 0x156   : > { %1562 = vst [vmem:[%s2103_s29 + $0xc8] sm:$0xff] %v1529_v21  ;;  %1564 = vst [vmem:[%s2103_s29 + $0xd8] sm:$0xff] %v1531_v22 }
 0x173   : > { %v1452_v23 = vpop.f32.mrf.mxu0  ;;  %v1495_v25 = vpop.f32.mrf.mxu1 }
 0x174   : > { %v1453_v24 = vadd.f32 %v1452_v23, %v2096_v12  ;;  %v1496_v26 = vadd.f32 %v1495_v25, %v2096_v12 }
 0x175   : > { %v1454_v27 = vpop.f32.mrf.mxu0  ;;  %v1497_v0 = vpop.f32.mrf.mxu1 }
 0x176   : > { %v1516_v28 = vmax.f32 %v1453_v24, 0.0  ;;  %v1455_v30 = vadd.f32 %v1454_v27, %v2096_v12  ;;  %v1518_v31 = vmax.f32 %v1496_v26, 0.0  ;;  %v1498_v32 = vadd.f32 %v1497_v0, %v2096_v12 }
 0x177   : > { %v1456_v33 = vpop.f32.mrf.mxu0  ;;  %v1499_v36 = vpop.f32.mrf.mxu1 }
 0x178   : > { %1548 = vst [vmem:[%s2103_s29 + $0x60] sm:$0xff] %v1516_v28  ;;  %v1517_v34 = vmax.f32 %v1455_v30, 0.0  ;;  %v1457_v35 = vadd.f32 %v1456_v33, %v2106_v18  ;;  %1550 = vst [vmem:[%s2103_s29 + $0x70] sm:$0xff] %v1518_v31  ;;  %v1519_v37 = vmax.f32 %v1498_v32, 0.0  ;;  %v1500_v38 = vadd.f32 %v1499_v36, %v2106_v18 }
 0x179   : > { %v1458_v39 = vpop.f32.mrf.mxu0  ;;  %v1501_v41 = vpop.f32.mrf.mxu1 }
 0x17a   : > { %1549 = vst [vmem:[%s2103_s29 + $0x68] sm:$0xff] %v1517_v34  ;;  %v1532_v40 = vmax.f32 %v1457_v35, 0.0  ;;  %v1459_v12 = vadd.f32 %v1458_v39, %v2106_v18  ;;  %1552 = vst.msk [vmem:[%s2103_s29 + $0x78] sm:$0xff] %vm1551_vm2, %v1519_v37  ;;  %v1534_v42 = vmax.f32 %v1500_v38, 0.0  ;;  %v1502_v43 = vadd.f32 %v1501_v41, %v2106_v18 }
 0x17c   : > { %1565 = vst [vmem:[%s2103_s29 + $0xe0] sm:$0xff] %v1532_v40  ;;  %v1533_v44 = vmax.f32 %v1459_v12, 0.0  ;;  %1567 = vst [vmem:[%s2103_s29 + $0xf0] sm:$0xff] %v1534_v42  ;;  %v1535_v45 = vmax.f32 %v1502_v43, 0.0 }
 0x17e   : > { %1566 = vst [vmem:[%s2103_s29 + $0xe8] sm:$0xff] %v1533_v44  ;;  %1568 = vst.msk [vmem:[%s2103_s29 + $0xf8] sm:$0xff] %vm1551_vm2, %v1535_v45 }
 0x17f PF: > { %s13_s12 = sadd.s32 1, %s1849_s12  }
 0x180   : > { %p10_p4 = scmp.ge.s32.totalorder %s13_s12, 4  }
 0x182   :  { %12 = sbr.rel (!%p10_p4) target bundleno = 1 (0x1), region = 62 }

// kernel: food101_forward.8
= control target key start
LH: loop header
LB: loop body
LE: loop exit
PB: predicated region body
PF: predicated region fallthrough
CT: control target
= control target key end

     0   :  { %s4123_s12 = smov 0   ;;  %s5119_s0 = inlined_call_operand.vmem [shape: f32[704,2,44], index: 0, kind: input, shape index: {}]   ;;  %s5120_s1 = inlined_call_operand.vmem [shape: f32[44,22], index: 1, kind: input, shape index: {}]   ;;  %s5121_s2 = inlined_call_operand.vmem [shape: f32[44,22], index: 2, kind: input, shape index: {}]   ;;  %s5122_s3 = inlined_call_operand.vmem [shape: f32[704,22], index: 3, kind: output, shape index: {}]  }
   0x1 LB: > { %s3732_s13 = sadd.s32 4294967295, %s4101_s12   ;;  %p3736_p0 = scmp.ge.s32.totalorder %s4101_s12, 1  ;;  %s4101_s12 = sphi %s4123_s12, %s13_s12  }
   0x2   : > { %p138_p1 = scmp.lt.s32.totalorder %s4101_s12, 3 }
   0x4   : > { %p139_p2 = pnand %p3736_p0, %p138_p1 }
   0x5   : > { %s162_s22 = smul.u32 (!%p139_p2), 352, %s3732_s13 }
   0x6   : > { %142 = sbr.rel (%p139_p2) target bundleno = 551 (0x227), region = 32 }
   0x7   : > { %p163_p3 = scmp.lt.s32.totalorder (!%p139_p2), %s162_s22, 703  ;;  %s4938_s18 = smul.u32 (!%p139_p2), 44, %s3732_s13 }
   0x9   : > { %p169_p4 = scmp.lt.s32.totalorder (!%p139_p2), %s4938_s18, 87 }
   0xb   : > { %v1939_v0 = vld [vmem:[%s5120_s1 + $0x28] sm:$0xf]  ;;  %vm3004_vm0 = vcmask 1043456   ;;  %v1938_v2 = vld [vmem:[%s5120_s1 + $0x20] sm:$0xff]  ;;  %v1937_v4 = vld [vmem:[%s5120_s1 + $0x18] sm:$0xff]  ;;  %s5124_s22 = smov (!%p163_p3, %s162_s22), 703 }
   0xc   : > { %v3298_v1 = vld [vmem:[%s5121_s2 + $0x28] sm:$0xf]  ;;  %3931 = vmatprep.subr.msk.mxu0 %vm3004_vm0, %v1939_v0  ;;  %v3297_v3 = vld [vmem:[%s5121_s2 + $0x20] sm:$0xff]  ;;  %v3296_v5 = vld [vmem:[%s5121_s2 + $0x18] sm:$0xff]  ;;  %s3737_s8 = sshll.u32 %s5124_s22, 1  ;;  %vm2293_vm1 = vcmask 1041409  }
   0xd   : > { %4009 = vmatprep.subr.msk.mxu1 %vm3004_vm0, %v3298_v1  ;;  %3932 = vmatpush3.msk.msra.mxu0 %vm3004_vm0, %v1939_v0  ;;  %v1936_v6 = vld [vmem:[%s5120_s1 + $0x10] sm:$0xff]  ;;  %v1935_v8 = vld [vmem:[%s5120_s1 + $0x8] sm:$0xff]  ;;  %v1934_v10 = vld [vmem:[%s5120_s1] sm:$0xff]  ;;  %s4172_s17 = scalar_lea.vmem %s5119_s0, %s3737_s8  ;;  %vm2296_vm2 = vcmask 1042434   ;;  %vm2299_vm3 = vcmask 1043459   ;;  %vm2302_vm4 = vcmask 1044484  }
   0xe   : > { %4010 = vmatpush3.msk.msra.mxu1 %vm3004_vm0, %v3298_v1  ;;  %3933 = vmatprep.subr.mxu0 %v1938_v2  ;;  %v3295_v7 = vld [vmem:[%s5121_s2 + $0x10] sm:$0xff]  ;;  %v3294_v9 = vld [vmem:[%s5121_s2 + $0x8] sm:$0xff]  ;;  %v3293_v11 = vld [vmem:[%s5121_s2] sm:$0xff]  ;;  %vm2305_vm5 = vcmask 1045509   ;;  %vm2308_vm6 = vcmask 1046534   ;;  %vm2311_vm7 = vcmask 1047559  }
   0xf   : > { %4011 = vmatprep.subr.mxu1 %v3297_v3  ;;  %3934 = vmatpush3.msra.mxu0 %v1938_v2  ;;  %v174_v12 = vld [vmem:[%s4172_s17] sm:$0x3]  ;;  %v175_v13 = vld [vmem:[%s4172_s17 + $0x2] sm:$0x3]  ;;  %v176_v14 = vld [vmem:[%s4172_s17 + $0x4] sm:$0x3] }
  0x10   : > { %4012 = vmatpush3.msra.mxu1 %v3297_v3  ;;  %3935 = vmatprep.subr.mxu0 %v1937_v4  ;;  %v177_v15 = vld [vmem:[%s4172_s17 + $0x6] sm:$0x3]  ;;  %v178_v16 = vld [vmem:[%s4172_s17 + $0x8] sm:$0x3]  ;;  %v179_v17 = vld [vmem:[%s4172_s17 + $0xa] sm:$0x3] }
  0x11   : > { %4013 = vmatprep.subr.mxu1 %v3296_v5  ;;  %3936 = vmatpush3.msra.mxu0 %v1937_v4  ;;  %v180_v18 = vld [vmem:[%s4172_s17 + $0xc] sm:$0x3]  ;;  %v181_v19 = vld [vmem:[%s4172_s17 + $0xe] sm:$0x3]  ;;  %v878_v20 = vrot.slane %v174_v12, 1  ;;  %v879_v21 = vrot.slane %v175_v13, 1 }
  0x12   : > { %4014 = vmatpush3.msra.mxu1 %v3296_v5  ;;  %3937 = vmatprep.subr.mxu0 %v1936_v6  ;;  %v880_v22 = vrot.slane %v176_v14, 1  ;;  %v881_v23 = vrot.slane %v177_v15, 1  ;;  %v882_v24 = vrot.slane %v178_v16, 1  ;;  %v883_v25 = vrot.slane %v179_v17, 1  ;;  %v182_v26 = vld [vmem:[%s4172_s17 + $0x10] sm:$0x3] }
  0x13   : > { %4015 = vmatprep.subr.mxu1 %v3295_v7  ;;  %3938 = vmatpush3.msra.mxu0 %v1936_v6  ;;  %v884_v27 = vrot.slane %v180_v18, 1  ;;  %v885_v28 = vrot.slane %v181_v19, 1  ;;  %v1582_v29 = vmax.f32 %v174_v12, %v878_v20  ;;  %v1583_v30 = vmax.f32 %v175_v13, %v879_v21  ;;  %v183_v31 = vld [vmem:[%s4172_s17 + $0x12] sm:$0x3]  ;;  %v184_v36 = vld [vmem:[%s4172_s17 + $0x14] sm:$0x3] }
  0x14   : > { %4016 = vmatpush3.msra.mxu1 %v3295_v7  ;;  %3939 = vmatprep.subr.mxu0 %v1935_v8  ;;  %vm2915_vm8 = vcmask 359424   ;;  %v1584_v32 = vmax.f32 %v176_v14, %v880_v22  ;;  %v1585_v33 = vmax.f32 %v177_v15, %v881_v23  ;;  %v1586_v34 = vmax.f32 %v178_v16, %v882_v24  ;;  %v185_v37 = vld [vmem:[%s4172_s17 + $0x16] sm:$0x3]  ;;  %v186_v38 = vld [vmem:[%s4172_s17 + $0x18] sm:$0x3]  ;;  %s5126_s18 = smov (!%p169_p4, %s4938_s18), 87 }
  0x15   : > { %4017 = vmatprep.subr.mxu1 %v3294_v9  ;;  %3940 = vmatpush3.msra.mxu0 %v1935_v8  ;;  %v1587_v35 = vmax.f32 %v179_v17, %v883_v25  ;;  %v1588_v39 = vmax.f32 %v180_v18, %v884_v27  ;;  %v1589_v40 = vmax.f32 %v181_v19, %v885_v28  ;;  %v2292_v41 = vrot.slane %v1583_v30, 7  ;;  %v187_v42 = vld [vmem:[%s4172_s17 + $0x1a] sm:$0x3]  ;;  %v188_v43 = vld [vmem:[%s4172_s17 + $0x1c] sm:$0x3]  ;;  %s3738_s13 = sshll.u32 %s5126_s18, 3 }
  0x16   : > { %4018 = vmatpush3.msra.mxu1 %v3294_v9  ;;  %3941 = vmatprep.subr.mxu0 %v1934_v10  ;;  %v886_v44 = vrot.slane %v182_v26, 1  ;;  %v2295_v45 = vrot.slane %v1584_v32, 6  ;;  %v2298_v46 = vrot.slane %v1585_v33, 5  ;;  %v2301_v47 = vrot.slane %v1586_v34, 4  ;;  %v189_v49 = vld [vmem:[%s4172_s17 + $0x1e] sm:$0x3]  ;;  %s4988_s21 = scalar_lea.vmem %s5122_s3, %s3738_s13 }
  0x17   : > { %4019 = vmatprep.subr.mxu1 %v3293_v11  ;;  %3942 = vmatpush3.msra.mxu0 %v1934_v10  ;;  %v2304_v48 = vrot.slane %v1587_v35, 3  ;;  %v2294_v50 = vsel %vm2293_vm1, %v2292_v41, %v1582_v29  ;;  %v2307_v51 = vrot.slane %v1588_v39, 2  ;;  %v2310_v52 = vrot.slane %v1589_v40, 1  ;;  %v190_v2 = vld [vmem:[%s4172_s17 + $0x20] sm:$0x3] }
  0x18   : > { %4020 = vmatpush3.msra.mxu1 %v3293_v11  ;;  %v887_v53 = vrot.slane %v183_v31, 1  ;;  %v2297_v54 = vsel %vm2296_vm2, %v2295_v45, %v2294_v50  ;;  %v888_v55 = vrot.slane %v184_v36, 1  ;;  %v889_v56 = vrot.slane %v185_v37, 1  ;;  %v191_v7 = vld [vmem:[%s4172_s17 + $0x22] sm:$0x3] }
  0x19   : > { %v890_v57 = vrot.slane %v186_v38, 1  ;;  %v2300_v58 = vsel %vm2299_vm3, %v2298_v46, %v2297_v54  ;;  %v891_v59 = vrot.slane %v187_v42, 1  ;;  %v892_v60 = vrot.slane %v188_v43, 1  ;;  %v192_v8 = vld [vmem:[%s4172_s17 + $0x24] sm:$0x3] }
  0x1a   : > { %v893_v61 = vrot.slane %v189_v49, 1  ;;  %v2303_v62 = vsel %vm2302_vm4, %v2301_v47, %v2300_v58  ;;  %v1590_v63 = vmax.f32 %v182_v26, %v886_v44  ;;  %v1591_v0 = vmax.f32 %v183_v31, %v887_v53  ;;  %v193_v9 = vld [vmem:[%s4172_s17 + $0x26] sm:$0x3]  ;;  %v194_v14 = vld [vmem:[%s4172_s17 + $0x28] sm:$0x3] }
  0x1b   : > { %v1592_v1 = vmax.f32 %v184_v36, %v888_v55  ;;  %v2306_v3 = vsel %vm2305_vm5, %v2304_v48, %v2303_v62  ;;  %v1593_v4 = vmax.f32 %v185_v37, %v889_v56  ;;  %v1594_v5 = vmax.f32 %v186_v38, %v890_v57  ;;  %v195_v15 = vld [vmem:[%s4172_s17 + $0x2a] sm:$0x3]  ;;  %v196_v20 = vld [vmem:[%s4172_s17 + $0x2c] sm:$0x3]  ;;  %v197_v25 = vld [vmem:[%s4172_s17 + $0x2e] sm:$0x3] }
  0x1c   : > { %v1595_v6 = vmax.f32 %v187_v42, %v891_v59  ;;  %v2309_v10 = vsel %vm2308_vm6, %v2307_v51, %v2306_v3  ;;  %v1596_v11 = vmax.f32 %v188_v43, %v892_v60  ;;  %v1597_v12 = vmax.f32 %v189_v49, %v893_v61  ;;  %v198_v42 = vld [vmem:[%s4172_s17 + $0x30] sm:$0x3]  ;;  %v199_v43 = vld [vmem:[%s4172_s17 + $0x32] sm:$0x3]  ;;  %v200_v48 = vld [vmem:[%s4172_s17 + $0x34] sm:$0x3] }
  0x1d   : > { %v2313_v13 = vrot.slane %v1591_v0, 7  ;;  %v2312_v16 = vsel %vm2311_vm7, %v2310_v52, %v2309_v10  ;;  %v2315_v17 = vrot.slane %v1592_v1, 6  ;;  %v2317_v18 = vrot.slane %v1593_v4, 5  ;;  %v201_v49 = vld [vmem:[%s4172_s17 + $0x36] sm:$0x3] }
  0x1e   : > { %v2319_v19 = vrot.slane %v1594_v5, 4  ;;  %3943 = vmatprep.mubr.msk.f32.mxu0 %vm2915_vm8, %v2312_v16  ;;  %4021 = vmatprep.mubr.msk.f32.mxu1 %vm2915_vm8, %v2312_v16  ;;  %v2321_v22 = vrot.slane %v1595_v6, 3  ;;  %v2323_v23 = vrot.slane %v1596_v11, 2  ;;  %v2325_v24 = vrot.slane %v1597_v12, 1  ;;  %v202_v50 = vld [vmem:[%s4172_s17 + $0x38] sm:$0x3] }
  0x1f   : > { %v2314_v21 = vsel %vm2293_vm1, %v2313_v13, %v1590_v63  ;;  %v894_v27 = vrot.slane %v190_v2, 1  ;;  %v895_v28 = vrot.slane %v191_v7, 1  ;;  %v896_v29 = vrot.slane %v192_v8, 1  ;;  %v203_v55 = vld [vmem:[%s4172_s17 + $0x3a] sm:$0x3] }
  0x20   : > { %v2316_v26 = vsel %vm2296_vm2, %v2315_v17, %v2314_v21  ;;  %v897_v31 = vrot.slane %v193_v9, 1  ;;  %v898_v32 = vrot.slane %v194_v14, 1  ;;  %v899_v33 = vrot.slane %v195_v15, 1  ;;  %v204_v56 = vld [vmem:[%s4172_s17 + $0x3c] sm:$0x3] }
  0x21   : > { %v2318_v30 = vsel %vm2299_vm3, %v2317_v18, %v2316_v26  ;;  %v900_v35 = vrot.slane %v196_v20, 1  ;;  %v901_v36 = vrot.slane %v197_v25, 1  ;;  %v1598_v37 = vmax.f32 %v190_v2, %v894_v27  ;;  %v205_v61 = vld [vmem:[%s4172_s17 + $0x3e] sm:$0x3]  ;;  %v209_v21 = vld [vmem:[%s4172_s17 + $0x46] sm:$0x3] }
  0x22   : > { %v2320_v34 = vsel %vm2302_vm4, %v2319_v19, %v2318_v30  ;;  %v1599_v39 = vmax.f32 %v191_v7, %v895_v28  ;;  %v1600_v40 = vmax.f32 %v192_v8, %v896_v29  ;;  %v1601_v41 = vmax.f32 %v193_v9, %v897_v31  ;;  %v207_v19 = vld [vmem:[%s4172_s17 + $0x42] sm:$0x3]  ;;  %v210_v26 = vld [vmem:[%s4172_s17 + $0x48] sm:$0x3]  ;;  %v211_v27 = vld [vmem:[%s4172_s17 + $0x4a] sm:$0x3] }
  0x23   : > { %v2322_v38 = vsel %vm2305_vm5, %v2321_v22, %v2320_v34  ;;  %v1602_v45 = vmax.f32 %v194_v14, %v898_v32  ;;  %v1603_v46 = vmax.f32 %v195_v15, %v899_v33  ;;  %v1604_v47 = vmax.f32 %v196_v20, %v900_v35  ;;  %v206_v14 = vld [vmem:[%s4172_s17 + $0x40] sm:$0x3]  ;;  %v208_v20 = vld [vmem:[%s4172_s17 + $0x44] sm:$0x3]  ;;  %v212_v32 = vld [vmem:[%s4172_s17 + $0x4c] sm:$0x3] }
  0x24   : > { %v2324_v44 = vsel %vm2308_vm6, %v2323_v23, %v2322_v38  ;;  %v1605_v52 = vmax.f32 %v197_v25, %v901_v36  ;;  %v2327_v53 = vrot.slane %v1599_v39, 7  ;;  %v2329_v54 = vrot.slane %v1600_v40, 6 }
  0x25   : > { %v2326_v51 = vsel %vm2311_vm7, %v2325_v24, %v2324_v44  ;;  %v2331_v57 = vrot.slane %v1601_v41, 5  ;;  %v2333_v58 = vrot.slane %v1602_v45, 4  ;;  %v2335_v59 = vrot.slane %v1603_v46, 3 }
  0x26   : > { %3944 = vmatmul.mubr.msk.f32.vlgmr.msra.gmra.mxu0 %vm2915_vm8, %v2326_v51  ;;  %4022 = vmatmul.mubr.msk.f32.vlgmr.msra.gmra.mxu1 %vm2915_vm8, %v2326_v51  ;;  %v2337_v60 = vrot.slane %v1604_v47, 2  ;;  %v2328_v62 = vsel %vm2293_vm1, %v2327_v53, %v1598_v37  ;;  %v2339_v63 = vrot.slane %v1605_v52, 1  ;;  %v902_v0 = vrot.slane %v198_v42, 1  ;;  %v213_v37 = vld [vmem:[%s4172_s17 + $0x4e] sm:$0x3] }
  0x27   : > { %v903_v1 = vrot.slane %v199_v43, 1  ;;  %v2330_v2 = vsel %vm2296_vm2, %v2329_v54, %v2328_v62  ;;  %v904_v3 = vrot.slane %v200_v48, 1  ;;  %v905_v4 = vrot.slane %v201_v49, 1  ;;  %v214_v54 = vld [vmem:[%s4172_s17 + $0x50] sm:$0x3] }
  0x28   : > { %v906_v5 = vrot.slane %v202_v50, 1  ;;  %v2332_v6 = vsel %vm2299_vm3, %v2331_v57, %v2330_v2  ;;  %v907_v7 = vrot.slane %v203_v55, 1  ;;  %v908_v8 = vrot.slane %v204_v56, 1  ;;  %v218_v62 = vld [vmem:[%s4172_s17 + $0x58] sm:$0x3] }
  0x29   : > { %v909_v9 = vrot.slane %v205_v61, 1  ;;  %v2334_v10 = vsel %vm2302_vm4, %v2333_v58, %v2332_v6  ;;  %v1606_v11 = vmax.f32 %v198_v42, %v902_v0  ;;  %v1607_v12 = vmax.f32 %v199_v43, %v903_v1 }
  0x2a   : > { %v1608_v13 = vmax.f32 %v200_v48, %v904_v3  ;;  %v2336_v15 = vsel %vm2305_vm5, %v2335_v59, %v2334_v10  ;;  %v1609_v16 = vmax.f32 %v201_v49, %v905_v4  ;;  %v1610_v17 = vmax.f32 %v202_v50, %v906_v5  ;;  %v219_v3 = vld [vmem:[%s4172_s17 + $0x5a] sm:$0x3]  ;;  %v220_v4 = vld [vmem:[%s4172_s17 + $0x5c] sm:$0x3] }
  0x2b   : > { %v1611_v18 = vmax.f32 %v203_v55, %v907_v7  ;;  %v2338_v22 = vsel %vm2308_vm6, %v2337_v60, %v2336_v15  ;;  %v1612_v23 = vmax.f32 %v204_v56, %v908_v8  ;;  %v1613_v24 = vmax.f32 %v205_v61, %v909_v9  ;;  %v215_v55 = vld [vmem:[%s4172_s17 + $0x52] sm:$0x3]  ;;  %v216_v60 = vld [vmem:[%s4172_s17 + $0x54] sm:$0x3]  ;;  %v217_v61 = vld [vmem:[%s4172_s17 + $0x56] sm:$0x3] }
  0x2c   : > { %v2341_v25 = vrot.slane %v1607_v12, 7  ;;  %v2340_v28 = vsel %vm2311_vm7, %v2339_v63, %v2338_v22  ;;  %v2343_v29 = vrot.slane %v1608_v13, 6  ;;  %v2345_v30 = vrot.slane %v1609_v16, 5  ;;  %v221_v9 = vld [vmem:[%s4172_s17 + $0x5e] sm:$0x3] }
  0x2d   : > { %v2347_v31 = vrot.slane %v1610_v17, 4  ;;  %3946 = vmatprep.mubr.msk.f32.mxu0 %vm2915_vm8, %v2340_v28  ;;  %4024 = vmatprep.mubr.msk.f32.mxu1 %vm2915_vm8, %v2340_v28  ;;  %v2349_v34 = vrot.slane %v1611_v18, 3  ;;  %v2351_v35 = vrot.slane %v1612_v23, 2  ;;  %v2353_v36 = vrot.slane %v1613_v24, 1 }
  0x2e   : > { %v2342_v33 = vsel %vm2293_vm1, %v2341_v25, %v1606_v11  ;;  %v910_v39 = vrot.slane %v206_v14, 1  ;;  %v911_v40 = vrot.slane %v207_v19, 1  ;;  %v912_v41 = vrot.slane %v208_v20, 1 }
  0x2f   : > { %v2344_v38 = vsel %vm2296_vm2, %v2343_v29, %v2342_v33  ;;  %v913_v43 = vrot.slane %v209_v21, 1  ;;  %v914_v44 = vrot.slane %v210_v26, 1  ;;  %v915_v45 = vrot.slane %v211_v27, 1  ;;  %v225_v33 = vld [vmem:[%s4172_s17 + $0x66] sm:$0x3] }
  0x30   : > { %v2346_v42 = vsel %vm2299_vm3, %v2345_v30, %v2344_v38  ;;  %v916_v47 = vrot.slane %v212_v32, 1  ;;  %v917_v48 = vrot.slane %v213_v37, 1  ;;  %v1614_v49 = vmax.f32 %v206_v14, %v910_v39  ;;  %v226_v38 = vld [vmem:[%s4172_s17 + $0x68] sm:$0x3]  ;;  %v227_v39 = vld [vmem:[%s4172_s17 + $0x6a] sm:$0x3] }
  0x31   : > { %v2348_v46 = vsel %vm2302_vm4, %v2347_v31, %v2346_v42  ;;  %v1615_v51 = vmax.f32 %v207_v19, %v911_v40  ;;  %v1616_v52 = vmax.f32 %v208_v20, %v912_v41  ;;  %v1617_v53 = vmax.f32 %v209_v21, %v913_v43  ;;  %v223_v31 = vld [vmem:[%s4172_s17 + $0x62] sm:$0x3] }
  0x32   : > { %v2350_v50 = vsel %vm2305_vm5, %v2349_v34, %v2348_v46  ;;  %v1618_v57 = vmax.f32 %v210_v26, %v914_v44  ;;  %v1619_v58 = vmax.f32 %v211_v27, %v915_v45  ;;  %v1620_v59 = vmax.f32 %v212_v32, %v916_v47  ;;  %v222_v26 = vld [vmem:[%s4172_s17 + $0x60] sm:$0x3]  ;;  %v224_v32 = vld [vmem:[%s4172_s17 + $0x64] sm:$0x3]  ;;  %v228_v44 = vld [vmem:[%s4172_s17 + $0x6c] sm:$0x3] }
  0x33   : > { %v2352_v56 = vsel %vm2308_vm6, %v2351_v35, %v2350_v50  ;;  %v1621_v0 = vmax.f32 %v213_v37, %v917_v48  ;;  %v2355_v1 = vrot.slane %v1615_v51, 7  ;;  %v2357_v2 = vrot.slane %v1616_v52, 6 }
  0x34   : > { %v2354_v63 = vsel %vm2311_vm7, %v2353_v36, %v2352_v56  ;;  %v2359_v5 = vrot.slane %v1617_v53, 5  ;;  %v2361_v6 = vrot.slane %v1618_v57, 4  ;;  %v2363_v7 = vrot.slane %v1619_v58, 3 }
  0x35   : > { %3947 = vmatmul.mubr.msk.f32.gmra.mxu0 %vm2915_vm8, %v2354_v63  ;;  %4025 = vmatmul.mubr.msk.f32.gmra.mxu1 %vm2915_vm8, %v2354_v63  ;;  %v2365_v8 = vrot.slane %v1620_v59, 2  ;;  %v2356_v10 = vsel %vm2293_vm1, %v2355_v1, %v1614_v49  ;;  %v2367_v11 = vrot.slane %v1621_v0, 1  ;;  %v918_v12 = vrot.slane %v214_v54, 1  ;;  %v229_v49 = vld [vmem:[%s4172_s17 + $0x6e] sm:$0x3] }
  0x36   : > { %v919_v13 = vrot.slane %v215_v55, 1  ;;  %v2358_v14 = vsel %vm2296_vm2, %v2357_v2, %v2356_v10  ;;  %v920_v15 = vrot.slane %v216_v60, 1  ;;  %v921_v16 = vrot.slane %v217_v61, 1  ;;  %v230_v2 = vld [vmem:[%s4172_s17 + $0x70] sm:$0x3] }
  0x37   : > { %v922_v17 = vrot.slane %v218_v62, 1  ;;  %v2360_v18 = vsel %vm2299_vm3, %v2359_v5, %v2358_v14  ;;  %v923_v19 = vrot.slane %v219_v3, 1  ;;  %v924_v20 = vrot.slane %v220_v4, 1  ;;  %v234_v10 = vld [vmem:[%s4172_s17 + $0x78] sm:$0x3] }
  0x38   : > { %v925_v21 = vrot.slane %v221_v9, 1  ;;  %v2362_v22 = vsel %vm2302_vm4, %v2361_v6, %v2360_v18  ;;  %v1622_v23 = vmax.f32 %v214_v54, %v918_v12  ;;  %v1623_v24 = vmax.f32 %v215_v55, %v919_v13 }
  0x39   : > { %v1624_v25 = vmax.f32 %v216_v60, %v920_v15  ;;  %v2364_v27 = vsel %vm2305_vm5, %v2363_v7, %v2362_v22  ;;  %v1625_v28 = vmax.f32 %v217_v61, %v921_v16  ;;  %v1626_v29 = vmax.f32 %v218_v62, %v922_v17  ;;  %v235_v15 = vld [vmem:[%s4172_s17 + $0x7a] sm:$0x3]  ;;  %v236_v16 = vld [vmem:[%s4172_s17 + $0x7c] sm:$0x3] }
  0x3a   : > { %v1627_v30 = vmax.f32 %v219_v3, %v923_v19  ;;  %v2366_v34 = vsel %vm2308_vm6, %v2365_v8, %v2364_v27  ;;  %v1628_v35 = vmax.f32 %v220_v4, %v924_v20  ;;  %v1629_v36 = vmax.f32 %v221_v9, %v925_v21  ;;  %v231_v3 = vld [vmem:[%s4172_s17 + $0x72] sm:$0x3]  ;;  %v232_v8 = vld [vmem:[%s4172_s17 + $0x74] sm:$0x3]  ;;  %v233_v9 = vld [vmem:[%s4172_s17 + $0x76] sm:$0x3] }
  0x3b   : > { %v2369_v37 = vrot.slane %v1623_v24, 7  ;;  %v2368_v40 = vsel %vm2311_vm7, %v2367_v11, %v2366_v34  ;;  %v2371_v41 = vrot.slane %v1624_v25, 6  ;;  %v2373_v42 = vrot.slane %v1625_v28, 5  ;;  %v237_v21 = vld [vmem:[%s4172_s17 + $0x7e] sm:$0x3] }
  0x3c   : > { %v2375_v43 = vrot.slane %v1626_v29, 4  ;;  %3949 = vmatprep.mubr.msk.f32.mxu0 %vm2915_vm8, %v2368_v40  ;;  %4027 = vmatprep.mubr.msk.f32.mxu1 %vm2915_vm8, %v2368_v40  ;;  %v2377_v46 = vrot.slane %v1627_v30, 3  ;;  %v2379_v47 = vrot.slane %v1628_v35, 2  ;;  %v2381_v48 = vrot.slane %v1629_v36, 1 }
  0x3d   : > { %v2370_v45 = vsel %vm2293_vm1, %v2369_v37, %v1622_v23  ;;  %v926_v51 = vrot.slane %v222_v26, 1  ;;  %v927_v52 = vrot.slane %v223_v31, 1  ;;  %v928_v53 = vrot.slane %v224_v32, 1 }
  0x3e   : > { %v2372_v50 = vsel %vm2296_vm2, %v2371_v41, %v2370_v45  ;;  %v929_v55 = vrot.slane %v225_v33, 1  ;;  %v930_v56 = vrot.slane %v226_v38, 1  ;;  %v931_v57 = vrot.slane %v227_v39, 1  ;;  %v241_v45 = vld [vmem:[%s4172_s17 + $0x86] sm:$0x3] }
  0x3f   : > { %v2374_v54 = vsel %vm2299_vm3, %v2373_v42, %v2372_v50  ;;  %v932_v59 = vrot.slane %v228_v44, 1  ;;  %v933_v60 = vrot.slane %v229_v49, 1  ;;  %v1630_v61 = vmax.f32 %v222_v26, %v926_v51  ;;  %v242_v50 = vld [vmem:[%s4172_s17 + $0x88] sm:$0x3]  ;;  %v243_v51 = vld [vmem:[%s4172_s17 + $0x8a] sm:$0x3] }
  0x40   : > { %v2376_v58 = vsel %vm2302_vm4, %v2375_v43, %v2374_v54  ;;  %v1631_v63 = vmax.f32 %v223_v31, %v927_v52  ;;  %v1632_v0 = vmax.f32 %v224_v32, %v928_v53  ;;  %v1633_v1 = vmax.f32 %v225_v33, %v929_v55  ;;  %v239_v43 = vld [vmem:[%s4172_s17 + $0x82] sm:$0x3] }
  0x41   : > { %v2378_v62 = vsel %vm2305_vm5, %v2377_v46, %v2376_v58  ;;  %v1634_v5 = vmax.f32 %v226_v38, %v930_v56  ;;  %v1635_v6 = vmax.f32 %v227_v39, %v931_v57  ;;  %v1636_v7 = vmax.f32 %v228_v44, %v932_v59  ;;  %v238_v38 = vld [vmem:[%s4172_s17 + $0x80] sm:$0x3]  ;;  %v240_v44 = vld [vmem:[%s4172_s17 + $0x84] sm:$0x3]  ;;  %v244_v56 = vld [vmem:[%s4172_s17 + $0x8c] sm:$0x3] }
  0x42   : > { %v2380_v4 = vsel %vm2308_vm6, %v2379_v47, %v2378_v62  ;;  %v1637_v12 = vmax.f32 %v229_v49, %v933_v60  ;;  %v2383_v13 = vrot.slane %v1631_v63, 7  ;;  %v2385_v14 = vrot.slane %v1632_v0, 6 }
  0x43   : > { %v2382_v11 = vsel %vm2311_vm7, %v2381_v48, %v2380_v4  ;;  %v2387_v17 = vrot.slane %v1633_v1, 5  ;;  %v2389_v18 = vrot.slane %v1634_v5, 4  ;;  %v2391_v19 = vrot.slane %v1635_v6, 3 }
  0x44   : > { %3950 = vmatmul.mubr.msk.f32.gmra.mxu0 %vm2915_vm8, %v2382_v11  ;;  %4028 = vmatmul.mubr.msk.f32.gmra.mxu1 %vm2915_vm8, %v2382_v11  ;;  %v2393_v20 = vrot.slane %v1636_v7, 2  ;;  %v2384_v22 = vsel %vm2293_vm1, %v2383_v13, %v1630_v61  ;;  %v2395_v23 = vrot.slane %v1637_v12, 1  ;;  %v934_v24 = vrot.slane %v230_v2, 1  ;;  %v245_v61 = vld [vmem:[%s4172_s17 + $0x8e] sm:$0x3] }
  0x45   : > { %v935_v25 = vrot.slane %v231_v3, 1  ;;  %v2386_v26 = vsel %vm2296_vm2, %v2385_v14, %v2384_v22  ;;  %v936_v27 = vrot.slane %v232_v8, 1  ;;  %v937_v28 = vrot.slane %v233_v9, 1  ;;  %v246_v14 = vld [vmem:[%s4172_s17 + $0x90] sm:$0x3] }
  0x46   : > { %v938_v29 = vrot.slane %v234_v10, 1  ;;  %v2388_v30 = vsel %vm2299_vm3, %v2387_v17, %v2386_v26  ;;  %v939_v31 = vrot.slane %v235_v15, 1  ;;  %v940_v32 = vrot.slane %v236_v16, 1  ;;  %v250_v22 = vld [vmem:[%s4172_s17 + $0x98] sm:$0x3] }
  0x47   : > { %v941_v33 = vrot.slane %v237_v21, 1  ;;  %v2390_v34 = vsel %vm2302_vm4, %v2389_v18, %v2388_v30  ;;  %v1638_v35 = vmax.f32 %v230_v2, %v934_v24  ;;  %v1639_v36 = vmax.f32 %v231_v3, %v935_v25 }
  0x48   : > { %v1640_v37 = vmax.f32 %v232_v8, %v936_v27  ;;  %v2392_v39 = vsel %vm2305_vm5, %v2391_v19, %v2390_v34  ;;  %v1641_v40 = vmax.f32 %v233_v9, %v937_v28  ;;  %v1642_v41 = vmax.f32 %v234_v10, %v938_v29  ;;  %v251_v27 = vld [vmem:[%s4172_s17 + $0x9a] sm:$0x3]  ;;  %v252_v28 = vld [vmem:[%s4172_s17 + $0x9c] sm:$0x3] }
  0x49   : > { %v1643_v42 = vmax.f32 %v235_v15, %v939_v31  ;;  %v2394_v46 = vsel %vm2308_vm6, %v2393_v20, %v2392_v39  ;;  %v1644_v47 = vmax.f32 %v236_v16, %v940_v32  ;;  %v1645_v48 = vmax.f32 %v237_v21, %v941_v33  ;;  %v247_v15 = vld [vmem:[%s4172_s17 + $0x92] sm:$0x3]  ;;  %v248_v20 = vld [vmem:[%s4172_s17 + $0x94] sm:$0x3]  ;;  %v249_v21 = vld [vmem:[%s4172_s17 + $0x96] sm:$0x3] }
  0x4a   : > { %v2397_v49 = vrot.slane %v1639_v36, 7  ;;  %v2396_v52 = vsel %vm2311_vm7, %v2395_v23, %v2394_v46  ;;  %v2399_v53 = vrot.slane %v1640_v37, 6  ;;  %v2401_v54 = vrot.slane %v1641_v40, 5  ;;  %v253_v33 = vld [vmem:[%s4172_s17 + $0x9e] sm:$0x3] }
  0x4b   : > { %v2403_v55 = vrot.slane %v1642_v41, 4  ;;  %3952 = vmatprep.mubr.msk.f32.mxu0 %vm2915_vm8, %v2396_v52  ;;  %4030 = vmatprep.mubr.msk.f32.mxu1 %vm2915_vm8, %v2396_v52  ;;  %v2405_v58 = vrot.slane %v1643_v42, 3  ;;  %v2407_v59 = vrot.slane %v1644_v47, 2  ;;  %v2409_v60 = vrot.slane %v1645_v48, 1 }
  0x4c   : > { %v2398_v57 = vsel %vm2293_vm1, %v2397_v49, %v1638_v35  ;;  %v942_v63 = vrot.slane %v238_v38, 1  ;;  %v943_v0 = vrot.slane %v239_v43, 1  ;;  %v944_v1 = vrot.slane %v240_v44, 1 }
  0x4d   : > { %v2400_v62 = vsel %vm2296_vm2, %v2399_v53, %v2398_v57  ;;  %v945_v3 = vrot.slane %v241_v45, 1  ;;  %v946_v4 = vrot.slane %v242_v50, 1  ;;  %v947_v5 = vrot.slane %v243_v51, 1  ;;  %v257_v57 = vld [vmem:[%s4172_s17 + $0xa6] sm:$0x3] }
  0x4e   : > { %v2402_v2 = vsel %vm2299_vm3, %v2401_v54, %v2400_v62  ;;  %v948_v7 = vrot.slane %v244_v56, 1  ;;  %v949_v8 = vrot.slane %v245_v61, 1  ;;  %v1646_v9 = vmax.f32 %v238_v38, %v942_v63  ;;  %v258_v62 = vld [vmem:[%s4172_s17 + $0xa8] sm:$0x3]  ;;  %v259_v63 = vld [vmem:[%s4172_s17 + $0xaa] sm:$0x3] }
  0x4f   : > { %v2404_v6 = vsel %vm2302_vm4, %v2403_v55, %v2402_v2  ;;  %v1647_v11 = vmax.f32 %v239_v43, %v943_v0  ;;  %v1648_v12 = vmax.f32 %v240_v44, %v944_v1  ;;  %v1649_v13 = vmax.f32 %v241_v45, %v945_v3  ;;  %v255_v55 = vld [vmem:[%s4172_s17 + $0xa2] sm:$0x3] }
  0x50   : > { %v2406_v10 = vsel %vm2305_vm5, %v2405_v58, %v2404_v6  ;;  %v1650_v17 = vmax.f32 %v242_v50, %v946_v4  ;;  %v1651_v18 = vmax.f32 %v243_v51, %v947_v5  ;;  %v1652_v19 = vmax.f32 %v244_v56, %v948_v7  ;;  %v254_v50 = vld [vmem:[%s4172_s17 + $0xa0] sm:$0x3]  ;;  %v256_v56 = vld [vmem:[%s4172_s17 + $0xa4] sm:$0x3]  ;;  %v260_v4 = vld [vmem:[%s4172_s17 + $0xac] sm:$0x3] }
  0x51   : > { %v2408_v16 = vsel %vm2308_vm6, %v2407_v59, %v2406_v10  ;;  %v1653_v24 = vmax.f32 %v245_v61, %v949_v8  ;;  %v2411_v25 = vrot.slane %v1647_v11, 7  ;;  %v2413_v26 = vrot.slane %v1648_v12, 6 }
  0x52   : > { %v2410_v23 = vsel %vm2311_vm7, %v2409_v60, %v2408_v16  ;;  %v2415_v29 = vrot.slane %v1649_v13, 5  ;;  %v2417_v30 = vrot.slane %v1650_v17, 4  ;;  %v2419_v31 = vrot.slane %v1651_v18, 3 }
  0x53   : > { %3953 = vmatmul.mubr.msk.f32.gmra.mxu0 %vm2915_vm8, %v2410_v23  ;;  %4031 = vmatmul.mubr.msk.f32.gmra.mxu1 %vm2915_vm8, %v2410_v23  ;;  %v2421_v32 = vrot.slane %v1652_v19, 2  ;;  %v2412_v34 = vsel %vm2293_vm1, %v2411_v25, %v1646_v9  ;;  %v2423_v35 = vrot.slane %v1653_v24, 1  ;;  %v950_v36 = vrot.slane %v246_v14, 1  ;;  %v261_v9 = vld [vmem:[%s4172_s17 + $0xae] sm:$0x3] }
  0x54   : > { %v951_v37 = vrot.slane %v247_v15, 1  ;;  %v2414_v38 = vsel %vm2296_vm2, %v2413_v26, %v2412_v34  ;;  %v952_v39 = vrot.slane %v248_v20, 1  ;;  %v953_v40 = vrot.slane %v249_v21, 1  ;;  %v262_v26 = vld [vmem:[%s4172_s17 + $0xb0] sm:$0x3] }
  0x55   : > { %v954_v41 = vrot.slane %v250_v22, 1  ;;  %v2416_v42 = vsel %vm2299_vm3, %v2415_v29, %v2414_v38  ;;  %v955_v43 = vrot.slane %v251_v27, 1  ;;  %v956_v44 = vrot.slane %v252_v28, 1  ;;  %v266_v34 = vld [vmem:[%s4172_s17 + $0xb8] sm:$0x3] }
  0x56   : > { %v957_v45 = vrot.slane %v253_v33, 1  ;;  %v2418_v46 = vsel %vm2302_vm4, %v2417_v30, %v2416_v42  ;;  %v1654_v47 = vmax.f32 %v246_v14, %v950_v36  ;;  %v1655_v48 = vmax.f32 %v247_v15, %v951_v37 }
  0x57   : > { %v1656_v49 = vmax.f32 %v248_v20, %v952_v39  ;;  %v2420_v51 = vsel %vm2305_vm5, %v2419_v31, %v2418_v46  ;;  %v1657_v52 = vmax.f32 %v249_v21, %v953_v40  ;;  %v1658_v53 = vmax.f32 %v250_v22, %v954_v41  ;;  %v267_v39 = vld [vmem:[%s4172_s17 + $0xba] sm:$0x3]  ;;  %v268_v40 = vld [vmem:[%s4172_s17 + $0xbc] sm:$0x3] }
  0x58   : > { %v1659_v54 = vmax.f32 %v251_v27, %v955_v43  ;;  %v2422_v58 = vsel %vm2308_vm6, %v2421_v32, %v2420_v51  ;;  %v1660_v59 = vmax.f32 %v252_v28, %v956_v44  ;;  %v1661_v60 = vmax.f32 %v253_v33, %v957_v45  ;;  %v263_v27 = vld [vmem:[%s4172_s17 + $0xb2] sm:$0x3]  ;;  %v264_v32 = vld [vmem:[%s4172_s17 + $0xb4] sm:$0x3]  ;;  %v265_v33 = vld [vmem:[%s4172_s17 + $0xb6] sm:$0x3] }
  0x59   : > { %v2425_v61 = vrot.slane %v1655_v48, 7  ;;  %v2424_v0 = vsel %vm2311_vm7, %v2423_v35, %v2422_v58  ;;  %v2427_v1 = vrot.slane %v1656_v49, 6  ;;  %v2429_v2 = vrot.slane %v1657_v52, 5  ;;  %v269_v45 = vld [vmem:[%s4172_s17 + $0xbe] sm:$0x3] }
  0x5a   : > { %v2431_v3 = vrot.slane %v1658_v53, 4  ;;  %3955 = vmatprep.mubr.msk.f32.mxu0 %vm2915_vm8, %v2424_v0  ;;  %4033 = vmatprep.mubr.msk.f32.mxu1 %vm2915_vm8, %v2424_v0  ;;  %v2433_v6 = vrot.slane %v1659_v54, 3  ;;  %v2435_v7 = vrot.slane %v1660_v59, 2  ;;  %v2437_v8 = vrot.slane %v1661_v60, 1 }
  0x5b   : > { %v2426_v5 = vsel %vm2293_vm1, %v2425_v61, %v1654_v47  ;;  %v958_v11 = vrot.slane %v254_v50, 1  ;;  %v959_v12 = vrot.slane %v255_v55, 1  ;;  %v960_v13 = vrot.slane %v256_v56, 1 }
  0x5c   : > { %v2428_v10 = vsel %vm2296_vm2, %v2427_v1, %v2426_v5  ;;  %v961_v15 = vrot.slane %v257_v57, 1  ;;  %v962_v16 = vrot.slane %v258_v62, 1  ;;  %v963_v17 = vrot.slane %v259_v63, 1  ;;  %v273_v5 = vld [vmem:[%s4172_s17 + $0xc6] sm:$0x3] }
  0x5d   : > { %v2430_v14 = vsel %vm2299_vm3, %v2429_v2, %v2428_v10  ;;  %v964_v19 = vrot.slane %v260_v4, 1  ;;  %v965_v20 = vrot.slane %v261_v9, 1  ;;  %v1662_v21 = vmax.f32 %v254_v50, %v958_v11  ;;  %v274_v10 = vld [vmem:[%s4172_s17 + $0xc8] sm:$0x3]  ;;  %v275_v11 = vld [vmem:[%s4172_s17 + $0xca] sm:$0x3] }
  0x5e   : > { %v2432_v18 = vsel %vm2302_vm4, %v2431_v3, %v2430_v14  ;;  %v1663_v23 = vmax.f32 %v255_v55, %v959_v12  ;;  %v1664_v24 = vmax.f32 %v256_v56, %v960_v13  ;;  %v1665_v25 = vmax.f32 %v257_v57, %v961_v15  ;;  %v271_v3 = vld [vmem:[%s4172_s17 + $0xc2] sm:$0x3] }
  0x5f   : > { %v2434_v22 = vsel %vm2305_vm5, %v2433_v6, %v2432_v18  ;;  %v1666_v29 = vmax.f32 %v258_v62, %v962_v16  ;;  %v1667_v30 = vmax.f32 %v259_v63, %v963_v17  ;;  %v1668_v31 = vmax.f32 %v260_v4, %v964_v19  ;;  %v270_v62 = vld [vmem:[%s4172_s17 + $0xc0] sm:$0x3]  ;;  %v272_v4 = vld [vmem:[%s4172_s17 + $0xc4] sm:$0x3]  ;;  %v276_v16 = vld [vmem:[%s4172_s17 + $0xcc] sm:$0x3] }
  0x60   : > { %v2436_v28 = vsel %vm2308_vm6, %v2435_v7, %v2434_v22  ;;  %v1669_v36 = vmax.f32 %v261_v9, %v965_v20  ;;  %v2439_v37 = vrot.slane %v1663_v23, 7  ;;  %v2441_v38 = vrot.slane %v1664_v24, 6 }
  0x61   : > { %v2438_v35 = vsel %vm2311_vm7, %v2437_v8, %v2436_v28  ;;  %v2443_v41 = vrot.slane %v1665_v25, 5  ;;  %v2445_v42 = vrot.slane %v1666_v29, 4  ;;  %v2447_v43 = vrot.slane %v1667_v30, 3 }
  0x62   : > { %3956 = vmatmul.mubr.msk.f32.gmra.mxu0 %vm2915_vm8, %v2438_v35  ;;  %4034 = vmatmul.mubr.msk.f32.gmra.mxu1 %vm2915_vm8, %v2438_v35  ;;  %v2449_v44 = vrot.slane %v1668_v31, 2  ;;  %v2440_v46 = vsel %vm2293_vm1, %v2439_v37, %v1662_v21  ;;  %v2451_v47 = vrot.slane %v1669_v36, 1  ;;  %v966_v48 = vrot.slane %v262_v26, 1  ;;  %v277_v21 = vld [vmem:[%s4172_s17 + $0xce] sm:$0x3] }
  0x63   : > { %v967_v49 = vrot.slane %v263_v27, 1  ;;  %v2442_v50 = vsel %vm2296_vm2, %v2441_v38, %v2440_v46  ;;  %v968_v51 = vrot.slane %v264_v32, 1  ;;  %v969_v52 = vrot.slane %v265_v33, 1  ;;  %v278_v38 = vld [vmem:[%s4172_s17 + $0xd0] sm:$0x3] }
  0x64   : > { %v970_v53 = vrot.slane %v266_v34, 1  ;;  %v2444_v54 = vsel %vm2299_vm3, %v2443_v41, %v2442_v50  ;;  %v971_v55 = vrot.slane %v267_v39, 1  ;;  %v972_v56 = vrot.slane %v268_v40, 1  ;;  %v282_v46 = vld [vmem:[%s4172_s17 + $0xd8] sm:$0x3] }
  0x65   : > { %v973_v57 = vrot.slane %v269_v45, 1  ;;  %v2446_v58 = vsel %vm2302_vm4, %v2445_v42, %v2444_v54  ;;  %v1670_v59 = vmax.f32 %v262_v26, %v966_v48  ;;  %v1671_v60 = vmax.f32 %v263_v27, %v967_v49 }
  0x66   : > { %v1672_v61 = vmax.f32 %v264_v32, %v968_v51  ;;  %v2448_v63 = vsel %vm2305_vm5, %v2447_v43, %v2446_v58  ;;  %v1673_v0 = vmax.f32 %v265_v33, %v969_v52  ;;  %v1674_v1 = vmax.f32 %v266_v34, %v970_v53  ;;  %v283_v51 = vld [vmem:[%s4172_s17 + $0xda] sm:$0x3]  ;;  %v284_v52 = vld [vmem:[%s4172_s17 + $0xdc] sm:$0x3] }
  0x67   : > { %v1675_v2 = vmax.f32 %v267_v39, %v971_v55  ;;  %v2450_v6 = vsel %vm2308_vm6, %v2449_v44, %v2448_v63  ;;  %v1676_v7 = vmax.f32 %v268_v40, %v972_v56  ;;  %v1677_v8 = vmax.f32 %v269_v45, %v973_v57  ;;  %v279_v39 = vld [vmem:[%s4172_s17 + $0xd2] sm:$0x3]  ;;  %v280_v44 = vld [vmem:[%s4172_s17 + $0xd4] sm:$0x3]  ;;  %v281_v45 = vld [vmem:[%s4172_s17 + $0xd6] sm:$0x3] }
  0x68   : > { %v2453_v9 = vrot.slane %v1671_v60, 7  ;;  %v2452_v12 = vsel %vm2311_vm7, %v2451_v47, %v2450_v6  ;;  %v2455_v13 = vrot.slane %v1672_v61, 6  ;;  %v2457_v14 = vrot.slane %v1673_v0, 5  ;;  %v285_v57 = vld [vmem:[%s4172_s17 + $0xde] sm:$0x3] }
  0x69   : > { %v2459_v15 = vrot.slane %v1674_v1, 4  ;;  %3958 = vmatprep.mubr.msk.f32.mxu0 %vm2915_vm8, %v2452_v12  ;;  %4036 = vmatprep.mubr.msk.f32.mxu1 %vm2915_vm8, %v2452_v12  ;;  %v2461_v18 = vrot.slane %v1675_v2, 3  ;;  %v2463_v19 = vrot.slane %v1676_v7, 2  ;;  %v2465_v20 = vrot.slane %v1677_v8, 1 }
  0x6a   : > { %v2454_v17 = vsel %vm2293_vm1, %v2453_v9, %v1670_v59  ;;  %v974_v23 = vrot.slane %v270_v62, 1  ;;  %v975_v24 = vrot.slane %v271_v3, 1  ;;  %v976_v25 = vrot.slane %v272_v4, 1 }
  0x6b   : > { %v2456_v22 = vsel %vm2296_vm2, %v2455_v13, %v2454_v17  ;;  %v977_v27 = vrot.slane %v273_v5, 1  ;;  %v978_v28 = vrot.slane %v274_v10, 1  ;;  %v979_v29 = vrot.slane %v275_v11, 1  ;;  %v289_v17 = vld [vmem:[%s4172_s17 + $0xe6] sm:$0x3] }
  0x6c   : > { %v2458_v26 = vsel %vm2299_vm3, %v2457_v14, %v2456_v22  ;;  %v980_v31 = vrot.slane %v276_v16, 1  ;;  %v981_v32 = vrot.slane %v277_v21, 1  ;;  %v1678_v33 = vmax.f32 %v270_v62, %v974_v23  ;;  %v290_v22 = vld [vmem:[%s4172_s17 + $0xe8] sm:$0x3]  ;;  %v291_v23 = vld [vmem:[%s4172_s17 + $0xea] sm:$0x3] }
  0x6d   : > { %v2460_v30 = vsel %vm2302_vm4, %v2459_v15, %v2458_v26  ;;  %v1679_v35 = vmax.f32 %v271_v3, %v975_v24  ;;  %v1680_v36 = vmax.f32 %v272_v4, %v976_v25  ;;  %v1681_v37 = vmax.f32 %v273_v5, %v977_v27  ;;  %v287_v15 = vld [vmem:[%s4172_s17 + $0xe2] sm:$0x3] }
  0x6e   : > { %v2462_v34 = vsel %vm2305_vm5, %v2461_v18, %v2460_v30  ;;  %v1682_v41 = vmax.f32 %v274_v10, %v978_v28  ;;  %v1683_v42 = vmax.f32 %v275_v11, %v979_v29  ;;  %v1684_v43 = vmax.f32 %v276_v16, %v980_v31  ;;  %v286_v10 = vld [vmem:[%s4172_s17 + $0xe0] sm:$0x3]  ;;  %v288_v16 = vld [vmem:[%s4172_s17 + $0xe4] sm:$0x3]  ;;  %v292_v28 = vld [vmem:[%s4172_s17 + $0xec] sm:$0x3] }
  0x6f   : > { %v2464_v40 = vsel %vm2308_vm6, %v2463_v19, %v2462_v34  ;;  %v1685_v48 = vmax.f32 %v277_v21, %v981_v32  ;;  %v2467_v49 = vrot.slane %v1679_v35, 7  ;;  %v2469_v50 = vrot.slane %v1680_v36, 6 }
  0x70   : > { %v2466_v47 = vsel %vm2311_vm7, %v2465_v20, %v2464_v40  ;;  %v2471_v53 = vrot.slane %v1681_v37, 5  ;;  %v2473_v54 = vrot.slane %v1682_v41, 4  ;;  %v2475_v55 = vrot.slane %v1683_v42, 3 }
  0x71   : > { %3959 = vmatmul.mubr.msk.f32.gmra.mxu0 %vm2915_vm8, %v2466_v47  ;;  %4037 = vmatmul.mubr.msk.f32.gmra.mxu1 %vm2915_vm8, %v2466_v47  ;;  %v2477_v56 = vrot.slane %v1684_v43, 2  ;;  %v2468_v58 = vsel %vm2293_vm1, %v2467_v49, %v1678_v33  ;;  %v2479_v59 = vrot.slane %v1685_v48, 1  ;;  %v982_v60 = vrot.slane %v278_v38, 1  ;;  %v293_v33 = vld [vmem:[%s4172_s17 + $0xee] sm:$0x3] }
  0x72   : > { %v983_v61 = vrot.slane %v279_v39, 1  ;;  %v2470_v62 = vsel %vm2296_vm2, %v2469_v50, %v2468_v58  ;;  %v984_v63 = vrot.slane %v280_v44, 1  ;;  %v985_v0 = vrot.slane %v281_v45, 1  ;;  %v294_v50 = vld [vmem:[%s4172_s17 + $0xf0] sm:$0x3] }
  0x73   : > { %v986_v1 = vrot.slane %v282_v46, 1  ;;  %v2472_v2 = vsel %vm2299_vm3, %v2471_v53, %v2470_v62  ;;  %v987_v3 = vrot.slane %v283_v51, 1  ;;  %v988_v4 = vrot.slane %v284_v52, 1  ;;  %v298_v58 = vld [vmem:[%s4172_s17 + $0xf8] sm:$0x3] }
  0x74   : > { %v989_v5 = vrot.slane %v285_v57, 1  ;;  %v2474_v6 = vsel %vm2302_vm4, %v2473_v54, %v2472_v2  ;;  %v1686_v7 = vmax.f32 %v278_v38, %v982_v60  ;;  %v1687_v8 = vmax.f32 %v279_v39, %v983_v61 }
  0x75   : > { %v1688_v9 = vmax.f32 %v280_v44, %v984_v63  ;;  %v2476_v11 = vsel %vm2305_vm5, %v2475_v55, %v2474_v6  ;;  %v1689_v12 = vmax.f32 %v281_v45, %v985_v0  ;;  %v1690_v13 = vmax.f32 %v282_v46, %v986_v1  ;;  %v299_v63 = vld [vmem:[%s4172_s17 + $0xfa] sm:$0x3]  ;;  %v300_v0 = vld [vmem:[%s4172_s17 + $0xfc] sm:$0x3] }
  0x76   : > { %v1691_v14 = vmax.f32 %v283_v51, %v987_v3  ;;  %v2478_v18 = vsel %vm2308_vm6, %v2477_v56, %v2476_v11  ;;  %v1692_v19 = vmax.f32 %v284_v52, %v988_v4  ;;  %v1693_v20 = vmax.f32 %v285_v57, %v989_v5  ;;  %v295_v51 = vld [vmem:[%s4172_s17 + $0xf2] sm:$0x3]  ;;  %v296_v56 = vld [vmem:[%s4172_s17 + $0xf4] sm:$0x3]  ;;  %v297_v57 = vld [vmem:[%s4172_s17 + $0xf6] sm:$0x3] }
  0x77   : > { %v2481_v21 = vrot.slane %v1687_v8, 7  ;;  %v2480_v24 = vsel %vm2311_vm7, %v2479_v59, %v2478_v18  ;;  %v2483_v25 = vrot.slane %v1688_v9, 6  ;;  %v2485_v26 = vrot.slane %v1689_v12, 5  ;;  %v301_v5 = vld [vmem:[%s4172_s17 + $0xfe] sm:$0x3] }
  0x78   : > { %v2487_v27 = vrot.slane %v1690_v13, 4  ;;  %3961 = vmatprep.mubr.msk.f32.mxu0 %vm2915_vm8, %v2480_v24  ;;  %4039 = vmatprep.mubr.msk.f32.mxu1 %vm2915_vm8, %v2480_v24  ;;  %v2489_v30 = vrot.slane %v1691_v14, 3  ;;  %v2491_v31 = vrot.slane %v1692_v19, 2  ;;  %v2493_v32 = vrot.slane %v1693_v20, 1 }
  0x79   : > { %v2482_v29 = vsel %vm2293_vm1, %v2481_v21, %v1686_v7  ;;  %v990_v35 = vrot.slane %v286_v10, 1  ;;  %v991_v36 = vrot.slane %v287_v15, 1  ;;  %v992_v37 = vrot.slane %v288_v16, 1 }
  0x7a   : > { %v2484_v34 = vsel %vm2296_vm2, %v2483_v25, %v2482_v29  ;;  %v993_v39 = vrot.slane %v289_v17, 1  ;;  %v994_v40 = vrot.slane %v290_v22, 1  ;;  %v995_v41 = vrot.slane %v291_v23, 1  ;;  %v305_v29 = vld [vmem:[%s4172_s17 + $0x106] sm:$0x3] }
  0x7b   : > { %v2486_v38 = vsel %vm2299_vm3, %v2485_v26, %v2484_v34  ;;  %v996_v43 = vrot.slane %v292_v28, 1  ;;  %v997_v44 = vrot.slane %v293_v33, 1  ;;  %v1694_v45 = vmax.f32 %v286_v10, %v990_v35  ;;  %v306_v34 = vld [vmem:[%s4172_s17 + $0x108] sm:$0x3]  ;;  %v307_v35 = vld [vmem:[%s4172_s17 + $0x10a] sm:$0x3] }
  0x7c   : > { %v2488_v42 = vsel %vm2302_vm4, %v2487_v27, %v2486_v38  ;;  %v1695_v47 = vmax.f32 %v287_v15, %v991_v36  ;;  %v1696_v48 = vmax.f32 %v288_v16, %v992_v37  ;;  %v1697_v49 = vmax.f32 %v289_v17, %v993_v39  ;;  %v303_v27 = vld [vmem:[%s4172_s17 + $0x102] sm:$0x3] }
  0x7d   : > { %v2490_v46 = vsel %vm2305_vm5, %v2489_v30, %v2488_v42  ;;  %v1698_v53 = vmax.f32 %v290_v22, %v994_v40  ;;  %v1699_v54 = vmax.f32 %v291_v23, %v995_v41  ;;  %v1700_v55 = vmax.f32 %v292_v28, %v996_v43  ;;  %v302_v22 = vld [vmem:[%s4172_s17 + $0x100] sm:$0x3]  ;;  %v304_v28 = vld [vmem:[%s4172_s17 + $0x104] sm:$0x3]  ;;  %v308_v40 = vld [vmem:[%s4172_s17 + $0x10c] sm:$0x3] }
  0x7e   : > { %v2492_v52 = vsel %vm2308_vm6, %v2491_v31, %v2490_v46  ;;  %v1701_v60 = vmax.f32 %v293_v33, %v997_v44  ;;  %v2495_v61 = vrot.slane %v1695_v47, 7  ;;  %v2497_v62 = vrot.slane %v1696_v48, 6 }
  0x7f   : > { %v2494_v59 = vsel %vm2311_vm7, %v2493_v32, %v2492_v52  ;;  %v2499_v1 = vrot.slane %v1697_v49, 5  ;;  %v2501_v2 = vrot.slane %v1698_v53, 4  ;;  %v2503_v3 = vrot.slane %v1699_v54, 3 }
  0x80   : > { %3962 = vmatmul.mubr.msk.f32.gmra.mxu0 %vm2915_vm8, %v2494_v59  ;;  %4040 = vmatmul.mubr.msk.f32.gmra.mxu1 %vm2915_vm8, %v2494_v59  ;;  %v2505_v4 = vrot.slane %v1700_v55, 2  ;;  %v2496_v6 = vsel %vm2293_vm1, %v2495_v61, %v1694_v45  ;;  %v2507_v7 = vrot.slane %v1701_v60, 1  ;;  %v998_v8 = vrot.slane %v294_v50, 1  ;;  %v309_v45 = vld [vmem:[%s4172_s17 + $0x10e] sm:$0x3] }
  0x81   : > { %v999_v9 = vrot.slane %v295_v51, 1  ;;  %v2498_v10 = vsel %vm2296_vm2, %v2497_v62, %v2496_v6  ;;  %v1000_v11 = vrot.slane %v296_v56, 1  ;;  %v1001_v12 = vrot.slane %v297_v57, 1  ;;  %v310_v62 = vld [vmem:[%s4172_s17 + $0x110] sm:$0x3] }
  0x82   : > { %v1002_v13 = vrot.slane %v298_v58, 1  ;;  %v2500_v14 = vsel %vm2299_vm3, %v2499_v1, %v2498_v10  ;;  %v1003_v15 = vrot.slane %v299_v63, 1  ;;  %v1004_v16 = vrot.slane %v300_v0, 1  ;;  %v314_v6 = vld [vmem:[%s4172_s17 + $0x118] sm:$0x3] }
  0x83   : > { %v1005_v17 = vrot.slane %v301_v5, 1  ;;  %v2502_v18 = vsel %vm2302_vm4, %v2501_v2, %v2500_v14  ;;  %v1702_v19 = vmax.f32 %v294_v50, %v998_v8  ;;  %v1703_v20 = vmax.f32 %v295_v51, %v999_v9 }
  0x84   : > { %v1704_v21 = vmax.f32 %v296_v56, %v1000_v11  ;;  %v2504_v23 = vsel %vm2305_vm5, %v2503_v3, %v2502_v18  ;;  %v1705_v24 = vmax.f32 %v297_v57, %v1001_v12  ;;  %v1706_v25 = vmax.f32 %v298_v58, %v1002_v13  ;;  %v315_v11 = vld [vmem:[%s4172_s17 + $0x11a] sm:$0x3]  ;;  %v316_v12 = vld [vmem:[%s4172_s17 + $0x11c] sm:$0x3] }
  0x85   : > { %v1707_v26 = vmax.f32 %v299_v63, %v1003_v15  ;;  %v2506_v30 = vsel %vm2308_vm6, %v2505_v4, %v2504_v23  ;;  %v1708_v31 = vmax.f32 %v300_v0, %v1004_v16  ;;  %v1709_v32 = vmax.f32 %v301_v5, %v1005_v17  ;;  %v311_v63 = vld [vmem:[%s4172_s17 + $0x112] sm:$0x3]  ;;  %v312_v4 = vld [vmem:[%s4172_s17 + $0x114] sm:$0x3]  ;;  %v313_v5 = vld [vmem:[%s4172_s17 + $0x116] sm:$0x3] }
  0x86   : > { %v2509_v33 = vrot.slane %v1703_v20, 7  ;;  %v2508_v36 = vsel %vm2311_vm7, %v2507_v7, %v2506_v30  ;;  %v2511_v37 = vrot.slane %v1704_v21, 6  ;;  %v2513_v38 = vrot.slane %v1705_v24, 5  ;;  %v317_v17 = vld [vmem:[%s4172_s17 + $0x11e] sm:$0x3] }
  0x87   : > { %v2515_v39 = vrot.slane %v1706_v25, 4  ;;  %3964 = vmatprep.mubr.msk.f32.mxu0 %vm2915_vm8, %v2508_v36  ;;  %4042 = vmatprep.mubr.msk.f32.mxu1 %vm2915_vm8, %v2508_v36  ;;  %v2517_v42 = vrot.slane %v1707_v26, 3  ;;  %v2519_v43 = vrot.slane %v1708_v31, 2  ;;  %v2521_v44 = vrot.slane %v1709_v32, 1 }
  0x88   : > { %v2510_v41 = vsel %vm2293_vm1, %v2509_v33, %v1702_v19  ;;  %v1006_v47 = vrot.slane %v302_v22, 1  ;;  %v1007_v48 = vrot.slane %v303_v27, 1  ;;  %v1008_v49 = vrot.slane %v304_v28, 1 }
  0x89   : > { %v2512_v46 = vsel %vm2296_vm2, %v2511_v37, %v2510_v41  ;;  %v1009_v51 = vrot.slane %v305_v29, 1  ;;  %v1010_v52 = vrot.slane %v306_v34, 1  ;;  %v1011_v53 = vrot.slane %v307_v35, 1  ;;  %v321_v41 = vld [vmem:[%s4172_s17 + $0x126] sm:$0x3] }
  0x8a   : > { %v2514_v50 = vsel %vm2299_vm3, %v2513_v38, %v2512_v46  ;;  %v1012_v55 = vrot.slane %v308_v40, 1  ;;  %v1013_v56 = vrot.slane %v309_v45, 1  ;;  %v1710_v57 = vmax.f32 %v302_v22, %v1006_v47  ;;  %v322_v46 = vld [vmem:[%s4172_s17 + $0x128] sm:$0x3]  ;;  %v323_v47 = vld [vmem:[%s4172_s17 + $0x12a] sm:$0x3] }
  0x8b   : > { %v2516_v54 = vsel %vm2302_vm4, %v2515_v39, %v2514_v50  ;;  %v1711_v59 = vmax.f32 %v303_v27, %v1007_v48  ;;  %v1712_v60 = vmax.f32 %v304_v28, %v1008_v49  ;;  %v1713_v61 = vmax.f32 %v305_v29, %v1009_v51  ;;  %v319_v39 = vld [vmem:[%s4172_s17 + $0x122] sm:$0x3] }
  0x8c   : > { %v2518_v58 = vsel %vm2305_vm5, %v2517_v42, %v2516_v54  ;;  %v1714_v1 = vmax.f32 %v306_v34, %v1010_v52  ;;  %v1715_v2 = vmax.f32 %v307_v35, %v1011_v53  ;;  %v1716_v3 = vmax.f32 %v308_v40, %v1012_v55  ;;  %v318_v34 = vld [vmem:[%s4172_s17 + $0x120] sm:$0x3]  ;;  %v320_v40 = vld [vmem:[%s4172_s17 + $0x124] sm:$0x3]  ;;  %v324_v52 = vld [vmem:[%s4172_s17 + $0x12c] sm:$0x3] }
  0x8d   : > { %v2520_v0 = vsel %vm2308_vm6, %v2519_v43, %v2518_v58  ;;  %v1717_v8 = vmax.f32 %v309_v45, %v1013_v56  ;;  %v2523_v9 = vrot.slane %v1711_v59, 7  ;;  %v2525_v10 = vrot.slane %v1712_v60, 6 }
  0x8e   : > { %v2522_v7 = vsel %vm2311_vm7, %v2521_v44, %v2520_v0  ;;  %v2527_v13 = vrot.slane %v1713_v61, 5  ;;  %v2529_v14 = vrot.slane %v1714_v1, 4  ;;  %v2531_v15 = vrot.slane %v1715_v2, 3 }
  0x8f   : > { %3965 = vmatmul.mubr.msk.f32.gmra.mxu0 %vm2915_vm8, %v2522_v7  ;;  %4043 = vmatmul.mubr.msk.f32.gmra.mxu1 %vm2915_vm8, %v2522_v7  ;;  %v2533_v16 = vrot.slane %v1716_v3, 2  ;;  %v2524_v18 = vsel %vm2293_vm1, %v2523_v9, %v1710_v57  ;;  %v2535_v19 = vrot.slane %v1717_v8, 1  ;;  %v1014_v20 = vrot.slane %v310_v62, 1  ;;  %v325_v57 = vld [vmem:[%s4172_s17 + $0x12e] sm:$0x3] }
  0x90   : > { %v1015_v21 = vrot.slane %v311_v63, 1  ;;  %v2526_v22 = vsel %vm2296_vm2, %v2525_v10, %v2524_v18  ;;  %v1016_v23 = vrot.slane %v312_v4, 1  ;;  %v1017_v24 = vrot.slane %v313_v5, 1  ;;  %v326_v10 = vld [vmem:[%s4172_s17 + $0x130] sm:$0x3] }
  0x91   : > { %v1018_v25 = vrot.slane %v314_v6, 1  ;;  %v2528_v26 = vsel %vm2299_vm3, %v2527_v13, %v2526_v22  ;;  %v1019_v27 = vrot.slane %v315_v11, 1  ;;  %v1020_v28 = vrot.slane %v316_v12, 1  ;;  %v330_v18 = vld [vmem:[%s4172_s17 + $0x138] sm:$0x3] }
  0x92   : > { %v1021_v29 = vrot.slane %v317_v17, 1  ;;  %v2530_v30 = vsel %vm2302_vm4, %v2529_v14, %v2528_v26  ;;  %v1718_v31 = vmax.f32 %v310_v62, %v1014_v20  ;;  %v1719_v32 = vmax.f32 %v311_v63, %v1015_v21 }
  0x93   : > { %v1720_v33 = vmax.f32 %v312_v4, %v1016_v23  ;;  %v2532_v35 = vsel %vm2305_vm5, %v2531_v15, %v2530_v30  ;;  %v1721_v36 = vmax.f32 %v313_v5, %v1017_v24  ;;  %v1722_v37 = vmax.f32 %v314_v6, %v1018_v25  ;;  %v331_v23 = vld [vmem:[%s4172_s17 + $0x13a] sm:$0x3]  ;;  %v332_v24 = vld [vmem:[%s4172_s17 + $0x13c] sm:$0x3] }
  0x94   : > { %v1723_v38 = vmax.f32 %v315_v11, %v1019_v27  ;;  %v2534_v42 = vsel %vm2308_vm6, %v2533_v16, %v2532_v35  ;;  %v1724_v43 = vmax.f32 %v316_v12, %v1020_v28  ;;  %v1725_v44 = vmax.f32 %v317_v17, %v1021_v29  ;;  %v327_v11 = vld [vmem:[%s4172_s17 + $0x132] sm:$0x3]  ;;  %v328_v16 = vld [vmem:[%s4172_s17 + $0x134] sm:$0x3]  ;;  %v329_v17 = vld [vmem:[%s4172_s17 + $0x136] sm:$0x3] }
  0x95   : > { %v2537_v45 = vrot.slane %v1719_v32, 7  ;;  %v2536_v48 = vsel %vm2311_vm7, %v2535_v19, %v2534_v42  ;;  %v2539_v49 = vrot.slane %v1720_v33, 6  ;;  %v2541_v50 = vrot.slane %v1721_v36, 5  ;;  %v333_v29 = vld [vmem:[%s4172_s17 + $0x13e] sm:$0x3] }
  0x96   : > { %v2543_v51 = vrot.slane %v1722_v37, 4  ;;  %3967 = vmatprep.mubr.msk.f32.mxu0 %vm2915_vm8, %v2536_v48  ;;  %4045 = vmatprep.mubr.msk.f32.mxu1 %vm2915_vm8, %v2536_v48  ;;  %v2545_v54 = vrot.slane %v1723_v38, 3  ;;  %v2547_v55 = vrot.slane %v1724_v43, 2  ;;  %v2549_v56 = vrot.slane %v1725_v44, 1 }
  0x97   : > { %v2538_v53 = vsel %vm2293_vm1, %v2537_v45, %v1718_v31  ;;  %v1022_v59 = vrot.slane %v318_v34, 1  ;;  %v1023_v60 = vrot.slane %v319_v39, 1  ;;  %v1024_v61 = vrot.slane %v320_v40, 1 }
  0x98   : > { %v2540_v58 = vsel %vm2296_vm2, %v2539_v49, %v2538_v53  ;;  %v1025_v63 = vrot.slane %v321_v41, 1  ;;  %v1026_v0 = vrot.slane %v322_v46, 1  ;;  %v1027_v1 = vrot.slane %v323_v47, 1  ;;  %v337_v53 = vld [vmem:[%s4172_s17 + $0x146] sm:$0x3] }
  0x99   : > { %v2542_v62 = vsel %vm2299_vm3, %v2541_v50, %v2540_v58  ;;  %v1028_v3 = vrot.slane %v324_v52, 1  ;;  %v1029_v4 = vrot.slane %v325_v57, 1  ;;  %v1726_v5 = vmax.f32 %v318_v34, %v1022_v59  ;;  %v338_v58 = vld [vmem:[%s4172_s17 + $0x148] sm:$0x3]  ;;  %v339_v59 = vld [vmem:[%s4172_s17 + $0x14a] sm:$0x3] }
  0x9a   : > { %v2544_v2 = vsel %vm2302_vm4, %v2543_v51, %v2542_v62  ;;  %v1727_v7 = vmax.f32 %v319_v39, %v1023_v60  ;;  %v1728_v8 = vmax.f32 %v320_v40, %v1024_v61  ;;  %v1729_v9 = vmax.f32 %v321_v41, %v1025_v63  ;;  %v335_v51 = vld [vmem:[%s4172_s17 + $0x142] sm:$0x3] }
  0x9b   : > { %v2546_v6 = vsel %vm2305_vm5, %v2545_v54, %v2544_v2  ;;  %v1730_v13 = vmax.f32 %v322_v46, %v1026_v0  ;;  %v1731_v14 = vmax.f32 %v323_v47, %v1027_v1  ;;  %v1732_v15 = vmax.f32 %v324_v52, %v1028_v3  ;;  %v334_v46 = vld [vmem:[%s4172_s17 + $0x140] sm:$0x3]  ;;  %v336_v52 = vld [vmem:[%s4172_s17 + $0x144] sm:$0x3]  ;;  %v340_v0 = vld [vmem:[%s4172_s17 + $0x14c] sm:$0x3] }
  0x9c   : > { %v2548_v12 = vsel %vm2308_vm6, %v2547_v55, %v2546_v6  ;;  %v1733_v20 = vmax.f32 %v325_v57, %v1029_v4  ;;  %v2551_v21 = vrot.slane %v1727_v7, 7  ;;  %v2553_v22 = vrot.slane %v1728_v8, 6 }
  0x9d   : > { %v2550_v19 = vsel %vm2311_vm7, %v2549_v56, %v2548_v12  ;;  %v2555_v25 = vrot.slane %v1729_v9, 5  ;;  %v2557_v26 = vrot.slane %v1730_v13, 4  ;;  %v2559_v27 = vrot.slane %v1731_v14, 3 }
  0x9e   : > { %3968 = vmatmul.mubr.msk.f32.gmra.mxu0 %vm2915_vm8, %v2550_v19  ;;  %4046 = vmatmul.mubr.msk.f32.gmra.mxu1 %vm2915_vm8, %v2550_v19  ;;  %v2561_v28 = vrot.slane %v1732_v15, 2  ;;  %v2552_v30 = vsel %vm2293_vm1, %v2551_v21, %v1726_v5  ;;  %v2563_v31 = vrot.slane %v1733_v20, 1  ;;  %v1030_v32 = vrot.slane %v326_v10, 1  ;;  %v341_v5 = vld [vmem:[%s4172_s17 + $0x14e] sm:$0x3] }
  0x9f   : > { %v1031_v33 = vrot.slane %v327_v11, 1  ;;  %v2554_v34 = vsel %vm2296_vm2, %v2553_v22, %v2552_v30  ;;  %v1032_v35 = vrot.slane %v328_v16, 1  ;;  %v1033_v36 = vrot.slane %v329_v17, 1  ;;  %v342_v22 = vld [vmem:[%s4172_s17 + $0x150] sm:$0x3] }
  0xa0   : > { %v1034_v37 = vrot.slane %v330_v18, 1  ;;  %v2556_v38 = vsel %vm2299_vm3, %v2555_v25, %v2554_v34  ;;  %v1035_v39 = vrot.slane %v331_v23, 1  ;;  %v1036_v40 = vrot.slane %v332_v24, 1  ;;  %v346_v30 = vld [vmem:[%s4172_s17 + $0x158] sm:$0x3] }
  0xa1   : > { %v1037_v41 = vrot.slane %v333_v29, 1  ;;  %v2558_v42 = vsel %vm2302_vm4, %v2557_v26, %v2556_v38  ;;  %v1734_v43 = vmax.f32 %v326_v10, %v1030_v32  ;;  %v1735_v44 = vmax.f32 %v327_v11, %v1031_v33 }
  0xa2   : > { %v1736_v45 = vmax.f32 %v328_v16, %v1032_v35  ;;  %v2560_v47 = vsel %vm2305_vm5, %v2559_v27, %v2558_v42  ;;  %v1737_v48 = vmax.f32 %v329_v17, %v1033_v36  ;;  %v1738_v49 = vmax.f32 %v330_v18, %v1034_v37  ;;  %v347_v35 = vld [vmem:[%s4172_s17 + $0x15a] sm:$0x3]  ;;  %v348_v36 = vld [vmem:[%s4172_s17 + $0x15c] sm:$0x3] }
  0xa3   : > { %v1739_v50 = vmax.f32 %v331_v23, %v1035_v39  ;;  %v2562_v54 = vsel %vm2308_vm6, %v2561_v28, %v2560_v47  ;;  %v1740_v55 = vmax.f32 %v332_v24, %v1036_v40  ;;  %v1741_v56 = vmax.f32 %v333_v29, %v1037_v41  ;;  %v343_v23 = vld [vmem:[%s4172_s17 + $0x152] sm:$0x3]  ;;  %v344_v28 = vld [vmem:[%s4172_s17 + $0x154] sm:$0x3]  ;;  %v345_v29 = vld [vmem:[%s4172_s17 + $0x156] sm:$0x3] }
  0xa4   : > { %v2565_v57 = vrot.slane %v1735_v44, 7  ;;  %v2564_v60 = vsel %vm2311_vm7, %v2563_v31, %v2562_v54  ;;  %v2567_v61 = vrot.slane %v1736_v45, 6  ;;  %v2569_v62 = vrot.slane %v1737_v48, 5  ;;  %v349_v41 = vld [vmem:[%s4172_s17 + $0x15e] sm:$0x3] }
  0xa5   : > { %v2571_v63 = vrot.slane %v1738_v49, 4  ;;  %3970 = vmatprep.mubr.msk.f32.mxu0 %vm2915_vm8, %v2564_v60  ;;  %4048 = vmatprep.mubr.msk.f32.mxu1 %vm2915_vm8, %v2564_v60  ;;  %v2573_v2 = vrot.slane %v1739_v50, 3  ;;  %v2575_v3 = vrot.slane %v1740_v55, 2  ;;  %v2577_v4 = vrot.slane %v1741_v56, 1 }
  0xa6   : > { %v2566_v1 = vsel %vm2293_vm1, %v2565_v57, %v1734_v43  ;;  %v1038_v7 = vrot.slane %v334_v46, 1  ;;  %v1039_v8 = vrot.slane %v335_v51, 1  ;;  %v1040_v9 = vrot.slane %v336_v52, 1 }
  0xa7   : > { %v2568_v6 = vsel %vm2296_vm2, %v2567_v61, %v2566_v1  ;;  %v1041_v11 = vrot.slane %v337_v53, 1  ;;  %v1042_v12 = vrot.slane %v338_v58, 1  ;;  %v1043_v13 = vrot.slane %v339_v59, 1  ;;  %v353_v1 = vld [vmem:[%s4172_s17 + $0x166] sm:$0x3] }
  0xa8   : > { %v2570_v10 = vsel %vm2299_vm3, %v2569_v62, %v2568_v6  ;;  %v1044_v15 = vrot.slane %v340_v0, 1  ;;  %v1045_v16 = vrot.slane %v341_v5, 1  ;;  %v1742_v17 = vmax.f32 %v334_v46, %v1038_v7  ;;  %v354_v6 = vld [vmem:[%s4172_s17 + $0x168] sm:$0x3]  ;;  %v355_v7 = vld [vmem:[%s4172_s17 + $0x16a] sm:$0x3] }
  0xa9   : > { %v2572_v14 = vsel %vm2302_vm4, %v2571_v63, %v2570_v10  ;;  %v1743_v19 = vmax.f32 %v335_v51, %v1039_v8  ;;  %v1744_v20 = vmax.f32 %v336_v52, %v1040_v9  ;;  %v1745_v21 = vmax.f32 %v337_v53, %v1041_v11  ;;  %v351_v63 = vld [vmem:[%s4172_s17 + $0x162] sm:$0x3] }
  0xaa   : > { %v2574_v18 = vsel %vm2305_vm5, %v2573_v2, %v2572_v14  ;;  %v1746_v25 = vmax.f32 %v338_v58, %v1042_v12  ;;  %v1747_v26 = vmax.f32 %v339_v59, %v1043_v13  ;;  %v1748_v27 = vmax.f32 %v340_v0, %v1044_v15  ;;  %v350_v58 = vld [vmem:[%s4172_s17 + $0x160] sm:$0x3]  ;;  %v352_v0 = vld [vmem:[%s4172_s17 + $0x164] sm:$0x3]  ;;  %v356_v12 = vld [vmem:[%s4172_s17 + $0x16c] sm:$0x3] }
  0xab   : > { %v2576_v24 = vsel %vm2308_vm6, %v2575_v3, %v2574_v18  ;;  %v1749_v32 = vmax.f32 %v341_v5, %v1045_v16  ;;  %v2579_v33 = vrot.slane %v1743_v19, 7  ;;  %v2581_v34 = vrot.slane %v1744_v20, 6 }
  0xac   : > { %v2578_v31 = vsel %vm2311_vm7, %v2577_v4, %v2576_v24  ;;  %v2583_v37 = vrot.slane %v1745_v21, 5  ;;  %v2585_v38 = vrot.slane %v1746_v25, 4  ;;  %v2587_v39 = vrot.slane %v1747_v26, 3 }
  0xad   : > { %3971 = vmatmul.mubr.msk.f32.gmra.mxu0 %vm2915_vm8, %v2578_v31  ;;  %4049 = vmatmul.mubr.msk.f32.gmra.mxu1 %vm2915_vm8, %v2578_v31  ;;  %v2589_v40 = vrot.slane %v1748_v27, 2  ;;  %v2580_v42 = vsel %vm2293_vm1, %v2579_v33, %v1742_v17  ;;  %v2591_v43 = vrot.slane %v1749_v32, 1  ;;  %v1046_v44 = vrot.slane %v342_v22, 1  ;;  %v357_v17 = vld [vmem:[%s4172_s17 + $0x16e] sm:$0x3] }
  0xae   : > { %v1047_v45 = vrot.slane %v343_v23, 1  ;;  %v2582_v46 = vsel %vm2296_vm2, %v2581_v34, %v2580_v42  ;;  %v1048_v47 = vrot.slane %v344_v28, 1  ;;  %v1049_v48 = vrot.slane %v345_v29, 1  ;;  %v358_v34 = vld [vmem:[%s4172_s17 + $0x170] sm:$0x3] }
  0xaf   : > { %v1050_v49 = vrot.slane %v346_v30, 1  ;;  %v2584_v50 = vsel %vm2299_vm3, %v2583_v37, %v2582_v46  ;;  %v1051_v51 = vrot.slane %v347_v35, 1  ;;  %v1052_v52 = vrot.slane %v348_v36, 1  ;;  %v362_v42 = vld [vmem:[%s4172_s17 + $0x178] sm:$0x3] }
  0xb0   : > { %v1053_v53 = vrot.slane %v349_v41, 1  ;;  %v2586_v54 = vsel %vm2302_vm4, %v2585_v38, %v2584_v50  ;;  %v1750_v55 = vmax.f32 %v342_v22, %v1046_v44  ;;  %v1751_v56 = vmax.f32 %v343_v23, %v1047_v45 }
  0xb1   : > { %v1752_v57 = vmax.f32 %v344_v28, %v1048_v47  ;;  %v2588_v59 = vsel %vm2305_vm5, %v2587_v39, %v2586_v54  ;;  %v1753_v60 = vmax.f32 %v345_v29, %v1049_v48  ;;  %v1754_v61 = vmax.f32 %v346_v30, %v1050_v49  ;;  %v363_v47 = vld [vmem:[%s4172_s17 + $0x17a] sm:$0x3]  ;;  %v364_v48 = vld [vmem:[%s4172_s17 + $0x17c] sm:$0x3] }
  0xb2   : > { %v1755_v62 = vmax.f32 %v347_v35, %v1051_v51  ;;  %v2590_v2 = vsel %vm2308_vm6, %v2589_v40, %v2588_v59  ;;  %v1756_v3 = vmax.f32 %v348_v36, %v1052_v52  ;;  %v1757_v4 = vmax.f32 %v349_v41, %v1053_v53  ;;  %v359_v35 = vld [vmem:[%s4172_s17 + $0x172] sm:$0x3]  ;;  %v360_v40 = vld [vmem:[%s4172_s17 + $0x174] sm:$0x3]  ;;  %v361_v41 = vld [vmem:[%s4172_s17 + $0x176] sm:$0x3] }
  0xb3   : > { %v2593_v5 = vrot.slane %v1751_v56, 7  ;;  %v2592_v8 = vsel %vm2311_vm7, %v2591_v43, %v2590_v2  ;;  %v2595_v9 = vrot.slane %v1752_v57, 6  ;;  %v2597_v10 = vrot.slane %v1753_v60, 5  ;;  %v365_v53 = vld [vmem:[%s4172_s17 + $0x17e] sm:$0x3] }
  0xb4   : > { %v2599_v11 = vrot.slane %v1754_v61, 4  ;;  %3973 = vmatprep.mubr.msk.f32.mxu0 %vm2915_vm8, %v2592_v8  ;;  %4051 = vmatprep.mubr.msk.f32.mxu1 %vm2915_vm8, %v2592_v8  ;;  %v2601_v14 = vrot.slane %v1755_v62, 3  ;;  %v2603_v15 = vrot.slane %v1756_v3, 2  ;;  %v2605_v16 = vrot.slane %v1757_v4, 1 }
  0xb5   : > { %v2594_v13 = vsel %vm2293_vm1, %v2593_v5, %v1750_v55  ;;  %v1054_v19 = vrot.slane %v350_v58, 1  ;;  %v1055_v20 = vrot.slane %v351_v63, 1  ;;  %v1056_v21 = vrot.slane %v352_v0, 1 }
  0xb6   : > { %v2596_v18 = vsel %vm2296_vm2, %v2595_v9, %v2594_v13  ;;  %v1057_v23 = vrot.slane %v353_v1, 1  ;;  %v1058_v24 = vrot.slane %v354_v6, 1  ;;  %v1059_v25 = vrot.slane %v355_v7, 1  ;;  %v369_v13 = vld [vmem:[%s4172_s17 + $0x186] sm:$0x3] }
  0xb7   : > { %v2598_v22 = vsel %vm2299_vm3, %v2597_v10, %v2596_v18  ;;  %v1060_v27 = vrot.slane %v356_v12, 1  ;;  %v1061_v28 = vrot.slane %v357_v17, 1  ;;  %v1758_v29 = vmax.f32 %v350_v58, %v1054_v19  ;;  %v370_v18 = vld [vmem:[%s4172_s17 + $0x188] sm:$0x3]  ;;  %v371_v19 = vld [vmem:[%s4172_s17 + $0x18a] sm:$0x3] }
  0xb8   : > { %v2600_v26 = vsel %vm2302_vm4, %v2599_v11, %v2598_v22  ;;  %v1759_v31 = vmax.f32 %v351_v63, %v1055_v20  ;;  %v1760_v32 = vmax.f32 %v352_v0, %v1056_v21  ;;  %v1761_v33 = vmax.f32 %v353_v1, %v1057_v23  ;;  %v367_v11 = vld [vmem:[%s4172_s17 + $0x182] sm:$0x3] }
  0xb9   : > { %v2602_v30 = vsel %vm2305_vm5, %v2601_v14, %v2600_v26  ;;  %v1762_v37 = vmax.f32 %v354_v6, %v1058_v24  ;;  %v1763_v38 = vmax.f32 %v355_v7, %v1059_v25  ;;  %v1764_v39 = vmax.f32 %v356_v12, %v1060_v27  ;;  %v366_v6 = vld [vmem:[%s4172_s17 + $0x180] sm:$0x3]  ;;  %v368_v12 = vld [vmem:[%s4172_s17 + $0x184] sm:$0x3]  ;;  %v372_v24 = vld [vmem:[%s4172_s17 + $0x18c] sm:$0x3] }
  0xba   : > { %v2604_v36 = vsel %vm2308_vm6, %v2603_v15, %v2602_v30  ;;  %v1765_v44 = vmax.f32 %v357_v17, %v1061_v28  ;;  %v2607_v45 = vrot.slane %v1759_v31, 7  ;;  %v2609_v46 = vrot.slane %v1760_v32, 6 }
  0xbb   : > { %v2606_v43 = vsel %vm2311_vm7, %v2605_v16, %v2604_v36  ;;  %v2611_v49 = vrot.slane %v1761_v33, 5  ;;  %v2613_v50 = vrot.slane %v1762_v37, 4  ;;  %v2615_v51 = vrot.slane %v1763_v38, 3 }
  0xbc   : > { %3974 = vmatmul.mubr.msk.f32.gmra.mxu0 %vm2915_vm8, %v2606_v43  ;;  %4052 = vmatmul.mubr.msk.f32.gmra.mxu1 %vm2915_vm8, %v2606_v43  ;;  %v2617_v52 = vrot.slane %v1764_v39, 2  ;;  %v2608_v54 = vsel %vm2293_vm1, %v2607_v45, %v1758_v29  ;;  %v2619_v55 = vrot.slane %v1765_v44, 1  ;;  %v1062_v56 = vrot.slane %v358_v34, 1  ;;  %v373_v29 = vld [vmem:[%s4172_s17 + $0x18e] sm:$0x3] }
  0xbd   : > { %v1063_v57 = vrot.slane %v359_v35, 1  ;;  %v2610_v58 = vsel %vm2296_vm2, %v2609_v46, %v2608_v54  ;;  %v1064_v59 = vrot.slane %v360_v40, 1  ;;  %v1065_v60 = vrot.slane %v361_v41, 1  ;;  %v374_v46 = vld [vmem:[%s4172_s17 + $0x190] sm:$0x3] }
  0xbe   : > { %v1066_v61 = vrot.slane %v362_v42, 1  ;;  %v2612_v62 = vsel %vm2299_vm3, %v2611_v49, %v2610_v58  ;;  %v1067_v63 = vrot.slane %v363_v47, 1  ;;  %v1068_v0 = vrot.slane %v364_v48, 1  ;;  %v378_v54 = vld [vmem:[%s4172_s17 + $0x198] sm:$0x3] }
  0xbf   : > { %v1069_v1 = vrot.slane %v365_v53, 1  ;;  %v2614_v2 = vsel %vm2302_vm4, %v2613_v50, %v2612_v62  ;;  %v1766_v3 = vmax.f32 %v358_v34, %v1062_v56  ;;  %v1767_v4 = vmax.f32 %v359_v35, %v1063_v57 }
  0xc0   : > { %v1768_v5 = vmax.f32 %v360_v40, %v1064_v59  ;;  %v2616_v7 = vsel %vm2305_vm5, %v2615_v51, %v2614_v2  ;;  %v1769_v8 = vmax.f32 %v361_v41, %v1065_v60  ;;  %v1770_v9 = vmax.f32 %v362_v42, %v1066_v61  ;;  %v379_v59 = vld [vmem:[%s4172_s17 + $0x19a] sm:$0x3]  ;;  %v380_v60 = vld [vmem:[%s4172_s17 + $0x19c] sm:$0x3] }
  0xc1   : > { %v1771_v10 = vmax.f32 %v363_v47, %v1067_v63  ;;  %v2618_v14 = vsel %vm2308_vm6, %v2617_v52, %v2616_v7  ;;  %v1772_v15 = vmax.f32 %v364_v48, %v1068_v0  ;;  %v1773_v16 = vmax.f32 %v365_v53, %v1069_v1  ;;  %v375_v47 = vld [vmem:[%s4172_s17 + $0x192] sm:$0x3]  ;;  %v376_v52 = vld [vmem:[%s4172_s17 + $0x194] sm:$0x3]  ;;  %v377_v53 = vld [vmem:[%s4172_s17 + $0x196] sm:$0x3] }
  0xc2   : > { %v2621_v17 = vrot.slane %v1767_v4, 7  ;;  %v2620_v20 = vsel %vm2311_vm7, %v2619_v55, %v2618_v14  ;;  %v2623_v21 = vrot.slane %v1768_v5, 6  ;;  %v2625_v22 = vrot.slane %v1769_v8, 5  ;;  %v381_v1 = vld [vmem:[%s4172_s17 + $0x19e] sm:$0x3] }
  0xc3   : > { %v2627_v23 = vrot.slane %v1770_v9, 4  ;;  %3976 = vmatprep.mubr.msk.f32.mxu0 %vm2915_vm8, %v2620_v20  ;;  %4054 = vmatprep.mubr.msk.f32.mxu1 %vm2915_vm8, %v2620_v20  ;;  %v2629_v26 = vrot.slane %v1771_v10, 3  ;;  %v2631_v27 = vrot.slane %v1772_v15, 2  ;;  %v2633_v28 = vrot.slane %v1773_v16, 1 }
  0xc4   : > { %v2622_v25 = vsel %vm2293_vm1, %v2621_v17, %v1766_v3  ;;  %v1070_v31 = vrot.slane %v366_v6, 1  ;;  %v1071_v32 = vrot.slane %v367_v11, 1  ;;  %v1072_v33 = vrot.slane %v368_v12, 1 }
  0xc5   : > { %v2624_v30 = vsel %vm2296_vm2, %v2623_v21, %v2622_v25  ;;  %v1073_v35 = vrot.slane %v369_v13, 1  ;;  %v1074_v36 = vrot.slane %v370_v18, 1  ;;  %v1075_v37 = vrot.slane %v371_v19, 1  ;;  %v385_v25 = vld [vmem:[%s4172_s17 + $0x1a6] sm:$0x3] }
  0xc6   : > { %v2626_v34 = vsel %vm2299_vm3, %v2625_v22, %v2624_v30  ;;  %v1076_v39 = vrot.slane %v372_v24, 1  ;;  %v1077_v40 = vrot.slane %v373_v29, 1  ;;  %v1774_v41 = vmax.f32 %v366_v6, %v1070_v31  ;;  %v386_v30 = vld [vmem:[%s4172_s17 + $0x1a8] sm:$0x3]  ;;  %v387_v31 = vld [vmem:[%s4172_s17 + $0x1aa] sm:$0x3] }
  0xc7   : > { %v2628_v38 = vsel %vm2302_vm4, %v2627_v23, %v2626_v34  ;;  %v1775_v43 = vmax.f32 %v367_v11, %v1071_v32  ;;  %v1776_v44 = vmax.f32 %v368_v12, %v1072_v33  ;;  %v1777_v45 = vmax.f32 %v369_v13, %v1073_v35  ;;  %v383_v23 = vld [vmem:[%s4172_s17 + $0x1a2] sm:$0x3] }
  0xc8   : > { %v2630_v42 = vsel %vm2305_vm5, %v2629_v26, %v2628_v38  ;;  %v1778_v49 = vmax.f32 %v370_v18, %v1074_v36  ;;  %v1779_v50 = vmax.f32 %v371_v19, %v1075_v37  ;;  %v1780_v51 = vmax.f32 %v372_v24, %v1076_v39  ;;  %v382_v18 = vld [vmem:[%s4172_s17 + $0x1a0] sm:$0x3]  ;;  %v384_v24 = vld [vmem:[%s4172_s17 + $0x1a4] sm:$0x3]  ;;  %v388_v36 = vld [vmem:[%s4172_s17 + $0x1ac] sm:$0x3] }
  0xc9   : > { %v2632_v48 = vsel %vm2308_vm6, %v2631_v27, %v2630_v42  ;;  %v1781_v56 = vmax.f32 %v373_v29, %v1077_v40  ;;  %v2635_v57 = vrot.slane %v1775_v43, 7  ;;  %v2637_v58 = vrot.slane %v1776_v44, 6 }
  0xca   : > { %v2634_v55 = vsel %vm2311_vm7, %v2633_v28, %v2632_v48  ;;  %v2639_v61 = vrot.slane %v1777_v45, 5  ;;  %v2641_v62 = vrot.slane %v1778_v49, 4  ;;  %v2643_v63 = vrot.slane %v1779_v50, 3 }
  0xcb   : > { %3977 = vmatmul.mubr.msk.f32.gmra.mxu0 %vm2915_vm8, %v2634_v55  ;;  %4055 = vmatmul.mubr.msk.f32.gmra.mxu1 %vm2915_vm8, %v2634_v55  ;;  %v2645_v0 = vrot.slane %v1780_v51, 2  ;;  %v2636_v2 = vsel %vm2293_vm1, %v2635_v57, %v1774_v41  ;;  %v2647_v3 = vrot.slane %v1781_v56, 1  ;;  %v1078_v4 = vrot.slane %v374_v46, 1  ;;  %v389_v41 = vld [vmem:[%s4172_s17 + $0x1ae] sm:$0x3] }
  0xcc   : > { %v1079_v5 = vrot.slane %v375_v47, 1  ;;  %v2638_v6 = vsel %vm2296_vm2, %v2637_v58, %v2636_v2  ;;  %v1080_v7 = vrot.slane %v376_v52, 1  ;;  %v1081_v8 = vrot.slane %v377_v53, 1  ;;  %v390_v58 = vld [vmem:[%s4172_s17 + $0x1b0] sm:$0x3] }
  0xcd   : > { %v1082_v9 = vrot.slane %v378_v54, 1  ;;  %v2640_v10 = vsel %vm2299_vm3, %v2639_v61, %v2638_v6  ;;  %v1083_v11 = vrot.slane %v379_v59, 1  ;;  %v1084_v12 = vrot.slane %v380_v60, 1  ;;  %v394_v2 = vld [vmem:[%s4172_s17 + $0x1b8] sm:$0x3] }
  0xce   : > { %v1085_v13 = vrot.slane %v381_v1, 1  ;;  %v2642_v14 = vsel %vm2302_vm4, %v2641_v62, %v2640_v10  ;;  %v1782_v15 = vmax.f32 %v374_v46, %v1078_v4  ;;  %v1783_v16 = vmax.f32 %v375_v47, %v1079_v5 }
  0xcf   : > { %v1784_v17 = vmax.f32 %v376_v52, %v1080_v7  ;;  %v2644_v19 = vsel %vm2305_vm5, %v2643_v63, %v2642_v14  ;;  %v1785_v20 = vmax.f32 %v377_v53, %v1081_v8  ;;  %v1786_v21 = vmax.f32 %v378_v54, %v1082_v9  ;;  %v395_v7 = vld [vmem:[%s4172_s17 + $0x1ba] sm:$0x3]  ;;  %v396_v8 = vld [vmem:[%s4172_s17 + $0x1bc] sm:$0x3] }
  0xd0   : > { %v1787_v22 = vmax.f32 %v379_v59, %v1083_v11  ;;  %v2646_v26 = vsel %vm2308_vm6, %v2645_v0, %v2644_v19  ;;  %v1788_v27 = vmax.f32 %v380_v60, %v1084_v12  ;;  %v1789_v28 = vmax.f32 %v381_v1, %v1085_v13  ;;  %v391_v59 = vld [vmem:[%s4172_s17 + $0x1b2] sm:$0x3]  ;;  %v392_v0 = vld [vmem:[%s4172_s17 + $0x1b4] sm:$0x3]  ;;  %v393_v1 = vld [vmem:[%s4172_s17 + $0x1b6] sm:$0x3] }
  0xd1   : > { %v2649_v29 = vrot.slane %v1783_v16, 7  ;;  %v2648_v32 = vsel %vm2311_vm7, %v2647_v3, %v2646_v26  ;;  %v2651_v33 = vrot.slane %v1784_v17, 6  ;;  %v2653_v34 = vrot.slane %v1785_v20, 5  ;;  %v397_v13 = vld [vmem:[%s4172_s17 + $0x1be] sm:$0x3] }
  0xd2   : > { %v2655_v35 = vrot.slane %v1786_v21, 4  ;;  %3979 = vmatprep.mubr.msk.f32.mxu0 %vm2915_vm8, %v2648_v32  ;;  %4057 = vmatprep.mubr.msk.f32.mxu1 %vm2915_vm8, %v2648_v32  ;;  %v2657_v38 = vrot.slane %v1787_v22, 3  ;;  %v2659_v39 = vrot.slane %v1788_v27, 2  ;;  %v2661_v40 = vrot.slane %v1789_v28, 1 }
  0xd3   : > { %v2650_v37 = vsel %vm2293_vm1, %v2649_v29, %v1782_v15  ;;  %v1086_v43 = vrot.slane %v382_v18, 1  ;;  %v1087_v44 = vrot.slane %v383_v23, 1  ;;  %v1088_v45 = vrot.slane %v384_v24, 1 }
  0xd4   : > { %v2652_v42 = vsel %vm2296_vm2, %v2651_v33, %v2650_v37  ;;  %v1089_v47 = vrot.slane %v385_v25, 1  ;;  %v1090_v48 = vrot.slane %v386_v30, 1  ;;  %v1091_v49 = vrot.slane %v387_v31, 1  ;;  %v401_v37 = vld [vmem:[%s4172_s17 + $0x1c6] sm:$0x3] }
  0xd5   : > { %v2654_v46 = vsel %vm2299_vm3, %v2653_v34, %v2652_v42  ;;  %v1092_v51 = vrot.slane %v388_v36, 1  ;;  %v1093_v52 = vrot.slane %v389_v41, 1  ;;  %v1790_v53 = vmax.f32 %v382_v18, %v1086_v43  ;;  %v402_v42 = vld [vmem:[%s4172_s17 + $0x1c8] sm:$0x3]  ;;  %v403_v43 = vld [vmem:[%s4172_s17 + $0x1ca] sm:$0x3] }
  0xd6   : > { %v2656_v50 = vsel %vm2302_vm4, %v2655_v35, %v2654_v46  ;;  %v1791_v55 = vmax.f32 %v383_v23, %v1087_v44  ;;  %v1792_v56 = vmax.f32 %v384_v24, %v1088_v45  ;;  %v1793_v57 = vmax.f32 %v385_v25, %v1089_v47  ;;  %v399_v35 = vld [vmem:[%s4172_s17 + $0x1c2] sm:$0x3] }
  0xd7   : > { %v2658_v54 = vsel %vm2305_vm5, %v2657_v38, %v2656_v50  ;;  %v1794_v61 = vmax.f32 %v386_v30, %v1090_v48  ;;  %v1795_v62 = vmax.f32 %v387_v31, %v1091_v49  ;;  %v1796_v63 = vmax.f32 %v388_v36, %v1092_v51  ;;  %v398_v30 = vld [vmem:[%s4172_s17 + $0x1c0] sm:$0x3]  ;;  %v400_v36 = vld [vmem:[%s4172_s17 + $0x1c4] sm:$0x3]  ;;  %v404_v48 = vld [vmem:[%s4172_s17 + $0x1cc] sm:$0x3] }
  0xd8   : > { %v2660_v60 = vsel %vm2308_vm6, %v2659_v39, %v2658_v54  ;;  %v1797_v4 = vmax.f32 %v389_v41, %v1093_v52  ;;  %v2663_v5 = vrot.slane %v1791_v55, 7  ;;  %v2665_v6 = vrot.slane %v1792_v56, 6 }
  0xd9   : > { %v2662_v3 = vsel %vm2311_vm7, %v2661_v40, %v2660_v60  ;;  %v2667_v9 = vrot.slane %v1793_v57, 5  ;;  %v2669_v10 = vrot.slane %v1794_v61, 4  ;;  %v2671_v11 = vrot.slane %v1795_v62, 3 }
  0xda   : > { %3980 = vmatmul.mubr.msk.f32.gmra.mxu0 %vm2915_vm8, %v2662_v3  ;;  %4058 = vmatmul.mubr.msk.f32.gmra.mxu1 %vm2915_vm8, %v2662_v3  ;;  %v2673_v12 = vrot.slane %v1796_v63, 2  ;;  %v2664_v14 = vsel %vm2293_vm1, %v2663_v5, %v1790_v53  ;;  %v2675_v15 = vrot.slane %v1797_v4, 1  ;;  %v1094_v16 = vrot.slane %v390_v58, 1  ;;  %v405_v53 = vld [vmem:[%s4172_s17 + $0x1ce] sm:$0x3] }
  0xdb   : > { %v1095_v17 = vrot.slane %v391_v59, 1  ;;  %v2666_v18 = vsel %vm2296_vm2, %v2665_v6, %v2664_v14  ;;  %v1096_v19 = vrot.slane %v392_v0, 1  ;;  %v1097_v20 = vrot.slane %v393_v1, 1  ;;  %v406_v6 = vld [vmem:[%s4172_s17 + $0x1d0] sm:$0x3] }
  0xdc   : > { %v1098_v21 = vrot.slane %v394_v2, 1  ;;  %v2668_v22 = vsel %vm2299_vm3, %v2667_v9, %v2666_v18  ;;  %v1099_v23 = vrot.slane %v395_v7, 1  ;;  %v1100_v24 = vrot.slane %v396_v8, 1  ;;  %v410_v14 = vld [vmem:[%s4172_s17 + $0x1d8] sm:$0x3] }
  0xdd   : > { %v1101_v25 = vrot.slane %v397_v13, 1  ;;  %v2670_v26 = vsel %vm2302_vm4, %v2669_v10, %v2668_v22  ;;  %v1798_v27 = vmax.f32 %v390_v58, %v1094_v16  ;;  %v1799_v28 = vmax.f32 %v391_v59, %v1095_v17 }
  0xde   : > { %v1800_v29 = vmax.f32 %v392_v0, %v1096_v19  ;;  %v2672_v31 = vsel %vm2305_vm5, %v2671_v11, %v2670_v26  ;;  %v1801_v32 = vmax.f32 %v393_v1, %v1097_v20  ;;  %v1802_v33 = vmax.f32 %v394_v2, %v1098_v21  ;;  %v411_v19 = vld [vmem:[%s4172_s17 + $0x1da] sm:$0x3]  ;;  %v412_v20 = vld [vmem:[%s4172_s17 + $0x1dc] sm:$0x3] }
  0xdf   : > { %v1803_v34 = vmax.f32 %v395_v7, %v1099_v23  ;;  %v2674_v38 = vsel %vm2308_vm6, %v2673_v12, %v2672_v31  ;;  %v1804_v39 = vmax.f32 %v396_v8, %v1100_v24  ;;  %v1805_v40 = vmax.f32 %v397_v13, %v1101_v25  ;;  %v407_v7 = vld [vmem:[%s4172_s17 + $0x1d2] sm:$0x3]  ;;  %v408_v12 = vld [vmem:[%s4172_s17 + $0x1d4] sm:$0x3]  ;;  %v409_v13 = vld [vmem:[%s4172_s17 + $0x1d6] sm:$0x3] }
  0xe0   : > { %v2677_v41 = vrot.slane %v1799_v28, 7  ;;  %v2676_v44 = vsel %vm2311_vm7, %v2675_v15, %v2674_v38  ;;  %v2679_v45 = vrot.slane %v1800_v29, 6  ;;  %v2681_v46 = vrot.slane %v1801_v32, 5  ;;  %v413_v25 = vld [vmem:[%s4172_s17 + $0x1de] sm:$0x3] }
  0xe1   : > { %v2683_v47 = vrot.slane %v1802_v33, 4  ;;  %3982 = vmatprep.mubr.msk.f32.mxu0 %vm2915_vm8, %v2676_v44  ;;  %4060 = vmatprep.mubr.msk.f32.mxu1 %vm2915_vm8, %v2676_v44  ;;  %v2685_v50 = vrot.slane %v1803_v34, 3  ;;  %v2687_v51 = vrot.slane %v1804_v39, 2  ;;  %v2689_v52 = vrot.slane %v1805_v40, 1 }
  0xe2   : > { %v2678_v49 = vsel %vm2293_vm1, %v2677_v41, %v1798_v27  ;;  %v1102_v55 = vrot.slane %v398_v30, 1  ;;  %v1103_v56 = vrot.slane %v399_v35, 1  ;;  %v1104_v57 = vrot.slane %v400_v36, 1 }
  0xe3   : > { %v2680_v54 = vsel %vm2296_vm2, %v2679_v45, %v2678_v49  ;;  %v1105_v59 = vrot.slane %v401_v37, 1  ;;  %v1106_v60 = vrot.slane %v402_v42, 1  ;;  %v1107_v61 = vrot.slane %v403_v43, 1  ;;  %v417_v49 = vld [vmem:[%s4172_s17 + $0x1e6] sm:$0x3] }
  0xe4   : > { %v2682_v58 = vsel %vm2299_vm3, %v2681_v46, %v2680_v54  ;;  %v1108_v63 = vrot.slane %v404_v48, 1  ;;  %v1109_v0 = vrot.slane %v405_v53, 1  ;;  %v1806_v1 = vmax.f32 %v398_v30, %v1102_v55  ;;  %v418_v54 = vld [vmem:[%s4172_s17 + $0x1e8] sm:$0x3]  ;;  %v419_v55 = vld [vmem:[%s4172_s17 + $0x1ea] sm:$0x3] }
  0xe5   : > { %v2684_v62 = vsel %vm2302_vm4, %v2683_v47, %v2682_v58  ;;  %v1807_v3 = vmax.f32 %v399_v35, %v1103_v56  ;;  %v1808_v4 = vmax.f32 %v400_v36, %v1104_v57  ;;  %v1809_v5 = vmax.f32 %v401_v37, %v1105_v59  ;;  %v415_v47 = vld [vmem:[%s4172_s17 + $0x1e2] sm:$0x3] }
  0xe6   : > { %v2686_v2 = vsel %vm2305_vm5, %v2685_v50, %v2684_v62  ;;  %v1810_v9 = vmax.f32 %v402_v42, %v1106_v60  ;;  %v1811_v10 = vmax.f32 %v403_v43, %v1107_v61  ;;  %v1812_v11 = vmax.f32 %v404_v48, %v1108_v63  ;;  %v414_v42 = vld [vmem:[%s4172_s17 + $0x1e0] sm:$0x3]  ;;  %v416_v48 = vld [vmem:[%s4172_s17 + $0x1e4] sm:$0x3]  ;;  %v420_v60 = vld [vmem:[%s4172_s17 + $0x1ec] sm:$0x3] }
  0xe7   : > { %v2688_v8 = vsel %vm2308_vm6, %v2687_v51, %v2686_v2  ;;  %v1813_v16 = vmax.f32 %v405_v53, %v1109_v0  ;;  %v2691_v17 = vrot.slane %v1807_v3, 7  ;;  %v2693_v18 = vrot.slane %v1808_v4, 6 }
  0xe8   : > { %v2690_v15 = vsel %vm2311_vm7, %v2689_v52, %v2688_v8  ;;  %v2695_v21 = vrot.slane %v1809_v5, 5  ;;  %v2697_v22 = vrot.slane %v1810_v9, 4  ;;  %v2699_v23 = vrot.slane %v1811_v10, 3 }
  0xe9   : > { %3983 = vmatmul.mubr.msk.f32.gmra.mxu0 %vm2915_vm8, %v2690_v15  ;;  %4061 = vmatmul.mubr.msk.f32.gmra.mxu1 %vm2915_vm8, %v2690_v15  ;;  %v2701_v24 = vrot.slane %v1812_v11, 2  ;;  %v2692_v26 = vsel %vm2293_vm1, %v2691_v17, %v1806_v1  ;;  %v2703_v27 = vrot.slane %v1813_v16, 1  ;;  %v1110_v28 = vrot.slane %v406_v6, 1  ;;  %v421_v1 = vld [vmem:[%s4172_s17 + $0x1ee] sm:$0x3] }
  0xea   : > { %v1111_v29 = vrot.slane %v407_v7, 1  ;;  %v2694_v30 = vsel %vm2296_vm2, %v2693_v18, %v2692_v26  ;;  %v1112_v31 = vrot.slane %v408_v12, 1  ;;  %v1113_v32 = vrot.slane %v409_v13, 1  ;;  %v422_v18 = vld [vmem:[%s4172_s17 + $0x1f0] sm:$0x3] }
  0xeb   : > { %v1114_v33 = vrot.slane %v410_v14, 1  ;;  %v2696_v34 = vsel %vm2299_vm3, %v2695_v21, %v2694_v30  ;;  %v1115_v35 = vrot.slane %v411_v19, 1  ;;  %v1116_v36 = vrot.slane %v412_v20, 1  ;;  %v426_v26 = vld [vmem:[%s4172_s17 + $0x1f8] sm:$0x3] }
  0xec   : > { %v1117_v37 = vrot.slane %v413_v25, 1  ;;  %v2698_v38 = vsel %vm2302_vm4, %v2697_v22, %v2696_v34  ;;  %v1814_v39 = vmax.f32 %v406_v6, %v1110_v28  ;;  %v1815_v40 = vmax.f32 %v407_v7, %v1111_v29 }
  0xed   : > { %v1816_v41 = vmax.f32 %v408_v12, %v1112_v31  ;;  %v2700_v43 = vsel %vm2305_vm5, %v2699_v23, %v2698_v38  ;;  %v1817_v44 = vmax.f32 %v409_v13, %v1113_v32  ;;  %v1818_v45 = vmax.f32 %v410_v14, %v1114_v33  ;;  %v427_v31 = vld [vmem:[%s4172_s17 + $0x1fa] sm:$0x3]  ;;  %v428_v32 = vld [vmem:[%s4172_s17 + $0x1fc] sm:$0x3] }
  0xee   : > { %v1819_v46 = vmax.f32 %v411_v19, %v1115_v35  ;;  %v2702_v50 = vsel %vm2308_vm6, %v2701_v24, %v2700_v43  ;;  %v1820_v51 = vmax.f32 %v412_v20, %v1116_v36  ;;  %v1821_v52 = vmax.f32 %v413_v25, %v1117_v37  ;;  %v423_v19 = vld [vmem:[%s4172_s17 + $0x1f2] sm:$0x3]  ;;  %v424_v24 = vld [vmem:[%s4172_s17 + $0x1f4] sm:$0x3]  ;;  %v425_v25 = vld [vmem:[%s4172_s17 + $0x1f6] sm:$0x3] }
  0xef   : > { %v2705_v53 = vrot.slane %v1815_v40, 7  ;;  %v2704_v56 = vsel %vm2311_vm7, %v2703_v27, %v2702_v50  ;;  %v2707_v57 = vrot.slane %v1816_v41, 6  ;;  %v2709_v58 = vrot.slane %v1817_v44, 5  ;;  %v429_v37 = vld [vmem:[%s4172_s17 + $0x1fe] sm:$0x3] }
  0xf0   : > { %v2711_v59 = vrot.slane %v1818_v45, 4  ;;  %3985 = vmatprep.mubr.msk.f32.mxu0 %vm2915_vm8, %v2704_v56  ;;  %4063 = vmatprep.mubr.msk.f32.mxu1 %vm2915_vm8, %v2704_v56  ;;  %v2713_v62 = vrot.slane %v1819_v46, 3  ;;  %v2715_v63 = vrot.slane %v1820_v51, 2  ;;  %v2717_v0 = vrot.slane %v1821_v52, 1 }
  0xf1   : > { %v2706_v61 = vsel %vm2293_vm1, %v2705_v53, %v1814_v39  ;;  %v1118_v3 = vrot.slane %v414_v42, 1  ;;  %v1119_v4 = vrot.slane %v415_v47, 1  ;;  %v1120_v5 = vrot.slane %v416_v48, 1 }
  0xf2   : > { %v2708_v2 = vsel %vm2296_vm2, %v2707_v57, %v2706_v61  ;;  %v1121_v7 = vrot.slane %v417_v49, 1  ;;  %v1122_v8 = vrot.slane %v418_v54, 1  ;;  %v1123_v9 = vrot.slane %v419_v55, 1  ;;  %v433_v61 = vld [vmem:[%s4172_s17 + $0x206] sm:$0x3] }
  0xf3   : > { %v2710_v6 = vsel %vm2299_vm3, %v2709_v58, %v2708_v2  ;;  %v1124_v11 = vrot.slane %v420_v60, 1  ;;  %v1125_v12 = vrot.slane %v421_v1, 1  ;;  %v1822_v13 = vmax.f32 %v414_v42, %v1118_v3  ;;  %v434_v2 = vld [vmem:[%s4172_s17 + $0x208] sm:$0x3]  ;;  %v435_v3 = vld [vmem:[%s4172_s17 + $0x20a] sm:$0x3] }
  0xf4   : > { %v2712_v10 = vsel %vm2302_vm4, %v2711_v59, %v2710_v6  ;;  %v1823_v15 = vmax.f32 %v415_v47, %v1119_v4  ;;  %v1824_v16 = vmax.f32 %v416_v48, %v1120_v5  ;;  %v1825_v17 = vmax.f32 %v417_v49, %v1121_v7  ;;  %v431_v59 = vld [vmem:[%s4172_s17 + $0x202] sm:$0x3] }
  0xf5   : > { %v2714_v14 = vsel %vm2305_vm5, %v2713_v62, %v2712_v10  ;;  %v1826_v21 = vmax.f32 %v418_v54, %v1122_v8  ;;  %v1827_v22 = vmax.f32 %v419_v55, %v1123_v9  ;;  %v1828_v23 = vmax.f32 %v420_v60, %v1124_v11  ;;  %v430_v54 = vld [vmem:[%s4172_s17 + $0x200] sm:$0x3]  ;;  %v432_v60 = vld [vmem:[%s4172_s17 + $0x204] sm:$0x3]  ;;  %v436_v8 = vld [vmem:[%s4172_s17 + $0x20c] sm:$0x3] }
  0xf6   : > { %v2716_v20 = vsel %vm2308_vm6, %v2715_v63, %v2714_v14  ;;  %v1829_v28 = vmax.f32 %v421_v1, %v1125_v12  ;;  %v2719_v29 = vrot.slane %v1823_v15, 7  ;;  %v2721_v30 = vrot.slane %v1824_v16, 6 }
  0xf7   : > { %v2718_v27 = vsel %vm2311_vm7, %v2717_v0, %v2716_v20  ;;  %v2723_v33 = vrot.slane %v1825_v17, 5  ;;  %v2725_v34 = vrot.slane %v1826_v21, 4  ;;  %v2727_v35 = vrot.slane %v1827_v22, 3 }
  0xf8   : > { %3986 = vmatmul.mubr.msk.f32.gmra.mxu0 %vm2915_vm8, %v2718_v27  ;;  %4064 = vmatmul.mubr.msk.f32.gmra.mxu1 %vm2915_vm8, %v2718_v27  ;;  %v2729_v36 = vrot.slane %v1828_v23, 2  ;;  %v2720_v38 = vsel %vm2293_vm1, %v2719_v29, %v1822_v13  ;;  %v2731_v39 = vrot.slane %v1829_v28, 1  ;;  %v1126_v40 = vrot.slane %v422_v18, 1  ;;  %v437_v13 = vld [vmem:[%s4172_s17 + $0x20e] sm:$0x3] }
  0xf9   : > { %v1127_v41 = vrot.slane %v423_v19, 1  ;;  %v2722_v42 = vsel %vm2296_vm2, %v2721_v30, %v2720_v38  ;;  %v1128_v43 = vrot.slane %v424_v24, 1  ;;  %v1129_v44 = vrot.slane %v425_v25, 1  ;;  %v438_v30 = vld [vmem:[%s4172_s17 + $0x210] sm:$0x3] }
  0xfa   : > { %v1130_v45 = vrot.slane %v426_v26, 1  ;;  %v2724_v46 = vsel %vm2299_vm3, %v2723_v33, %v2722_v42  ;;  %v1131_v47 = vrot.slane %v427_v31, 1  ;;  %v1132_v48 = vrot.slane %v428_v32, 1  ;;  %v442_v38 = vld [vmem:[%s4172_s17 + $0x218] sm:$0x3] }
  0xfb   : > { %v1133_v49 = vrot.slane %v429_v37, 1  ;;  %v2726_v50 = vsel %vm2302_vm4, %v2725_v34, %v2724_v46  ;;  %v1830_v51 = vmax.f32 %v422_v18, %v1126_v40  ;;  %v1831_v52 = vmax.f32 %v423_v19, %v1127_v41 }
  0xfc   : > { %v1832_v53 = vmax.f32 %v424_v24, %v1128_v43  ;;  %v2728_v55 = vsel %vm2305_vm5, %v2727_v35, %v2726_v50  ;;  %v1833_v56 = vmax.f32 %v425_v25, %v1129_v44  ;;  %v1834_v57 = vmax.f32 %v426_v26, %v1130_v45  ;;  %v443_v43 = vld [vmem:[%s4172_s17 + $0x21a] sm:$0x3]  ;;  %v444_v44 = vld [vmem:[%s4172_s17 + $0x21c] sm:$0x3] }
  0xfd   : > { %v1835_v58 = vmax.f32 %v427_v31, %v1131_v47  ;;  %v2730_v62 = vsel %vm2308_vm6, %v2729_v36, %v2728_v55  ;;  %v1836_v63 = vmax.f32 %v428_v32, %v1132_v48  ;;  %v1837_v0 = vmax.f32 %v429_v37, %v1133_v49  ;;  %v439_v31 = vld [vmem:[%s4172_s17 + $0x212] sm:$0x3]  ;;  %v440_v36 = vld [vmem:[%s4172_s17 + $0x214] sm:$0x3]  ;;  %v441_v37 = vld [vmem:[%s4172_s17 + $0x216] sm:$0x3] }
  0xfe   : > { %v2733_v1 = vrot.slane %v1831_v52, 7  ;;  %v2732_v4 = vsel %vm2311_vm7, %v2731_v39, %v2730_v62  ;;  %v2735_v5 = vrot.slane %v1832_v53, 6  ;;  %v2737_v6 = vrot.slane %v1833_v56, 5  ;;  %v445_v49 = vld [vmem:[%s4172_s17 + $0x21e] sm:$0x3] }
  0xff   : > { %v2739_v7 = vrot.slane %v1834_v57, 4  ;;  %3988 = vmatprep.mubr.msk.f32.mxu0 %vm2915_vm8, %v2732_v4  ;;  %4066 = vmatprep.mubr.msk.f32.mxu1 %vm2915_vm8, %v2732_v4  ;;  %v2741_v10 = vrot.slane %v1835_v58, 3  ;;  %v2743_v11 = vrot.slane %v1836_v63, 2  ;;  %v2745_v12 = vrot.slane %v1837_v0, 1 }
 0x100   : > { %v2734_v9 = vsel %vm2293_vm1, %v2733_v1, %v1830_v51  ;;  %v1134_v15 = vrot.slane %v430_v54, 1  ;;  %v1135_v16 = vrot.slane %v431_v59, 1  ;;  %v1136_v17 = vrot.slane %v432_v60, 1 }
 0x101   : > { %v2736_v14 = vsel %vm2296_vm2, %v2735_v5, %v2734_v9  ;;  %v1137_v19 = vrot.slane %v433_v61, 1  ;;  %v1138_v20 = vrot.slane %v434_v2, 1  ;;  %v1139_v21 = vrot.slane %v435_v3, 1  ;;  %v449_v9 = vld [vmem:[%s4172_s17 + $0x226] sm:$0x3] }
 0x102   : > { %v2738_v18 = vsel %vm2299_vm3, %v2737_v6, %v2736_v14  ;;  %v1140_v23 = vrot.slane %v436_v8, 1  ;;  %v1141_v24 = vrot.slane %v437_v13, 1  ;;  %v1838_v25 = vmax.f32 %v430_v54, %v1134_v15  ;;  %v450_v14 = vld [vmem:[%s4172_s17 + $0x228] sm:$0x3]  ;;  %v451_v15 = vld [vmem:[%s4172_s17 + $0x22a] sm:$0x3] }
 0x103   : > { %v2740_v22 = vsel %vm2302_vm4, %v2739_v7, %v2738_v18  ;;  %v1839_v27 = vmax.f32 %v431_v59, %v1135_v16  ;;  %v1840_v28 = vmax.f32 %v432_v60, %v1136_v17  ;;  %v1841_v29 = vmax.f32 %v433_v61, %v1137_v19  ;;  %v447_v7 = vld [vmem:[%s4172_s17 + $0x222] sm:$0x3] }
 0x104   : > { %v2742_v26 = vsel %vm2305_vm5, %v2741_v10, %v2740_v22  ;;  %v1842_v33 = vmax.f32 %v434_v2, %v1138_v20  ;;  %v1843_v34 = vmax.f32 %v435_v3, %v1139_v21  ;;  %v1844_v35 = vmax.f32 %v436_v8, %v1140_v23  ;;  %v446_v2 = vld [vmem:[%s4172_s17 + $0x220] sm:$0x3]  ;;  %v448_v8 = vld [vmem:[%s4172_s17 + $0x224] sm:$0x3]  ;;  %v452_v20 = vld [vmem:[%s4172_s17 + $0x22c] sm:$0x3] }
 0x105   : > { %v2744_v32 = vsel %vm2308_vm6, %v2743_v11, %v2742_v26  ;;  %v1845_v40 = vmax.f32 %v437_v13, %v1141_v24  ;;  %v2747_v41 = vrot.slane %v1839_v27, 7  ;;  %v2749_v42 = vrot.slane %v1840_v28, 6 }
 0x106   : > { %v2746_v39 = vsel %vm2311_vm7, %v2745_v12, %v2744_v32  ;;  %v2751_v45 = vrot.slane %v1841_v29, 5  ;;  %v2753_v46 = vrot.slane %v1842_v33, 4  ;;  %v2755_v47 = vrot.slane %v1843_v34, 3 }
 0x107   : > { %3989 = vmatmul.mubr.msk.f32.gmra.mxu0 %vm2915_vm8, %v2746_v39  ;;  %4067 = vmatmul.mubr.msk.f32.gmra.mxu1 %vm2915_vm8, %v2746_v39  ;;  %v2757_v48 = vrot.slane %v1844_v35, 2  ;;  %v2748_v50 = vsel %vm2293_vm1, %v2747_v41, %v1838_v25  ;;  %v2759_v51 = vrot.slane %v1845_v40, 1  ;;  %v1142_v52 = vrot.slane %v438_v30, 1  ;;  %v453_v25 = vld [vmem:[%s4172_s17 + $0x22e] sm:$0x3] }
 0x108   : > { %v1143_v53 = vrot.slane %v439_v31, 1  ;;  %v2750_v54 = vsel %vm2296_vm2, %v2749_v42, %v2748_v50  ;;  %v1144_v55 = vrot.slane %v440_v36, 1  ;;  %v1145_v56 = vrot.slane %v441_v37, 1  ;;  %v454_v42 = vld [vmem:[%s4172_s17 + $0x230] sm:$0x3] }
 0x109   : > { %v1146_v57 = vrot.slane %v442_v38, 1  ;;  %v2752_v58 = vsel %vm2299_vm3, %v2751_v45, %v2750_v54  ;;  %v1147_v59 = vrot.slane %v443_v43, 1  ;;  %v1148_v60 = vrot.slane %v444_v44, 1  ;;  %v458_v50 = vld [vmem:[%s4172_s17 + $0x238] sm:$0x3] }
 0x10a   : > { %v1149_v61 = vrot.slane %v445_v49, 1  ;;  %v2754_v62 = vsel %vm2302_vm4, %v2753_v46, %v2752_v58  ;;  %v1846_v63 = vmax.f32 %v438_v30, %v1142_v52  ;;  %v1847_v0 = vmax.f32 %v439_v31, %v1143_v53 }
 0x10b   : > { %v1848_v1 = vmax.f32 %v440_v36, %v1144_v55  ;;  %v2756_v3 = vsel %vm2305_vm5, %v2755_v47, %v2754_v62  ;;  %v1849_v4 = vmax.f32 %v441_v37, %v1145_v56  ;;  %v1850_v5 = vmax.f32 %v442_v38, %v1146_v57  ;;  %v459_v55 = vld [vmem:[%s4172_s17 + $0x23a] sm:$0x3]  ;;  %v460_v56 = vld [vmem:[%s4172_s17 + $0x23c] sm:$0x3] }
 0x10c   : > { %v1851_v6 = vmax.f32 %v443_v43, %v1147_v59  ;;  %v2758_v10 = vsel %vm2308_vm6, %v2757_v48, %v2756_v3  ;;  %v1852_v11 = vmax.f32 %v444_v44, %v1148_v60  ;;  %v1853_v12 = vmax.f32 %v445_v49, %v1149_v61  ;;  %v455_v43 = vld [vmem:[%s4172_s17 + $0x232] sm:$0x3]  ;;  %v456_v48 = vld [vmem:[%s4172_s17 + $0x234] sm:$0x3]  ;;  %v457_v49 = vld [vmem:[%s4172_s17 + $0x236] sm:$0x3] }
 0x10d   : > { %v2761_v13 = vrot.slane %v1847_v0, 7  ;;  %v2760_v16 = vsel %vm2311_vm7, %v2759_v51, %v2758_v10  ;;  %v2763_v17 = vrot.slane %v1848_v1, 6  ;;  %v2765_v18 = vrot.slane %v1849_v4, 5  ;;  %v461_v61 = vld [vmem:[%s4172_s17 + $0x23e] sm:$0x3] }
 0x10e   : > { %v2767_v19 = vrot.slane %v1850_v5, 4  ;;  %3991 = vmatprep.mubr.msk.f32.mxu0 %vm2915_vm8, %v2760_v16  ;;  %4069 = vmatprep.mubr.msk.f32.mxu1 %vm2915_vm8, %v2760_v16  ;;  %v2769_v22 = vrot.slane %v1851_v6, 3  ;;  %v2771_v23 = vrot.slane %v1852_v11, 2  ;;  %v2773_v24 = vrot.slane %v1853_v12, 1 }
 0x10f   : > { %v2762_v21 = vsel %vm2293_vm1, %v2761_v13, %v1846_v63  ;;  %v1150_v27 = vrot.slane %v446_v2, 1  ;;  %v1151_v28 = vrot.slane %v447_v7, 1  ;;  %v1152_v29 = vrot.slane %v448_v8, 1 }
 0x110   : > { %v2764_v26 = vsel %vm2296_vm2, %v2763_v17, %v2762_v21  ;;  %v1153_v31 = vrot.slane %v449_v9, 1  ;;  %v1154_v32 = vrot.slane %v450_v14, 1  ;;  %v1155_v33 = vrot.slane %v451_v15, 1  ;;  %v465_v21 = vld [vmem:[%s4172_s17 + $0x246] sm:$0x3] }
 0x111   : > { %v2766_v30 = vsel %vm2299_vm3, %v2765_v18, %v2764_v26  ;;  %v1156_v35 = vrot.slane %v452_v20, 1  ;;  %v1157_v36 = vrot.slane %v453_v25, 1  ;;  %v1854_v37 = vmax.f32 %v446_v2, %v1150_v27  ;;  %v466_v26 = vld [vmem:[%s4172_s17 + $0x248] sm:$0x3]  ;;  %v467_v27 = vld [vmem:[%s4172_s17 + $0x24a] sm:$0x3] }
 0x112   : > { %v2768_v34 = vsel %vm2302_vm4, %v2767_v19, %v2766_v30  ;;  %v1855_v39 = vmax.f32 %v447_v7, %v1151_v28  ;;  %v1856_v40 = vmax.f32 %v448_v8, %v1152_v29  ;;  %v1857_v41 = vmax.f32 %v449_v9, %v1153_v31  ;;  %v463_v19 = vld [vmem:[%s4172_s17 + $0x242] sm:$0x3] }
 0x113   : > { %v2770_v38 = vsel %vm2305_vm5, %v2769_v22, %v2768_v34  ;;  %v1858_v45 = vmax.f32 %v450_v14, %v1154_v32  ;;  %v1859_v46 = vmax.f32 %v451_v15, %v1155_v33  ;;  %v1860_v47 = vmax.f32 %v452_v20, %v1156_v35  ;;  %v462_v14 = vld [vmem:[%s4172_s17 + $0x240] sm:$0x3]  ;;  %v464_v20 = vld [vmem:[%s4172_s17 + $0x244] sm:$0x3]  ;;  %v468_v32 = vld [vmem:[%s4172_s17 + $0x24c] sm:$0x3] }
 0x114   : > { %v2772_v44 = vsel %vm2308_vm6, %v2771_v23, %v2770_v38  ;;  %v1861_v52 = vmax.f32 %v453_v25, %v1157_v36  ;;  %v2775_v53 = vrot.slane %v1855_v39, 7  ;;  %v2777_v54 = vrot.slane %v1856_v40, 6  ;;  %v4786_v38 = vpop.f32.mrf.mxu0  ;;  %v4788_v39 = vpop.f32.mrf.mxu1 }
 0x115   : > { %v2774_v51 = vsel %vm2311_vm7, %v2773_v24, %v2772_v44  ;;  %v2779_v57 = vrot.slane %v1857_v41, 5  ;;  %v2781_v58 = vrot.slane %v1858_v45, 4  ;;  %v2783_v59 = vrot.slane %v1859_v46, 3 }
 0x116   : > { %3992 = vmatmul.mubr.msk.f32.gmra.mxu0 %vm2915_vm8, %v2774_v51  ;;  %4070 = vmatmul.mubr.msk.f32.gmra.mxu1 %vm2915_vm8, %v2774_v51  ;;  %v2785_v60 = vrot.slane %v1860_v47, 2  ;;  %v2776_v62 = vsel %vm2293_vm1, %v2775_v53, %v1854_v37  ;;  %v2787_v63 = vrot.slane %v1861_v52, 1  ;;  %v1158_v0 = vrot.slane %v454_v42, 1  ;;  %v469_v37 = vld [vmem:[%s4172_s17 + $0x24e] sm:$0x3] }
 0x117   : > { %v1159_v1 = vrot.slane %v455_v43, 1  ;;  %v2778_v2 = vsel %vm2296_vm2, %v2777_v54, %v2776_v62  ;;  %v1160_v3 = vrot.slane %v456_v48, 1  ;;  %v1161_v4 = vrot.slane %v457_v49, 1 }
 0x118   : > { %v1162_v5 = vrot.slane %v458_v50, 1  ;;  %v2780_v6 = vsel %vm2299_vm3, %v2779_v57, %v2778_v2  ;;  %v1163_v7 = vrot.slane %v459_v55, 1  ;;  %v1164_v8 = vrot.slane %v460_v56, 1  ;;  %v471_v57 = vld [vmem:[%s4172_s17 + $0x252] sm:$0x3] }
 0x119   : > { %v1165_v9 = vrot.slane %v461_v61, 1  ;;  %v2782_v10 = vsel %vm2302_vm4, %v2781_v58, %v2780_v6  ;;  %v1862_v11 = vmax.f32 %v454_v42, %v1158_v0  ;;  %v1863_v12 = vmax.f32 %v455_v43, %v1159_v1  ;;  %v4796_v58 = vpop.f32.mrf.mxu0  ;;  %v472_v0 = vld [vmem:[%s4172_s17 + $0x254] sm:$0x3]  ;;  %v473_v1 = vld [vmem:[%s4172_s17 + $0x256] sm:$0x3] }
 0x11a   : > { %v1864_v13 = vmax.f32 %v456_v48, %v1160_v3  ;;  %v2784_v15 = vsel %vm2305_vm5, %v2783_v59, %v2782_v10  ;;  %v1865_v16 = vmax.f32 %v457_v49, %v1161_v4  ;;  %v1866_v17 = vmax.f32 %v458_v50, %v1162_v5  ;;  %v4798_v59 = vpop.f32.mrf.mxu1  ;;  %v474_v2 = vld [vmem:[%s4172_s17 + $0x258] sm:$0x3] }
 0x11b   : > { %v1867_v18 = vmax.f32 %v459_v55, %v1163_v7  ;;  %v2786_v22 = vsel %vm2308_vm6, %v2785_v60, %v2784_v15  ;;  %v1868_v23 = vmax.f32 %v460_v56, %v1164_v8  ;;  %v1869_v24 = vmax.f32 %v461_v61, %v1165_v9  ;;  %v470_v56 = vld [vmem:[%s4172_s17 + $0x250] sm:$0x3]  ;;  %v475_v7 = vld [vmem:[%s4172_s17 + $0x25a] sm:$0x3]  ;;  %v476_v8 = vld [vmem:[%s4172_s17 + $0x25c] sm:$0x3] }
 0x11c   : > { %v2789_v25 = vrot.slane %v1863_v12, 7  ;;  %v2788_v28 = vsel %vm2311_vm7, %v2787_v63, %v2786_v22  ;;  %v2791_v29 = vrot.slane %v1864_v13, 6  ;;  %v2793_v30 = vrot.slane %v1865_v16, 5  ;;  %v477_v13 = vld [vmem:[%s4172_s17 + $0x25e] sm:$0x3] }
 0x11d   : > { %v2795_v31 = vrot.slane %v1866_v17, 4  ;;  %3994 = vmatprep.mubr.msk.f32.mxu0 %vm2915_vm8, %v2788_v28  ;;  %4072 = vmatprep.mubr.msk.f32.mxu1 %vm2915_vm8, %v2788_v28  ;;  %v2797_v34 = vrot.slane %v1867_v18, 3  ;;  %v2799_v35 = vrot.slane %v1868_v23, 2  ;;  %v2801_v36 = vrot.slane %v1869_v24, 1  ;;  %v4811_v18 = vpop.f32.mrf.mxu0 }
 0x11e   : > { %v2790_v33 = vsel %vm2293_vm1, %v2789_v25, %v1862_v11  ;;  %v1166_v41 = vrot.slane %v462_v14, 1  ;;  %v1167_v42 = vrot.slane %v463_v19, 1  ;;  %v1168_v43 = vrot.slane %v464_v20, 1 }
 0x11f   : > { %v2792_v40 = vsel %vm2296_vm2, %v2791_v29, %v2790_v33  ;;  %v1169_v45 = vrot.slane %v465_v21, 1  ;;  %v1170_v46 = vrot.slane %v466_v26, 1  ;;  %v1171_v47 = vrot.slane %v467_v27, 1 }
 0x120   : > { %v2794_v44 = vsel %vm2299_vm3, %v2793_v30, %v2792_v40  ;;  %v1172_v49 = vrot.slane %v468_v32, 1  ;;  %v1173_v50 = vrot.slane %v469_v37, 1  ;;  %v1870_v51 = vmax.f32 %v462_v14, %v1166_v41  ;;  %v480_v40 = vld [vmem:[%s4172_s17 + $0x264] sm:$0x3]  ;;  %v481_v41 = vld [vmem:[%s4172_s17 + $0x266] sm:$0x3] }
 0x121   : > { %v2796_v48 = vsel %vm2302_vm4, %v2795_v31, %v2794_v44  ;;  %v1871_v53 = vmax.f32 %v463_v19, %v1167_v42  ;;  %v1872_v54 = vmax.f32 %v464_v20, %v1168_v43  ;;  %v1873_v55 = vmax.f32 %v465_v21, %v1169_v45  ;;  %v4813_v19 = vpop.f32.mrf.mxu1  ;;  %v4823_v42 = vpop.f32.mrf.mxu0 }
 0x122   : > { %v2798_v52 = vsel %vm2305_vm5, %v2797_v34, %v2796_v48  ;;  %v1874_v61 = vmax.f32 %v466_v26, %v1170_v46  ;;  %v1875_v62 = vmax.f32 %v467_v27, %v1171_v47  ;;  %v1876_v63 = vmax.f32 %v468_v32, %v1172_v49  ;;  %v478_v32 = vld [vmem:[%s4172_s17 + $0x260] sm:$0x3]  ;;  %v482_v48 = vld [vmem:[%s4172_s17 + $0x268] sm:$0x3]  ;;  %v483_v49 = vld [vmem:[%s4172_s17 + $0x26a] sm:$0x3] }
 0x123   : > { %v2800_v60 = vsel %vm2308_vm6, %v2799_v35, %v2798_v52  ;;  %v1877_v4 = vmax.f32 %v469_v37, %v1173_v50  ;;  %v2803_v5 = vrot.slane %v1871_v53, 7  ;;  %v2805_v6 = vrot.slane %v1872_v54, 6  ;;  %v479_v37 = vld [vmem:[%s4172_s17 + $0x262] sm:$0x3]  ;;  %v4825_v43 = vpop.f32.mrf.mxu1  ;;  %v484_v54 = vld [vmem:[%s4172_s17 + $0x26c] sm:$0x3] }
 0x124   : > { %v2802_v3 = vsel %vm2311_vm7, %v2801_v36, %v2800_v60  ;;  %v2807_v9 = vrot.slane %v1873_v55, 5  ;;  %v2809_v10 = vrot.slane %v1874_v61, 4  ;;  %v2811_v11 = vrot.slane %v1875_v62, 3  ;;  %v485_v61 = vld [vmem:[%s4172_s17 + $0x26e] sm:$0x3] }
 0x125   : > { %3995 = vmatmul.mubr.msk.f32.gmra.mxu0 %vm2915_vm8, %v2802_v3  ;;  %4073 = vmatmul.mubr.msk.f32.gmra.mxu1 %vm2915_vm8, %v2802_v3  ;;  %v2813_v12 = vrot.slane %v1876_v63, 2  ;;  %v2804_v14 = vsel %vm2293_vm1, %v2803_v5, %v1870_v51  ;;  %v2815_v15 = vrot.slane %v1877_v4, 1  ;;  %v1174_v16 = vrot.slane %v470_v56, 1  ;;  %v4839_v3 = vpop.f32.mrf.mxu1 }
 0x126   : > { %v1175_v17 = vrot.slane %v471_v57, 1  ;;  %v2806_v20 = vsel %vm2296_vm2, %v2805_v6, %v2804_v14  ;;  %v1176_v21 = vrot.slane %v472_v0, 1  ;;  %v1177_v22 = vrot.slane %v473_v1, 1 }
 0x127   : > { %v1178_v23 = vrot.slane %v474_v2, 1  ;;  %v2808_v24 = vsel %vm2299_vm3, %v2807_v9, %v2806_v20  ;;  %v1179_v25 = vrot.slane %v475_v7, 1  ;;  %v1180_v26 = vrot.slane %v476_v8, 1 }
 0x128   : > { %v1181_v27 = vrot.slane %v477_v13, 1  ;;  %v2810_v28 = vsel %vm2302_vm4, %v2809_v10, %v2808_v24  ;;  %v1878_v29 = vmax.f32 %v470_v56, %v1174_v16  ;;  %v1879_v30 = vmax.f32 %v471_v57, %v1175_v17  ;;  %v486_v16 = vld [vmem:[%s4172_s17 + $0x270] sm:$0x3]  ;;  %v487_v17 = vld [vmem:[%s4172_s17 + $0x272] sm:$0x3] }
 0x129   : > { %v1880_v31 = vmax.f32 %v472_v0, %v1176_v21  ;;  %v2812_v33 = vsel %vm2305_vm5, %v2811_v11, %v2810_v28  ;;  %v1881_v34 = vmax.f32 %v473_v1, %v1177_v22  ;;  %v1882_v35 = vmax.f32 %v474_v2, %v1178_v23  ;;  %v4837_v2 = vpop.f32.mrf.mxu0  ;;  %v488_v24 = vld [vmem:[%s4172_s17 + $0x274] sm:$0x3]  ;;  %v4852_v28 = vpop.f32.mrf.mxu1 }
 0x12a   : > { %v1883_v36 = vmax.f32 %v475_v7, %v1179_v25  ;;  %v2814_v44 = vsel %vm2308_vm6, %v2813_v12, %v2812_v33  ;;  %v1884_v45 = vmax.f32 %v476_v8, %v1180_v26  ;;  %v1885_v46 = vmax.f32 %v477_v13, %v1181_v27  ;;  %v489_v25 = vld [vmem:[%s4172_s17 + $0x276] sm:$0x3]  ;;  %v490_v26 = vld [vmem:[%s4172_s17 + $0x278] sm:$0x3]  ;;  %v491_v33 = vld [vmem:[%s4172_s17 + $0x27a] sm:$0x3] }
 0x12b   : > { %v2817_v47 = vrot.slane %v1879_v30, 7  ;;  %v2816_v50 = vsel %vm2311_vm7, %v2815_v15, %v2814_v44  ;;  %v2819_v51 = vrot.slane %v1880_v31, 6  ;;  %v2821_v52 = vrot.slane %v1881_v34, 5  ;;  %v4850_v27 = vpop.f32.mrf.mxu0  ;;  %v492_v34 = vld [vmem:[%s4172_s17 + $0x27c] sm:$0x3] }
 0x12c   : > { %v2823_v53 = vrot.slane %v1882_v35, 4  ;;  %3997 = vmatprep.mubr.msk.f32.mxu0 %vm2915_vm8, %v2816_v50  ;;  %4075 = vmatprep.mubr.msk.f32.mxu1 %vm2915_vm8, %v2816_v50  ;;  %v2825_v56 = vrot.slane %v1883_v36, 3  ;;  %v2827_v57 = vrot.slane %v1884_v45, 2  ;;  %v2829_v60 = vrot.slane %v1885_v46, 1 }
 0x12d   : > { %v2818_v55 = vsel %vm2293_vm1, %v2817_v47, %v1878_v29  ;;  %v1182_v63 = vrot.slane %v478_v32, 1  ;;  %v1183_v0 = vrot.slane %v479_v37, 1  ;;  %v1184_v1 = vrot.slane %v480_v40, 1 }
 0x12e   : > { %v2820_v62 = vsel %vm2296_vm2, %v2819_v51, %v2818_v55  ;;  %v1185_v5 = vrot.slane %v481_v41, 1  ;;  %v1186_v6 = vrot.slane %v482_v48, 1  ;;  %v1187_v7 = vrot.slane %v483_v49, 1 }
 0x12f   : > { %v2822_v4 = vsel %vm2299_vm3, %v2821_v52, %v2820_v62  ;;  %v1188_v9 = vrot.slane %v484_v54, 1  ;;  %v1189_v10 = vrot.slane %v485_v61, 1  ;;  %v1886_v11 = vmax.f32 %v478_v32, %v1182_v63  ;;  %v4862_v52 = vpop.f32.mrf.mxu0 }
 0x130   : > { %v2824_v8 = vsel %vm2302_vm4, %v2823_v53, %v2822_v4  ;;  %v1887_v13 = vmax.f32 %v479_v37, %v1183_v0  ;;  %v1888_v14 = vmax.f32 %v480_v40, %v1184_v1  ;;  %v1889_v15 = vmax.f32 %v481_v41, %v1185_v5  ;;  %v493_v41 = vld [vmem:[%s4172_s17 + $0x27e] sm:$0x3]  ;;  %v4864_v53 = vpop.f32.mrf.mxu1  ;;  %v494_v0 = vld [vmem:[%s4172_s17 + $0x280] sm:$0x3] }
 0x131   : > { %v2826_v12 = vsel %vm2305_vm5, %v2825_v56, %v2824_v8  ;;  %v1890_v21 = vmax.f32 %v482_v48, %v1186_v6  ;;  %v1891_v22 = vmax.f32 %v483_v49, %v1187_v7  ;;  %v1892_v23 = vmax.f32 %v484_v54, %v1188_v9  ;;  %v495_v7 = vld [vmem:[%s4172_s17 + $0x282] sm:$0x3]  ;;  %v496_v8 = vld [vmem:[%s4172_s17 + $0x284] sm:$0x3]  ;;  %v497_v9 = vld [vmem:[%s4172_s17 + $0x286] sm:$0x3] }
 0x132   : > { %v2828_v20 = vsel %vm2308_vm6, %v2827_v57, %v2826_v12  ;;  %v1893_v30 = vmax.f32 %v485_v61, %v1189_v10  ;;  %v2831_v31 = vrot.slane %v1887_v13, 7  ;;  %v2833_v32 = vrot.slane %v1888_v14, 6  ;;  %v498_v14 = vld [vmem:[%s4172_s17 + $0x288] sm:$0x3] }
 0x133   : > { %v2830_v29 = vsel %vm2311_vm7, %v2829_v60, %v2828_v20  ;;  %v2835_v35 = vrot.slane %v1889_v15, 5  ;;  %v2837_v36 = vrot.slane %v1890_v21, 4  ;;  %v2839_v37 = vrot.slane %v1891_v22, 3  ;;  %v499_v15 = vld [vmem:[%s4172_s17 + $0x28a] sm:$0x3] }
 0x134   : > { %3998 = vmatmul.mubr.msk.f32.gmra.mxu0 %vm2915_vm8, %v2830_v29  ;;  %4076 = vmatmul.mubr.msk.f32.gmra.mxu1 %vm2915_vm8, %v2830_v29  ;;  %v2841_v40 = vrot.slane %v1892_v23, 2  ;;  %v2832_v44 = vsel %vm2293_vm1, %v2831_v31, %v1886_v11  ;;  %v2843_v45 = vrot.slane %v1893_v30, 1  ;;  %v1190_v46 = vrot.slane %v486_v16, 1  ;;  %v501_v31 = vld [vmem:[%s4172_s17 + $0x28e] sm:$0x3] }
 0x135   : > { %v1191_v47 = vrot.slane %v487_v17, 1  ;;  %v2834_v48 = vsel %vm2296_vm2, %v2833_v32, %v2832_v44  ;;  %v1192_v49 = vrot.slane %v488_v24, 1  ;;  %v1193_v50 = vrot.slane %v489_v25, 1 }
 0x136   : > { %v1194_v51 = vrot.slane %v490_v26, 1  ;;  %v2836_v54 = vsel %vm2299_vm3, %v2835_v35, %v2834_v48  ;;  %v1195_v55 = vrot.slane %v491_v33, 1  ;;  %v1196_v56 = vrot.slane %v492_v34, 1 }
 0x137   : > { %v1197_v57 = vrot.slane %v493_v41, 1  ;;  %v2838_v60 = vsel %vm2302_vm4, %v2837_v36, %v2836_v54  ;;  %v1894_v61 = vmax.f32 %v486_v16, %v1190_v46  ;;  %v1895_v62 = vmax.f32 %v487_v17, %v1191_v47  ;;  %v4876_v16 = vpop.f32.mrf.mxu0  ;;  %v4878_v17 = vpop.f32.mrf.mxu1 }
 0x138   : > { %v1896_v63 = vmax.f32 %v488_v24, %v1192_v49  ;;  %v2840_v1 = vsel %vm2305_vm5, %v2839_v37, %v2838_v60  ;;  %v1897_v4 = vmax.f32 %v489_v25, %v1193_v50  ;;  %v1898_v5 = vmax.f32 %v490_v26, %v1194_v51  ;;  %v500_v24 = vld [vmem:[%s4172_s17 + $0x28c] sm:$0x3] }
 0x139   : > { %v1899_v6 = vmax.f32 %v491_v33, %v1195_v55  ;;  %v2842_v10 = vsel %vm2308_vm6, %v2841_v40, %v2840_v1  ;;  %v1900_v11 = vmax.f32 %v492_v34, %v1196_v56  ;;  %v1901_v12 = vmax.f32 %v493_v41, %v1197_v57  ;;  %v4888_v44 = vpop.f32.mrf.mxu0  ;;  %v502_v56 = vld [vmem:[%s4172_s17 + $0x290] sm:$0x3]  ;;  %v503_v57 = vld [vmem:[%s4172_s17 + $0x292] sm:$0x3]  ;;  %v504_v1 = vld [vmem:[%s4172_s17 + $0x294] sm:$0x3] }
 0x13a   : > { %v2845_v13 = vrot.slane %v1895_v62, 7  ;;  %v2844_v20 = vsel %vm2311_vm7, %v2843_v45, %v2842_v10  ;;  %v2847_v21 = vrot.slane %v1896_v63, 6  ;;  %v2849_v22 = vrot.slane %v1897_v4, 5  ;;  %v4890_v45 = vpop.f32.mrf.mxu1  ;;  %v505_v4 = vld [vmem:[%s4172_s17 + $0x296] sm:$0x3] }
 0x13b   : > { %v2851_v23 = vrot.slane %v1898_v5, 4  ;;  %4000 = vmatprep.mubr.msk.f32.mxu0 %vm2915_vm8, %v2844_v20  ;;  %4078 = vmatprep.mubr.msk.f32.mxu1 %vm2915_vm8, %v2844_v20  ;;  %v2853_v26 = vrot.slane %v1899_v6, 3  ;;  %v2855_v29 = vrot.slane %v1900_v11, 2  ;;  %v2857_v30 = vrot.slane %v1901_v12, 1  ;;  %v506_v5 = vld [vmem:[%s4172_s17 + $0x298] sm:$0x3]  ;;  %v4903_v12 = vpop.f32.mrf.mxu0 }
 0x13c   : > { %v2846_v25 = vsel %vm2293_vm1, %v2845_v13, %v1894_v61  ;;  %v1198_v33 = vrot.slane %v494_v0, 1  ;;  %v1199_v34 = vrot.slane %v495_v7, 1  ;;  %v1200_v35 = vrot.slane %v496_v8, 1  ;;  %v507_v11 = vld [vmem:[%s4172_s17 + $0x29a] sm:$0x3] }
 0x13d   : > { %v2848_v32 = vsel %vm2296_vm2, %v2847_v21, %v2846_v25  ;;  %v1201_v37 = vrot.slane %v497_v9, 1  ;;  %v1202_v40 = vrot.slane %v498_v14, 1  ;;  %v1203_v41 = vrot.slane %v499_v15, 1  ;;  %v509_v21 = vld [vmem:[%s4172_s17 + $0x29e] sm:$0x3] }
 0x13e   : > { %v2850_v36 = vsel %vm2299_vm3, %v2849_v22, %v2848_v32  ;;  %v1204_v47 = vrot.slane %v500_v24, 1  ;;  %v1205_v48 = vrot.slane %v501_v31, 1  ;;  %v1902_v49 = vmax.f32 %v494_v0, %v1198_v33 }
 0x13f   : > { %v2852_v46 = vsel %vm2302_vm4, %v2851_v23, %v2850_v36  ;;  %v1903_v51 = vmax.f32 %v495_v7, %v1199_v34  ;;  %v1904_v54 = vmax.f32 %v496_v8, %v1200_v35  ;;  %v1905_v55 = vmax.f32 %v497_v9, %v1201_v37  ;;  %v508_v8 = vld [vmem:[%s4172_s17 + $0x29c] sm:$0x3]  ;;  %v4905_v9 = vpop.f32.mrf.mxu1  ;;  %v4913_v36 = vpop.f32.mrf.mxu0 }
 0x140   : > { %v2854_v50 = vsel %vm2305_vm5, %v2853_v26, %v2852_v46  ;;  %v1906_v61 = vmax.f32 %v498_v14, %v1202_v40  ;;  %v1907_v62 = vmax.f32 %v499_v15, %v1203_v41  ;;  %v1908_v63 = vmax.f32 %v500_v24, %v1204_v47 }
 0x141   : > { %v2856_v60 = vsel %vm2308_vm6, %v2855_v29, %v2854_v50  ;;  %v1909_v6 = vmax.f32 %v501_v31, %v1205_v48  ;;  %v2859_v10 = vrot.slane %v1903_v51, 7  ;;  %v2861_v7 = vrot.slane %v1904_v54, 6  ;;  %v4915_v37 = vpop.f32.mrf.mxu1  ;;  %v510_v48 = vld [vmem:[%s4172_s17 + $0x2a0] sm:$0x3] }
 0x142   : > { %v2858_v0 = vsel %vm2311_vm7, %v2857_v30, %v2856_v60  ;;  %v2863_v13 = vrot.slane %v1905_v55, 5  ;;  %v2865_v14 = vrot.slane %v1906_v61, 4  ;;  %v2867_v15 = vrot.slane %v1907_v62, 3  ;;  %v511_v55 = vld [vmem:[%s4172_s17 + $0x2a2] sm:$0x3] }
 0x143   : > { %4001 = vmatmul.mubr.msk.f32.gmra.mxu0 %vm2915_vm8, %v2858_v0  ;;  %4079 = vmatmul.mubr.msk.f32.gmra.mxu1 %vm2915_vm8, %v2858_v0  ;;  %v2869_v20 = vrot.slane %v1908_v63, 2  ;;  %v2860_v22 = vsel %vm2293_vm1, %v2859_v10, %v1902_v49  ;;  %v2871_v23 = vrot.slane %v1909_v6, 1  ;;  %v1206_v24 = vrot.slane %v502_v56, 1  ;;  %v512_v60 = vld [vmem:[%s4172_s17 + $0x2a4] sm:$0x3] }
 0x144   : > { %v1207_v25 = vrot.slane %v503_v57, 1  ;;  %v2862_v26 = vsel %vm2296_vm2, %v2861_v7, %v2860_v22  ;;  %v1208_v29 = vrot.slane %v504_v1, 1  ;;  %v1209_v30 = vrot.slane %v505_v4, 1  ;;  %v513_v61 = vld [vmem:[%s4172_s17 + $0x2a6] sm:$0x3] }
 0x145   : > { %v1210_v31 = vrot.slane %v506_v5, 1  ;;  %v2864_v32 = vsel %vm2299_vm3, %v2863_v13, %v2862_v26  ;;  %v1211_v33 = vrot.slane %v507_v11, 1  ;;  %v1212_v34 = vrot.slane %v508_v8, 1  ;;  %v516_v13 = vld [vmem:[%s4172_s17 + $0x2ac] sm:$0x3] }
 0x146   : > { %v1213_v35 = vrot.slane %v509_v21, 1  ;;  %v2866_v40 = vsel %vm2302_vm4, %v2865_v14, %v2864_v32  ;;  %v1910_v41 = vmax.f32 %v502_v56, %v1206_v24  ;;  %v1911_v46 = vmax.f32 %v503_v57, %v1207_v25  ;;  %v514_v56 = vld [vmem:[%s4172_s17 + $0x2a8] sm:$0x3]  ;;  %v515_v57 = vld [vmem:[%s4172_s17 + $0x2aa] sm:$0x3] }
 0x147   : > { %v1912_v47 = vmax.f32 %v504_v1, %v1208_v29  ;;  %v2868_v49 = vsel %vm2305_vm5, %v2867_v15, %v2866_v40  ;;  %v1913_v50 = vmax.f32 %v505_v4, %v1209_v30  ;;  %v1914_v51 = vmax.f32 %v506_v5, %v1210_v31  ;;  %v4928_v5 = vpop.f32.mrf.mxu0 }
 0x148   : > { %v1915_v54 = vmax.f32 %v507_v11, %v1211_v33  ;;  %v2870_v62 = vsel %vm2308_vm6, %v2869_v20, %v2868_v49  ;;  %v1916_v63 = vmax.f32 %v508_v8, %v1212_v34  ;;  %v1917_v0 = vmax.f32 %v509_v21, %v1213_v35  ;;  %v4930_v11 = vpop.f32.mrf.mxu1  ;;  %v517_v21 = vld [vmem:[%s4172_s17 + $0x2ae] sm:$0x3] }
 0x149   : > { %v2873_v6 = vrot.slane %v1911_v46, 7  ;;  %v2872_v1 = vsel %vm2311_vm7, %v2871_v23, %v2870_v62  ;;  %v2875_v10 = vrot.slane %v1912_v47, 6  ;;  %v2877_v7 = vrot.slane %v1913_v50, 5  ;;  %v4943_v40 = vpop.f32.mrf.mxu0 }
 0x14a   : > { %v2879_v4 = vrot.slane %v1914_v51, 4  ;;  %4003 = vmatprep.mubr.msk.f32.mxu0 %vm2915_vm8, %v2872_v1  ;;  %4081 = vmatprep.mubr.msk.f32.mxu1 %vm2915_vm8, %v2872_v1  ;;  %v2881_v14 = vrot.slane %v1915_v54, 3  ;;  %v2883_v15 = vrot.slane %v1916_v63, 2  ;;  %v2885_v20 = vrot.slane %v1917_v0, 1  ;;  %v518_v51 = vld [vmem:[%s4172_s17 + $0x2b0] sm:$0x3] }
 0x14b   : > { %v2874_v8 = vsel %vm2293_vm1, %v2873_v6, %v1910_v41  ;;  %v1214_v23 = vrot.slane %v510_v48, 1  ;;  %v1215_v24 = vrot.slane %v511_v55, 1  ;;  %v1216_v25 = vrot.slane %v512_v60, 1  ;;  %v4945_v41 = vpop.f32.mrf.mxu1  ;;  %v519_v54 = vld [vmem:[%s4172_s17 + $0x2b2] sm:$0x3] }
 0x14c   : > { %v2876_v22 = vsel %vm2296_vm2, %v2875_v10, %v2874_v8  ;;  %v1217_v29 = vrot.slane %v513_v61, 1  ;;  %v1218_v30 = vrot.slane %v514_v56, 1  ;;  %v1219_v31 = vrot.slane %v515_v57, 1  ;;  %v520_v6 = vld [vmem:[%s4172_s17 + $0x2b4] sm:$0x3] }
 0x14d   : > { %v2878_v26 = vsel %vm2299_vm3, %v2877_v7, %v2876_v22  ;;  %v1220_v33 = vrot.slane %v516_v13, 1  ;;  %v1221_v34 = vrot.slane %v517_v21, 1  ;;  %v1918_v35 = vmax.f32 %v510_v48, %v1214_v23  ;;  %v521_v1 = vld [vmem:[%s4172_s17 + $0x2b6] sm:$0x3]  ;;  %v522_v10 = vld [vmem:[%s4172_s17 + $0x2b8] sm:$0x3]  ;;  %v4961_v22 = vpop.f32.mrf.mxu0  ;;  %v4963_v23 = vpop.f32.mrf.mxu1 }
 0x14e   : > { %v2880_v32 = vsel %vm2302_vm4, %v2879_v4, %v2878_v26  ;;  %v1919_v47 = vmax.f32 %v511_v55, %v1215_v24  ;;  %v1920_v49 = vmax.f32 %v512_v60, %v1216_v25  ;;  %v1921_v50 = vmax.f32 %v513_v61, %v1217_v29  ;;  %v523_v61 = vld [vmem:[%s4172_s17 + $0x2ba] sm:$0x3]  ;;  %v524_v8 = vld [vmem:[%s4172_s17 + $0x2bc] sm:$0x3] }
 0x14f   : > { %v2882_v46 = vsel %vm2305_vm5, %v2881_v14, %v2880_v32  ;;  %v1922_v63 = vmax.f32 %v514_v56, %v1218_v30  ;;  %v1923_v0 = vmax.f32 %v515_v57, %v1219_v31  ;;  %v1924_v48 = vmax.f32 %v516_v13, %v1220_v33 }
 0x150   : > { %v2884_v62 = vsel %vm2308_vm6, %v2883_v15, %v2882_v46  ;;  %v1925_v4 = vmax.f32 %v517_v21, %v1221_v34  ;;  %v2887_v55 = vrot.slane %v1919_v47, 7  ;;  %v2889_v60 = vrot.slane %v1920_v49, 6  ;;  %v525_v15 = vld [vmem:[%s4172_s17 + $0x2be] sm:$0x3] }
 0x151   : > { %v2886_v7 = vsel %vm2311_vm7, %v2885_v20, %v2884_v62  ;;  %v2891_v56 = vrot.slane %v1921_v50, 5  ;;  %v2893_v57 = vrot.slane %v1922_v63, 4  ;;  %v2895_v13 = vrot.slane %v1923_v0, 3  ;;  %v4974_v62 = vpop.f32.mrf.mxu0  ;;  %v4976_v63 = vpop.f32.mrf.mxu1 }
 0x152   : > { %4004 = vmatmul.mubr.msk.f32.gmra.mxu0 %vm2915_vm8, %v2886_v7  ;;  %4082 = vmatmul.mubr.msk.f32.gmra.mxu1 %vm2915_vm8, %v2886_v7  ;;  %v2897_v14 = vrot.slane %v1924_v48, 2  ;;  %v2888_v20 = vsel %vm2293_vm1, %v2887_v55, %v1918_v35  ;;  %v2899_v21 = vrot.slane %v1925_v4, 1  ;;  %v1222_v24 = vrot.slane %v518_v51, 1 }
 0x153   : > { %v1223_v25 = vrot.slane %v519_v54, 1  ;;  %v2890_v26 = vsel %vm2296_vm2, %v2889_v60, %v2888_v20  ;;  %v1224_v29 = vrot.slane %v520_v6, 1  ;;  %v1225_v30 = vrot.slane %v521_v1, 1 }
 0x154   : > { %v1226_v31 = vrot.slane %v522_v10, 1  ;;  %v2892_v32 = vsel %vm2299_vm3, %v2891_v56, %v2890_v26  ;;  %v1227_v33 = vrot.slane %v523_v61, 1  ;;  %v1228_v34 = vrot.slane %v524_v8, 1 }
 0x155   : > { %v1229_v46 = vrot.slane %v525_v15, 1  ;;  %v2894_v47 = vsel %vm2302_vm4, %v2893_v57, %v2892_v32  ;;  %v1926_v35 = vmax.f32 %v518_v51, %v1222_v24  ;;  %v1927_v49 = vmax.f32 %v519_v54, %v1223_v25 }
 0x156   : > { %v1928_v50 = vmax.f32 %v520_v6, %v1224_v29  ;;  %v2896_v0 = vsel %vm2305_vm5, %v2895_v13, %v2894_v47  ;;  %v1929_v48 = vmax.f32 %v521_v1, %v1225_v30  ;;  %v1930_v7 = vmax.f32 %v522_v10, %v1226_v31 }
 0x157   : > { %v1931_v4 = vmax.f32 %v523_v61, %v1227_v33  ;;  %v2898_v55 = vsel %vm2308_vm6, %v2897_v14, %v2896_v0  ;;  %v1932_v60 = vmax.f32 %v524_v8, %v1228_v34  ;;  %v1933_v56 = vmax.f32 %v525_v15, %v1229_v46  ;;  %v3144_v8 = vpop.f32.mrf.mxu0  ;;  %v3438_v14 = vpop.f32.mrf.mxu1 }
 0x158   : > { %v2901_v20 = vrot.slane %v1927_v49, 7  ;;  %v2900_v57 = vsel %vm2311_vm7, %v2899_v21, %v2898_v55  ;;  %v2903_v51 = vrot.slane %v1928_v50, 6  ;;  %v2905_v54 = vrot.slane %v1929_v48, 5 }
 0x159   : > { %v2907_v6 = vrot.slane %v1930_v7, 4  ;;  %4006 = vmatprep.mubr.msk.f32.mxu0 %vm2915_vm8, %v2900_v57  ;;  %4084 = vmatprep.mubr.msk.f32.mxu1 %vm2915_vm8, %v2900_v57  ;;  %v2909_v1 = vrot.slane %v1931_v4, 3  ;;  %v2911_v10 = vrot.slane %v1932_v60, 2  ;;  %v2913_v61 = vrot.slane %v1933_v56, 1 }
 0x15a   : > { %v2902_v13 = vsel %vm2293_vm1, %v2901_v20, %v1926_v35  ;;  %v3588_v21 = vmax.f32 %v4786_v38, %v4788_v39  ;;  %vm3631_vm9 = vcmask 179200   ;;  %v3587_v24 = vmax.f32 %v4796_v58, %v4798_v59 }
 0x15b   : > { %v2904_v15 = vsel %vm2296_vm2, %v2903_v51, %v2902_v13  ;;  %v3590_v26 = vmax.f32 %v4811_v18, %v4813_v19  ;;  %v3589_v29 = vmax.f32 %v4823_v42, %v4825_v43  ;;  %v3592_v30 = vmax.f32 %v4837_v2, %v4839_v3 }
 0x15c   : > { %v2906_v25 = vsel %vm2299_vm3, %v2905_v54, %v2904_v15  ;;  %3633 = vst.msk [vmem:[%s4988_s21 + $0x8] sm:$0xff] %vm3631_vm9, %v3588_v21  ;;  %3632 = vst.msk [vmem:[%s4988_s21] sm:$0xff] %vm3631_vm9, %v3587_v24  ;;  %v3591_v38 = vmax.f32 %v4850_v27, %v4852_v28  ;;  %v3594_v39 = vmax.f32 %v4862_v52, %v4864_v53 }
 0x15d   : > { %v2908_v31 = vsel %vm2302_vm4, %v2907_v6, %v2906_v25  ;;  %v3593_v58 = vmax.f32 %v4876_v16, %v4878_v17  ;;  %3635 = vst.msk [vmem:[%s4988_s21 + $0x18] sm:$0xff] %vm3631_vm9, %v3590_v26  ;;  %3634 = vst.msk [vmem:[%s4988_s21 + $0x10] sm:$0xff] %vm3631_vm9, %v3589_v29  ;;  %v3596_v18 = vmax.f32 %v4888_v44, %v4890_v45 }
 0x15e   : > { %v2910_v59 = vsel %vm2305_vm5, %v2909_v1, %v2908_v31  ;;  %3637 = vst.msk [vmem:[%s4988_s21 + $0x28] sm:$0xff] %vm3631_vm9, %v3592_v30  ;;  %v3595_v19 = vmax.f32 %v4903_v12, %v4905_v9  ;;  %v3598_v42 = vmax.f32 %v4913_v36, %v4915_v37  ;;  %v3969_v43 = vpop.f32.mrf.mxu0  ;;  %v4047_v2 = vpop.f32.mrf.mxu1  ;;  %3636 = vst.msk [vmem:[%s4988_s21 + $0x20] sm:$0xff] %vm3631_vm9, %v3591_v38 }
 0x15f   : > { %v2912_v3 = vsel %vm2308_vm6, %v2911_v10, %v2910_v59  ;;  %3639 = vst.msk [vmem:[%s4988_s21 + $0x38] sm:$0xff] %vm3631_vm9, %v3594_v39  ;;  %3638 = vst.msk [vmem:[%s4988_s21 + $0x30] sm:$0xff] %vm3631_vm9, %v3593_v58  ;;  %v3597_v27 = vmax.f32 %v4928_v5, %v4930_v11  ;;  %v3600_v28 = vmax.f32 %v4943_v40, %v4945_v41 }
 0x160   : > { %v3599_v52 = vmax.f32 %v4961_v22, %v4963_v23  ;;  %v2914_v53 = vsel %vm2311_vm7, %v2913_v61, %v2912_v3  ;;  %3641 = vst.msk [vmem:[%s4988_s21 + $0x48] sm:$0xff] %vm3631_vm9, %v3596_v18  ;;  %3640 = vst.msk [vmem:[%s4988_s21 + $0x40] sm:$0xff] %vm3631_vm9, %v3595_v19  ;;  %v3602_v16 = vmax.f32 %v4974_v62, %v4976_v63  ;;  %v3154_v45 = vpop.f32.mrf.mxu0  ;;  %v3448_v12 = vpop.f32.mrf.mxu1 }
 0x161   : > { %3643 = vst.msk [vmem:[%s4988_s21 + $0x58] sm:$0xff] %vm3631_vm9, %v3598_v42  ;;  %v3601_v17 = vmax.f32 %v3144_v8, %v3438_v14  ;;  %v3604_v44 = vmax.f32 %v3969_v43, %v4047_v2  ;;  %4007 = vmatmul.mubr.msk.f32.gmra.mxu0 %vm2915_vm8, %v2914_v53  ;;  %4085 = vmatmul.mubr.msk.f32.gmra.mxu1 %vm2915_vm8, %v2914_v53  ;;  %3642 = vst.msk [vmem:[%s4988_s21 + $0x50] sm:$0xff] %vm3631_vm9, %v3597_v27 }
 0x162   : > { %3645 = vst.msk [vmem:[%s4988_s21 + $0x68] sm:$0xff] %vm3631_vm9, %v3600_v28  ;;  %3644 = vst.msk [vmem:[%s4988_s21 + $0x60] sm:$0xff] %vm3631_vm9, %v3599_v52  ;;  %v3603_v9 = vmax.f32 %v3154_v45, %v3448_v12 }
 0x163   : > { %3647 = vst.msk [vmem:[%s4988_s21 + $0x78] sm:$0xff] %vm3631_vm9, %v3602_v16  ;;  %3646 = vst.msk [vmem:[%s4988_s21 + $0x70] sm:$0xff] %vm3631_vm9, %v3601_v17 }
 0x164   : > { %3649 = vst.msk [vmem:[%s4988_s21 + $0x88] sm:$0xff] %vm3631_vm9, %v3604_v44  ;;  %3648 = vst.msk [vmem:[%s4988_s21 + $0x80] sm:$0xff] %vm3631_vm9, %v3603_v9 }
 0x16d   : > { %v3972_v36 = vpop.f32.mrf.mxu0  ;;  %v4050_v37 = vpop.f32.mrf.mxu1 }
 0x16e   : > { %v3606_v5 = vmax.f32 %v3972_v36, %v4050_v37 }
 0x16f   : > { %v3164_v11 = vpop.f32.mrf.mxu0  ;;  %v3458_v40 = vpop.f32.mrf.mxu1 }
 0x170   : > { %3651 = vst.msk [vmem:[%s4988_s21 + $0x98] sm:$0xff] %vm3631_vm9, %v3606_v5  ;;  %v3605_v41 = vmax.f32 %v3164_v11, %v3458_v40 }
 0x172   : > { %3650 = vst.msk [vmem:[%s4988_s21 + $0x90] sm:$0xff] %vm3631_vm9, %v3605_v41 }
 0x17c   : > { %v3975_v22 = vpop.f32.mrf.mxu0  ;;  %v4053_v23 = vpop.f32.mrf.mxu1 }
 0x17d   : > { %v3608_v32 = vmax.f32 %v3975_v22, %v4053_v23 }
 0x17e   : > { %v3174_v33 = vpop.f32.mrf.mxu0  ;;  %v3468_v34 = vpop.f32.mrf.mxu1 }
 0x17f   : > { %3653 = vst.msk [vmem:[%s4988_s21 + $0xa8] sm:$0xff] %vm3631_vm9, %v3608_v32  ;;  %v3607_v46 = vmax.f32 %v3174_v33, %v3468_v34 }
 0x181   : > { %3652 = vst.msk [vmem:[%s4988_s21 + $0xa0] sm:$0xff] %vm3631_vm9, %v3607_v46 }
 0x18b   : > { %v3978_v47 = vpop.f32.mrf.mxu0  ;;  %v4056_v35 = vpop.f32.mrf.mxu1 }
 0x18c   : > { %v3610_v49 = vmax.f32 %v3978_v47, %v4056_v35 }
 0x18d   : > { %v3184_v50 = vpop.f32.mrf.mxu0  ;;  %v3478_v62 = vpop.f32.mrf.mxu1 }
 0x18e   : > { %3655 = vst.msk [vmem:[%s4988_s21 + $0xb8] sm:$0xff] %vm3631_vm9, %v3610_v49  ;;  %v3609_v63 = vmax.f32 %v3184_v50, %v3478_v62 }
 0x190   : > { %3654 = vst.msk [vmem:[%s4988_s21 + $0xb0] sm:$0xff] %vm3631_vm9, %v3609_v63 }
 0x19a   : > { %v3981_v0 = vpop.f32.mrf.mxu0  ;;  %v4059_v48 = vpop.f32.mrf.mxu1 }
 0x19b   : > { %v3612_v7 = vmax.f32 %v3981_v0, %v4059_v48 }
 0x19c   : > { %v3194_v4 = vpop.f32.mrf.mxu0  ;;  %v3488_v55 = vpop.f32.mrf.mxu1 }
 0x19d   : > { %3657 = vst.msk [vmem:[%s4988_s21 + $0xc8] sm:$0xff] %vm3631_vm9, %v3612_v7  ;;  %v3611_v60 = vmax.f32 %v3194_v4, %v3488_v55 }
 0x19f   : > { %3656 = vst.msk [vmem:[%s4988_s21 + $0xc0] sm:$0xff] %vm3631_vm9, %v3611_v60 }
 0x1a9   : > { %v3984_v56 = vpop.f32.mrf.mxu0  ;;  %v4062_v20 = vpop.f32.mrf.mxu1 }
 0x1aa   : > { %v3614_v57 = vmax.f32 %v3984_v56, %v4062_v20 }
 0x1ab   : > { %v3204_v51 = vpop.f32.mrf.mxu0  ;;  %v3498_v54 = vpop.f32.mrf.mxu1 }
 0x1ac   : > { %3659 = vst.msk [vmem:[%s4988_s21 + $0xd8] sm:$0xff] %vm3631_vm9, %v3614_v57  ;;  %v3613_v6 = vmax.f32 %v3204_v51, %v3498_v54 }
 0x1ae   : > { %3658 = vst.msk [vmem:[%s4988_s21 + $0xd0] sm:$0xff] %vm3631_vm9, %v3613_v6 }
 0x1b8   : > { %v3987_v13 = vpop.f32.mrf.mxu0  ;;  %v4065_v1 = vpop.f32.mrf.mxu1 }
 0x1b9   : > { %v3616_v10 = vmax.f32 %v3987_v13, %v4065_v1 }
 0x1ba   : > { %v3214_v61 = vpop.f32.mrf.mxu0  ;;  %v3508_v8 = vpop.f32.mrf.mxu1 }
 0x1bb   : > { %3661 = vst.msk [vmem:[%s4988_s21 + $0xe8] sm:$0xff] %vm3631_vm9, %v3616_v10  ;;  %v3615_v14 = vmax.f32 %v3214_v61, %v3508_v8 }
 0x1bd   : > { %3660 = vst.msk [vmem:[%s4988_s21 + $0xe0] sm:$0xff] %vm3631_vm9, %v3615_v14 }
 0x1c7   : > { %v3990_v15 = vpop.f32.mrf.mxu0  ;;  %v4068_v21 = vpop.f32.mrf.mxu1 }
 0x1c8   : > { %v3618_v24 = vmax.f32 %v3990_v15, %v4068_v21 }
 0x1c9   : > { %v3224_v25 = vpop.f32.mrf.mxu0  ;;  %v3518_v26 = vpop.f32.mrf.mxu1 }
 0x1ca   : > { %3663 = vst.msk [vmem:[%s4988_s21 + $0xf8] sm:$0xff] %vm3631_vm9, %v3618_v24  ;;  %v3617_v29 = vmax.f32 %v3224_v25, %v3518_v26 }
 0x1cc   : > { %3662 = vst.msk [vmem:[%s4988_s21 + $0xf0] sm:$0xff] %vm3631_vm9, %v3617_v29 }
 0x1d6   : > { %v3993_v30 = vpop.f32.mrf.mxu0  ;;  %v4071_v31 = vpop.f32.mrf.mxu1 }
 0x1d7   : > { %v3620_v38 = vmax.f32 %v3993_v30, %v4071_v31 }
 0x1d8   : > { %v3234_v39 = vpop.f32.mrf.mxu0  ;;  %v3528_v58 = vpop.f32.mrf.mxu1 }
 0x1d9   : > { %3665 = vst.msk [vmem:[%s4988_s21 + $0x108] sm:$0xff] %vm3631_vm9, %v3620_v38  ;;  %v3619_v59 = vmax.f32 %v3234_v39, %v3528_v58 }
 0x1db   : > { %3664 = vst.msk [vmem:[%s4988_s21 + $0x100] sm:$0xff] %vm3631_vm9, %v3619_v59 }
 0x1e5   : > { %v3996_v18 = vpop.f32.mrf.mxu0  ;;  %v4074_v19 = vpop.f32.mrf.mxu1 }
 0x1e6   : > { %v3622_v42 = vmax.f32 %v3996_v18, %v4074_v19 }
 0x1e7   : > { %v3244_v43 = vpop.f32.mrf.mxu0  ;;  %v3538_v2 = vpop.f32.mrf.mxu1 }
 0x1e8   : > { %3667 = vst.msk [vmem:[%s4988_s21 + $0x118] sm:$0xff] %vm3631_vm9, %v3622_v42  ;;  %v3621_v3 = vmax.f32 %v3244_v43, %v3538_v2 }
 0x1ea   : > { %3666 = vst.msk [vmem:[%s4988_s21 + $0x110] sm:$0xff] %vm3631_vm9, %v3621_v3 }
 0x1f4   : > { %v3999_v27 = vpop.f32.mrf.mxu0  ;;  %v4077_v28 = vpop.f32.mrf.mxu1 }
 0x1f5   : > { %v3624_v52 = vmax.f32 %v3999_v27, %v4077_v28 }
 0x1f6   : > { %v3254_v53 = vpop.f32.mrf.mxu0  ;;  %v3548_v16 = vpop.f32.mrf.mxu1 }
 0x1f7   : > { %3669 = vst.msk [vmem:[%s4988_s21 + $0x128] sm:$0xff] %vm3631_vm9, %v3624_v52  ;;  %v3623_v17 = vmax.f32 %v3254_v53, %v3548_v16 }
 0x1f9   : > { %3668 = vst.msk [vmem:[%s4988_s21 + $0x120] sm:$0xff] %vm3631_vm9, %v3623_v17 }
 0x203   : > { %v4002_v44 = vpop.f32.mrf.mxu0  ;;  %v4080_v45 = vpop.f32.mrf.mxu1 }
 0x204   : > { %v3626_v12 = vmax.f32 %v4002_v44, %v4080_v45 }
 0x205   : > { %v3264_v9 = vpop.f32.mrf.mxu0  ;;  %v3558_v36 = vpop.f32.mrf.mxu1 }
 0x206   : > { %3671 = vst.msk [vmem:[%s4988_s21 + $0x138] sm:$0xff] %vm3631_vm9, %v3626_v12  ;;  %v3625_v37 = vmax.f32 %v3264_v9, %v3558_v36 }
 0x208   : > { %3670 = vst.msk [vmem:[%s4988_s21 + $0x130] sm:$0xff] %vm3631_vm9, %v3625_v37 }
 0x212   : > { %v4005_v5 = vpop.f32.mrf.mxu0  ;;  %v4083_v11 = vpop.f32.mrf.mxu1 }
 0x213   : > { %v3628_v40 = vmax.f32 %v4005_v5, %v4083_v11 }
 0x214   : > { %v3274_v41 = vpop.f32.mrf.mxu0  ;;  %v3568_v22 = vpop.f32.mrf.mxu1 }
 0x215   : > { %3673 = vst.msk [vmem:[%s4988_s21 + $0x148] sm:$0xff] %vm3631_vm9, %v3628_v40  ;;  %v3627_v23 = vmax.f32 %v3274_v41, %v3568_v22 }
 0x217   : > { %3672 = vst.msk [vmem:[%s4988_s21 + $0x140] sm:$0xff] %vm3631_vm9, %v3627_v23 }
 0x221   : > { %v4008_v32 = vpop.f32.mrf.mxu0  ;;  %v4086_v33 = vpop.f32.mrf.mxu1 }
 0x222   : > { %v3630_v34 = vmax.f32 %v4008_v32, %v4086_v33 }
 0x223   : > { %v3284_v46 = vpop.f32.mrf.mxu0  ;;  %v3578_v47 = vpop.f32.mrf.mxu1 }
 0x224   : > { %3675 = vst.msk [vmem:[%s4988_s21 + $0x158] sm:$0xff] %vm3631_vm9, %v3630_v34  ;;  %v3629_v35 = vmax.f32 %v3284_v46, %v3578_v47 }
 0x226   : > { %3674 = vst.msk [vmem:[%s4988_s21 + $0x150] sm:$0xff] %vm3631_vm9, %v3629_v35 }
 0x227 PF: > { %s13_s12 = sadd.s32 1, %s4101_s12  }
 0x228   : > { %p10_p5 = scmp.ge.s32.totalorder %s13_s12, 4  }
 0x22a   :  { %12 = sbr.rel (!%p10_p5) target bundleno = 1 (0x1), region = 62 }

// kernel: food101_forward.9
= control target key start
LH: loop header
LB: loop body
LE: loop exit
PB: predicated region body
PF: predicated region fallthrough
CT: control target
= control target key end

     0   :  { %vm7475_vm0 = vmmov 0   ;;  %vm4150_vm1 = vcmask 523264   ;;  %vm5467_vm2 = vcmask 1043456   ;;  %vm5568_vm3 = vcmask 1041408   ;;  %s9163_s1 = inlined_call_operand.vmem [shape: bf16[7744,120], index: 1, kind: input, shape index: {}]   ;;  %s9164_s0 = inlined_call_operand.vmem [shape: bf16[8,7744], index: 0, kind: input, shape index: {}]   ;;  %s9165_s2 = inlined_call_operand.vmem [shape: f32[1,120], index: 2, kind: input, shape index: {}]   ;;  %s9166_s3 = inlined_call_operand.vmem [shape: bf16[120,84], index: 3, kind: input, shape index: {}]   ;;  %s9167_s5 = inlined_call_operand.vmem [shape: bf16[84,101], index: 5, kind: input, shape index: {}]   ;;  %s9168_s4 = inlined_call_operand.vmem [shape: f32[1,84], index: 4, kind: input, shape index: {}]   ;;  %s9169_s6 = inlined_call_operand.vmem [shape: f32[1,101], index: 6, kind: input, shape index: {}]   ;;  %s9170_s7 = inlined_call_operand.vmem [shape: f32[8,101], index: 7, kind: output, shape index: {}]  }
   0x1   :  { %v6915_v0 = vld [vmem:[%s9163_s1 + $0x78] sm:$0xff]   ;;  %v6919_v4 = vld [vmem:[%s9163_s1 + $0x70] sm:$0xff]   ;;  %v6923_v8 = vld [vmem:[%s9163_s1 + $0x68] sm:$0xff]   ;;  %vm5463_vm4 = vcmask 982016   ;;  %vm5564_vm5 = vcmask 687104   ;;  %vm5613_vm6 = vcmask 826368  }
   0x2   :  { %v6916_v1 = vld [vmem:[%s9163_s1 + $0x38] sm:$0xff]   ;;  %6184 = vmatprep.subr.bf16.mxu0 %v6915_v0  ;;  %v6920_v5 = vld [vmem:[%s9163_s1 + $0x30] sm:$0xff]   ;;  %v6924_v9 = vld [vmem:[%s9163_s1 + $0x28] sm:$0xff]  }
   0x3   :  { %v6917_v2 = vld [vmem:[%s9163_s1 + $0xf8] sm:$0xff]   ;;  %6185 = vmatpush3.bf16.msra.mxu0 %v6916_v1  ;;  %v6921_v6 = vld [vmem:[%s9163_s1 + $0xf0] sm:$0xff]   ;;  %v6925_v10 = vld [vmem:[%s9163_s1 + $0xe8] sm:$0xff]  }
   0x4   :  { %v6918_v3 = vld [vmem:[%s9163_s1 + $0xb8] sm:$0xff]   ;;  %6206 = vmatprep.subr.bf16.mxu1 %v6917_v2  ;;  %6186 = vmatprep.subr.bf16.mxu0 %v6919_v4  ;;  %v6922_v7 = vld [vmem:[%s9163_s1 + $0xb0] sm:$0xff]   ;;  %v6926_v11 = vld [vmem:[%s9163_s1 + $0xa8] sm:$0xff]  }
   0x5   :  { %6207 = vmatpush3.bf16.msra.mxu1 %v6918_v3  ;;  %v6927_v12 = vld [vmem:[%s9163_s1 + $0x60] sm:$0xff]   ;;  %v6931_v16 = vld [vmem:[%s9163_s1 + $0x58] sm:$0xff]   ;;  %v6935_v20 = vld [vmem:[%s9163_s1 + $0x50] sm:$0xff]  }
   0x6   :  { %6208 = vmatprep.subr.bf16.mxu1 %v6921_v6  ;;  %v6928_v13 = vld [vmem:[%s9163_s1 + $0x20] sm:$0xff]   ;;  %v6932_v17 = vld [vmem:[%s9163_s1 + $0x18] sm:$0xff]   ;;  %v6936_v21 = vld [vmem:[%s9163_s1 + $0x10] sm:$0xff]  }
   0x7   :  { %6187 = vmatpush3.bf16.msra.mxu0 %v6920_v5  ;;  %v6929_v14 = vld [vmem:[%s9163_s1 + $0xe0] sm:$0xff]   ;;  %v6933_v18 = vld [vmem:[%s9163_s1 + $0xd8] sm:$0xff]   ;;  %v6937_v22 = vld [vmem:[%s9163_s1 + $0xd0] sm:$0xff]  }
   0x8   :  { %6188 = vmatprep.subr.bf16.mxu0 %v6923_v8  ;;  %v6930_v15 = vld [vmem:[%s9163_s1 + $0xa0] sm:$0xff]   ;;  %v6934_v19 = vld [vmem:[%s9163_s1 + $0x98] sm:$0xff]   ;;  %v6938_v23 = vld [vmem:[%s9163_s1 + $0x90] sm:$0xff]  }
   0x9   :  { %6209 = vmatpush3.bf16.msra.mxu1 %v6922_v7  ;;  %v6939_v24 = vld [vmem:[%s9163_s1 + $0x48] sm:$0xff]   ;;  %v6943_v28 = vld [vmem:[%s9163_s1 + $0x40] sm:$0xff]   ;;  %v6949_v35 = vld [vmem:[%s9163_s1 + $0x178] sm:$0xff]  }
   0xa   :  { %6210 = vmatprep.subr.bf16.mxu1 %v6925_v10  ;;  %v6940_v25 = vld [vmem:[%s9163_s1 + $0x8] sm:$0xff]   ;;  %v6944_v29 = vld [vmem:[%s9163_s1] sm:$0xff]   ;;  %v6952_v39 = vld [vmem:[%s9163_s1 + $0x138] sm:$0xff]  }
   0xb   :  { %6189 = vmatpush3.bf16.msra.mxu0 %v6924_v9  ;;  %v6941_v26 = vld [vmem:[%s9163_s1 + $0xc8] sm:$0xff]   ;;  %v6945_v30 = vld [vmem:[%s9163_s1 + $0xc0] sm:$0xff]   ;;  %v6953_v40 = vld [vmem:[%s9163_s1 + $0x1f8] sm:$0xff]  }
   0xc   :  { %6190 = vmatprep.subr.bf16.mxu0 %v6927_v12  ;;  %v6942_v27 = vld [vmem:[%s9163_s1 + $0x88] sm:$0xff]   ;;  %v27_v31 = vld [vmem:[%s9164_s0] sm:$0xff]  ;;  %v6954_v41 = vld [vmem:[%s9163_s1 + $0x1b8] sm:$0xff]  }
   0xd   :  { %6211 = vmatpush3.bf16.msra.mxu1 %v6926_v11  ;;  %v5620_v32 = vcombine.low %v27_v31, %v27_v31  ;;  %v5621_v33 = vcombine.high %v27_v31, %v27_v31  ;;  %v6948_v34 = vld [vmem:[%s9163_s1 + $0x80] sm:$0xff]   ;;  %v28_v36 = vld [vmem:[%s9164_s0 + $0x8] sm:$0xff]  ;;  %v6955_v42 = vld [vmem:[%s9163_s1 + $0x170] sm:$0xff]  }
   0xe   :  { %6212 = vmatprep.subr.bf16.mxu1 %v6929_v14  ;;  %v5622_v37 = vcombine.low %v28_v36, %v28_v36  ;;  %v5623_v38 = vcombine.high %v28_v36, %v28_v36  ;;  %v6956_v43 = vld [vmem:[%s9163_s1 + $0x130] sm:$0xff]   ;;  %v6959_v46 = vld [vmem:[%s9163_s1 + $0x168] sm:$0xff]   ;;  %v6963_v50 = vld [vmem:[%s9163_s1 + $0x160] sm:$0xff]  }
   0xf   :  { %6191 = vmatpush3.bf16.msra.mxu0 %v6928_v13  ;;  %4186 = vmatprep.mubr.bf16.mxu0 %v5621_v33  ;;  %v6957_v44 = vld [vmem:[%s9163_s1 + $0x1f0] sm:$0xff]   ;;  %v6960_v47 = vld [vmem:[%s9163_s1 + $0x128] sm:$0xff]   ;;  %v6964_v51 = vld [vmem:[%s9163_s1 + $0x120] sm:$0xff]  }
  0x10   :  { %6192 = vmatprep.subr.bf16.mxu0 %v6931_v16  ;;  %4226 = vmatprep.mubr.bf16.mxu1 %v5623_v38  ;;  %v6958_v45 = vld [vmem:[%s9163_s1 + $0x1b0] sm:$0xff]   ;;  %v6961_v48 = vld [vmem:[%s9163_s1 + $0x1e8] sm:$0xff]   ;;  %v6965_v52 = vld [vmem:[%s9163_s1 + $0x1e0] sm:$0xff]  }
  0x11   :  { %6213 = vmatpush3.bf16.msra.mxu1 %v6930_v15  ;;  %v6962_v49 = vld [vmem:[%s9163_s1 + $0x1a8] sm:$0xff]   ;;  %v6966_v53 = vld [vmem:[%s9163_s1 + $0x1a0] sm:$0xff]   ;;  %v6967_v54 = vld [vmem:[%s9163_s1 + $0x158] sm:$0xff]  }
  0x12   :  { %6214 = vmatprep.subr.bf16.mxu1 %v6933_v18  ;;  %v6968_v55 = vld [vmem:[%s9163_s1 + $0x118] sm:$0xff]   ;;  %v6971_v58 = vld [vmem:[%s9163_s1 + $0x150] sm:$0xff]   ;;  %v6975_v62 = vld [vmem:[%s9163_s1 + $0x148] sm:$0xff]  }
  0x13   :  { %6193 = vmatpush3.bf16.msra.mxu0 %v6932_v17  ;;  %v6969_v56 = vld [vmem:[%s9163_s1 + $0x1d8] sm:$0xff]   ;;  %v6972_v59 = vld [vmem:[%s9163_s1 + $0x110] sm:$0xff]   ;;  %v6976_v63 = vld [vmem:[%s9163_s1 + $0x108] sm:$0xff]  }
  0x14   :  { %6194 = vmatprep.subr.bf16.mxu0 %v6935_v20  ;;  %v6970_v57 = vld [vmem:[%s9163_s1 + $0x198] sm:$0xff]   ;;  %v6973_v60 = vld [vmem:[%s9163_s1 + $0x1d0] sm:$0xff]   ;;  %v6977_v0 = vld [vmem:[%s9163_s1 + $0x1c8] sm:$0xff]  }
  0x15   :  { %6215 = vmatpush3.bf16.msra.mxu1 %v6934_v19  ;;  %v6974_v61 = vld [vmem:[%s9163_s1 + $0x190] sm:$0xff]   ;;  %v6978_v1 = vld [vmem:[%s9163_s1 + $0x188] sm:$0xff]   ;;  %v6979_v2 = vld [vmem:[%s9163_s1 + $0x140] sm:$0xff]  }
  0x16   :  { %6216 = vmatprep.subr.bf16.mxu1 %v6937_v22  ;;  %v6980_v3 = vld [vmem:[%s9163_s1 + $0x100] sm:$0xff]   ;;  %v29_v5 = vld [vmem:[%s9164_s0 + $0x10] sm:$0xff]  ;;  %v6985_v9 = vld [vmem:[%s9163_s1 + $0x278] sm:$0xff]  }
  0x17   :  { %6195 = vmatpush3.bf16.msra.mxu0 %v6936_v21  ;;  %v6981_v4 = vld [vmem:[%s9163_s1 + $0x1c0] sm:$0xff]   ;;  %v5624_v6 = vcombine.low %v29_v5, %v29_v5  ;;  %v5625_v7 = vcombine.high %v29_v5, %v29_v5  ;;  %v30_v10 = vld [vmem:[%s9164_s0 + $0x18] sm:$0xff]  ;;  %v6991_v16 = vld [vmem:[%s9163_s1 + $0x270] sm:$0xff]  }
  0x18   :  { %6196 = vmatprep.subr.bf16.mxu0 %v6939_v24  ;;  %v6984_v8 = vld [vmem:[%s9163_s1 + $0x180] sm:$0xff]   ;;  %v5626_v11 = vcombine.low %v30_v10, %v30_v10  ;;  %v5627_v12 = vcombine.high %v30_v10, %v30_v10  ;;  %v6988_v13 = vld [vmem:[%s9163_s1 + $0x238] sm:$0xff]   ;;  %v6992_v17 = vld [vmem:[%s9163_s1 + $0x230] sm:$0xff]  }
  0x19   :  { %6217 = vmatpush3.bf16.msra.mxu1 %v6938_v23  ;;  %v6989_v14 = vld [vmem:[%s9163_s1 + $0x2f8] sm:$0xff]   ;;  %v6993_v18 = vld [vmem:[%s9163_s1 + $0x2f0] sm:$0xff]   ;;  %v6995_v20 = vld [vmem:[%s9163_s1 + $0x268] sm:$0xff]  }
  0x1a   :  { %6218 = vmatprep.subr.bf16.mxu1 %v6941_v26  ;;  %v6990_v15 = vld [vmem:[%s9163_s1 + $0x2b8] sm:$0xff]   ;;  %v6994_v19 = vld [vmem:[%s9163_s1 + $0x2b0] sm:$0xff]   ;;  %v6996_v21 = vld [vmem:[%s9163_s1 + $0x228] sm:$0xff]  }
  0x1b   :  { %6197 = vmatpush3.bf16.msra.mxu0 %v6940_v25  ;;  %v6997_v22 = vld [vmem:[%s9163_s1 + $0x2e8] sm:$0xff]   ;;  %v6999_v24 = vld [vmem:[%s9163_s1 + $0x260] sm:$0xff]   ;;  %v7006_v31 = vld [vmem:[%s9163_s1 + $0x298] sm:$0xff]  }
  0x1c   :  { %6198 = vmatprep.subr.bf16.mxu0 %v6943_v28  ;;  %v6998_v23 = vld [vmem:[%s9163_s1 + $0x2a8] sm:$0xff]   ;;  %v7000_v25 = vld [vmem:[%s9163_s1 + $0x220] sm:$0xff]   ;;  %v7003_v28 = vld [vmem:[%s9163_s1 + $0x258] sm:$0xff]  }
  0x1d   :  { %6219 = vmatpush3.bf16.msra.mxu1 %v6942_v27  ;;  %v7001_v26 = vld [vmem:[%s9163_s1 + $0x2e0] sm:$0xff]   ;;  %v7008_v33 = vld [vmem:[%s9163_s1 + $0x210] sm:$0xff]   ;;  %v7011_v36 = vld [vmem:[%s9163_s1 + $0x248] sm:$0xff]  }
  0x1e   :  { %6220 = vmatprep.subr.bf16.mxu1 %v6945_v30  ;;  %v7002_v27 = vld [vmem:[%s9163_s1 + $0x2a0] sm:$0xff]   ;;  %v7005_v30 = vld [vmem:[%s9163_s1 + $0x2d8] sm:$0xff]   ;;  %v7013_v38 = vld [vmem:[%s9163_s1 + $0x2c8] sm:$0xff]  }
  0x1f   :  { %6199 = vmatpush3.bf16.msra.mxu0 %v6944_v29  ;;  %v7004_v29 = vld [vmem:[%s9163_s1 + $0x218] sm:$0xff]   ;;  %v7047_v10 = vld [vmem:[%s9163_s1 + $0x348] sm:$0xff]  }
  0x20   :  { %6228 = vmatprep.subr.bf16.mxu0 %v6949_v35  ;;  %v7010_v35 = vld [vmem:[%s9163_s1 + $0x290] sm:$0xff]   ;;  %v7042_v5 = vld [vmem:[%s9163_s1 + $0x398] sm:$0xff]  }
  0x21   :  { %6221 = vmatpush3.bf16.msra.mxu1 %v6948_v34  ;;  %v7009_v34 = vld [vmem:[%s9163_s1 + $0x2d0] sm:$0xff]  }
  0x22   :  { %4187 = vmatmul.mubr.bf16.vlgmr.msra.gmra.mxu0 %v5620_v32  ;;  %6250 = vmatprep.subr.bf16.mxu1 %v6953_v40  ;;  %v7007_v32 = vld [vmem:[%s9163_s1 + $0x250] sm:$0xff]   ;;  %v7015_v40 = vld [vmem:[%s9163_s1 + $0x240] sm:$0xff]  }
  0x23   :  { %6229 = vmatpush3.bf16.msra.mxu0 %v6952_v39  ;;  %4266 = vmatprep.mubr.bf16.mxu0 %v5625_v7  ;;  %v7014_v39 = vld [vmem:[%s9163_s1 + $0x288] sm:$0xff]   ;;  %v7044_v7 = vld [vmem:[%s9163_s1 + $0x310] sm:$0xff]  }
  0x24   :  { %4227 = vmatmul.mubr.bf16.vlgmr.msra.gmra.mxu1 %v5622_v37  ;;  %6230 = vmatprep.subr.bf16.mxu0 %v6955_v42  ;;  %v7012_v37 = vld [vmem:[%s9163_s1 + $0x208] sm:$0xff]   ;;  %v7017_v42 = vld [vmem:[%s9163_s1 + $0x2c0] sm:$0xff]  }
  0x25   :  { %6251 = vmatpush3.bf16.msra.mxu1 %v6954_v41  ;;  %4306 = vmatprep.mubr.bf16.mxu1 %v5627_v12  ;;  %v7016_v41 = vld [vmem:[%s9163_s1 + $0x200] sm:$0xff]   ;;  %v7049_v12 = vld [vmem:[%s9163_s1 + $0x3c8] sm:$0xff]  }
  0x26   :  { %6252 = vmatprep.subr.bf16.mxu1 %v6957_v44 }
  0x27   :  { %6231 = vmatpush3.bf16.msra.mxu0 %v6956_v43  ;;  %v31_v43 = vld [vmem:[%s9164_s0 + $0x20] sm:$0xff] }
  0x28   :  { %6232 = vmatprep.subr.bf16.mxu0 %v6959_v46  ;;  %v5628_v44 = vcombine.low %v31_v43, %v31_v43  ;;  %v7020_v46 = vld [vmem:[%s9163_s1 + $0x280] sm:$0xff]  }
  0x29   :  { %6253 = vmatpush3.bf16.msra.mxu1 %v6958_v45  ;;  %v5629_v45 = vcombine.high %v31_v43, %v31_v43  ;;  %v7078_v43 = vld [vmem:[%s9163_s1 + $0x498] sm:$0xff]  }
  0x2a   :  { %6254 = vmatprep.subr.bf16.mxu1 %v6961_v48  ;;  %v32_v48 = vld [vmem:[%s9164_s0 + $0x28] sm:$0xff] }
  0x2b   :  { %6233 = vmatpush3.bf16.msra.mxu0 %v6960_v47  ;;  %v7021_v47 = vld [vmem:[%s9163_s1 + $0x378] sm:$0xff]  }
  0x2c   :  { %6234 = vmatprep.subr.bf16.mxu0 %v6963_v50  ;;  %v5631_v50 = vcombine.high %v32_v48, %v32_v48 }
  0x2d   :  { %6255 = vmatpush3.bf16.msra.mxu1 %v6962_v49  ;;  %v5630_v49 = vcombine.low %v32_v48, %v32_v48  ;;  %v7083_v48 = vld [vmem:[%s9163_s1 + $0x448] sm:$0xff]  }
  0x2e   :  { %6256 = vmatprep.subr.bf16.mxu1 %v6965_v52  ;;  %v7025_v52 = vld [vmem:[%s9163_s1 + $0x3f8] sm:$0xff]  }
  0x2f   :  { %6235 = vmatpush3.bf16.msra.mxu0 %v6964_v51  ;;  %v7024_v51 = vld [vmem:[%s9163_s1 + $0x338] sm:$0xff]  }
  0x30   :  { %6236 = vmatprep.subr.bf16.mxu0 %v6967_v54  ;;  %v7027_v54 = vld [vmem:[%s9163_s1 + $0x370] sm:$0xff]  }
  0x31   :  { %6257 = vmatpush3.bf16.msra.mxu1 %v6966_v53  ;;  %v7026_v53 = vld [vmem:[%s9163_s1 + $0x3b8] sm:$0xff]  }
  0x32   :  { %6258 = vmatprep.subr.bf16.mxu1 %v6969_v56  ;;  %v7029_v56 = vld [vmem:[%s9163_s1 + $0x3f0] sm:$0xff]  }
  0x33   :  { %6237 = vmatpush3.bf16.msra.mxu0 %v6968_v55  ;;  %v7028_v55 = vld [vmem:[%s9163_s1 + $0x330] sm:$0xff]  }
  0x34   :  { %6238 = vmatprep.subr.bf16.mxu0 %v6971_v58  ;;  %v7031_v58 = vld [vmem:[%s9163_s1 + $0x368] sm:$0xff]  }
  0x35   :  { %6259 = vmatpush3.bf16.msra.mxu1 %v6970_v57  ;;  %v7030_v57 = vld [vmem:[%s9163_s1 + $0x3b0] sm:$0xff]  }
  0x36   :  { %6260 = vmatprep.subr.bf16.mxu1 %v6973_v60  ;;  %v7033_v60 = vld [vmem:[%s9163_s1 + $0x3e8] sm:$0xff]  }
  0x37   :  { %6239 = vmatpush3.bf16.msra.mxu0 %v6972_v59  ;;  %v7032_v59 = vld [vmem:[%s9163_s1 + $0x328] sm:$0xff]  }
  0x38   :  { %6240 = vmatprep.subr.bf16.mxu0 %v6975_v62  ;;  %v7035_v62 = vld [vmem:[%s9163_s1 + $0x360] sm:$0xff]  }
  0x39   :  { %6261 = vmatpush3.bf16.msra.mxu1 %v6974_v61  ;;  %v7034_v61 = vld [vmem:[%s9163_s1 + $0x3a8] sm:$0xff]  }
  0x3a   :  { %6262 = vmatprep.subr.bf16.mxu1 %v6977_v0  ;;  %v7037_v0 = vld [vmem:[%s9163_s1 + $0x3e0] sm:$0xff]  }
  0x3b   :  { %6241 = vmatpush3.bf16.msra.mxu0 %v6976_v63  ;;  %v7036_v63 = vld [vmem:[%s9163_s1 + $0x320] sm:$0xff]  }
  0x3c   :  { %6242 = vmatprep.subr.bf16.mxu0 %v6979_v2  ;;  %v7039_v2 = vld [vmem:[%s9163_s1 + $0x358] sm:$0xff]  }
  0x3d   :  { %6263 = vmatpush3.bf16.msra.mxu1 %v6978_v1  ;;  %v7038_v1 = vld [vmem:[%s9163_s1 + $0x3a0] sm:$0xff]  }
  0x3e   :  { %6264 = vmatprep.subr.bf16.mxu1 %v6981_v4  ;;  %v7041_v4 = vld [vmem:[%s9163_s1 + $0x3d8] sm:$0xff]  }
  0x3f   :  { %6243 = vmatpush3.bf16.msra.mxu0 %v6980_v3  ;;  %v7040_v3 = vld [vmem:[%s9163_s1 + $0x318] sm:$0xff]  }
  0x40   :  { %6272 = vmatprep.subr.bf16.mxu0 %v6985_v9  ;;  %v7046_v9 = vld [vmem:[%s9163_s1 + $0x390] sm:$0xff]  }
  0x41   :  { %6265 = vmatpush3.bf16.msra.mxu1 %v6984_v8  ;;  %v7045_v8 = vld [vmem:[%s9163_s1 + $0x3d0] sm:$0xff]  }
  0x42   :  { %4267 = vmatmul.mubr.bf16.vlgmr.msra.gmra.mxu0 %v5624_v6  ;;  %6294 = vmatprep.subr.bf16.mxu1 %v6989_v14  ;;  %v7043_v6 = vld [vmem:[%s9163_s1 + $0x350] sm:$0xff]   ;;  %v7051_v14 = vld [vmem:[%s9163_s1 + $0x340] sm:$0xff]  }
  0x43   :  { %6273 = vmatpush3.bf16.msra.mxu0 %v6988_v13  ;;  %4346 = vmatprep.mubr.bf16.mxu0 %v5629_v45  ;;  %v7050_v13 = vld [vmem:[%s9163_s1 + $0x388] sm:$0xff]   ;;  %v7080_v45 = vld [vmem:[%s9163_s1 + $0x410] sm:$0xff]  }
  0x44   :  { %4307 = vmatmul.mubr.bf16.vlgmr.msra.gmra.mxu1 %v5626_v11  ;;  %6274 = vmatprep.subr.bf16.mxu0 %v6991_v16  ;;  %v7048_v11 = vld [vmem:[%s9163_s1 + $0x308] sm:$0xff]   ;;  %v7053_v16 = vld [vmem:[%s9163_s1 + $0x3c0] sm:$0xff]  }
  0x45   :  { %6295 = vmatpush3.bf16.msra.mxu1 %v6990_v15  ;;  %4386 = vmatprep.mubr.bf16.mxu1 %v5631_v50  ;;  %v7052_v15 = vld [vmem:[%s9163_s1 + $0x300] sm:$0xff]   ;;  %v7085_v50 = vld [vmem:[%s9163_s1 + $0x4c8] sm:$0xff]  }
  0x46   :  { %6296 = vmatprep.subr.bf16.mxu1 %v6993_v18 }
  0x47   :  { %6275 = vmatpush3.bf16.msra.mxu0 %v6992_v17  ;;  %v33_v17 = vld [vmem:[%s9164_s0 + $0x30] sm:$0xff] }
  0x48   :  { %6276 = vmatprep.subr.bf16.mxu0 %v6995_v20  ;;  %v5632_v18 = vcombine.low %v33_v17, %v33_v17  ;;  %v7056_v20 = vld [vmem:[%s9163_s1 + $0x380] sm:$0xff]  }
  0x49   :  { %6297 = vmatpush3.bf16.msra.mxu1 %v6994_v19  ;;  %v5633_v19 = vcombine.high %v33_v17, %v33_v17  ;;  %v7114_v17 = vld [vmem:[%s9163_s1 + $0x598] sm:$0xff]  }
  0x4a   :  { %6298 = vmatprep.subr.bf16.mxu1 %v6997_v22  ;;  %v34_v22 = vld [vmem:[%s9164_s0 + $0x38] sm:$0xff] }
  0x4b   :  { %6277 = vmatpush3.bf16.msra.mxu0 %v6996_v21  ;;  %v7057_v21 = vld [vmem:[%s9163_s1 + $0x478] sm:$0xff]  }
  0x4c   :  { %6278 = vmatprep.subr.bf16.mxu0 %v6999_v24  ;;  %v5635_v24 = vcombine.high %v34_v22, %v34_v22 }
  0x4d   :  { %6299 = vmatpush3.bf16.msra.mxu1 %v6998_v23  ;;  %v5634_v23 = vcombine.low %v34_v22, %v34_v22  ;;  %v7119_v22 = vld [vmem:[%s9163_s1 + $0x548] sm:$0xff]  }
  0x4e   :  { %6300 = vmatprep.subr.bf16.mxu1 %v7001_v26  ;;  %v7061_v26 = vld [vmem:[%s9163_s1 + $0x4f8] sm:$0xff]  }
  0x4f   :  { %6279 = vmatpush3.bf16.msra.mxu0 %v7000_v25  ;;  %v7060_v25 = vld [vmem:[%s9163_s1 + $0x438] sm:$0xff]  }
  0x50   :  { %6280 = vmatprep.subr.bf16.mxu0 %v7003_v28  ;;  %v7063_v28 = vld [vmem:[%s9163_s1 + $0x470] sm:$0xff]  }
  0x51   :  { %6301 = vmatpush3.bf16.msra.mxu1 %v7002_v27  ;;  %v7062_v27 = vld [vmem:[%s9163_s1 + $0x4b8] sm:$0xff]  }
  0x52   :  { %6302 = vmatprep.subr.bf16.mxu1 %v7005_v30  ;;  %v7065_v30 = vld [vmem:[%s9163_s1 + $0x4f0] sm:$0xff]  }
  0x53   :  { %6281 = vmatpush3.bf16.msra.mxu0 %v7004_v29  ;;  %v7064_v29 = vld [vmem:[%s9163_s1 + $0x430] sm:$0xff]  }
  0x54   :  { %6282 = vmatprep.subr.bf16.mxu0 %v7007_v32  ;;  %v7067_v32 = vld [vmem:[%s9163_s1 + $0x468] sm:$0xff]  }
  0x55   :  { %6303 = vmatpush3.bf16.msra.mxu1 %v7006_v31  ;;  %v7066_v31 = vld [vmem:[%s9163_s1 + $0x4b0] sm:$0xff]  }
  0x56   :  { %6304 = vmatprep.subr.bf16.mxu1 %v7009_v34  ;;  %v7069_v34 = vld [vmem:[%s9163_s1 + $0x4e8] sm:$0xff]  }
  0x57   :  { %6283 = vmatpush3.bf16.msra.mxu0 %v7008_v33  ;;  %v7068_v33 = vld [vmem:[%s9163_s1 + $0x428] sm:$0xff]  }
  0x58   :  { %6284 = vmatprep.subr.bf16.mxu0 %v7011_v36  ;;  %v7071_v36 = vld [vmem:[%s9163_s1 + $0x460] sm:$0xff]  }
  0x59   :  { %6305 = vmatpush3.bf16.msra.mxu1 %v7010_v35  ;;  %v7070_v35 = vld [vmem:[%s9163_s1 + $0x4a8] sm:$0xff]  }
  0x5a   :  { %6306 = vmatprep.subr.bf16.mxu1 %v7013_v38  ;;  %v7073_v38 = vld [vmem:[%s9163_s1 + $0x4e0] sm:$0xff]  }
  0x5b   :  { %6285 = vmatpush3.bf16.msra.mxu0 %v7012_v37  ;;  %v7072_v37 = vld [vmem:[%s9163_s1 + $0x420] sm:$0xff]  }
  0x5c   :  { %6286 = vmatprep.subr.bf16.mxu0 %v7015_v40  ;;  %v7075_v40 = vld [vmem:[%s9163_s1 + $0x458] sm:$0xff]  }
  0x5d   :  { %6307 = vmatpush3.bf16.msra.mxu1 %v7014_v39  ;;  %v7074_v39 = vld [vmem:[%s9163_s1 + $0x4a0] sm:$0xff]  }
  0x5e   :  { %6308 = vmatprep.subr.bf16.mxu1 %v7017_v42  ;;  %v7077_v42 = vld [vmem:[%s9163_s1 + $0x4d8] sm:$0xff]  }
  0x5f   :  { %6287 = vmatpush3.bf16.msra.mxu0 %v7016_v41  ;;  %v7076_v41 = vld [vmem:[%s9163_s1 + $0x418] sm:$0xff]  }
  0x60   :  { %6316 = vmatprep.subr.bf16.mxu0 %v7021_v47  ;;  %v7082_v47 = vld [vmem:[%s9163_s1 + $0x490] sm:$0xff]  }
  0x61   :  { %6309 = vmatpush3.bf16.msra.mxu1 %v7020_v46  ;;  %v7081_v46 = vld [vmem:[%s9163_s1 + $0x4d0] sm:$0xff]  }
  0x62   :  { %4347 = vmatmul.mubr.bf16.vlgmr.msra.gmra.mxu0 %v5628_v44  ;;  %6338 = vmatprep.subr.bf16.mxu1 %v7025_v52  ;;  %v7079_v44 = vld [vmem:[%s9163_s1 + $0x450] sm:$0xff]   ;;  %v7087_v52 = vld [vmem:[%s9163_s1 + $0x440] sm:$0xff]  }
  0x63   :  { %6317 = vmatpush3.bf16.msra.mxu0 %v7024_v51  ;;  %4426 = vmatprep.mubr.bf16.mxu0 %v5633_v19  ;;  %v7086_v51 = vld [vmem:[%s9163_s1 + $0x488] sm:$0xff]   ;;  %v7116_v19 = vld [vmem:[%s9163_s1 + $0x510] sm:$0xff]  }
  0x64   :  { %4387 = vmatmul.mubr.bf16.vlgmr.msra.gmra.mxu1 %v5630_v49  ;;  %6318 = vmatprep.subr.bf16.mxu0 %v7027_v54  ;;  %v7084_v49 = vld [vmem:[%s9163_s1 + $0x408] sm:$0xff]   ;;  %v7089_v54 = vld [vmem:[%s9163_s1 + $0x4c0] sm:$0xff]  }
  0x65   :  { %6339 = vmatpush3.bf16.msra.mxu1 %v7026_v53  ;;  %4466 = vmatprep.mubr.bf16.mxu1 %v5635_v24  ;;  %v7088_v53 = vld [vmem:[%s9163_s1 + $0x400] sm:$0xff]   ;;  %v7121_v24 = vld [vmem:[%s9163_s1 + $0x5c8] sm:$0xff]  }
  0x66   :  { %6340 = vmatprep.subr.bf16.mxu1 %v7029_v56 }
  0x67   :  { %6319 = vmatpush3.bf16.msra.mxu0 %v7028_v55  ;;  %v35_v55 = vld [vmem:[%s9164_s0 + $0x40] sm:$0xff] }
  0x68   :  { %6320 = vmatprep.subr.bf16.mxu0 %v7031_v58  ;;  %v5636_v56 = vcombine.low %v35_v55, %v35_v55  ;;  %v7092_v58 = vld [vmem:[%s9163_s1 + $0x480] sm:$0xff]  }
  0x69   :  { %6341 = vmatpush3.bf16.msra.mxu1 %v7030_v57  ;;  %v5637_v57 = vcombine.high %v35_v55, %v35_v55  ;;  %v7150_v55 = vld [vmem:[%s9163_s1 + $0x698] sm:$0xff]  }
  0x6a   :  { %6342 = vmatprep.subr.bf16.mxu1 %v7033_v60  ;;  %v36_v60 = vld [vmem:[%s9164_s0 + $0x48] sm:$0xff] }
  0x6b   :  { %6321 = vmatpush3.bf16.msra.mxu0 %v7032_v59  ;;  %v7093_v59 = vld [vmem:[%s9163_s1 + $0x578] sm:$0xff]  }
  0x6c   :  { %6322 = vmatprep.subr.bf16.mxu0 %v7035_v62  ;;  %v5639_v62 = vcombine.high %v36_v60, %v36_v60 }
  0x6d   :  { %6343 = vmatpush3.bf16.msra.mxu1 %v7034_v61  ;;  %v5638_v61 = vcombine.low %v36_v60, %v36_v60  ;;  %v7155_v60 = vld [vmem:[%s9163_s1 + $0x648] sm:$0xff]  }
  0x6e   :  { %6344 = vmatprep.subr.bf16.mxu1 %v7037_v0  ;;  %v7097_v0 = vld [vmem:[%s9163_s1 + $0x5f8] sm:$0xff]  }
  0x6f   :  { %6323 = vmatpush3.bf16.msra.mxu0 %v7036_v63  ;;  %v7096_v63 = vld [vmem:[%s9163_s1 + $0x538] sm:$0xff]  }
  0x70   :  { %6324 = vmatprep.subr.bf16.mxu0 %v7039_v2  ;;  %v7099_v2 = vld [vmem:[%s9163_s1 + $0x570] sm:$0xff]  }
  0x71   :  { %6345 = vmatpush3.bf16.msra.mxu1 %v7038_v1  ;;  %v7098_v1 = vld [vmem:[%s9163_s1 + $0x5b8] sm:$0xff]  }
  0x72   :  { %6346 = vmatprep.subr.bf16.mxu1 %v7041_v4  ;;  %v7101_v4 = vld [vmem:[%s9163_s1 + $0x5f0] sm:$0xff]  }
  0x73   :  { %6325 = vmatpush3.bf16.msra.mxu0 %v7040_v3  ;;  %v7100_v3 = vld [vmem:[%s9163_s1 + $0x530] sm:$0xff]  }
  0x74   :  { %6326 = vmatprep.subr.bf16.mxu0 %v7043_v6  ;;  %v7103_v6 = vld [vmem:[%s9163_s1 + $0x568] sm:$0xff]  }
  0x75   :  { %6347 = vmatpush3.bf16.msra.mxu1 %v7042_v5  ;;  %v7102_v5 = vld [vmem:[%s9163_s1 + $0x5b0] sm:$0xff]  }
  0x76   :  { %6348 = vmatprep.subr.bf16.mxu1 %v7045_v8  ;;  %v7105_v8 = vld [vmem:[%s9163_s1 + $0x5e8] sm:$0xff]  }
  0x77   :  { %6327 = vmatpush3.bf16.msra.mxu0 %v7044_v7  ;;  %v7104_v7 = vld [vmem:[%s9163_s1 + $0x528] sm:$0xff]  }
  0x78   :  { %6328 = vmatprep.subr.bf16.mxu0 %v7047_v10  ;;  %v7107_v10 = vld [vmem:[%s9163_s1 + $0x560] sm:$0xff]  }
  0x79   :  { %6349 = vmatpush3.bf16.msra.mxu1 %v7046_v9  ;;  %v7106_v9 = vld [vmem:[%s9163_s1 + $0x5a8] sm:$0xff]  }
  0x7a   :  { %6350 = vmatprep.subr.bf16.mxu1 %v7049_v12  ;;  %v7109_v12 = vld [vmem:[%s9163_s1 + $0x5e0] sm:$0xff]  }
  0x7b   :  { %6329 = vmatpush3.bf16.msra.mxu0 %v7048_v11  ;;  %v7108_v11 = vld [vmem:[%s9163_s1 + $0x520] sm:$0xff]  }
  0x7c   :  { %6330 = vmatprep.subr.bf16.mxu0 %v7051_v14  ;;  %v7111_v14 = vld [vmem:[%s9163_s1 + $0x558] sm:$0xff]  }
  0x7d   :  { %6351 = vmatpush3.bf16.msra.mxu1 %v7050_v13  ;;  %v7110_v13 = vld [vmem:[%s9163_s1 + $0x5a0] sm:$0xff]  }
  0x7e   :  { %6352 = vmatprep.subr.bf16.mxu1 %v7053_v16  ;;  %v7113_v16 = vld [vmem:[%s9163_s1 + $0x5d8] sm:$0xff]  }
  0x7f   :  { %6331 = vmatpush3.bf16.msra.mxu0 %v7052_v15  ;;  %v7112_v15 = vld [vmem:[%s9163_s1 + $0x518] sm:$0xff]  }
  0x80   :  { %6360 = vmatprep.subr.bf16.mxu0 %v7057_v21  ;;  %v7118_v21 = vld [vmem:[%s9163_s1 + $0x590] sm:$0xff]  }
  0x81   :  { %6353 = vmatpush3.bf16.msra.mxu1 %v7056_v20  ;;  %v7117_v20 = vld [vmem:[%s9163_s1 + $0x5d0] sm:$0xff]  }
  0x82   :  { %4427 = vmatmul.mubr.bf16.vlgmr.msra.gmra.mxu0 %v5632_v18  ;;  %6382 = vmatprep.subr.bf16.mxu1 %v7061_v26  ;;  %v7115_v18 = vld [vmem:[%s9163_s1 + $0x550] sm:$0xff]   ;;  %v7123_v26 = vld [vmem:[%s9163_s1 + $0x540] sm:$0xff]  }
  0x83   :  { %6361 = vmatpush3.bf16.msra.mxu0 %v7060_v25  ;;  %4506 = vmatprep.mubr.bf16.mxu0 %v5637_v57  ;;  %v7122_v25 = vld [vmem:[%s9163_s1 + $0x588] sm:$0xff]   ;;  %v7152_v57 = vld [vmem:[%s9163_s1 + $0x610] sm:$0xff]  }
  0x84   :  { %4467 = vmatmul.mubr.bf16.vlgmr.msra.gmra.mxu1 %v5634_v23  ;;  %6362 = vmatprep.subr.bf16.mxu0 %v7063_v28  ;;  %v7120_v23 = vld [vmem:[%s9163_s1 + $0x508] sm:$0xff]   ;;  %v7125_v28 = vld [vmem:[%s9163_s1 + $0x5c0] sm:$0xff]  }
  0x85   :  { %6383 = vmatpush3.bf16.msra.mxu1 %v7062_v27  ;;  %4546 = vmatprep.mubr.bf16.mxu1 %v5639_v62  ;;  %v7124_v27 = vld [vmem:[%s9163_s1 + $0x500] sm:$0xff]   ;;  %v7157_v62 = vld [vmem:[%s9163_s1 + $0x6c8] sm:$0xff]  }
  0x86   :  { %6384 = vmatprep.subr.bf16.mxu1 %v7065_v30 }
  0x87   :  { %6363 = vmatpush3.bf16.msra.mxu0 %v7064_v29  ;;  %v37_v29 = vld [vmem:[%s9164_s0 + $0x50] sm:$0xff] }
  0x88   :  { %6364 = vmatprep.subr.bf16.mxu0 %v7067_v32  ;;  %v5640_v30 = vcombine.low %v37_v29, %v37_v29  ;;  %v7128_v32 = vld [vmem:[%s9163_s1 + $0x580] sm:$0xff]  }
  0x89   :  { %6385 = vmatpush3.bf16.msra.mxu1 %v7066_v31  ;;  %v5641_v31 = vcombine.high %v37_v29, %v37_v29 }
  0x8a   :  { %6386 = vmatprep.subr.bf16.mxu1 %v7069_v34  ;;  %v38_v34 = vld [vmem:[%s9164_s0 + $0x58] sm:$0xff] }
  0x8b   :  { %6365 = vmatpush3.bf16.msra.mxu0 %v7068_v33  ;;  %v7129_v33 = vld [vmem:[%s9163_s1 + $0x678] sm:$0xff]  }
  0x8c   :  { %6366 = vmatprep.subr.bf16.mxu0 %v7071_v36  ;;  %v5643_v36 = vcombine.high %v38_v34, %v38_v34 }
  0x8d   :  { %6387 = vmatpush3.bf16.msra.mxu1 %v7070_v35  ;;  %v5642_v35 = vcombine.low %v38_v34, %v38_v34  ;;  %v7178_v34 = vld [vmem:[%s9163_s1 + $0x7a8] sm:$0xff]  }
  0x8e   :  { %6388 = vmatprep.subr.bf16.mxu1 %v7073_v38  ;;  %v7133_v38 = vld [vmem:[%s9163_s1 + $0x6f8] sm:$0xff]  }
  0x8f   :  { %6367 = vmatpush3.bf16.msra.mxu0 %v7072_v37  ;;  %v7132_v37 = vld [vmem:[%s9163_s1 + $0x638] sm:$0xff]  }
  0x90   :  { %6368 = vmatprep.subr.bf16.mxu0 %v7075_v40  ;;  %v7135_v40 = vld [vmem:[%s9163_s1 + $0x670] sm:$0xff]  }
  0x91   :  { %6389 = vmatpush3.bf16.msra.mxu1 %v7074_v39  ;;  %v7134_v39 = vld [vmem:[%s9163_s1 + $0x6b8] sm:$0xff]  }
  0x92   :  { %6390 = vmatprep.subr.bf16.mxu1 %v7077_v42  ;;  %v7137_v42 = vld [vmem:[%s9163_s1 + $0x6f0] sm:$0xff]  }
  0x93   :  { %6369 = vmatpush3.bf16.msra.mxu0 %v7076_v41  ;;  %v7136_v41 = vld [vmem:[%s9163_s1 + $0x630] sm:$0xff]  }
  0x94   :  { %6370 = vmatprep.subr.bf16.mxu0 %v7079_v44  ;;  %v7139_v44 = vld [vmem:[%s9163_s1 + $0x668] sm:$0xff]  }
  0x95   :  { %6391 = vmatpush3.bf16.msra.mxu1 %v7078_v43  ;;  %v7138_v43 = vld [vmem:[%s9163_s1 + $0x6b0] sm:$0xff]  }
  0x96   :  { %6392 = vmatprep.subr.bf16.mxu1 %v7081_v46  ;;  %v7141_v46 = vld [vmem:[%s9163_s1 + $0x6e8] sm:$0xff]  }
  0x97   :  { %6371 = vmatpush3.bf16.msra.mxu0 %v7080_v45  ;;  %v7140_v45 = vld [vmem:[%s9163_s1 + $0x628] sm:$0xff]  }
  0x98   :  { %6372 = vmatprep.subr.bf16.mxu0 %v7083_v48  ;;  %v7143_v48 = vld [vmem:[%s9163_s1 + $0x660] sm:$0xff]  }
  0x99   :  { %6393 = vmatpush3.bf16.msra.mxu1 %v7082_v47  ;;  %v7142_v47 = vld [vmem:[%s9163_s1 + $0x6a8] sm:$0xff]  }
  0x9a   :  { %6394 = vmatprep.subr.bf16.mxu1 %v7085_v50  ;;  %v7145_v50 = vld [vmem:[%s9163_s1 + $0x6e0] sm:$0xff]  }
  0x9b   :  { %6373 = vmatpush3.bf16.msra.mxu0 %v7084_v49  ;;  %v7144_v49 = vld [vmem:[%s9163_s1 + $0x620] sm:$0xff]  }
  0x9c   :  { %6374 = vmatprep.subr.bf16.mxu0 %v7087_v52  ;;  %v7147_v52 = vld [vmem:[%s9163_s1 + $0x658] sm:$0xff]  }
  0x9d   :  { %6395 = vmatpush3.bf16.msra.mxu1 %v7086_v51  ;;  %v7146_v51 = vld [vmem:[%s9163_s1 + $0x6a0] sm:$0xff]  }
  0x9e   :  { %6396 = vmatprep.subr.bf16.mxu1 %v7089_v54  ;;  %v7149_v54 = vld [vmem:[%s9163_s1 + $0x6d8] sm:$0xff]  }
  0x9f   :  { %6375 = vmatpush3.bf16.msra.mxu0 %v7088_v53  ;;  %v7148_v53 = vld [vmem:[%s9163_s1 + $0x618] sm:$0xff]  }
  0xa0   :  { %6404 = vmatprep.subr.bf16.mxu0 %v7093_v59  ;;  %v7154_v59 = vld [vmem:[%s9163_s1 + $0x690] sm:$0xff]  }
  0xa1   :  { %6397 = vmatpush3.bf16.msra.mxu1 %v7092_v58  ;;  %v7153_v58 = vld [vmem:[%s9163_s1 + $0x6d0] sm:$0xff]  }
  0xa2   :  { %4507 = vmatmul.mubr.bf16.vlgmr.msra.gmra.mxu0 %v5636_v56  ;;  %6426 = vmatprep.subr.bf16.mxu1 %v7097_v0  ;;  %v7151_v56 = vld [vmem:[%s9163_s1 + $0x650] sm:$0xff]   ;;  %v7159_v0 = vld [vmem:[%s9163_s1 + $0x640] sm:$0xff]  }
  0xa3   :  { %6405 = vmatpush3.bf16.msra.mxu0 %v7096_v63  ;;  %4586 = vmatprep.mubr.bf16.mxu0 %v5641_v31  ;;  %v7158_v63 = vld [vmem:[%s9163_s1 + $0x688] sm:$0xff]  }
  0xa4   :  { %4547 = vmatmul.mubr.bf16.vlgmr.msra.gmra.mxu1 %v5638_v61  ;;  %6406 = vmatprep.subr.bf16.mxu0 %v7099_v2  ;;  %v7156_v61 = vld [vmem:[%s9163_s1 + $0x608] sm:$0xff]   ;;  %v7161_v2 = vld [vmem:[%s9163_s1 + $0x6c0] sm:$0xff]  }
  0xa5   :  { %6427 = vmatpush3.bf16.msra.mxu1 %v7098_v1  ;;  %4626 = vmatprep.mubr.bf16.mxu1 %v5643_v36  ;;  %v7160_v1 = vld [vmem:[%s9163_s1 + $0x600] sm:$0xff]   ;;  %v7175_v31 = vld [vmem:[%s9163_s1 + $0x768] sm:$0xff]  }
  0xa6   :  { %6428 = vmatprep.subr.bf16.mxu1 %v7101_v4  ;;  %v7180_v36 = vld [vmem:[%s9163_s1 + $0x720] sm:$0xff]  }
  0xa7   :  { %6407 = vmatpush3.bf16.msra.mxu0 %v7100_v3  ;;  %v39_v3 = vld [vmem:[%s9164_s0 + $0x60] sm:$0xff] }
  0xa8   :  { %6408 = vmatprep.subr.bf16.mxu0 %v7103_v6  ;;  %v5645_v6 = vcombine.high %v39_v3, %v39_v3 }
  0xa9   :  { %6429 = vmatpush3.bf16.msra.mxu1 %v7102_v5  ;;  %v5644_v5 = vcombine.low %v39_v3, %v39_v3 }
  0xaa   :  { %6430 = vmatprep.subr.bf16.mxu1 %v7105_v8  ;;  %v7165_v8 = vld [vmem:[%s9163_s1 + $0x778] sm:$0xff]  }
  0xab   :  { %6409 = vmatpush3.bf16.msra.mxu0 %v7104_v7  ;;  %v7164_v7 = vld [vmem:[%s9163_s1 + $0x680] sm:$0xff]  }
  0xac   :  { %6410 = vmatprep.subr.bf16.mxu0 %v7107_v10 }
  0xad   :  { %6431 = vmatpush3.bf16.msra.mxu1 %v7106_v9  ;;  %v40_v9 = vld [vmem:[%s9164_s0 + $0x68] sm:$0xff] }
  0xae   :  { %6432 = vmatprep.subr.bf16.mxu1 %v7109_v12  ;;  %v5646_v12 = vcombine.low %v40_v9, %v40_v9 }
  0xaf   :  { %6411 = vmatpush3.bf16.msra.mxu0 %v7108_v11 }
  0xb0   :  { %6412 = vmatprep.subr.bf16.mxu0 %v7111_v14  ;;  %v7168_v14 = vld [vmem:[%s9163_s1 + $0x738] sm:$0xff]  }
  0xb1   :  { %6433 = vmatpush3.bf16.msra.mxu1 %v7110_v13  ;;  %v5647_v13 = vcombine.high %v40_v9, %v40_v9 }
  0xb2   :  { %6434 = vmatprep.subr.bf16.mxu1 %v7113_v16 }
  0xb3   :  { %6413 = vmatpush3.bf16.msra.mxu0 %v7112_v15  ;;  %v5619_v15 = vld [vmem:[%s9165_s2] ss:$0 sm:$0xff] }
  0xb4   :  { %6414 = vmatprep.subr.bf16.mxu0 %v7115_v18 }
  0xb5   :  { %6435 = vmatpush3.bf16.msra.mxu1 %v7114_v17  ;;  %v7169_v17 = vld [vmem:[%s9163_s1 + $0x7f8] sm:$0xff]  }
  0xb6   :  { %6436 = vmatprep.subr.bf16.mxu1 %v7117_v20 }
  0xb7   :  { %6415 = vmatpush3.bf16.msra.mxu0 %v7116_v19 }
  0xb8   :  { %6416 = vmatprep.subr.bf16.mxu0 %v7119_v22 }
  0xb9   :  { %6437 = vmatpush3.bf16.msra.mxu1 %v7118_v21  ;;  %v7170_v21 = vld [vmem:[%s9163_s1 + $0x7b8] sm:$0xff]  }
  0xba   :  { %6438 = vmatprep.subr.bf16.mxu1 %v7121_v24 }
  0xbb   :  { %6417 = vmatpush3.bf16.msra.mxu0 %v7120_v23  ;;  %v7171_v23 = vld [vmem:[%s9163_s1 + $0x770] sm:$0xff]  }
  0xbc   :  { %6418 = vmatprep.subr.bf16.mxu0 %v7123_v26 }
  0xbd   :  { %6439 = vmatpush3.bf16.msra.mxu1 %v7122_v25 }
  0xbe   :  { %6440 = vmatprep.subr.bf16.mxu1 %v7125_v28  ;;  %v7173_v28 = vld [vmem:[%s9163_s1 + $0x7f0] sm:$0xff]  }
  0xbf   :  { %6419 = vmatpush3.bf16.msra.mxu0 %v7124_v27  ;;  %v7172_v27 = vld [vmem:[%s9163_s1 + $0x730] sm:$0xff]  }
  0xc0   :  { %6448 = vmatprep.subr.bf16.mxu0 %v7129_v33  ;;  %v7177_v33 = vld [vmem:[%s9163_s1 + $0x7e8] sm:$0xff]  }
  0xc1   :  { %6441 = vmatpush3.bf16.msra.mxu1 %v7128_v32  ;;  %v7176_v32 = vld [vmem:[%s9163_s1 + $0x728] sm:$0xff]  }
  0xc2   :  { %4587 = vmatmul.mubr.bf16.vlgmr.msra.gmra.mxu0 %v5640_v30  ;;  %6470 = vmatprep.subr.bf16.mxu1 %v7133_v38  ;;  %v7174_v30 = vld [vmem:[%s9163_s1 + $0x7b0] sm:$0xff]   ;;  %v7182_v38 = vld [vmem:[%s9163_s1 + $0x7a0] sm:$0xff]  }
  0xc3   :  { %6449 = vmatpush3.bf16.msra.mxu0 %v7132_v37  ;;  %4666 = vmatprep.mubr.bf16.mxu0 %v5645_v6  ;;  %v7181_v37 = vld [vmem:[%s9163_s1 + $0x7e0] sm:$0xff]  }
  0xc4   :  { %4627 = vmatmul.mubr.bf16.vlgmr.msra.gmra.mxu1 %v5642_v35  ;;  %6450 = vmatprep.subr.bf16.mxu0 %v7135_v40  ;;  %v7179_v35 = vld [vmem:[%s9163_s1 + $0x760] sm:$0xff]   ;;  %v7184_v40 = vld [vmem:[%s9163_s1 + $0x718] sm:$0xff]  }
  0xc5   :  { %6471 = vmatpush3.bf16.msra.mxu1 %v7134_v39  ;;  %4706 = vmatprep.mubr.bf16.mxu1 %v5647_v13  ;;  %v7183_v39 = vld [vmem:[%s9163_s1 + $0x758] sm:$0xff]   ;;  %v7208_v13 = vld [vmem:[%s9163_s1 + $0x830] sm:$0xff]  }
  0xc6   :  { %6472 = vmatprep.subr.bf16.mxu1 %v7137_v42  ;;  %v7186_v42 = vld [vmem:[%s9163_s1 + $0x798] sm:$0xff]  }
  0xc7   :  { %6451 = vmatpush3.bf16.msra.mxu0 %v7136_v41  ;;  %v7185_v41 = vld [vmem:[%s9163_s1 + $0x7d8] sm:$0xff]  }
  0xc8   :  { %6452 = vmatprep.subr.bf16.mxu0 %v7139_v44  ;;  %v7188_v44 = vld [vmem:[%s9163_s1 + $0x710] sm:$0xff]  }
  0xc9   :  { %6473 = vmatpush3.bf16.msra.mxu1 %v7138_v43  ;;  %v7187_v43 = vld [vmem:[%s9163_s1 + $0x750] sm:$0xff]  }
  0xca   :  { %6474 = vmatprep.subr.bf16.mxu1 %v7141_v46  ;;  %v7190_v46 = vld [vmem:[%s9163_s1 + $0x790] sm:$0xff]  }
  0xcb   :  { %6453 = vmatpush3.bf16.msra.mxu0 %v7140_v45  ;;  %v7189_v45 = vld [vmem:[%s9163_s1 + $0x7d0] sm:$0xff]  }
  0xcc   :  { %6454 = vmatprep.subr.bf16.mxu0 %v7143_v48  ;;  %v7192_v48 = vld [vmem:[%s9163_s1 + $0x708] sm:$0xff]  }
  0xcd   :  { %6475 = vmatpush3.bf16.msra.mxu1 %v7142_v47  ;;  %v7191_v47 = vld [vmem:[%s9163_s1 + $0x748] sm:$0xff]  }
  0xce   :  { %6476 = vmatprep.subr.bf16.mxu1 %v7145_v50  ;;  %v7194_v50 = vld [vmem:[%s9163_s1 + $0x788] sm:$0xff]  }
  0xcf   :  { %6455 = vmatpush3.bf16.msra.mxu0 %v7144_v49  ;;  %v7193_v49 = vld [vmem:[%s9163_s1 + $0x7c8] sm:$0xff]  }
  0xd0   :  { %6456 = vmatprep.subr.bf16.mxu0 %v7147_v52  ;;  %v7196_v52 = vld [vmem:[%s9163_s1 + $0x700] sm:$0xff]  }
  0xd1   :  { %6477 = vmatpush3.bf16.msra.mxu1 %v7146_v51  ;;  %v7195_v51 = vld [vmem:[%s9163_s1 + $0x740] sm:$0xff]  }
  0xd2   :  { %6478 = vmatprep.subr.bf16.mxu1 %v7149_v54 }
  0xd3   :  { %6457 = vmatpush3.bf16.msra.mxu0 %v7148_v53  ;;  %v7197_v53 = vld [vmem:[%s9163_s1 + $0x7c0] sm:$0xff]  }
  0xd4   :  { %6458 = vmatprep.subr.bf16.mxu0 %v7151_v56 }
  0xd5   :  { %6479 = vmatpush3.bf16.msra.mxu1 %v7150_v55  ;;  %v41_v55 = vld [vmem:[%s9164_s0 + $0x70] sm:$0xff] }
  0xd6   :  { %6480 = vmatprep.subr.bf16.mxu1 %v7153_v58  ;;  %v5648_v56 = vcombine.low %v41_v55, %v41_v55  ;;  %v7200_v58 = vld [vmem:[%s9163_s1 + $0x780] sm:$0xff]  }
  0xd7   :  { %6459 = vmatpush3.bf16.msra.mxu0 %v7152_v57  ;;  %v5649_v57 = vcombine.high %v41_v55, %v41_v55 }
  0xd8   :  { %6460 = vmatprep.subr.bf16.mxu0 %v7155_v60  ;;  %v7201_v60 = vld [vmem:[%s9163_s1 + $0x878] sm:$0xff]  }
  0xd9   :  { %6481 = vmatpush3.bf16.msra.mxu1 %v7154_v59 }
  0xda   :  { %6482 = vmatprep.subr.bf16.mxu1 %v7157_v62 }
  0xdb   :  { %6461 = vmatpush3.bf16.msra.mxu0 %v7156_v61  ;;  %v42_v61 = vld [vmem:[%s9164_s0 + $0x78] sm:$0xff] }
  0xdc   :  { %6462 = vmatprep.subr.bf16.mxu0 %v7159_v0  ;;  %v5650_v0 = vcombine.low %v42_v61, %v42_v61 }
  0xdd   :  { %6483 = vmatpush3.bf16.msra.mxu1 %v7158_v63 }
  0xde   :  { %6484 = vmatprep.subr.bf16.mxu1 %v7161_v2  ;;  %v7204_v2 = vld [vmem:[%s9163_s1 + $0x838] sm:$0xff]  }
  0xdf   :  { %6463 = vmatpush3.bf16.msra.mxu0 %v7160_v1  ;;  %v5651_v1 = vcombine.high %v42_v61, %v42_v61 }
  0xe0   :  { %6492 = vmatprep.subr.bf16.mxu0 %v7165_v8 }
  0xe1   :  { %6485 = vmatpush3.bf16.msra.mxu1 %v7164_v7  ;;  %v7206_v7 = vld [vmem:[%s9163_s1 + $0x8b8] sm:$0xff]  }
  0xe2   :  { %v6200_v4 = vpop.f32.mrf.mxu0  ;;  %4667 = vmatmul.mubr.bf16.vlgmr.msra.gmra.mxu0 %v5644_v5  ;;  %6514 = vmatprep.subr.bf16.mxu1 %v7169_v17  ;;  %v7205_v5 = vld [vmem:[%s9163_s1 + $0x8f8] sm:$0xff]   ;;  %v7211_v17 = vld [vmem:[%s9163_s1 + $0x868] sm:$0xff]  }
  0xe3   :  { %6493 = vmatpush3.bf16.msra.mxu0 %v7168_v14  ;;  %4746 = vmatprep.mubr.bf16.mxu0 %v5649_v57  ;;  %v7209_v14 = vld [vmem:[%s9163_s1 + $0x8f0] sm:$0xff]  }
  0xe4   :  { %v6201_v10 = vpop.f32.mrf.mxu0  ;;  %v6222_v11 = vpop.f32.mrf.mxu1  ;;  %4707 = vmatmul.mubr.bf16.vlgmr.msra.gmra.mxu1 %v5646_v12  ;;  %6494 = vmatprep.subr.bf16.mxu0 %v7171_v23  ;;  %v7217_v23 = vld [vmem:[%s9163_s1 + $0x8e0] sm:$0xff]  }
  0xe5   :  { %v6202_v16 = vadd.f32 %v6201_v10, %v6200_v4  ;;  %6515 = vmatpush3.bf16.msra.mxu1 %v7170_v21  ;;  %4786 = vmatprep.mubr.bf16.mxu1 %v5651_v1  ;;  %v7207_v10 = vld [vmem:[%s9163_s1 + $0x870] sm:$0xff]   ;;  %v7215_v21 = vld [vmem:[%s9163_s1 + $0x860] sm:$0xff]  }
  0xe6   :  { %v6203_v18 = vpop.f32.mrf.mxu0  ;;  %v6223_v19 = vpop.f32.mrf.mxu1  ;;  %6516 = vmatprep.subr.bf16.mxu1 %v7173_v28  ;;  %v7222_v28 = vld [vmem:[%s9163_s1 + $0x898] sm:$0xff]   ;;  %v7245_v1 = vld [vmem:[%s9163_s1 + $0x9f0] sm:$0xff]  }
  0xe7   :  { %v4189_v20 = vadd.f32 %v6202_v16, %v5619_v15  ;;  %v6224_v22 = vadd.f32 %v6223_v19, %v6222_v11  ;;  %6495 = vmatpush3.bf16.msra.mxu0 %v7172_v27  ;;  %v7210_v16 = vld [vmem:[%s9163_s1 + $0x8b0] sm:$0xff]   ;;  %v7212_v18 = vld [vmem:[%s9163_s1 + $0x828] sm:$0xff]   ;;  %v7221_v27 = vld [vmem:[%s9163_s1 + $0x8d8] sm:$0xff]  }
  0xe8   :  { %v6204_v24 = vpop.f32.mrf.mxu0  ;;  %v6225_v25 = vpop.f32.mrf.mxu1  ;;  %6496 = vmatprep.subr.bf16.mxu0 %v7175_v31  ;;  %v7213_v19 = vld [vmem:[%s9163_s1 + $0x8e8] sm:$0xff]   ;;  %v7225_v31 = vld [vmem:[%s9163_s1 + $0x8d0] sm:$0xff]  }
  0xe9   :  { %v8248_v26 = vadd.f32 %v6224_v22, %v4189_v20  ;;  %6517 = vmatpush3.bf16.msra.mxu1 %v7174_v30  ;;  %v7214_v20 = vld [vmem:[%s9163_s1 + $0x8a8] sm:$0xff]   ;;  %v7216_v22 = vld [vmem:[%s9163_s1 + $0x820] sm:$0xff]   ;;  %v7219_v25 = vld [vmem:[%s9163_s1 + $0x858] sm:$0xff]  }
  0xea   :  { %v6226_v29 = vpop.f32.mrf.mxu1  ;;  %6518 = vmatprep.subr.bf16.mxu1 %v7177_v33  ;;  %v7218_v24 = vld [vmem:[%s9163_s1 + $0x8a0] sm:$0xff]   ;;  %v7224_v30 = vld [vmem:[%s9163_s1 + $0x810] sm:$0xff]   ;;  %v7227_v33 = vld [vmem:[%s9163_s1 + $0x848] sm:$0xff]  }
  0xeb   :  { %6497 = vmatpush3.bf16.msra.mxu0 %v7176_v32  ;;  %v7223_v29 = vld [vmem:[%s9163_s1 + $0x850] sm:$0xff]  }
  0xec   :  { %6498 = vmatprep.subr.bf16.mxu0 %v7179_v35  ;;  %v7226_v32 = vld [vmem:[%s9163_s1 + $0x890] sm:$0xff]   ;;  %v7229_v35 = vld [vmem:[%s9163_s1 + $0x8c8] sm:$0xff]  }
  0xed   :  { %6519 = vmatpush3.bf16.msra.mxu1 %v7178_v34  ;;  %v7228_v34 = vld [vmem:[%s9163_s1 + $0x808] sm:$0xff]  }
  0xee   :  { %6520 = vmatprep.subr.bf16.mxu1 %v7181_v37  ;;  %v7231_v37 = vld [vmem:[%s9163_s1 + $0x840] sm:$0xff]  }
  0xef   :  { %6499 = vmatpush3.bf16.msra.mxu0 %v7180_v36  ;;  %v7230_v36 = vld [vmem:[%s9163_s1 + $0x888] sm:$0xff]  }
  0xf0   :  { %6500 = vmatprep.subr.bf16.mxu0 %v7183_v39  ;;  %v7233_v39 = vld [vmem:[%s9163_s1 + $0x8c0] sm:$0xff]  }
  0xf1   :  { %6521 = vmatpush3.bf16.msra.mxu1 %v7182_v38  ;;  %v7232_v38 = vld [vmem:[%s9163_s1 + $0x800] sm:$0xff]  }
  0xf2   :  { %6522 = vmatprep.subr.bf16.mxu1 %v7185_v41 }
  0xf3   :  { %6501 = vmatpush3.bf16.msra.mxu0 %v7184_v40  ;;  %v43_v40 = vld [vmem:[%s9164_s0 + $0x80] sm:$0xff] }
  0xf4   :  { %6502 = vmatprep.subr.bf16.mxu0 %v7187_v43  ;;  %v5653_v43 = vcombine.high %v43_v40, %v43_v40 }
  0xf5   :  { %6523 = vmatpush3.bf16.msra.mxu1 %v7186_v42  ;;  %v5652_v42 = vcombine.low %v43_v40, %v43_v40 }
  0xf6   :  { %6524 = vmatprep.subr.bf16.mxu1 %v7189_v45  ;;  %v7237_v45 = vld [vmem:[%s9163_s1 + $0x978] sm:$0xff]  }
  0xf7   :  { %6503 = vmatpush3.bf16.msra.mxu0 %v7188_v44  ;;  %v7236_v44 = vld [vmem:[%s9163_s1 + $0x880] sm:$0xff]  }
  0xf8   :  { %6504 = vmatprep.subr.bf16.mxu0 %v7191_v47 }
  0xf9   :  { %6525 = vmatpush3.bf16.msra.mxu1 %v7190_v46 }
  0xfa   :  { %6526 = vmatprep.subr.bf16.mxu1 %v7193_v49 }
  0xfb   :  { %6505 = vmatpush3.bf16.msra.mxu0 %v7192_v48  ;;  %v44_v48 = vld [vmem:[%s9164_s0 + $0x88] sm:$0xff] }
  0xfc   :  { %6506 = vmatprep.subr.bf16.mxu0 %v7195_v51  ;;  %v5655_v51 = vcombine.high %v44_v48, %v44_v48 }
  0xfd   :  { %6527 = vmatpush3.bf16.msra.mxu1 %v7194_v50  ;;  %v5654_v50 = vcombine.low %v44_v48, %v44_v48 }
  0xfe   :  { %6528 = vmatprep.subr.bf16.mxu1 %v7197_v53 }
  0xff   :  { %6507 = vmatpush3.bf16.msra.mxu0 %v7196_v52  ;;  %v7240_v52 = vld [vmem:[%s9163_s1 + $0x938] sm:$0xff]  }
 0x100   :  { %6536 = vmatprep.subr.bf16.mxu0 %v7201_v60 }
 0x101   :  { %6529 = vmatpush3.bf16.msra.mxu1 %v7200_v58  ;;  %v7242_v58 = vld [vmem:[%s9163_s1 + $0x9b8] sm:$0xff]  }
 0x102   :  { %v6244_v54 = vpop.f32.mrf.mxu0  ;;  %4747 = vmatmul.mubr.bf16.vlgmr.msra.gmra.mxu0 %v5648_v56  ;;  %6558 = vmatprep.subr.bf16.mxu1 %v7205_v5  ;;  %v7241_v56 = vld [vmem:[%s9163_s1 + $0x9f8] sm:$0xff]   ;;  %v7249_v5 = vld [vmem:[%s9163_s1 + $0x9e8] sm:$0xff]  }
 0x103   :  { %6537 = vmatpush3.bf16.msra.mxu0 %v7204_v2  ;;  %4826 = vmatprep.mubr.bf16.mxu0 %v5653_v43  ;;  %v7246_v2 = vld [vmem:[%s9163_s1 + $0x9b0] sm:$0xff]   ;;  %v7278_v43 = vld [vmem:[%s9163_s1 + $0xab8] sm:$0xff]  }
 0x104   :  { %v6245_v59 = vpop.f32.mrf.mxu0  ;;  %v6266_v63 = vpop.f32.mrf.mxu1  ;;  %4787 = vmatmul.mubr.bf16.vlgmr.msra.gmra.mxu1 %v5650_v0  ;;  %6538 = vmatprep.subr.bf16.mxu0 %v7207_v10  ;;  %v7254_v10 = vld [vmem:[%s9163_s1 + $0x9a0] sm:$0xff]  }
 0x105   :  { %v6246_v62 = vadd.f32 %v6245_v59, %v6244_v54  ;;  %6559 = vmatpush3.bf16.msra.mxu1 %v7206_v7  ;;  %4866 = vmatprep.mubr.bf16.mxu1 %v5655_v51  ;;  %v7251_v7 = vld [vmem:[%s9163_s1 + $0x960] sm:$0xff]  }
 0x106   :  { %v6247_v3 = vpop.f32.mrf.mxu0  ;;  %v6267_v6 = vpop.f32.mrf.mxu1  ;;  %6560 = vmatprep.subr.bf16.mxu1 %v7209_v14  ;;  %v7258_v14 = vld [vmem:[%s9163_s1 + $0x998] sm:$0xff]  }
 0x107   :  { %v4269_v4 = vadd.f32 %v6246_v62, %v8248_v26  ;;  %v6268_v8 = vadd.f32 %v6267_v6, %v6266_v63  ;;  %6539 = vmatpush3.bf16.msra.mxu0 %v7208_v13  ;;  %v7220_v26 = vld [vmem:[%s9163_s1 + $0x818] sm:$0xff]   ;;  %v7243_v62 = vld [vmem:[%s9163_s1 + $0x970] sm:$0xff]   ;;  %v7247_v3 = vld [vmem:[%s9163_s1 + $0x968] sm:$0xff]  }
 0x108   :  { %v6248_v9 = vpop.f32.mrf.mxu0  ;;  %v6269_v11 = vpop.f32.mrf.mxu1  ;;  %6540 = vmatprep.subr.bf16.mxu0 %v7211_v17  ;;  %v7244_v63 = vld [vmem:[%s9163_s1 + $0x930] sm:$0xff]   ;;  %v7250_v6 = vld [vmem:[%s9163_s1 + $0x9a8] sm:$0xff]   ;;  %v7257_v13 = vld [vmem:[%s9163_s1 + $0x9d8] sm:$0xff]  }
 0x109   :  { %v8353_v12 = vadd.f32 %v6268_v8, %v4269_v4  ;;  %6561 = vmatpush3.bf16.msra.mxu1 %v7210_v16  ;;  %v7248_v4 = vld [vmem:[%s9163_s1 + $0x928] sm:$0xff]   ;;  %v7252_v8 = vld [vmem:[%s9163_s1 + $0x920] sm:$0xff]   ;;  %v7255_v11 = vld [vmem:[%s9163_s1 + $0x958] sm:$0xff]  }
 0x10a   :  { %v6270_v15 = vpop.f32.mrf.mxu1  ;;  %6562 = vmatprep.subr.bf16.mxu1 %v7213_v19  ;;  %v7253_v9 = vld [vmem:[%s9163_s1 + $0x9e0] sm:$0xff]   ;;  %v7260_v16 = vld [vmem:[%s9163_s1 + $0x910] sm:$0xff]   ;;  %v7263_v19 = vld [vmem:[%s9163_s1 + $0x948] sm:$0xff]  }
 0x10b   :  { %6541 = vmatpush3.bf16.msra.mxu0 %v7212_v18  ;;  %v7259_v15 = vld [vmem:[%s9163_s1 + $0x950] sm:$0xff]  }
 0x10c   :  { %6542 = vmatprep.subr.bf16.mxu0 %v7215_v21  ;;  %v7261_v17 = vld [vmem:[%s9163_s1 + $0x9d0] sm:$0xff]   ;;  %v7265_v21 = vld [vmem:[%s9163_s1 + $0x9c8] sm:$0xff]  }
 0x10d   :  { %6563 = vmatpush3.bf16.msra.mxu1 %v7214_v20  ;;  %v7262_v18 = vld [vmem:[%s9163_s1 + $0x990] sm:$0xff]   ;;  %v7264_v20 = vld [vmem:[%s9163_s1 + $0x908] sm:$0xff]  }
 0x10e   :  { %6564 = vmatprep.subr.bf16.mxu1 %v7217_v23  ;;  %v7267_v23 = vld [vmem:[%s9163_s1 + $0x940] sm:$0xff]  }
 0x10f   :  { %6543 = vmatpush3.bf16.msra.mxu0 %v7216_v22  ;;  %v7266_v22 = vld [vmem:[%s9163_s1 + $0x988] sm:$0xff]  }
 0x110   :  { %6544 = vmatprep.subr.bf16.mxu0 %v7219_v25  ;;  %v7269_v25 = vld [vmem:[%s9163_s1 + $0x9c0] sm:$0xff]  }
 0x111   :  { %6565 = vmatpush3.bf16.msra.mxu1 %v7218_v24  ;;  %v7268_v24 = vld [vmem:[%s9163_s1 + $0x900] sm:$0xff]  }
 0x112   :  { %6566 = vmatprep.subr.bf16.mxu1 %v7221_v27 }
 0x113   :  { %6545 = vmatpush3.bf16.msra.mxu0 %v7220_v26  ;;  %v45_v26 = vld [vmem:[%s9164_s0 + $0x90] sm:$0xff] }
 0x114   :  { %6546 = vmatprep.subr.bf16.mxu0 %v7223_v29  ;;  %v5657_v29 = vcombine.high %v45_v26, %v45_v26 }
 0x115   :  { %6567 = vmatpush3.bf16.msra.mxu1 %v7222_v28  ;;  %v5656_v28 = vcombine.low %v45_v26, %v45_v26 }
 0x116   :  { %6568 = vmatprep.subr.bf16.mxu1 %v7225_v31  ;;  %v7273_v31 = vld [vmem:[%s9163_s1 + $0xa78] sm:$0xff]  }
 0x117   :  { %6547 = vmatpush3.bf16.msra.mxu0 %v7224_v30  ;;  %v7272_v30 = vld [vmem:[%s9163_s1 + $0x980] sm:$0xff]  }
 0x118   :  { %6548 = vmatprep.subr.bf16.mxu0 %v7227_v33 }
 0x119   :  { %6569 = vmatpush3.bf16.msra.mxu1 %v7226_v32  ;;  %v46_v32 = vld [vmem:[%s9164_s0 + $0x98] sm:$0xff] }
 0x11a   :  { %6570 = vmatprep.subr.bf16.mxu1 %v7229_v35  ;;  %v5658_v35 = vcombine.low %v46_v32, %v46_v32 }
 0x11b   :  { %6549 = vmatpush3.bf16.msra.mxu0 %v7228_v34 }
 0x11c   :  { %6550 = vmatprep.subr.bf16.mxu0 %v7231_v37  ;;  %v7276_v37 = vld [vmem:[%s9163_s1 + $0xa38] sm:$0xff]  }
 0x11d   :  { %6571 = vmatpush3.bf16.msra.mxu1 %v7230_v36  ;;  %v5659_v36 = vcombine.high %v46_v32, %v46_v32  ;;  %v7315_v32 = vld [vmem:[%s9163_s1 + $0xb70] sm:$0xff]  }
 0x11e   :  { %6572 = vmatprep.subr.bf16.mxu1 %v7233_v39  ;;  %v7277_v39 = vld [vmem:[%s9163_s1 + $0xaf8] sm:$0xff]  }
 0x11f   :  { %6551 = vmatpush3.bf16.msra.mxu0 %v7232_v38 }
 0x120   :  { %6580 = vmatprep.subr.bf16.mxu0 %v7237_v45  ;;  %v7279_v45 = vld [vmem:[%s9163_s1 + $0xa70] sm:$0xff]  }
 0x121   :  { %6573 = vmatpush3.bf16.msra.mxu1 %v7236_v44 }
 0x122   :  { %v6288_v41 = vpop.f32.mrf.mxu0  ;;  %4827 = vmatmul.mubr.bf16.vlgmr.msra.gmra.mxu0 %v5652_v42  ;;  %6602 = vmatprep.subr.bf16.mxu1 %v7241_v56  ;;  %v7286_v56 = vld [vmem:[%s9163_s1 + $0xaa8] sm:$0xff]  }
 0x123   :  { %6581 = vmatpush3.bf16.msra.mxu0 %v7240_v52  ;;  %4906 = vmatprep.mubr.bf16.mxu0 %v5657_v29  ;;  %v7282_v52 = vld [vmem:[%s9163_s1 + $0xab0] sm:$0xff]   ;;  %v7314_v29 = vld [vmem:[%s9163_s1 + $0xbb8] sm:$0xff]  }
 0x124   :  { %v6289_v46 = vpop.f32.mrf.mxu0  ;;  %v6310_v47 = vpop.f32.mrf.mxu1  ;;  %4867 = vmatmul.mubr.bf16.vlgmr.msra.gmra.mxu1 %v5654_v50  ;;  %6582 = vmatprep.subr.bf16.mxu0 %v7243_v62  ;;  %v7281_v50 = vld [vmem:[%s9163_s1 + $0xaf0] sm:$0xff]   ;;  %v7292_v62 = vld [vmem:[%s9163_s1 + $0xa18] sm:$0xff]  }
 0x125   :  { %v6290_v49 = vadd.f32 %v6289_v46, %v6288_v41  ;;  %6603 = vmatpush3.bf16.msra.mxu1 %v7242_v58  ;;  %4946 = vmatprep.mubr.bf16.mxu1 %v5659_v36  ;;  %v7288_v58 = vld [vmem:[%s9163_s1 + $0xa20] sm:$0xff]   ;;  %v7317_v36 = vld [vmem:[%s9163_s1 + $0xbf0] sm:$0xff]  }
 0x126   :  { %v6291_v53 = vpop.f32.mrf.mxu0  ;;  %v6311_v54 = vpop.f32.mrf.mxu1  ;;  %6604 = vmatprep.subr.bf16.mxu1 %v7245_v1  ;;  %v7295_v1 = vld [vmem:[%s9163_s1 + $0xa50] sm:$0xff]  }
 0x127   :  { %v4349_v55 = vadd.f32 %v6290_v49, %v8353_v12  ;;  %v6312_v57 = vadd.f32 %v6311_v54, %v6310_v47  ;;  %6583 = vmatpush3.bf16.msra.mxu0 %v7244_v63  ;;  %v7256_v12 = vld [vmem:[%s9163_s1 + $0x918] sm:$0xff]   ;;  %v7280_v49 = vld [vmem:[%s9163_s1 + $0xa30] sm:$0xff]   ;;  %v7283_v53 = vld [vmem:[%s9163_s1 + $0xa68] sm:$0xff]  }
 0x128   :  { %v6292_v59 = vpop.f32.mrf.mxu0  ;;  %v6313_v60 = vpop.f32.mrf.mxu1  ;;  %6584 = vmatprep.subr.bf16.mxu0 %v7247_v3  ;;  %v7284_v54 = vld [vmem:[%s9163_s1 + $0xa28] sm:$0xff]   ;;  %v7293_v63 = vld [vmem:[%s9163_s1 + $0xad8] sm:$0xff]   ;;  %v7297_v3 = vld [vmem:[%s9163_s1 + $0xad0] sm:$0xff]  }
 0x129   :  { %v8455_v61 = vadd.f32 %v6312_v57, %v4349_v55  ;;  %6605 = vmatpush3.bf16.msra.mxu1 %v7246_v2  ;;  %v7285_v55 = vld [vmem:[%s9163_s1 + $0xae8] sm:$0xff]   ;;  %v7287_v57 = vld [vmem:[%s9163_s1 + $0xa60] sm:$0xff]   ;;  %v7296_v2 = vld [vmem:[%s9163_s1 + $0xa10] sm:$0xff]  }
 0x12a   :  { %v6314_v0 = vpop.f32.mrf.mxu1  ;;  %6606 = vmatprep.subr.bf16.mxu1 %v7249_v5  ;;  %v7289_v59 = vld [vmem:[%s9163_s1 + $0xae0] sm:$0xff]   ;;  %v7299_v5 = vld [vmem:[%s9163_s1 + $0xa48] sm:$0xff]  }
 0x12b   :  { %6585 = vmatpush3.bf16.msra.mxu0 %v7248_v4  ;;  %v7290_v60 = vld [vmem:[%s9163_s1 + $0xaa0] sm:$0xff]   ;;  %v7294_v0 = vld [vmem:[%s9163_s1 + $0xa98] sm:$0xff]   ;;  %v7298_v4 = vld [vmem:[%s9163_s1 + $0xa90] sm:$0xff]  }
 0x12c   :  { %6586 = vmatprep.subr.bf16.mxu0 %v7251_v7  ;;  %v7301_v7 = vld [vmem:[%s9163_s1 + $0xac8] sm:$0xff]  }
 0x12d   :  { %6607 = vmatpush3.bf16.msra.mxu1 %v7250_v6  ;;  %v7300_v6 = vld [vmem:[%s9163_s1 + $0xa08] sm:$0xff]  }
 0x12e   :  { %6608 = vmatprep.subr.bf16.mxu1 %v7253_v9  ;;  %v7303_v9 = vld [vmem:[%s9163_s1 + $0xa40] sm:$0xff]  }
 0x12f   :  { %6587 = vmatpush3.bf16.msra.mxu0 %v7252_v8  ;;  %v7302_v8 = vld [vmem:[%s9163_s1 + $0xa88] sm:$0xff]  }
 0x130   :  { %6588 = vmatprep.subr.bf16.mxu0 %v7255_v11  ;;  %v7305_v11 = vld [vmem:[%s9163_s1 + $0xac0] sm:$0xff]  }
 0x131   :  { %6609 = vmatpush3.bf16.msra.mxu1 %v7254_v10  ;;  %v7304_v10 = vld [vmem:[%s9163_s1 + $0xa00] sm:$0xff]  }
 0x132   :  { %6610 = vmatprep.subr.bf16.mxu1 %v7257_v13  ;;  %v47_v13 = vld [vmem:[%s9164_s0 + $0xa0] sm:$0xff] }
 0x133   :  { %6589 = vmatpush3.bf16.msra.mxu0 %v7256_v12 }
 0x134   :  { %6590 = vmatprep.subr.bf16.mxu0 %v7259_v15  ;;  %v5661_v15 = vcombine.high %v47_v13, %v47_v13 }
 0x135   :  { %6611 = vmatpush3.bf16.msra.mxu1 %v7258_v14  ;;  %v5660_v14 = vcombine.low %v47_v13, %v47_v13 }
 0x136   :  { %6612 = vmatprep.subr.bf16.mxu1 %v7261_v17 }
 0x137   :  { %6591 = vmatpush3.bf16.msra.mxu0 %v7260_v16  ;;  %v7308_v16 = vld [vmem:[%s9163_s1 + $0xa80] sm:$0xff]  }
 0x138   :  { %6592 = vmatprep.subr.bf16.mxu0 %v7263_v19  ;;  %v48_v19 = vld [vmem:[%s9164_s0 + $0xa8] sm:$0xff] }
 0x139   :  { %6613 = vmatpush3.bf16.msra.mxu1 %v7262_v18  ;;  %v7309_v18 = vld [vmem:[%s9163_s1 + $0xb78] sm:$0xff]  }
 0x13a   :  { %6614 = vmatprep.subr.bf16.mxu1 %v7265_v21 }
 0x13b   :  { %6593 = vmatpush3.bf16.msra.mxu0 %v7264_v20 }
 0x13c   :  { %6594 = vmatprep.subr.bf16.mxu0 %v7267_v23  ;;  %v5663_v23 = vcombine.high %v48_v19, %v48_v19 }
 0x13d   :  { %6615 = vmatpush3.bf16.msra.mxu1 %v7266_v22  ;;  %v5662_v22 = vcombine.low %v48_v19, %v48_v19 }
 0x13e   :  { %6616 = vmatprep.subr.bf16.mxu1 %v7269_v25 }
 0x13f   :  { %6595 = vmatpush3.bf16.msra.mxu0 %v7268_v24  ;;  %v7312_v24 = vld [vmem:[%s9163_s1 + $0xb38] sm:$0xff]  }
 0x140   :  { %6624 = vmatprep.subr.bf16.mxu0 %v7273_v31 }
 0x141   :  { %6617 = vmatpush3.bf16.msra.mxu1 %v7272_v30 }
 0x142   :  { %v6332_v27 = vpop.f32.mrf.mxu0  ;;  %4907 = vmatmul.mubr.bf16.vlgmr.msra.gmra.mxu0 %v5656_v28  ;;  %6646 = vmatprep.subr.bf16.mxu1 %v7277_v39  ;;  %v7319_v39 = vld [vmem:[%s9163_s1 + $0xb68] sm:$0xff]  }
 0x143   :  { %6625 = vmatpush3.bf16.msra.mxu0 %v7276_v37  ;;  %4986 = vmatprep.mubr.bf16.mxu0 %v5661_v15 }
 0x144   :  { %v6333_v33 = vpop.f32.mrf.mxu0  ;;  %v6354_v34 = vpop.f32.mrf.mxu1  ;;  %4947 = vmatmul.mubr.bf16.vlgmr.msra.gmra.mxu1 %v5658_v35  ;;  %6626 = vmatprep.subr.bf16.mxu0 %v7279_v45  ;;  %v7316_v35 = vld [vmem:[%s9163_s1 + $0xb30] sm:$0xff]   ;;  %v7325_v45 = vld [vmem:[%s9163_s1 + $0xbe0] sm:$0xff]  }
 0x145   :  { %v6334_v38 = vadd.f32 %v6333_v33, %v6332_v27  ;;  %6647 = vmatpush3.bf16.msra.mxu1 %v7278_v43  ;;  %v7313_v27 = vld [vmem:[%s9163_s1 + $0xbf8] sm:$0xff]   ;;  %5026 = vmatprep.mubr.bf16.mxu1 %v5663_v23  ;;  %v7323_v43 = vld [vmem:[%s9163_s1 + $0xb60] sm:$0xff]   ;;  %v7353_v23 = vld [vmem:[%s9163_s1 + $0xcf0] sm:$0xff]  }
 0x146   :  { %v6335_v40 = vpop.f32.mrf.mxu0  ;;  %v6355_v41 = vpop.f32.mrf.mxu1  ;;  %6648 = vmatprep.subr.bf16.mxu1 %v7281_v50  ;;  %v7330_v50 = vld [vmem:[%s9163_s1 + $0xb98] sm:$0xff]  }
 0x147   :  { %v4429_v42 = vadd.f32 %v6334_v38, %v8455_v61  ;;  %v6356_v44 = vadd.f32 %v6355_v41, %v6354_v34  ;;  %6627 = vmatpush3.bf16.msra.mxu0 %v7280_v49  ;;  %v7291_v61 = vld [vmem:[%s9163_s1 + $0xa58] sm:$0xff]   ;;  %v7318_v38 = vld [vmem:[%s9163_s1 + $0xbb0] sm:$0xff]   ;;  %v7320_v40 = vld [vmem:[%s9163_s1 + $0xb28] sm:$0xff]  }
 0x148   :  { %v6336_v46 = vpop.f32.mrf.mxu0  ;;  %v6357_v47 = vpop.f32.mrf.mxu1  ;;  %6628 = vmatprep.subr.bf16.mxu0 %v7283_v53  ;;  %v7321_v41 = vld [vmem:[%s9163_s1 + $0xbe8] sm:$0xff]   ;;  %v7329_v49 = vld [vmem:[%s9163_s1 + $0xbd8] sm:$0xff]   ;;  %v7333_v53 = vld [vmem:[%s9163_s1 + $0xbd0] sm:$0xff]  }
 0x149   :  { %v8563_v48 = vadd.f32 %v6356_v44, %v4429_v42  ;;  %6649 = vmatpush3.bf16.msra.mxu1 %v7282_v52  ;;  %v7322_v42 = vld [vmem:[%s9163_s1 + $0xba8] sm:$0xff]   ;;  %v7324_v44 = vld [vmem:[%s9163_s1 + $0xb20] sm:$0xff]   ;;  %v7327_v47 = vld [vmem:[%s9163_s1 + $0xb58] sm:$0xff]  }
 0x14a   :  { %v6358_v51 = vpop.f32.mrf.mxu1  ;;  %6650 = vmatprep.subr.bf16.mxu1 %v7285_v55  ;;  %v7326_v46 = vld [vmem:[%s9163_s1 + $0xba0] sm:$0xff]   ;;  %v7332_v52 = vld [vmem:[%s9163_s1 + $0xb10] sm:$0xff]   ;;  %v7335_v55 = vld [vmem:[%s9163_s1 + $0xb48] sm:$0xff]  }
 0x14b   :  { %6629 = vmatpush3.bf16.msra.mxu0 %v7284_v54  ;;  %v7331_v51 = vld [vmem:[%s9163_s1 + $0xb50] sm:$0xff]  }
 0x14c   :  { %6630 = vmatprep.subr.bf16.mxu0 %v7287_v57  ;;  %v7334_v54 = vld [vmem:[%s9163_s1 + $0xb90] sm:$0xff]   ;;  %v7337_v57 = vld [vmem:[%s9163_s1 + $0xbc8] sm:$0xff]  }
 0x14d   :  { %6651 = vmatpush3.bf16.msra.mxu1 %v7286_v56  ;;  %v7336_v56 = vld [vmem:[%s9163_s1 + $0xb08] sm:$0xff]  }
 0x14e   :  { %6652 = vmatprep.subr.bf16.mxu1 %v7289_v59  ;;  %v7339_v59 = vld [vmem:[%s9163_s1 + $0xb40] sm:$0xff]  }
 0x14f   :  { %6631 = vmatpush3.bf16.msra.mxu0 %v7288_v58  ;;  %v7338_v58 = vld [vmem:[%s9163_s1 + $0xb88] sm:$0xff]  }
 0x150   :  { %6632 = vmatprep.subr.bf16.mxu0 %v7291_v61  ;;  %v7341_v61 = vld [vmem:[%s9163_s1 + $0xbc0] sm:$0xff]  }
 0x151   :  { %6653 = vmatpush3.bf16.msra.mxu1 %v7290_v60  ;;  %v7340_v60 = vld [vmem:[%s9163_s1 + $0xb00] sm:$0xff]  }
 0x152   :  { %6654 = vmatprep.subr.bf16.mxu1 %v7293_v63 }
 0x153   :  { %6633 = vmatpush3.bf16.msra.mxu0 %v7292_v62  ;;  %v49_v62 = vld [vmem:[%s9164_s0 + $0xb0] sm:$0xff] }
 0x154   :  { %6634 = vmatprep.subr.bf16.mxu0 %v7295_v1  ;;  %v5665_v1 = vcombine.high %v49_v62, %v49_v62 }
 0x155   :  { %6655 = vmatpush3.bf16.msra.mxu1 %v7294_v0  ;;  %v5664_v0 = vcombine.low %v49_v62, %v49_v62 }
 0x156   :  { %6656 = vmatprep.subr.bf16.mxu1 %v7297_v3  ;;  %v7345_v3 = vld [vmem:[%s9163_s1 + $0xc78] sm:$0xff]  }
 0x157   :  { %6635 = vmatpush3.bf16.msra.mxu0 %v7296_v2  ;;  %v7344_v2 = vld [vmem:[%s9163_s1 + $0xb80] sm:$0xff]  }
 0x158   :  { %6636 = vmatprep.subr.bf16.mxu0 %v7299_v5 }
 0x159   :  { %6657 = vmatpush3.bf16.msra.mxu1 %v7298_v4 }
 0x15a   :  { %6658 = vmatprep.subr.bf16.mxu1 %v7301_v7 }
 0x15b   :  { %6637 = vmatpush3.bf16.msra.mxu0 %v7300_v6  ;;  %v50_v6 = vld [vmem:[%s9164_s0 + $0xb8] sm:$0xff] }
 0x15c   :  { %6638 = vmatprep.subr.bf16.mxu0 %v7303_v9  ;;  %v5667_v9 = vcombine.high %v50_v6, %v50_v6 }
 0x15d   :  { %6659 = vmatpush3.bf16.msra.mxu1 %v7302_v8  ;;  %v5666_v8 = vcombine.low %v50_v6, %v50_v6 }
 0x15e   :  { %6660 = vmatprep.subr.bf16.mxu1 %v7305_v11 }
 0x15f   :  { %6639 = vmatpush3.bf16.msra.mxu0 %v7304_v10  ;;  %v7348_v10 = vld [vmem:[%s9163_s1 + $0xc38] sm:$0xff]  }
 0x160   :  { %6668 = vmatprep.subr.bf16.mxu0 %v7309_v18 }
 0x161   :  { %6661 = vmatpush3.bf16.msra.mxu1 %v7308_v16  ;;  %v7350_v16 = vld [vmem:[%s9163_s1 + $0xcb8] sm:$0xff]  }
 0x162   :  { %v6376_v12 = vpop.f32.mrf.mxu0  ;;  %4987 = vmatmul.mubr.bf16.vlgmr.msra.gmra.mxu0 %v5660_v14  ;;  %6690 = vmatprep.subr.bf16.mxu1 %v7313_v27  ;;  %v7349_v14 = vld [vmem:[%s9163_s1 + $0xcf8] sm:$0xff]   ;;  %v7357_v27 = vld [vmem:[%s9163_s1 + $0xce8] sm:$0xff]  }
 0x163   :  { %6669 = vmatpush3.bf16.msra.mxu0 %v7312_v24  ;;  %5066 = vmatprep.mubr.bf16.mxu0 %v5665_v1  ;;  %v7354_v24 = vld [vmem:[%s9163_s1 + $0xcb0] sm:$0xff]   ;;  %v7386_v1 = vld [vmem:[%s9163_s1 + $0xdb8] sm:$0xff]  }
 0x164   :  { %v6377_v17 = vpop.f32.mrf.mxu0  ;;  %v6398_v21 = vpop.f32.mrf.mxu1  ;;  %5027 = vmatmul.mubr.bf16.vlgmr.msra.gmra.mxu1 %v5662_v22  ;;  %6670 = vmatprep.subr.bf16.mxu0 %v7315_v32  ;;  %v7362_v32 = vld [vmem:[%s9163_s1 + $0xca0] sm:$0xff]  }
 0x165   :  { %v6378_v20 = vadd.f32 %v6377_v17, %v6376_v12  ;;  %6691 = vmatpush3.bf16.msra.mxu1 %v7314_v29  ;;  %5106 = vmatprep.mubr.bf16.mxu1 %v5667_v9  ;;  %v7359_v29 = vld [vmem:[%s9163_s1 + $0xc60] sm:$0xff]  }
 0x166   :  { %v6379_v25 = vpop.f32.mrf.mxu0  ;;  %v6399_v28 = vpop.f32.mrf.mxu1  ;;  %6692 = vmatprep.subr.bf16.mxu1 %v7317_v36  ;;  %v7366_v36 = vld [vmem:[%s9163_s1 + $0xc98] sm:$0xff]  }
 0x167   :  { %v4509_v26 = vadd.f32 %v6378_v20, %v8563_v48  ;;  %v6400_v30 = vadd.f32 %v6399_v28, %v6398_v21  ;;  %6671 = vmatpush3.bf16.msra.mxu0 %v7316_v35  ;;  %v7328_v48 = vld [vmem:[%s9163_s1 + $0xb18] sm:$0xff]   ;;  %v7351_v20 = vld [vmem:[%s9163_s1 + $0xc70] sm:$0xff]   ;;  %v7355_v25 = vld [vmem:[%s9163_s1 + $0xc68] sm:$0xff]  }
 0x168   :  { %v6380_v31 = vpop.f32.mrf.mxu0  ;;  %v6401_v33 = vpop.f32.mrf.mxu1  ;;  %6672 = vmatprep.subr.bf16.mxu0 %v7319_v39  ;;  %v7352_v21 = vld [vmem:[%s9163_s1 + $0xc30] sm:$0xff]   ;;  %v7358_v28 = vld [vmem:[%s9163_s1 + $0xca8] sm:$0xff]   ;;  %v7365_v35 = vld [vmem:[%s9163_s1 + $0xcd8] sm:$0xff]  }
 0x169   :  { %v8668_v34 = vadd.f32 %v6400_v30, %v4509_v26  ;;  %6693 = vmatpush3.bf16.msra.mxu1 %v7318_v38  ;;  %v7356_v26 = vld [vmem:[%s9163_s1 + $0xc28] sm:$0xff]   ;;  %v7360_v30 = vld [vmem:[%s9163_s1 + $0xc20] sm:$0xff]   ;;  %v7363_v33 = vld [vmem:[%s9163_s1 + $0xc58] sm:$0xff]  }
 0x16a   :  { %v6402_v37 = vpop.f32.mrf.mxu1  ;;  %6694 = vmatprep.subr.bf16.mxu1 %v7321_v41  ;;  %v7361_v31 = vld [vmem:[%s9163_s1 + $0xce0] sm:$0xff]   ;;  %v7368_v38 = vld [vmem:[%s9163_s1 + $0xc10] sm:$0xff]   ;;  %v7371_v41 = vld [vmem:[%s9163_s1 + $0xc48] sm:$0xff]  }
 0x16b   :  { %6673 = vmatpush3.bf16.msra.mxu0 %v7320_v40  ;;  %v7367_v37 = vld [vmem:[%s9163_s1 + $0xc50] sm:$0xff]  }
 0x16c   :  { %6674 = vmatprep.subr.bf16.mxu0 %v7323_v43  ;;  %v7369_v39 = vld [vmem:[%s9163_s1 + $0xcd0] sm:$0xff]   ;;  %v7373_v43 = vld [vmem:[%s9163_s1 + $0xcc8] sm:$0xff]  }
 0x16d   :  { %6695 = vmatpush3.bf16.msra.mxu1 %v7322_v42  ;;  %v7370_v40 = vld [vmem:[%s9163_s1 + $0xc90] sm:$0xff]   ;;  %v7372_v42 = vld [vmem:[%s9163_s1 + $0xc08] sm:$0xff]  }
 0x16e   :  { %6696 = vmatprep.subr.bf16.mxu1 %v7325_v45  ;;  %v7375_v45 = vld [vmem:[%s9163_s1 + $0xc40] sm:$0xff]  }
 0x16f   :  { %6675 = vmatpush3.bf16.msra.mxu0 %v7324_v44  ;;  %v7374_v44 = vld [vmem:[%s9163_s1 + $0xc88] sm:$0xff]  }
 0x170   :  { %6676 = vmatprep.subr.bf16.mxu0 %v7327_v47  ;;  %v7377_v47 = vld [vmem:[%s9163_s1 + $0xcc0] sm:$0xff]  }
 0x171   :  { %6697 = vmatpush3.bf16.msra.mxu1 %v7326_v46  ;;  %v7376_v46 = vld [vmem:[%s9163_s1 + $0xc00] sm:$0xff]  }
 0x172   :  { %6698 = vmatprep.subr.bf16.mxu1 %v7329_v49 }
 0x173   :  { %6677 = vmatpush3.bf16.msra.mxu0 %v7328_v48  ;;  %v51_v48 = vld [vmem:[%s9164_s0 + $0xc0] sm:$0xff] }
 0x174   :  { %6678 = vmatprep.subr.bf16.mxu0 %v7331_v51  ;;  %v5669_v51 = vcombine.high %v51_v48, %v51_v48 }
 0x175   :  { %6699 = vmatpush3.bf16.msra.mxu1 %v7330_v50  ;;  %v5668_v50 = vcombine.low %v51_v48, %v51_v48 }
 0x176   :  { %6700 = vmatprep.subr.bf16.mxu1 %v7333_v53  ;;  %v7381_v53 = vld [vmem:[%s9163_s1 + $0xd78] sm:$0xff]  }
 0x177   :  { %6679 = vmatpush3.bf16.msra.mxu0 %v7332_v52  ;;  %v7380_v52 = vld [vmem:[%s9163_s1 + $0xc80] sm:$0xff]  }
 0x178   :  { %6680 = vmatprep.subr.bf16.mxu0 %v7335_v55 }
 0x179   :  { %6701 = vmatpush3.bf16.msra.mxu1 %v7334_v54  ;;  %v52_v54 = vld [vmem:[%s9164_s0 + $0xc8] sm:$0xff] }
 0x17a   :  { %6702 = vmatprep.subr.bf16.mxu1 %v7337_v57  ;;  %v5670_v57 = vcombine.low %v52_v54, %v52_v54 }
 0x17b   :  { %6681 = vmatpush3.bf16.msra.mxu0 %v7336_v56 }
 0x17c   :  { %6682 = vmatprep.subr.bf16.mxu0 %v7339_v59  ;;  %v7384_v59 = vld [vmem:[%s9163_s1 + $0xd38] sm:$0xff]  }
 0x17d   :  { %6703 = vmatpush3.bf16.msra.mxu1 %v7338_v58  ;;  %v5671_v58 = vcombine.high %v52_v54, %v52_v54 }
 0x17e   :  { %6704 = vmatprep.subr.bf16.mxu1 %v7341_v61  ;;  %v7385_v61 = vld [vmem:[%s9163_s1 + $0xdf8] sm:$0xff]  }
 0x17f   :  { %6683 = vmatpush3.bf16.msra.mxu0 %v7340_v60 }
 0x180   :  { %6712 = vmatprep.subr.bf16.mxu0 %v7345_v3  ;;  %v7387_v3 = vld [vmem:[%s9163_s1 + $0xd70] sm:$0xff]  }
 0x181   :  { %6705 = vmatpush3.bf16.msra.mxu1 %v7344_v2 }
 0x182   :  { %v6420_v63 = vpop.f32.mrf.mxu0  ;;  %5067 = vmatmul.mubr.bf16.vlgmr.msra.gmra.mxu0 %v5664_v0  ;;  %6734 = vmatprep.subr.bf16.mxu1 %v7349_v14  ;;  %v7394_v14 = vld [vmem:[%s9163_s1 + $0xda8] sm:$0xff]  }
 0x183   :  { %6713 = vmatpush3.bf16.msra.mxu0 %v7348_v10  ;;  %5146 = vmatprep.mubr.bf16.mxu0 %v5669_v51  ;;  %v7390_v10 = vld [vmem:[%s9163_s1 + $0xdb0] sm:$0xff]   ;;  %v7422_v51 = vld [vmem:[%s9163_s1 + $0xeb8] sm:$0xff]  }
 0x184   :  { %v6421_v4 = vpop.f32.mrf.mxu0  ;;  %v6442_v5 = vpop.f32.mrf.mxu1  ;;  %5107 = vmatmul.mubr.bf16.vlgmr.msra.gmra.mxu1 %v5666_v8  ;;  %6714 = vmatprep.subr.bf16.mxu0 %v7351_v20  ;;  %v7389_v8 = vld [vmem:[%s9163_s1 + $0xdf0] sm:$0xff]   ;;  %v7400_v20 = vld [vmem:[%s9163_s1 + $0xd18] sm:$0xff]  }
 0x185   :  { %v6422_v7 = vadd.f32 %v6421_v4, %v6420_v63  ;;  %6735 = vmatpush3.bf16.msra.mxu1 %v7350_v16  ;;  %5186 = vmatprep.mubr.bf16.mxu1 %v5671_v58  ;;  %v7396_v16 = vld [vmem:[%s9163_s1 + $0xd20] sm:$0xff]   ;;  %v7425_v58 = vld [vmem:[%s9163_s1 + $0xef0] sm:$0xff]  }
 0x186   :  { %v6423_v11 = vpop.f32.mrf.mxu0  ;;  %v6443_v12 = vpop.f32.mrf.mxu1  ;;  %6736 = vmatprep.subr.bf16.mxu1 %v7353_v23  ;;  %v7403_v23 = vld [vmem:[%s9163_s1 + $0xd50] sm:$0xff]  }
 0x187   :  { %v4589_v13 = vadd.f32 %v6422_v7, %v8668_v34  ;;  %v6444_v15 = vadd.f32 %v6443_v12, %v6442_v5  ;;  %6715 = vmatpush3.bf16.msra.mxu0 %v7352_v21  ;;  %v7364_v34 = vld [vmem:[%s9163_s1 + $0xc18] sm:$0xff]   ;;  %v7388_v7 = vld [vmem:[%s9163_s1 + $0xd30] sm:$0xff]   ;;  %v7391_v11 = vld [vmem:[%s9163_s1 + $0xd68] sm:$0xff]  }
 0x188   :  { %v6424_v17 = vpop.f32.mrf.mxu0  ;;  %v6445_v18 = vpop.f32.mrf.mxu1  ;;  %6716 = vmatprep.subr.bf16.mxu0 %v7355_v25  ;;  %v7392_v12 = vld [vmem:[%s9163_s1 + $0xd28] sm:$0xff]   ;;  %v7401_v21 = vld [vmem:[%s9163_s1 + $0xdd8] sm:$0xff]   ;;  %v7405_v25 = vld [vmem:[%s9163_s1 + $0xdd0] sm:$0xff]  }
 0x189   :  { %v8770_v19 = vadd.f32 %v6444_v15, %v4589_v13  ;;  %6737 = vmatpush3.bf16.msra.mxu1 %v7354_v24  ;;  %v7393_v13 = vld [vmem:[%s9163_s1 + $0xde8] sm:$0xff]   ;;  %v7395_v15 = vld [vmem:[%s9163_s1 + $0xd60] sm:$0xff]   ;;  %v7404_v24 = vld [vmem:[%s9163_s1 + $0xd10] sm:$0xff]  }
 0x18a   :  { %v6446_v22 = vpop.f32.mrf.mxu1  ;;  %6738 = vmatprep.subr.bf16.mxu1 %v7357_v27  ;;  %v7397_v17 = vld [vmem:[%s9163_s1 + $0xde0] sm:$0xff]   ;;  %v7407_v27 = vld [vmem:[%s9163_s1 + $0xd48] sm:$0xff]  }
 0x18b   :  { %6717 = vmatpush3.bf16.msra.mxu0 %v7356_v26  ;;  %v7398_v18 = vld [vmem:[%s9163_s1 + $0xda0] sm:$0xff]   ;;  %v7402_v22 = vld [vmem:[%s9163_s1 + $0xd98] sm:$0xff]   ;;  %v7406_v26 = vld [vmem:[%s9163_s1 + $0xd90] sm:$0xff]  }
 0x18c   :  { %6718 = vmatprep.subr.bf16.mxu0 %v7359_v29  ;;  %v7409_v29 = vld [vmem:[%s9163_s1 + $0xdc8] sm:$0xff]  }
 0x18d   :  { %6739 = vmatpush3.bf16.msra.mxu1 %v7358_v28  ;;  %v7408_v28 = vld [vmem:[%s9163_s1 + $0xd08] sm:$0xff]  }
 0x18e   :  { %6740 = vmatprep.subr.bf16.mxu1 %v7361_v31  ;;  %v7411_v31 = vld [vmem:[%s9163_s1 + $0xd40] sm:$0xff]  }
 0x18f   :  { %6719 = vmatpush3.bf16.msra.mxu0 %v7360_v30  ;;  %v7410_v30 = vld [vmem:[%s9163_s1 + $0xd88] sm:$0xff]  }
 0x190   :  { %6720 = vmatprep.subr.bf16.mxu0 %v7363_v33  ;;  %v7413_v33 = vld [vmem:[%s9163_s1 + $0xdc0] sm:$0xff]  }
 0x191   :  { %6741 = vmatpush3.bf16.msra.mxu1 %v7362_v32  ;;  %v7412_v32 = vld [vmem:[%s9163_s1 + $0xd00] sm:$0xff]  }
 0x192   :  { %6742 = vmatprep.subr.bf16.mxu1 %v7365_v35 }
 0x193   :  { %6721 = vmatpush3.bf16.msra.mxu0 %v7364_v34  ;;  %v53_v34 = vld [vmem:[%s9164_s0 + $0xd0] sm:$0xff] }
 0x194   :  { %6722 = vmatprep.subr.bf16.mxu0 %v7367_v37  ;;  %v5673_v37 = vcombine.high %v53_v34, %v53_v34 }
 0x195   :  { %6743 = vmatpush3.bf16.msra.mxu1 %v7366_v36  ;;  %v5672_v36 = vcombine.low %v53_v34, %v53_v34 }
 0x196   :  { %6744 = vmatprep.subr.bf16.mxu1 %v7369_v39  ;;  %v7417_v39 = vld [vmem:[%s9163_s1 + $0xe78] sm:$0xff]  }
 0x197   :  { %6723 = vmatpush3.bf16.msra.mxu0 %v7368_v38  ;;  %v7416_v38 = vld [vmem:[%s9163_s1 + $0xd80] sm:$0xff]  }
 0x198   :  { %6724 = vmatprep.subr.bf16.mxu0 %v7371_v41 }
 0x199   :  { %6745 = vmatpush3.bf16.msra.mxu1 %v7370_v40  ;;  %v54_v40 = vld [vmem:[%s9164_s0 + $0xd8] sm:$0xff] }
 0x19a   :  { %6746 = vmatprep.subr.bf16.mxu1 %v7373_v43  ;;  %v5674_v43 = vcombine.low %v54_v40, %v54_v40 }
 0x19b   :  { %6725 = vmatpush3.bf16.msra.mxu0 %v7372_v42 }
 0x19c   :  { %6726 = vmatprep.subr.bf16.mxu0 %v7375_v45  ;;  %v7420_v45 = vld [vmem:[%s9163_s1 + $0xe38] sm:$0xff]  }
 0x19d   :  { %6747 = vmatpush3.bf16.msra.mxu1 %v7374_v44  ;;  %v5675_v44 = vcombine.high %v54_v40, %v54_v40 }
 0x19e   :  { %6748 = vmatprep.subr.bf16.mxu1 %v7377_v47  ;;  %v7421_v47 = vld [vmem:[%s9163_s1 + $0xef8] sm:$0xff]  }
 0x19f   :  { %6727 = vmatpush3.bf16.msra.mxu0 %v7376_v46 }
 0x1a0   :  { %6756 = vmatprep.subr.bf16.mxu0 %v7381_v53  ;;  %v7423_v53 = vld [vmem:[%s9163_s1 + $0xe70] sm:$0xff]  }
 0x1a1   :  { %6749 = vmatpush3.bf16.msra.mxu1 %v7380_v52 }
 0x1a2   :  { %v6464_v49 = vpop.f32.mrf.mxu0  ;;  %5147 = vmatmul.mubr.bf16.vlgmr.msra.gmra.mxu0 %v5668_v50  ;;  %6778 = vmatprep.subr.bf16.mxu1 %v7385_v61  ;;  %v7427_v61 = vld [vmem:[%s9163_s1 + $0xe68] sm:$0xff]  }
 0x1a3   :  { %6757 = vmatpush3.bf16.msra.mxu0 %v7384_v59  ;;  %5226 = vmatprep.mubr.bf16.mxu0 %v5673_v37 }
 0x1a4   :  { %v6465_v55 = vpop.f32.mrf.mxu0  ;;  %v6486_v56 = vpop.f32.mrf.mxu1  ;;  %5187 = vmatmul.mubr.bf16.vlgmr.msra.gmra.mxu1 %v5670_v57  ;;  %6758 = vmatprep.subr.bf16.mxu0 %v7387_v3  ;;  %v7424_v57 = vld [vmem:[%s9163_s1 + $0xe30] sm:$0xff]   ;;  %v7433_v3 = vld [vmem:[%s9163_s1 + $0xee0] sm:$0xff]  }
 0x1a5   :  { %v6466_v60 = vadd.f32 %v6465_v55, %v6464_v49  ;;  %6779 = vmatpush3.bf16.msra.mxu1 %v7386_v1  ;;  %5266 = vmatprep.mubr.bf16.mxu1 %v5675_v44  ;;  %v7431_v1 = vld [vmem:[%s9163_s1 + $0xe60] sm:$0xff]   ;;  %v7459_v44 = vld [vmem:[%s9164_s0 + $0xf0] ss:$0 sps:$4 sm:$0xff]  }
 0x1a6   :  { %v6467_v62 = vpop.f32.mrf.mxu0  ;;  %v6487_v63 = vpop.f32.mrf.mxu1  ;;  %6780 = vmatprep.subr.bf16.mxu1 %v7389_v8  ;;  %v7438_v8 = vld [vmem:[%s9163_s1 + $0xe98] sm:$0xff]  }
 0x1a7   :  { %v4669_v0 = vadd.f32 %v6466_v60, %v8770_v19  ;;  %v6488_v2 = vadd.f32 %v6487_v63, %v6486_v56  ;;  %6759 = vmatpush3.bf16.msra.mxu0 %v7388_v7  ;;  %v7399_v19 = vld [vmem:[%s9163_s1 + $0xd58] sm:$0xff]   ;;  %v7426_v60 = vld [vmem:[%s9163_s1 + $0xeb0] sm:$0xff]   ;;  %v7428_v62 = vld [vmem:[%s9163_s1 + $0xe28] sm:$0xff]  }
 0x1a8   :  { %v6468_v4 = vpop.f32.mrf.mxu0  ;;  %v6489_v5 = vpop.f32.mrf.mxu1  ;;  %6760 = vmatprep.subr.bf16.mxu0 %v7391_v11  ;;  %v7429_v63 = vld [vmem:[%s9163_s1 + $0xee8] sm:$0xff]   ;;  %v7437_v7 = vld [vmem:[%s9163_s1 + $0xed8] sm:$0xff]   ;;  %v7441_v11 = vld [vmem:[%s9163_s1 + $0xed0] sm:$0xff]  }
 0x1a9   :  { %v8878_v6 = vadd.f32 %v6488_v2, %v4669_v0  ;;  %6781 = vmatpush3.bf16.msra.mxu1 %v7390_v10  ;;  %v7430_v0 = vld [vmem:[%s9163_s1 + $0xea8] sm:$0xff]   ;;  %v7432_v2 = vld [vmem:[%s9163_s1 + $0xe20] sm:$0xff]   ;;  %v7435_v5 = vld [vmem:[%s9163_s1 + $0xe58] sm:$0xff]  }
 0x1aa   :  { %v6490_v9 = vpop.f32.mrf.mxu1  ;;  %6782 = vmatprep.subr.bf16.mxu1 %v7393_v13  ;;  %v7434_v4 = vld [vmem:[%s9163_s1 + $0xea0] sm:$0xff]   ;;  %v7440_v10 = vld [vmem:[%s9163_s1 + $0xe10] sm:$0xff]   ;;  %v7443_v13 = vld [vmem:[%s9163_s1 + $0xe48] sm:$0xff]  }
 0x1ab   :  { %6761 = vmatpush3.bf16.msra.mxu0 %v7392_v12  ;;  %v7439_v9 = vld [vmem:[%s9163_s1 + $0xe50] sm:$0xff]  }
 0x1ac   :  { %6762 = vmatprep.subr.bf16.mxu0 %v7395_v15  ;;  %v7442_v12 = vld [vmem:[%s9163_s1 + $0xe90] sm:$0xff]   ;;  %v7445_v15 = vld [vmem:[%s9163_s1 + $0xec8] sm:$0xff]  }
 0x1ad   :  { %6783 = vmatpush3.bf16.msra.mxu1 %v7394_v14  ;;  %v7444_v14 = vld [vmem:[%s9163_s1 + $0xe08] sm:$0xff]  }
 0x1ae   :  { %6784 = vmatprep.subr.bf16.mxu1 %v7397_v17  ;;  %v7447_v17 = vld [vmem:[%s9163_s1 + $0xe40] sm:$0xff]  }
 0x1af   :  { %6763 = vmatpush3.bf16.msra.mxu0 %v7396_v16  ;;  %v7446_v16 = vld [vmem:[%s9163_s1 + $0xe88] sm:$0xff]  }
 0x1b0   :  { %6764 = vmatprep.subr.bf16.mxu0 %v7399_v19  ;;  %v7449_v19 = vld [vmem:[%s9163_s1 + $0xec0] sm:$0xff]  }
 0x1b1   :  { %6785 = vmatpush3.bf16.msra.mxu1 %v7398_v18  ;;  %v7448_v18 = vld [vmem:[%s9163_s1 + $0xe00] sm:$0xff]  }
 0x1b2   :  { %6786 = vmatprep.subr.bf16.mxu1 %v7401_v21 }
 0x1b3   :  { %6765 = vmatpush3.bf16.msra.mxu0 %v7400_v20  ;;  %v55_v20 = vld [vmem:[%s9164_s0 + $0xe0] sm:$0xff] }
 0x1b4   :  { %6766 = vmatprep.subr.bf16.mxu0 %v7403_v23  ;;  %v5677_v23 = vcombine.high %v55_v20, %v55_v20 }
 0x1b5   :  { %6787 = vmatpush3.bf16.msra.mxu1 %v7402_v22  ;;  %v5676_v22 = vcombine.low %v55_v20, %v55_v20 }
 0x1b6   :  { %6788 = vmatprep.subr.bf16.mxu1 %v7405_v25  ;;  %v7474_v25 = vmov 0.0  }
 0x1b7   :  { %6767 = vmatpush3.bf16.msra.mxu0 %v7404_v24  ;;  %v7452_v24 = vld [vmem:[%s9163_s1 + $0xe80] sm:$0xff]  }
 0x1b8   :  { %6768 = vmatprep.subr.bf16.mxu0 %v7407_v27 }
 0x1b9   :  { %6789 = vmatpush3.bf16.msra.mxu1 %v7406_v26  ;;  %v56_v26 = vld [vmem:[%s9164_s0 + $0xe8] sm:$0xff] }
 0x1ba   :  { %6790 = vmatprep.subr.bf16.mxu1 %v7409_v29  ;;  %v5679_v29 = vcombine.high %v56_v26, %v56_v26 }
 0x1bb   :  { %6769 = vmatpush3.bf16.msra.mxu0 %v7408_v28  ;;  %v5678_v28 = vcombine.low %v56_v26, %v56_v26  ;;  %v7471_v26 = vld [vmem:[%s9167_s5 + $0x10] sm:$0xff]  }
 0x1bc   :  { %6770 = vmatprep.subr.bf16.mxu0 %v7411_v31 }
 0x1bd   :  { %6791 = vmatpush3.bf16.msra.mxu1 %v7410_v30  ;;  %v7455_v30 = vld [vmem:[%s9163_s1 + $0xf18] sm:$0xff]  }
 0x1be   :  { %6792 = vmatprep.subr.bf16.mxu1 %v7413_v33 }
 0x1bf   :  { %6771 = vmatpush3.bf16.msra.mxu0 %v7412_v32 }
 0x1c0   :  { %6800 = vmatprep.subr.bf16.mxu0 %v7417_v39 }
 0x1c1   :  { %6793 = vmatpush3.bf16.msra.mxu1 %v7416_v38 }
 0x1c2   :  { %v6508_v35 = vpop.f32.mrf.mxu0  ;;  %5227 = vmatmul.mubr.bf16.vlgmr.msra.gmra.mxu0 %v5672_v36  ;;  %6822 = vmatprep.subr.bf16.mxu1 %v7421_v47  ;;  %v7456_v36 = vld [vmem:[%s9163_s1 + $0xf10] sm:$0xff]  }
 0x1c3   :  { %6801 = vmatpush3.bf16.msra.mxu0 %v7420_v45  ;;  %5306 = vmatprep.mubr.bf16.mxu0 %v5677_v23 }
 0x1c4   :  { %v6509_v41 = vpop.f32.mrf.mxu0  ;;  %v6530_v42 = vpop.f32.mrf.mxu1  ;;  %5267 = vmatmul.mubr.bf16.vlgmr.msra.gmra.mxu1 %v5674_v43  ;;  %6802 = vmatprep.subr.bf16.mxu0 %v7423_v53  ;;  %v7458_v43 = vld [vmem:[%s9163_s1 + $0xf00] sm:$0xff]  }
 0x1c5   :  { %v6510_v46 = vadd.f32 %v6509_v41, %v6508_v35  ;;  %6823 = vmatpush3.bf16.msra.mxu1 %v7422_v51  ;;  %5346 = vmatprep.mubr.bf16.mxu1 %v5679_v29  ;;  %v7457_v41 = vld [vmem:[%s9163_s1 + $0xf08] sm:$0xff]  }
 0x1c6   :  { %v6511_v48 = vpop.f32.mrf.mxu0  ;;  %v6531_v49 = vpop.f32.mrf.mxu1  ;;  %6824 = vmatprep.subr.bf16.mxu1 %v7425_v58 }
 0x1c7   :  { %v4749_v50 = vadd.f32 %v6510_v46, %v8878_v6  ;;  %v6532_v52 = vadd.f32 %v6531_v49, %v6530_v42  ;;  %6803 = vmatpush3.bf16.msra.mxu0 %v7424_v57  ;;  %v7436_v6 = vld [vmem:[%s9163_s1 + $0xe18] sm:$0xff]  }
 0x1c8   :  { %v6512_v54 = vpop.f32.mrf.mxu0  ;;  %v6533_v55 = vpop.f32.mrf.mxu1  ;;  %6804 = vmatprep.subr.bf16.mxu0 %v7427_v61  ;;  %v7460_v57 = vld [vmem:[%s9166_s3 + $0x38] ss:$0 sps:$4 sm:$0xff]   ;;  %v7462_v61 = vld [vmem:[%s9166_s3 + $0x28] sm:$0xff]  }
 0x1c9   :  { %v8983_v56 = vadd.f32 %v6532_v52, %v4749_v50  ;;  %6825 = vmatpush3.bf16.msra.mxu1 %v7426_v60  ;;  %v5469_v58 = vsel %vm5467_vm2, %v7460_v57, 0 }
 0x1ca   :  { %v6534_v59 = vpop.f32.mrf.mxu1  ;;  %6826 = vmatprep.subr.bf16.mxu1 %v7429_v63 }
 0x1cb   :  { %6805 = vmatpush3.bf16.msra.mxu0 %v7428_v62  ;;  %v7461_v59 = vld [vmem:[%s9166_s3 + $0x30] sm:$0xff]  }
 0x1cc   :  { %6806 = vmatprep.subr.bf16.mxu0 %v7431_v1 }
 0x1cd   :  { %6827 = vmatpush3.bf16.msra.mxu1 %v7430_v0 }
 0x1ce   :  { %6828 = vmatprep.subr.bf16.mxu1 %v7433_v3  ;;  %v7463_v3 = vld [vmem:[%s9166_s3 + $0x20] sm:$0xff]  }
 0x1cf   :  { %6807 = vmatpush3.bf16.msra.mxu0 %v7432_v2 }
 0x1d0   :  { %6808 = vmatprep.subr.bf16.mxu0 %v7435_v5 }
 0x1d1   :  { %6829 = vmatpush3.bf16.msra.mxu1 %v7434_v4 }
 0x1d2   :  { %6830 = vmatprep.subr.bf16.mxu1 %v7437_v7 }
 0x1d3   :  { %6809 = vmatpush3.bf16.msra.mxu0 %v7436_v6 }
 0x1d4   :  { %6810 = vmatprep.subr.bf16.mxu0 %v7439_v9 }
 0x1d5   :  { %6831 = vmatpush3.bf16.msra.mxu1 %v7438_v8 }
 0x1d6   :  { %6832 = vmatprep.subr.bf16.mxu1 %v7441_v11  ;;  %v7465_v11 = vld [vmem:[%s9166_s3 + $0x10] sm:$0xff]  }
 0x1d7   :  { %6811 = vmatpush3.bf16.msra.mxu0 %v7440_v10  ;;  %v7464_v10 = vld [vmem:[%s9166_s3 + $0x18] sm:$0xff]  }
 0x1d8   :  { %6812 = vmatprep.subr.bf16.mxu0 %v7443_v13  ;;  %v7467_v13 = vld [vmem:[%s9166_s3] sm:$0xff]  }
 0x1d9   :  { %6833 = vmatpush3.bf16.msra.mxu1 %v7442_v12  ;;  %v7466_v12 = vld [vmem:[%s9166_s3 + $0x8] sm:$0xff]  }
 0x1da   :  { %6834 = vmatprep.subr.bf16.mxu1 %v7445_v15 }
 0x1db   :  { %6813 = vmatpush3.bf16.msra.mxu0 %v7444_v14  ;;  %v7468_v14 = vld [vmem:[%s9167_s5 + $0x28] ss:$0 sps:$4 sm:$0x33]  }
 0x1dc   :  { %6814 = vmatprep.subr.bf16.mxu0 %v7447_v17  ;;  %v5570_v15 = vsel %vm5568_vm3, %v7468_v14, 0 }
 0x1dd   :  { %6835 = vmatpush3.bf16.msra.mxu1 %v7446_v16  ;;  %v7469_v16 = vld [vmem:[%s9167_s5 + $0x20] sm:$0xff]  }
 0x1de   :  { %6836 = vmatprep.subr.bf16.mxu1 %v7449_v19 }
 0x1df   :  { %6815 = vmatpush3.bf16.msra.mxu0 %v7448_v18  ;;  %v7470_v18 = vld [vmem:[%s9167_s5 + $0x18] sm:$0xff]  }
 0x1e0   :  { %6865 = vmatprep.subr.bf16.mxu0 %v7474_v25 }
 0x1e1   :  { %6837 = vmatpush3.bf16.msra.mxu1 %v7452_v24 }
 0x1e2   :  { %v6552_v21 = vpop.f32.mrf.mxu0  ;;  %5307 = vmatmul.mubr.bf16.vlgmr.msra.gmra.mxu0 %v5676_v22  ;;  %6877 = vmatprep.subr.bf16.mxu1 %v7474_v25 }
 0x1e3   :  { %6866 = vmatpush3.bf16.msra.mxu0 %v7455_v30  ;;  %6873 = vmatprep.mubr.msk.bf16.mxu0 %vm7475_vm0, %v7474_v25 }
 0x1e4   :  { %v6553_v27 = vpop.f32.mrf.mxu0  ;;  %v6574_v32 = vpop.f32.mrf.mxu1  ;;  %5347 = vmatmul.mubr.bf16.vlgmr.msra.gmra.mxu1 %v5678_v28  ;;  %6867 = vmatprep.subr.bf16.mxu0 %v7474_v25 }
 0x1e5   :  { %v6554_v31 = vadd.f32 %v6553_v27, %v6552_v21  ;;  %6893 = vmatprep.mubr.msk.bf16.mxu1 %vm7475_vm0, %v7474_v25  ;;  %6878 = vmatpush3.bf16.msra.mxu1 %v5469_v58 }
 0x1e6   :  { %v6555_v33 = vpop.f32.mrf.mxu0  ;;  %v6575_v35 = vpop.f32.mrf.mxu1  ;;  %6879 = vmatprep.subr.bf16.mxu1 %v7474_v25 }
 0x1e7   :  { %v4829_v34 = vadd.f32 %v6554_v31, %v8983_v56  ;;  %v6576_v37 = vadd.f32 %v6575_v35, %v6574_v32  ;;  %6868 = vmatpush3.bf16.msra.mxu0 %v7456_v36 }
 0x1e8   :  { %v6556_v38 = vpop.f32.mrf.mxu0  ;;  %v6577_v39 = vpop.f32.mrf.mxu1  ;;  %6869 = vmatprep.subr.bf16.mxu0 %v7474_v25 }
 0x1e9   :  { %v4869_v40 = vadd.f32 %v6576_v37, %v4829_v34  ;;  %6880 = vmatpush3.bf16.msra.mxu1 %v7461_v59 }
 0x1ea   :  { %v6578_v42 = vpop.f32.mrf.mxu1  ;;  %6881 = vmatprep.subr.bf16.mxu1 %v7474_v25 }
 0x1eb   :  { %6870 = vmatpush3.bf16.msra.mxu0 %v7457_v41 }
 0x1ec   :  { %6871 = vmatprep.subr.bf16.mxu0 %v7474_v25 }
 0x1ed   :  { %6882 = vmatpush3.bf16.msra.mxu1 %v7462_v61 }
 0x1ee   :  { %6883 = vmatprep.subr.bf16.mxu1 %v7474_v25 }
 0x1ef   :  { %6872 = vmatpush3.bf16.msra.mxu0 %v7458_v43 }
 0x1f0   :  { %6897 = vmatprep.subr.bf16.mxu0 %v7474_v25 }
 0x1f1   :  { %6884 = vmatpush3.bf16.msra.mxu1 %v7463_v3 }
 0x1f2   :  { %6874 = vmatmul.mubr.msk.bf16.vlgmr.msra.gmra.mxu0 %vm4150_vm1, %v7459_v44  ;;  %6885 = vmatprep.subr.bf16.mxu1 %v7474_v25 }
 0x1f3   :  { %6909 = vmatprep.mubr.msk.bf16.mxu0 %vm7475_vm0, %v7474_v25  ;;  %6898 = vmatpush3.bf16.msra.mxu0 %v5570_v15 }
 0x1f4   :  { %6899 = vmatprep.subr.bf16.mxu0 %v7474_v25 }
 0x1f5   :  { %6886 = vmatpush3.bf16.msra.mxu1 %v7464_v10 }
 0x1f6   :  { %6887 = vmatprep.subr.bf16.mxu1 %v7474_v25 }
 0x1f7   :  { %6900 = vmatpush3.bf16.msra.mxu0 %v7469_v16 }
 0x1f8   :  { %6901 = vmatprep.subr.bf16.mxu0 %v7474_v25 }
 0x1f9   :  { %6888 = vmatpush3.bf16.msra.mxu1 %v7465_v11  ;;  %v7472_v11 = vld [vmem:[%s9167_s5 + $0x8] sm:$0xff]  }
 0x1fa   :  { %6889 = vmatprep.subr.bf16.mxu1 %v7474_v25 }
 0x1fb   :  { %6902 = vmatpush3.bf16.msra.mxu0 %v7470_v18 }
 0x1fc   :  { %6903 = vmatprep.subr.bf16.mxu0 %v7474_v25 }
 0x1fd   :  { %6890 = vmatpush3.bf16.msra.mxu1 %v7466_v12  ;;  %v7473_v12 = vld [vmem:[%s9167_s5] sm:$0xff]  }
 0x1fe   :  { %6891 = vmatprep.subr.bf16.mxu1 %v7474_v25 }
 0x1ff   :  { %6904 = vmatpush3.bf16.msra.mxu0 %v7471_v26 }
 0x200   :  { %6905 = vmatprep.subr.bf16.mxu0 %v7474_v25 }
 0x201   :  { %6892 = vmatpush3.bf16.msra.mxu1 %v7467_v13  ;;  %v6166_v13 = vld [vmem:[%s9168_s4] ss:$0 sm:$0xff] }
 0x202   :  { %v6596_v45 = vpop.f32.mrf.mxu0 }
 0x203   :  { %6906 = vmatpush3.bf16.msra.mxu0 %v7472_v11 }
 0x204   :  { %v6597_v46 = vpop.f32.mrf.mxu0  ;;  %v6618_v47 = vpop.f32.mrf.mxu1  ;;  %6907 = vmatprep.subr.bf16.mxu0 %v7474_v25  ;;  %v6176_v25 = vld [vmem:[%s9169_s6] ss:$0 sm:$0xff] }
 0x205   :  { %v6598_v48 = vadd.f32 %v6597_v46, %v6596_v45 }
 0x206   :  { %v6599_v49 = vpop.f32.mrf.mxu0  ;;  %v6619_v50 = vpop.f32.mrf.mxu1 }
 0x207   :  { %v4909_v51 = vadd.f32 %v6598_v48, %v4869_v40  ;;  %v6620_v52 = vadd.f32 %v6619_v50, %v6618_v47  ;;  %6908 = vmatpush3.bf16.msra.mxu0 %v7473_v12 }
 0x208   :  { %v6600_v53 = vpop.f32.mrf.mxu0  ;;  %v6621_v54 = vpop.f32.mrf.mxu1 }
 0x209   :  { %v4949_v55 = vadd.f32 %v6620_v52, %v4909_v51 }
 0x20a   :  { %v6622_v56 = vpop.f32.mrf.mxu1 }
 0x222   :  { %v6640_v60 = vpop.f32.mrf.mxu0 }
 0x224   :  { %v6641_v62 = vpop.f32.mrf.mxu0  ;;  %v6662_v63 = vpop.f32.mrf.mxu1 }
 0x225   :  { %v6642_v0 = vadd.f32 %v6641_v62, %v6640_v60 }
 0x226   :  { %v6643_v1 = vpop.f32.mrf.mxu0  ;;  %v6663_v2 = vpop.f32.mrf.mxu1 }
 0x227   :  { %v4989_v4 = vadd.f32 %v6642_v0, %v4949_v55  ;;  %v6664_v5 = vadd.f32 %v6663_v2, %v6662_v63 }
 0x228   :  { %v6644_v6 = vpop.f32.mrf.mxu0  ;;  %v6665_v7 = vpop.f32.mrf.mxu1 }
 0x229   :  { %v5029_v8 = vadd.f32 %v6664_v5, %v4989_v4 }
 0x22a   :  { %v6666_v9 = vpop.f32.mrf.mxu1 }
 0x242   :  { %v6684_v17 = vpop.f32.mrf.mxu0 }
 0x244   :  { %v6685_v19 = vpop.f32.mrf.mxu0  ;;  %v6706_v21 = vpop.f32.mrf.mxu1 }
 0x245   :  { %v6686_v20 = vadd.f32 %v6685_v19, %v6684_v17 }
 0x246   :  { %v6687_v22 = vpop.f32.mrf.mxu0  ;;  %v6707_v24 = vpop.f32.mrf.mxu1 }
 0x247   :  { %v5069_v23 = vadd.f32 %v6686_v20, %v5029_v8  ;;  %v6708_v27 = vadd.f32 %v6707_v24, %v6706_v21 }
 0x248   :  { %v6688_v28 = vpop.f32.mrf.mxu0  ;;  %v6709_v29 = vpop.f32.mrf.mxu1 }
 0x249   :  { %v5109_v30 = vadd.f32 %v6708_v27, %v5069_v23 }
 0x24a   :  { %v6710_v31 = vpop.f32.mrf.mxu1 }
 0x262   :  { %v6728_v32 = vpop.f32.mrf.mxu0 }
 0x264   :  { %v6729_v33 = vpop.f32.mrf.mxu0  ;;  %v6750_v34 = vpop.f32.mrf.mxu1 }
 0x265   :  { %v6730_v35 = vadd.f32 %v6729_v33, %v6728_v32 }
 0x266   :  { %v6731_v36 = vpop.f32.mrf.mxu0  ;;  %v6751_v37 = vpop.f32.mrf.mxu1 }
 0x267   :  { %v5149_v38 = vadd.f32 %v6730_v35, %v5109_v30  ;;  %v6752_v39 = vadd.f32 %v6751_v37, %v6750_v34 }
 0x268   :  { %v6732_v40 = vpop.f32.mrf.mxu0  ;;  %v6753_v41 = vpop.f32.mrf.mxu1 }
 0x269   :  { %v5189_v42 = vadd.f32 %v6752_v39, %v5149_v38 }
 0x26a   :  { %v6754_v43 = vpop.f32.mrf.mxu1 }
 0x282   :  { %v6772_v44 = vpop.f32.mrf.mxu0 }
 0x284   :  { %v6773_v45 = vpop.f32.mrf.mxu0  ;;  %v6794_v46 = vpop.f32.mrf.mxu1 }
 0x285   :  { %v6774_v53 = vadd.f32 %v6773_v45, %v6772_v44 }
 0x286   :  { %v6775_v47 = vpop.f32.mrf.mxu0  ;;  %v6795_v48 = vpop.f32.mrf.mxu1 }
 0x287   :  { %v5229_v58 = vadd.f32 %v6774_v53, %v5189_v42  ;;  %v6796_v59 = vadd.f32 %v6795_v48, %v6794_v46 }
 0x288   :  { %v6776_v49 = vpop.f32.mrf.mxu0  ;;  %v6797_v50 = vpop.f32.mrf.mxu1 }
 0x289   :  { %v5269_v0 = vadd.f32 %v6796_v59, %v5229_v58 }
 0x28a   :  { %v6798_v51 = vpop.f32.mrf.mxu1 }
 0x2a2   :  { %v6816_v52 = vpop.f32.mrf.mxu0 }
 0x2a4   :  { %v6817_v54 = vpop.f32.mrf.mxu0  ;;  %v6838_v55 = vpop.f32.mrf.mxu1 }
 0x2a5   :  { %v6818_v62 = vadd.f32 %v6817_v54, %v6816_v52 }
 0x2a6   :  { %v6819_v56 = vpop.f32.mrf.mxu0  ;;  %v6839_v57 = vpop.f32.mrf.mxu1 }
 0x2a7   :  { %v5309_v1 = vadd.f32 %v6818_v62, %v5269_v0  ;;  %v6840_v2 = vadd.f32 %v6839_v57, %v6838_v55 }
 0x2a8   :  { %v6820_v60 = vpop.f32.mrf.mxu0  ;;  %v6841_v61 = vpop.f32.mrf.mxu1 }
 0x2a9   :  { %v5349_v3 = vadd.f32 %v6840_v2, %v5309_v1 }
 0x2aa   :  { %v6842_v63 = vpop.f32.mrf.mxu1 }
 0x2b2   :  { %v5388_v4 = vpop.f32.mrf.mxu0 }
 0x2b3   :  { %v5389_v5 = vadd.f32 %v5388_v4, %v5349_v3 }
 0x2b4   :  { %v6875_v6 = vpop.f32.mrf.mxu0 }
 0x2b5   :  { %v5394_v7 = vmax.f32 %v5389_v5, 0.0 }
 0x2b6   :  { %v5391_v8 = vpop.f32.mrf.mxu0 }
 0x2b7   :  { %v5395_v9 = vpack.c.bf16 %v5394_v7, %v5394_v7 }
 0x2b8   :  { %v6876_v10 = vpop.f32.mrf.mxu0 }
 0x2b9   :  { %6894 = vmatmul.mubr.msk.bf16.vlgmr.msra.gmra.mxu1 %vm5463_vm4, %v5395_v9 }
 0x379   :  { %v5505_v14 = vpop.f32.mrf.mxu1 }
 0x37a   :  { %v5506_v15 = vadd.f32 %v6166_v13, %v5505_v14 }
 0x37b   :  { %v6895_v16 = vpop.f32.mrf.mxu1 }
 0x37c   :  { %v5511_v17 = vmax.f32 %v5506_v15, 0.0 }
 0x37d   :  { %v5508_v18 = vpop.f32.mrf.mxu1 }
 0x37e   :  { %v5512_v19 = vpack.c.bf16 %v5511_v17, %v5511_v17 }
 0x37f   :  { %v6896_v20 = vpop.f32.mrf.mxu1 }
 0x380   :  { %6910 = vmatmul.mubr.msk.bf16.vlgmr.msra.gmra.mxu0 %vm5564_vm5, %v5512_v19 }
 0x440   :  { %v5606_v21 = vpop.f32.mrf.mxu0 }
 0x441   :  { %v5607_v22 = vadd.f32 %v6176_v25, %v5606_v21 }
 0x442   :  { %v6911_v23 = vpop.f32.mrf.mxu0 }
 0x443   :  { %v5612_v24 = vmax.f32 %v5607_v22, 0.0 }
 0x444   :  { %v5609_v26 = vpop.f32.mrf.mxu0 }
 0x445   :  { %5614 = vst.msk [vmem:[%s9170_s7] sm:$0xff] %vm5613_vm6, %v5612_v24 }
 0x446   :  { %v6912_v27 = vpop.f32.mrf.mxu0 }

</bundles_post_ra>
